<compile_context>
chip_gen: v5e
topology: v5e:2x2
jax: 0.10.0
libtpu: 0.0.40
codegen_flags: <defaults>
</compile_context>

<pallas_src>
import functools

import numpy as np
import jax
import jax.numpy as jnp
from jax import lax
from jax.experimental import pallas as pl
from jax.experimental.pallas import tpu as pltpu  # noqa: F401


# ------------------------------ hyper-parameters ------------------------------

class Para:
    batch_size = 2
    window = 8       # T
    horizon = 4
    d_model = 32
    dff = 64
    d_k = 8
    n_heads = 2
    n_layers = 2
    dim_val = 32     # stored but unused in forward (as in the PyTorch module)


# ------------------------------ fused kernel ----------------------------------

def _fused_transformer_kernel(
    # activations / constants
    x_ref,          # (Me, 1)  raw input, flattened (b, t, i)-major, Me = B*T*n
    pe_enc_ref,     # (Me, 1)  PositionalEncoding(n), flattened + tiled over batch
    enc_w_ref,      # (1, D)   enc_input_fc weight (Linear(1 -> D), pre-transposed)
    enc_b_ref,      # (1, D)
    bias_t_ref,     # (Me, Me) encoder attn1 additive bias: 0 same (batch, series) else -1e30
    bias_s_ref,     # (Me, Me) encoder attn2 additive bias: 0 same (batch, time)   else -1e30
    bias_ds_ref,    # (Md, Md) decoder self-attn additive bias (same batch), Md = B*horizon
    bias_dc_ref,    # (Md, Me) decoder cross-attn additive bias (same batch)
    # stacked layer params, layer order: [enc_0 .. enc_{L-1}, dec_0 .. dec_{L-1}]
    wqkv_ref,       # (2L*2, D, 3*H*dk)  packed [Wq | Wk | Wv] (Wq pre-scaled by 1/sqrt(dk))
    bqkv_ref,       # (2L*2, 1, 3*H*dk)
    wo_ref,         # (2L*2, H*dk, D)
    bo_ref,         # (2L*2, 1, D)
    fc2w_ref,       # (2L, D, dff)
    fc2b_ref,       # (2L, 1, dff)
    fc1w_ref,       # (2L, dff, D)
    fc1b_ref,       # (2L, 1, D)
    lng_ref,        # (2L*3, 1, D)
    lnb_ref,        # (2L*3, 1, D)
    # QGB
    qln1w_ref,      # (1, D)
    qln1b_ref,      # (1, D)
    w2big_ref,      # (Md, Me)  kron(I_B, LN2.weight)
    b2col_ref,      # (Md, 1)
    w3big_ref,      # (Md, Me)  kron(I_B, LN3.weight)
    b3col_ref,      # (Md, 1)
    pe_dec_ref,     # (Md, D)   PositionalEncoding(d_model) tiled over batch
    # output head
    rowmask_ref,    # (Md, horizon*D)  selects block h = r % horizon per row
    sel_ref,        # (B, Md)          per-batch row-sum selector
    outw_ref,       # (horizon*D, horizon)
    outb_ref,       # (1, horizon)
    # output
    o_ref,          # (B, horizon)
    *, n_layers, n_heads, d_k, horizon):

    hdk = n_heads * d_k

    def elu(v):
        # exp(min(v, 0)) keeps the (unselected) negative branch finite.
        return jnp.where(v > 0.0, v, jnp.exp(jnp.minimum(v, 0.0)) - 1.0)

    def layer_norm(v, g, b):
        mu = jnp.mean(v, axis=-1, keepdims=True)
        c = v - mu
        var = jnp.mean(c * c, axis=-1, keepdims=True)
        return c * lax.rsqrt(var + 1e-5) * g + b

    def attention(idx, xq, xkv, bias, self_attn):
        """Multi-head attention block `idx`; per-group softmax via additive block-diag bias."""
        wqkv = wqkv_ref[idx]                       # (D, 3*H*dk)
        bqkv = bqkv_ref[idx]                       # (1, 3*H*dk)
        if self_attn:
            qkv = jnp.dot(xq, wqkv, preferred_element_type=jnp.float32) + bqkv
            q, k, v = qkv[:, :hdk], qkv[:, hdk:2 * hdk], qkv[:, 2 * hdk:]
        else:
            q = jnp.dot(xq, wqkv[:, :hdk],
                        preferred_element_type=jnp.float32) + bqkv[:, :hdk]
            kv = jnp.dot(xkv, wqkv[:, hdk:],
                         preferred_element_type=jnp.float32) + bqkv[:, hdk:]
            k, v = kv[:, :hdk], kv[:, hdk:]
        heads = []
        for h in range(n_heads):                   # tiny static loop (scores only)
            sl = slice(h * d_k, (h + 1) * d_k)
            # scale already folded into Wq/bq at init
            s = jnp.dot(q[:, sl], k[:, sl].T,
                        preferred_element_type=jnp.float32) + bias
            s = s - jnp.max(s, axis=-1, keepdims=True)
            p = jnp.exp(s)
            p = p * pl.reciprocal(jnp.sum(p, axis=-1, keepdims=True), approx=True)
            heads.append(jnp.dot(p, v[:, sl], preferred_element_type=jnp.float32))
        cat = jnp.concatenate(heads, axis=-1)      # (Mq, H*dk)
        return jnp.dot(cat, wo_ref[idx],
                       preferred_element_type=jnp.float32) + bo_ref[idx]

    def block_layer(li, x, bias1, bias2, kv2, self2):
        # attn1 (self) -> LN -> attn2 (self or cross) -> LN -> FFN -> LN
        a = attention(2 * li, x, x, bias1, True)
        x = layer_norm(x + a, lng_ref[3 * li], lnb_ref[3 * li])
        a = attention(2 * li + 1, x, kv2, bias2, self2)
        x = layer_norm(x + a, lng_ref[3 * li + 1], lnb_ref[3 * li + 1])
        h = elu(jnp.dot(x, fc2w_ref[li],
                        preferred_element_type=jnp.float32) + fc2b_ref[li])
        a = jnp.dot(h, fc1w_ref[li],
                    preferred_element_type=jnp.float32) + fc1b_ref[li]
        x = layer_norm(x + a, lng_ref[3 * li + 2], lnb_ref[3 * li + 2])
        return x

    # ---- input embedding: Linear(1 -> D) on (x + PE_n), as a broadcast FMA
    x_col = x_ref[...]                                                 # (Me, 1)
    xe = (x_col + pe_enc_ref[...]) * enc_w_ref[...] + enc_b_ref[...]   # (Me, D)

    # ---- encoder stack
    bias_t = bias_t_ref[...]
    bias_s = bias_s_ref[...]
    for li in range(n_layers):
        xe = block_layer(li, xe, bias_t, bias_s, None, True)

    # ---- QGB: Zd = pos( LN2(elu(LN1(x))) + LN3(e) )
    hx = elu(x_col * qln1w_ref[...] + qln1b_ref[...])                  # (Me, D)
    hx = jnp.dot(w2big_ref[...], hx,
                 preferred_element_type=jnp.float32) + b2col_ref[...]  # (Md, D)
    hz = jnp.dot(w3big_ref[...], xe,
                 preferred_element_type=jnp.float32) + b3col_ref[...]  # (Md, D)
    xd = hx + hz + pe_dec_ref[...]

    # ---- decoder stack (cross-attends to the encoder slab)
    bias_ds = bias_ds_ref[...]
    bias_dc = bias_dc_ref[...]
    for li in range(n_layers, 2 * n_layers):
        xd = block_layer(li, xd, bias_ds, bias_dc, xe, False)

    # ---- output head: ELU(Linear(horizon*D -> horizon)) on per-batch flatten.
    # Row r = b*horizon + h must multiply the h-th (D, horizon) block of outw:
    # replicate xd across the lane dim (-> exactly 128 lanes for D=32, HOR=4),
    # zero non-matching blocks with a precomputed mask, then one matmul.
    xd_rep = jnp.concatenate([xd] * horizon, axis=-1)                  # (Md, HOR*D)
    xd_exp = xd_rep * rowmask_ref[...]
    rows = jnp.dot(xd_exp, outw_ref[...],
                   preferred_element_type=jnp.float32)                 # (Md, HOR)
    out = jnp.dot(sel_ref[...], rows,
                  preferred_element_type=jnp.float32) + outb_ref[...]  # (B, HOR)
    o_ref[...] = elu(out)


# ------------------------------ parameter init --------------------------------

def _positional_encoding(seq_len, d):
    pos = np.arange(seq_len, dtype=np.float32)[:, None]
    i = np.arange(0, d, 2, dtype=np.float32)[None, :]
    div = np.exp(-np.log(10000.0) * i / d)
    pe = np.zeros((seq_len, d), np.float32)
    pe[:, 0::2] = np.sin(pos * div)
    pe[:, 1::2] = np.cos(pos * div)
    return pe


def _init_linear(key, in_dim, out_dim):
    kw, kb = jax.random.split(key)
    lim = 1.0 / np.sqrt(in_dim)
    w = jax.random.uniform(kw, (in_dim, out_dim), jnp.float32, -lim, lim)
    b = jax.random.uniform(kb, (out_dim,), jnp.float32, -lim, lim)
    return w, b


def _init_attn(key, d_model, d_k, n_heads):
    kq, kk, kv, ko = jax.random.split(key, 4)

    def per_head(k):
        ws, bs = [], []
        for sub in jax.random.split(k, n_heads):
            w, b = _init_linear(sub, d_model, d_k)
            ws.append(w)
            bs.append(b)
        return jnp.concatenate(ws, axis=1), jnp.concatenate(bs, axis=0)

    wq, bq = per_head(kq)
    wk, bk = per_head(kk)
    wv, bv = per_head(kv)
    wo, bo = _init_linear(ko, n_heads * d_k, d_model)
    w_qkv = jnp.concatenate([wq, wk, wv], axis=1)            # (D, 3*H*dk)
    b_qkv = jnp.concatenate([bq, bk, bv], axis=0)[None, :]   # (1, 3*H*dk)
    return w_qkv, b_qkv, wo, bo[None, :]


def _init_layer(key, d_model, d_k, n_heads, dff):
    k1, k2, k3, k4 = jax.random.split(key, 4)
    return dict(
        a1=_init_attn(k1, d_model, d_k, n_heads),
        a2=_init_attn(k2, d_model, d_k, n_heads),
        fc1=_init_linear(k3, dff, d_model),    # fc1: dff -> d_model
        fc2=_init_linear(k4, d_model, dff),    # fc2: d_model -> dff
    )


def init_transformer(key, para, n):
    """Builds the packed operand dict consumed by the fused kernel."""
    B, T, HOR = para.batch_size, para.window, para.horizon
    D, dff, dk, H, L = para.d_model, para.dff, para.d_k, para.n_heads, para.n_layers
    Me, Md = B * T * n, B * HOR

    keys = jax.random.split(key, 2 * L + 5)
    layers = [_init_layer(keys[i], D, dk, H, dff) for i in range(2 * L)]  # encs, then decs

    def stack_attn(field):
        return jnp.stack([lay[a][field] for lay in layers for a in ("a1", "a2")])

    enc_w, enc_b = _init_linear(keys[2 * L + 0], 1, D)
    ln1_w, ln1_b = _init_linear(keys[2 * L + 1], 1, D)
    ln2_w, ln2_b = _init_linear(keys[2 * L + 2], n * T, HOR)
    ln3_w, ln3_b = _init_linear(keys[2 * L + 3], T * n, HOR)
    out_w, out_b = _init_linear(keys[2 * L + 4], HOR * D, HOR)

    # fold the 1/sqrt(d_k) softmax scale into the packed Q weights / biases
    scale = 1.0 / np.sqrt(dk)
    wqkv = stack_attn(0)
    bqkv = stack_attn(1)
    wqkv = wqkv.at[:, :, :H * dk].multiply(scale)
    bqkv = bqkv.at[:, :, :H * dk].multiply(scale)

    # positional encodings, pre-tiled to the flat row layouts (constants)
    pe_n = _positional_encoding(T, n)                         # Transformer.pos
    pe_d = _positional_encoding(HOR, D)                       # QGB.pos
    pe_enc = np.tile(pe_n.reshape(T * n, 1), (B, 1))          # (Me, 1)
    pe_dec = np.tile(pe_d, (B, 1))                            # (Md, D)

    # additive block-diagonal attention biases replacing the torch transpose/view
    # regroupings: 0 inside a group, -1e30 outside (softmax weight -> 0).
    NEG = np.float32(-1e30)
    r = np.arange(Me)
    br, tr, ir = r // (T * n), (r // n) % T, r % n
    rd = np.arange(Md)
    bd = rd // HOR

    def same(a, b):
        return a[:, None] == b[None, :]

    bias_t = np.where(same(br, br) & same(ir, ir), np.float32(0.0), NEG)  # attend over time
    bias_s = np.where(same(br, br) & same(tr, tr), np.float32(0.0), NEG)  # attend over series
    bias_ds = np.where(same(bd, bd), np.float32(0.0), NEG)                # decoder self
    bias_dc = np.where(bd[:, None] == br[None, :], np.float32(0.0), NEG)  # decoder cross

    # output-head helpers: per-row weight-block selector and per-batch row-sum
    rowmask = np.zeros((Md, HOR * D), np.float32)
    for rr in range(Md):
        h = rr % HOR
        rowmask[rr, h * D:(h + 1) * D] = 1.0
    sel = np.zeros((B, Md), np.float32)
    for rr in range(Md):
        sel[rr // HOR, rr] = 1.0

    eye_b = jnp.eye(B, dtype=jnp.float32)

    return dict(
        pe_enc=jnp.asarray(pe_enc),
        enc_w=enc_w, enc_b=enc_b[None, :],
        bias_t=jnp.asarray(bias_t), bias_s=jnp.asarray(bias_s),
        bias_ds=jnp.asarray(bias_ds), bias_dc=jnp.asarray(bias_dc),
        wqkv=wqkv, bqkv=bqkv, wo=stack_attn(2), bo=stack_attn(3),
        fc2w=jnp.stack([lay["fc2"][0] for lay in layers]),
        fc2b=jnp.stack([lay["fc2"][1][None, :] for lay in layers]),
        fc1w=jnp.stack([lay["fc1"][0] for lay in layers]),
        fc1b=jnp.stack([lay["fc1"][1][None, :] for lay in layers]),
        lng=jnp.ones((2 * L * 3, 1, D), jnp.float32),   # nn.LayerNorm default init
        lnb=jnp.zeros((2 * L * 3, 1, D), jnp.float32),
        qln1w=ln1_w, qln1b=ln1_b[None, :],
        w2big=jnp.kron(eye_b, ln2_w.T),
        b2col=jnp.tile(ln2_b.reshape(HOR, 1), (B, 1)),
        w3big=jnp.kron(eye_b, ln3_w.T),
        b3col=jnp.tile(ln3_b.reshape(HOR, 1), (B, 1)),
        pe_dec=jnp.asarray(pe_dec),
        rowmask=jnp.asarray(rowmask), sel=jnp.asarray(sel),
        outw=out_w, outb=out_b[None, :],
    )


_OP_ORDER = (
    "pe_enc", "enc_w", "enc_b",
    "bias_t", "bias_s", "bias_ds", "bias_dc",
    "wqkv", "bqkv", "wo", "bo",
    "fc2w", "fc2b", "fc1w", "fc1b", "lng", "lnb",
    "qln1w", "qln1b", "w2big", "b2col", "w3big", "b3col", "pe_dec",
    "rowmask", "sel", "outw", "outb",
)


def make_forward(para, n):
    B, T, HOR = para.batch_size, para.window, para.horizon

    kernel = functools.partial(
        _fused_transformer_kernel,
        n_layers=para.n_layers, n_heads=para.n_heads, d_k=para.d_k,
        horizon=HOR)

    @jax.jit
    def forward(ops, x):
        x_col = x.reshape(B * T * n, 1)   # flat (b, t, i)-major slab; only glue op
        # Single fused, grid-less pallas_call: every operand lives wholly in VMEM.
        return pl.pallas_call(
            kernel,
            out_shape=jax.ShapeDtypeStruct((B, HOR), jnp.float32),
        )(x_col, *[ops[k] for k in _OP_ORDER])

    return forward


# ------------------------------ main -------------------------------------------

if __name__ == "__main__":
    para = Para()
    n = 4   # number of input series / channels

    key = jax.random.PRNGKey(0)
    k_params, k_x = jax.random.split(key)
    ops = init_transformer(k_params, para, n)
    x = jax.random.normal(k_x, (para.batch_size, para.window, n), jnp.float32)

    forward = make_forward(para, n)
    y = jax.block_until_ready(forward(ops, x))

    assert y.shape == (para.batch_size, para.horizon), y.shape
    assert bool(jnp.all(jnp.isfinite(y)))
    print("KERNEL_OK")
</pallas_src>

<mosaic_0001>
module attributes {stable_mosaic.version = 11 : i64} {
  func.func @_fused_transformer_kernel(%arg0: memref<64x1xf32, #tpu.memory_space<vmem>>, %arg1: memref<64x1xf32, #tpu.memory_space<vmem>>, %arg2: memref<1x32xf32, #tpu.memory_space<vmem>>, %arg3: memref<1x32xf32, #tpu.memory_space<vmem>>, %arg4: memref<64x64xf32, #tpu.memory_space<vmem>>, %arg5: memref<64x64xf32, #tpu.memory_space<vmem>>, %arg6: memref<8x8xf32, #tpu.memory_space<vmem>>, %arg7: memref<8x64xf32, #tpu.memory_space<vmem>>, %arg8: memref<8x32x48xf32, #tpu.memory_space<vmem>>, %arg9: memref<8x1x48xf32, #tpu.memory_space<vmem>>, %arg10: memref<8x16x32xf32, #tpu.memory_space<vmem>>, %arg11: memref<8x1x32xf32, #tpu.memory_space<vmem>>, %arg12: memref<4x32x64xf32, #tpu.memory_space<vmem>>, %arg13: memref<4x1x64xf32, #tpu.memory_space<vmem>>, %arg14: memref<4x64x32xf32, #tpu.memory_space<vmem>>, %arg15: memref<4x1x32xf32, #tpu.memory_space<vmem>>, %arg16: memref<12x1x32xf32, #tpu.memory_space<vmem>>, %arg17: memref<12x1x32xf32, #tpu.memory_space<vmem>>, %arg18: memref<1x32xf32, #tpu.memory_space<vmem>>, %arg19: memref<1x32xf32, #tpu.memory_space<vmem>>, %arg20: memref<8x64xf32, #tpu.memory_space<vmem>>, %arg21: memref<8x1xf32, #tpu.memory_space<vmem>>, %arg22: memref<8x64xf32, #tpu.memory_space<vmem>>, %arg23: memref<8x1xf32, #tpu.memory_space<vmem>>, %arg24: memref<8x32xf32, #tpu.memory_space<vmem>>, %arg25: memref<8x128xf32, #tpu.memory_space<vmem>>, %arg26: memref<2x8xf32, #tpu.memory_space<vmem>>, %arg27: memref<128x4xf32, #tpu.memory_space<vmem>>, %arg28: memref<1x4xf32, #tpu.memory_space<vmem>>, %arg29: memref<2x4xf32, #tpu.memory_space<vmem>>) attributes {dimension_semantics = [], scalar_prefetch = 0 : i64, scratch_operands = 0 : i64, tpu.core_type = #tpu.core_type<tc>} {
    %c0 = arith.constant 0 : index
    %c0_0 = arith.constant 0 : index
    %0 = vector.load %arg0[%c0, %c0_0] : memref<64x1xf32, #tpu.memory_space<vmem>>, vector<64x1xf32>
    %c0_1 = arith.constant 0 : index
    %c0_2 = arith.constant 0 : index
    %1 = vector.load %arg1[%c0_1, %c0_2] : memref<64x1xf32, #tpu.memory_space<vmem>>, vector<64x1xf32>
    %2 = arith.addf %0, %1 : vector<64x1xf32>
    %c0_3 = arith.constant 0 : index
    %c0_4 = arith.constant 0 : index
    %3 = vector.load %arg2[%c0_3, %c0_4] : memref<1x32xf32, #tpu.memory_space<vmem>>, vector<1x32xf32>
    %4 = vector.broadcast %2 : vector<64x1xf32> to vector<64x32xf32>
    %5 = vector.broadcast %3 : vector<1x32xf32> to vector<64x32xf32>
    %6 = arith.mulf %4, %5 : vector<64x32xf32>
    %c0_5 = arith.constant 0 : index
    %c0_6 = arith.constant 0 : index
    %7 = vector.load %arg3[%c0_5, %c0_6] : memref<1x32xf32, #tpu.memory_space<vmem>>, vector<1x32xf32>
    %8 = vector.broadcast %7 : vector<1x32xf32> to vector<64x32xf32>
    %9 = arith.addf %6, %8 : vector<64x32xf32>
    %c0_7 = arith.constant 0 : index
    %c0_8 = arith.constant 0 : index
    %10 = vector.load %arg4[%c0_7, %c0_8] : memref<64x64xf32, #tpu.memory_space<vmem>>, vector<64x64xf32>
    %c0_9 = arith.constant 0 : index
    %c0_10 = arith.constant 0 : index
    %11 = vector.load %arg5[%c0_9, %c0_10] : memref<64x64xf32, #tpu.memory_space<vmem>>, vector<64x64xf32>
    %c0_11 = arith.constant 0 : index
    %c0_12 = arith.constant 0 : index
    %c0_13 = arith.constant 0 : index
    %12 = vector.load %arg8[%c0_11, %c0_12, %c0_13] : memref<8x32x48xf32, #tpu.memory_space<vmem>>, vector<1x32x48xf32>
    %13 = vector.shape_cast %12 : vector<1x32x48xf32> to vector<32x48xf32>
    %c0_14 = arith.constant 0 : index
    %c0_15 = arith.constant 0 : index
    %c0_16 = arith.constant 0 : index
    %14 = vector.load %arg9[%c0_14, %c0_15, %c0_16] : memref<8x1x48xf32, #tpu.memory_space<vmem>>, vector<1x1x48xf32>
    %15 = vector.shape_cast %14 : vector<1x1x48xf32> to vector<1x48xf32>
    %cst = arith.constant dense<0.000000e+00> : vector<64x48xf32>
    %16 = tpu.matmul %9, %13, %cst {dimension_numbers = #tpu.dot_dimension_numbers<[1], [0], [0], [1], [0, 0, 1, 1], [], []>} : vector<64x32xf32>, vector<32x48xf32>, vector<64x48xf32> -> vector<64x48xf32>
    %17 = vector.broadcast %15 : vector<1x48xf32> to vector<64x48xf32>
    %18 = arith.addf %16, %17 : vector<64x48xf32>
    %19 = vector.extract_strided_slice %18 {offsets = [0, 0], sizes = [64, 16], strides = [1, 1]} : vector<64x48xf32> to vector<64x16xf32>
    %20 = vector.extract_strided_slice %18 {offsets = [0, 16], sizes = [64, 16], strides = [1, 1]} : vector<64x48xf32> to vector<64x16xf32>
    %21 = vector.extract_strided_slice %18 {offsets = [0, 32], sizes = [64, 16], strides = [1, 1]} : vector<64x48xf32> to vector<64x16xf32>
    %22 = vector.extract_strided_slice %19 {offsets = [0, 0], sizes = [64, 8], strides = [1, 1]} : vector<64x16xf32> to vector<64x8xf32>
    %23 = vector.extract_strided_slice %20 {offsets = [0, 0], sizes = [64, 8], strides = [1, 1]} : vector<64x16xf32> to vector<64x8xf32>
    %24 = tpu.transpose %23, [1, 0] : vector<64x8xf32> -> vector<8x64xf32>
    %cst_17 = arith.constant dense<0.000000e+00> : vector<64x64xf32>
    %25 = tpu.matmul %22, %24, %cst_17 {dimension_numbers = #tpu.dot_dimension_numbers<[1], [0], [0], [1], [0, 0, 1, 1], [], []>} : vector<64x8xf32>, vector<8x64xf32>, vector<64x64xf32> -> vector<64x64xf32>
    %26 = arith.addf %25, %10 : vector<64x64xf32>
    %cst_18 = arith.constant dense<0xFF800000> : vector<64xf32>
    %27 = vector.multi_reduction <maximumf>, %26, %cst_18 [1] : vector<64x64xf32> to vector<64xf32>
    %28 = vector.shape_cast %27 : vector<64xf32> to vector<64x1xf32>
    %29 = vector.broadcast %28 : vector<64x1xf32> to vector<64x64xf32>
    %30 = arith.subf %26, %29 : vector<64x64xf32>
    %31 = math.exp %30 : vector<64x64xf32>
    %cst_19 = arith.constant dense<0.000000e+00> : vector<64xf32>
    %32 = vector.multi_reduction <add>, %31, %cst_19 [1] : vector<64x64xf32> to vector<64xf32>
    %33 = vector.shape_cast %32 : vector<64xf32> to vector<64x1xf32>
    %34 = tpu.reciprocal %33 {approx = true} : vector<64x1xf32> -> vector<64x1xf32>
    %35 = vector.broadcast %34 : vector<64x1xf32> to vector<64x64xf32>
    %36 = arith.mulf %31, %35 : vector<64x64xf32>
    %37 = vector.extract_strided_slice %21 {offsets = [0, 0], sizes = [64, 8], strides = [1, 1]} : vector<64x16xf32> to vector<64x8xf32>
    %cst_20 = arith.constant dense<0.000000e+00> : vector<64x8xf32>
    %38 = tpu.matmul %36, %37, %cst_20 {dimension_numbers = #tpu.dot_dimension_numbers<[1], [0], [0], [1], [0, 0, 1, 1], [], []>} : vector<64x64xf32>, vector<64x8xf32>, vector<64x8xf32> -> vector<64x8xf32>
    %39 = vector.extract_strided_slice %19 {offsets = [0, 8], sizes = [64, 8], strides = [1, 1]} : vector<64x16xf32> to vector<64x8xf32>
    %40 = vector.extract_strided_slice %20 {offsets = [0, 8], sizes = [64, 8], strides = [1, 1]} : vector<64x16xf32> to vector<64x8xf32>
    %41 = tpu.transpose %40, [1, 0] : vector<64x8xf32> -> vector<8x64xf32>
    %cst_21 = arith.constant dense<0.000000e+00> : vector<64x64xf32>
    %42 = tpu.matmul %39, %41, %cst_21 {dimension_numbers = #tpu.dot_dimension_numbers<[1], [0], [0], [1], [0, 0, 1, 1], [], []>} : vector<64x8xf32>, vector<8x64xf32>, vector<64x64xf32> -> vector<64x64xf32>
    %43 = arith.addf %42, %10 : vector<64x64xf32>
    %cst_22 = arith.constant dense<0xFF800000> : vector<64xf32>
    %44 = vector.multi_reduction <maximumf>, %43, %cst_22 [1] : vector<64x64xf32> to vector<64xf32>
    %45 = vector.shape_cast %44 : vector<64xf32> to vector<64x1xf32>
    %46 = vector.broadcast %45 : vector<64x1xf32> to vector<64x64xf32>
    %47 = arith.subf %43, %46 : vector<64x64xf32>
    %48 = math.exp %47 : vector<64x64xf32>
    %cst_23 = arith.constant dense<0.000000e+00> : vector<64xf32>
    %49 = vector.multi_reduction <add>, %48, %cst_23 [1] : vector<64x64xf32> to vector<64xf32>
    %50 = vector.shape_cast %49 : vector<64xf32> to vector<64x1xf32>
    %51 = tpu.reciprocal %50 {approx = true} : vector<64x1xf32> -> vector<64x1xf32>
    %52 = vector.broadcast %51 : vector<64x1xf32> to vector<64x64xf32>
    %53 = arith.mulf %48, %52 : vector<64x64xf32>
    %54 = vector.extract_strided_slice %21 {offsets = [0, 8], sizes = [64, 8], strides = [1, 1]} : vector<64x16xf32> to vector<64x8xf32>
    %cst_24 = arith.constant dense<0.000000e+00> : vector<64x8xf32>
    %55 = tpu.matmul %53, %54, %cst_24 {dimension_numbers = #tpu.dot_dimension_numbers<[1], [0], [0], [1], [0, 0, 1, 1], [], []>} : vector<64x64xf32>, vector<64x8xf32>, vector<64x8xf32> -> vector<64x8xf32>
    %56 = tpu.concatenate %38, %55 in 1 : vector<64x8xf32>, vector<64x8xf32> -> vector<64x16xf32>
    %c0_25 = arith.constant 0 : index
    %c0_26 = arith.constant 0 : index
    %c0_27 = arith.constant 0 : index
    %57 = vector.load %arg10[%c0_25, %c0_26, %c0_27] : memref<8x16x32xf32, #tpu.memory_space<vmem>>, vector<1x16x32xf32>
    %58 = vector.shape_cast %57 : vector<1x16x32xf32> to vector<16x32xf32>
    %cst_28 = arith.constant dense<0.000000e+00> : vector<64x32xf32>
    %59 = tpu.matmul %56, %58, %cst_28 {dimension_numbers = #tpu.dot_dimension_numbers<[1], [0], [0], [1], [0, 0, 1, 1], [], []>} : vector<64x16xf32>, vector<16x32xf32>, vector<64x32xf32> -> vector<64x32xf32>
    %c0_29 = arith.constant 0 : index
    %c0_30 = arith.constant 0 : index
    %c0_31 = arith.constant 0 : index
    %60 = vector.load %arg11[%c0_29, %c0_30, %c0_31] : memref<8x1x32xf32, #tpu.memory_space<vmem>>, vector<1x1x32xf32>
    %61 = vector.shape_cast %60 : vector<1x1x32xf32> to vector<1x32xf32>
    %62 = vector.broadcast %61 : vector<1x32xf32> to vector<64x32xf32>
    %63 = arith.addf %59, %62 : vector<64x32xf32>
    %64 = arith.addf %9, %63 : vector<64x32xf32>
    %c0_32 = arith.constant 0 : index
    %c0_33 = arith.constant 0 : index
    %c0_34 = arith.constant 0 : index
    %65 = vector.load %arg16[%c0_32, %c0_33, %c0_34] : memref<12x1x32xf32, #tpu.memory_space<vmem>>, vector<1x1x32xf32>
    %66 = vector.shape_cast %65 : vector<1x1x32xf32> to vector<1x32xf32>
    %c0_35 = arith.constant 0 : index
    %c0_36 = arith.constant 0 : index
    %c0_37 = arith.constant 0 : index
    %67 = vector.load %arg17[%c0_35, %c0_36, %c0_37] : memref<12x1x32xf32, #tpu.memory_space<vmem>>, vector<1x1x32xf32>
    %68 = vector.shape_cast %67 : vector<1x1x32xf32> to vector<1x32xf32>
    %cst_38 = arith.constant dense<0.000000e+00> : vector<64xf32>
    %69 = vector.multi_reduction <add>, %64, %cst_38 [1] : vector<64x32xf32> to vector<64xf32>
    %70 = vector.shape_cast %69 : vector<64xf32> to vector<64x1xf32>
    %cst_39 = arith.constant 3.200000e+01 : f32
    %71 = vector.broadcast %cst_39 : f32 to vector<64x1xf32>
    %72 = arith.divf %70, %71 : vector<64x1xf32>
    %73 = vector.broadcast %72 : vector<64x1xf32> to vector<64x32xf32>
    %74 = arith.subf %64, %73 : vector<64x32xf32>
    %75 = arith.mulf %74, %74 : vector<64x32xf32>
    %cst_40 = arith.constant dense<0.000000e+00> : vector<64xf32>
    %76 = vector.multi_reduction <add>, %75, %cst_40 [1] : vector<64x32xf32> to vector<64xf32>
    %77 = vector.shape_cast %76 : vector<64xf32> to vector<64x1xf32>
    %cst_41 = arith.constant 3.200000e+01 : f32
    %78 = vector.broadcast %cst_41 : f32 to vector<64x1xf32>
    %79 = arith.divf %77, %78 : vector<64x1xf32>
    %cst_42 = arith.constant 9.99999974E-6 : f32
    %80 = vector.broadcast %cst_42 : f32 to vector<64x1xf32>
    %81 = arith.addf %79, %80 : vector<64x1xf32>
    %82 = math.rsqrt %81 : vector<64x1xf32>
    %83 = vector.broadcast %82 : vector<64x1xf32> to vector<64x32xf32>
    %84 = arith.mulf %74, %83 : vector<64x32xf32>
    %85 = vector.broadcast %66 : vector<1x32xf32> to vector<64x32xf32>
    %86 = arith.mulf %84, %85 : vector<64x32xf32>
    %87 = vector.broadcast %68 : vector<1x32xf32> to vector<64x32xf32>
    %88 = arith.addf %86, %87 : vector<64x32xf32>
    %c1 = arith.constant 1 : index
    %c0_43 = arith.constant 0 : index
    %c0_44 = arith.constant 0 : index
    %89 = vector.load %arg8[%c1, %c0_43, %c0_44] : memref<8x32x48xf32, #tpu.memory_space<vmem>>, vector<1x32x48xf32>
    %90 = vector.shape_cast %89 : vector<1x32x48xf32> to vector<32x48xf32>
    %c1_45 = arith.constant 1 : index
    %c0_46 = arith.constant 0 : index
    %c0_47 = arith.constant 0 : index
    %91 = vector.load %arg9[%c1_45, %c0_46, %c0_47] : memref<8x1x48xf32, #tpu.memory_space<vmem>>, vector<1x1x48xf32>
    %92 = vector.shape_cast %91 : vector<1x1x48xf32> to vector<1x48xf32>
    %cst_48 = arith.constant dense<0.000000e+00> : vector<64x48xf32>
    %93 = tpu.matmul %88, %90, %cst_48 {dimension_numbers = #tpu.dot_dimension_numbers<[1], [0], [0], [1], [0, 0, 1, 1], [], []>} : vector<64x32xf32>, vector<32x48xf32>, vector<64x48xf32> -> vector<64x48xf32>
    %94 = vector.broadcast %92 : vector<1x48xf32> to vector<64x48xf32>
    %95 = arith.addf %93, %94 : vector<64x48xf32>
    %96 = vector.extract_strided_slice %95 {offsets = [0, 0], sizes = [64, 16], strides = [1, 1]} : vector<64x48xf32> to vector<64x16xf32>
    %97 = vector.extract_strided_slice %95 {offsets = [0, 16], sizes = [64, 16], strides = [1, 1]} : vector<64x48xf32> to vector<64x16xf32>
    %98 = vector.extract_strided_slice %95 {offsets = [0, 32], sizes = [64, 16], strides = [1, 1]} : vector<64x48xf32> to vector<64x16xf32>
    %99 = vector.extract_strided_slice %96 {offsets = [0, 0], sizes = [64, 8], strides = [1, 1]} : vector<64x16xf32> to vector<64x8xf32>
    %100 = vector.extract_strided_slice %97 {offsets = [0, 0], sizes = [64, 8], strides = [1, 1]} : vector<64x16xf32> to vector<64x8xf32>
    %101 = tpu.transpose %100, [1, 0] : vector<64x8xf32> -> vector<8x64xf32>
    %cst_49 = arith.constant dense<0.000000e+00> : vector<64x64xf32>
    %102 = tpu.matmul %99, %101, %cst_49 {dimension_numbers = #tpu.dot_dimension_numbers<[1], [0], [0], [1], [0, 0, 1, 1], [], []>} : vector<64x8xf32>, vector<8x64xf32>, vector<64x64xf32> -> vector<64x64xf32>
    %103 = arith.addf %102, %11 : vector<64x64xf32>
    %cst_50 = arith.constant dense<0xFF800000> : vector<64xf32>
    %104 = vector.multi_reduction <maximumf>, %103, %cst_50 [1] : vector<64x64xf32> to vector<64xf32>
    %105 = vector.shape_cast %104 : vector<64xf32> to vector<64x1xf32>
    %106 = vector.broadcast %105 : vector<64x1xf32> to vector<64x64xf32>
    %107 = arith.subf %103, %106 : vector<64x64xf32>
    %108 = math.exp %107 : vector<64x64xf32>
    %cst_51 = arith.constant dense<0.000000e+00> : vector<64xf32>
    %109 = vector.multi_reduction <add>, %108, %cst_51 [1] : vector<64x64xf32> to vector<64xf32>
    %110 = vector.shape_cast %109 : vector<64xf32> to vector<64x1xf32>
    %111 = tpu.reciprocal %110 {approx = true} : vector<64x1xf32> -> vector<64x1xf32>
    %112 = vector.broadcast %111 : vector<64x1xf32> to vector<64x64xf32>
    %113 = arith.mulf %108, %112 : vector<64x64xf32>
    %114 = vector.extract_strided_slice %98 {offsets = [0, 0], sizes = [64, 8], strides = [1, 1]} : vector<64x16xf32> to vector<64x8xf32>
    %cst_52 = arith.constant dense<0.000000e+00> : vector<64x8xf32>
    %115 = tpu.matmul %113, %114, %cst_52 {dimension_numbers = #tpu.dot_dimension_numbers<[1], [0], [0], [1], [0, 0, 1, 1], [], []>} : vector<64x64xf32>, vector<64x8xf32>, vector<64x8xf32> -> vector<64x8xf32>
    %116 = vector.extract_strided_slice %96 {offsets = [0, 8], sizes = [64, 8], strides = [1, 1]} : vector<64x16xf32> to vector<64x8xf32>
    %117 = vector.extract_strided_slice %97 {offsets = [0, 8], sizes = [64, 8], strides = [1, 1]} : vector<64x16xf32> to vector<64x8xf32>
    %118 = tpu.transpose %117, [1, 0] : vector<64x8xf32> -> vector<8x64xf32>
    %cst_53 = arith.constant dense<0.000000e+00> : vector<64x64xf32>
    %119 = tpu.matmul %116, %118, %cst_53 {dimension_numbers = #tpu.dot_dimension_numbers<[1], [0], [0], [1], [0, 0, 1, 1], [], []>} : vector<64x8xf32>, vector<8x64xf32>, vector<64x64xf32> -> vector<64x64xf32>
    %120 = arith.addf %119, %11 : vector<64x64xf32>
    %cst_54 = arith.constant dense<0xFF800000> : vector<64xf32>
    %121 = vector.multi_reduction <maximumf>, %120, %cst_54 [1] : vector<64x64xf32> to vector<64xf32>
    %122 = vector.shape_cast %121 : vector<64xf32> to vector<64x1xf32>
    %123 = vector.broadcast %122 : vector<64x1xf32> to vector<64x64xf32>
    %124 = arith.subf %120, %123 : vector<64x64xf32>
    %125 = math.exp %124 : vector<64x64xf32>
    %cst_55 = arith.constant dense<0.000000e+00> : vector<64xf32>
    %126 = vector.multi_reduction <add>, %125, %cst_55 [1] : vector<64x64xf32> to vector<64xf32>
    %127 = vector.shape_cast %126 : vector<64xf32> to vector<64x1xf32>
    %128 = tpu.reciprocal %127 {approx = true} : vector<64x1xf32> -> vector<64x1xf32>
    %129 = vector.broadcast %128 : vector<64x1xf32> to vector<64x64xf32>
    %130 = arith.mulf %125, %129 : vector<64x64xf32>
    %131 = vector.extract_strided_slice %98 {offsets = [0, 8], sizes = [64, 8], strides = [1, 1]} : vector<64x16xf32> to vector<64x8xf32>
    %cst_56 = arith.constant dense<0.000000e+00> : vector<64x8xf32>
    %132 = tpu.matmul %130, %131, %cst_56 {dimension_numbers = #tpu.dot_dimension_numbers<[1], [0], [0], [1], [0, 0, 1, 1], [], []>} : vector<64x64xf32>, vector<64x8xf32>, vector<64x8xf32> -> vector<64x8xf32>
    %133 = tpu.concatenate %115, %132 in 1 : vector<64x8xf32>, vector<64x8xf32> -> vector<64x16xf32>
    %c1_57 = arith.constant 1 : index
    %c0_58 = arith.constant 0 : index
    %c0_59 = arith.constant 0 : index
    %134 = vector.load %arg10[%c1_57, %c0_58, %c0_59] : memref<8x16x32xf32, #tpu.memory_space<vmem>>, vector<1x16x32xf32>
    %135 = vector.shape_cast %134 : vector<1x16x32xf32> to vector<16x32xf32>
    %cst_60 = arith.constant dense<0.000000e+00> : vector<64x32xf32>
    %136 = tpu.matmul %133, %135, %cst_60 {dimension_numbers = #tpu.dot_dimension_numbers<[1], [0], [0], [1], [0, 0, 1, 1], [], []>} : vector<64x16xf32>, vector<16x32xf32>, vector<64x32xf32> -> vector<64x32xf32>
    %c1_61 = arith.constant 1 : index
    %c0_62 = arith.constant 0 : index
    %c0_63 = arith.constant 0 : index
    %137 = vector.load %arg11[%c1_61, %c0_62, %c0_63] : memref<8x1x32xf32, #tpu.memory_space<vmem>>, vector<1x1x32xf32>
    %138 = vector.shape_cast %137 : vector<1x1x32xf32> to vector<1x32xf32>
    %139 = vector.broadcast %138 : vector<1x32xf32> to vector<64x32xf32>
    %140 = arith.addf %136, %139 : vector<64x32xf32>
    %141 = arith.addf %88, %140 : vector<64x32xf32>
    %c1_64 = arith.constant 1 : index
    %c0_65 = arith.constant 0 : index
    %c0_66 = arith.constant 0 : index
    %142 = vector.load %arg16[%c1_64, %c0_65, %c0_66] : memref<12x1x32xf32, #tpu.memory_space<vmem>>, vector<1x1x32xf32>
    %143 = vector.shape_cast %142 : vector<1x1x32xf32> to vector<1x32xf32>
    %c1_67 = arith.constant 1 : index
    %c0_68 = arith.constant 0 : index
    %c0_69 = arith.constant 0 : index
    %144 = vector.load %arg17[%c1_67, %c0_68, %c0_69] : memref<12x1x32xf32, #tpu.memory_space<vmem>>, vector<1x1x32xf32>
    %145 = vector.shape_cast %144 : vector<1x1x32xf32> to vector<1x32xf32>
    %cst_70 = arith.constant dense<0.000000e+00> : vector<64xf32>
    %146 = vector.multi_reduction <add>, %141, %cst_70 [1] : vector<64x32xf32> to vector<64xf32>
    %147 = vector.shape_cast %146 : vector<64xf32> to vector<64x1xf32>
    %cst_71 = arith.constant 3.200000e+01 : f32
    %148 = vector.broadcast %cst_71 : f32 to vector<64x1xf32>
    %149 = arith.divf %147, %148 : vector<64x1xf32>
    %150 = vector.broadcast %149 : vector<64x1xf32> to vector<64x32xf32>
    %151 = arith.subf %141, %150 : vector<64x32xf32>
    %152 = arith.mulf %151, %151 : vector<64x32xf32>
    %cst_72 = arith.constant dense<0.000000e+00> : vector<64xf32>
    %153 = vector.multi_reduction <add>, %152, %cst_72 [1] : vector<64x32xf32> to vector<64xf32>
    %154 = vector.shape_cast %153 : vector<64xf32> to vector<64x1xf32>
    %cst_73 = arith.constant 3.200000e+01 : f32
    %155 = vector.broadcast %cst_73 : f32 to vector<64x1xf32>
    %156 = arith.divf %154, %155 : vector<64x1xf32>
    %cst_74 = arith.constant 9.99999974E-6 : f32
    %157 = vector.broadcast %cst_74 : f32 to vector<64x1xf32>
    %158 = arith.addf %156, %157 : vector<64x1xf32>
    %159 = math.rsqrt %158 : vector<64x1xf32>
    %160 = vector.broadcast %159 : vector<64x1xf32> to vector<64x32xf32>
    %161 = arith.mulf %151, %160 : vector<64x32xf32>
    %162 = vector.broadcast %143 : vector<1x32xf32> to vector<64x32xf32>
    %163 = arith.mulf %161, %162 : vector<64x32xf32>
    %164 = vector.broadcast %145 : vector<1x32xf32> to vector<64x32xf32>
    %165 = arith.addf %163, %164 : vector<64x32xf32>
    %c0_75 = arith.constant 0 : index
    %c0_76 = arith.constant 0 : index
    %c0_77 = arith.constant 0 : index
    %166 = vector.load %arg12[%c0_75, %c0_76, %c0_77] : memref<4x32x64xf32, #tpu.memory_space<vmem>>, vector<1x32x64xf32>
    %167 = vector.shape_cast %166 : vector<1x32x64xf32> to vector<32x64xf32>
    %cst_78 = arith.constant dense<0.000000e+00> : vector<64x64xf32>
    %168 = tpu.matmul %165, %167, %cst_78 {dimension_numbers = #tpu.dot_dimension_numbers<[1], [0], [0], [1], [0, 0, 1, 1], [], []>} : vector<64x32xf32>, vector<32x64xf32>, vector<64x64xf32> -> vector<64x64xf32>
    %c0_79 = arith.constant 0 : index
    %c0_80 = arith.constant 0 : index
    %c0_81 = arith.constant 0 : index
    %169 = vector.load %arg13[%c0_79, %c0_80, %c0_81] : memref<4x1x64xf32, #tpu.memory_space<vmem>>, vector<1x1x64xf32>
    %170 = vector.shape_cast %169 : vector<1x1x64xf32> to vector<1x64xf32>
    %171 = vector.broadcast %170 : vector<1x64xf32> to vector<64x64xf32>
    %172 = arith.addf %168, %171 : vector<64x64xf32>
    %cst_82 = arith.constant 0.000000e+00 : f32
    %173 = vector.broadcast %cst_82 : f32 to vector<64x64xf32>
    %174 = arith.cmpf ogt, %172, %173 : vector<64x64xf32>
    %cst_83 = arith.constant 0.000000e+00 : f32
    %175 = vector.broadcast %cst_83 : f32 to vector<64x64xf32>
    %176 = arith.minimumf %172, %175 : vector<64x64xf32>
    %177 = math.exp %176 : vector<64x64xf32>
    %cst_84 = arith.constant 1.000000e+00 : f32
    %178 = vector.broadcast %cst_84 : f32 to vector<64x64xf32>
    %179 = arith.subf %177, %178 : vector<64x64xf32>
    %180 = arith.select %174, %172, %179 : vector<64x64xi1>, vector<64x64xf32>
    %c0_85 = arith.constant 0 : index
    %c0_86 = arith.constant 0 : index
    %c0_87 = arith.constant 0 : index
    %181 = vector.load %arg14[%c0_85, %c0_86, %c0_87] : memref<4x64x32xf32, #tpu.memory_space<vmem>>, vector<1x64x32xf32>
    %182 = vector.shape_cast %181 : vector<1x64x32xf32> to vector<64x32xf32>
    %cst_88 = arith.constant dense<0.000000e+00> : vector<64x32xf32>
    %183 = tpu.matmul %180, %182, %cst_88 {dimension_numbers = #tpu.dot_dimension_numbers<[1], [0], [0], [1], [0, 0, 1, 1], [], []>} : vector<64x64xf32>, vector<64x32xf32>, vector<64x32xf32> -> vector<64x32xf32>
    %c0_89 = arith.constant 0 : index
    %c0_90 = arith.constant 0 : index
    %c0_91 = arith.constant 0 : index
    %184 = vector.load %arg15[%c0_89, %c0_90, %c0_91] : memref<4x1x32xf32, #tpu.memory_space<vmem>>, vector<1x1x32xf32>
    %185 = vector.shape_cast %184 : vector<1x1x32xf32> to vector<1x32xf32>
    %186 = vector.broadcast %185 : vector<1x32xf32> to vector<64x32xf32>
    %187 = arith.addf %183, %186 : vector<64x32xf32>
    %188 = arith.addf %165, %187 : vector<64x32xf32>
    %c2 = arith.constant 2 : index
    %c0_92 = arith.constant 0 : index
    %c0_93 = arith.constant 0 : index
    %189 = vector.load %arg16[%c2, %c0_92, %c0_93] : memref<12x1x32xf32, #tpu.memory_space<vmem>>, vector<1x1x32xf32>
    %190 = vector.shape_cast %189 : vector<1x1x32xf32> to vector<1x32xf32>
    %c2_94 = arith.constant 2 : index
    %c0_95 = arith.constant 0 : index
    %c0_96 = arith.constant 0 : index
    %191 = vector.load %arg17[%c2_94, %c0_95, %c0_96] : memref<12x1x32xf32, #tpu.memory_space<vmem>>, vector<1x1x32xf32>
    %192 = vector.shape_cast %191 : vector<1x1x32xf32> to vector<1x32xf32>
    %cst_97 = arith.constant dense<0.000000e+00> : vector<64xf32>
    %193 = vector.multi_reduction <add>, %188, %cst_97 [1] : vector<64x32xf32> to vector<64xf32>
    %194 = vector.shape_cast %193 : vector<64xf32> to vector<64x1xf32>
    %cst_98 = arith.constant 3.200000e+01 : f32
    %195 = vector.broadcast %cst_98 : f32 to vector<64x1xf32>
    %196 = arith.divf %194, %195 : vector<64x1xf32>
    %197 = vector.broadcast %196 : vector<64x1xf32> to vector<64x32xf32>
    %198 = arith.subf %188, %197 : vector<64x32xf32>
    %199 = arith.mulf %198, %198 : vector<64x32xf32>
    %cst_99 = arith.constant dense<0.000000e+00> : vector<64xf32>
    %200 = vector.multi_reduction <add>, %199, %cst_99 [1] : vector<64x32xf32> to vector<64xf32>
    %201 = vector.shape_cast %200 : vector<64xf32> to vector<64x1xf32>
    %cst_100 = arith.constant 3.200000e+01 : f32
    %202 = vector.broadcast %cst_100 : f32 to vector<64x1xf32>
    %203 = arith.divf %201, %202 : vector<64x1xf32>
    %cst_101 = arith.constant 9.99999974E-6 : f32
    %204 = vector.broadcast %cst_101 : f32 to vector<64x1xf32>
    %205 = arith.addf %203, %204 : vector<64x1xf32>
    %206 = math.rsqrt %205 : vector<64x1xf32>
    %207 = vector.broadcast %206 : vector<64x1xf32> to vector<64x32xf32>
    %208 = arith.mulf %198, %207 : vector<64x32xf32>
    %209 = vector.broadcast %190 : vector<1x32xf32> to vector<64x32xf32>
    %210 = arith.mulf %208, %209 : vector<64x32xf32>
    %211 = vector.broadcast %192 : vector<1x32xf32> to vector<64x32xf32>
    %212 = arith.addf %210, %211 : vector<64x32xf32>
    %c2_102 = arith.constant 2 : index
    %c0_103 = arith.constant 0 : index
    %c0_104 = arith.constant 0 : index
    %213 = vector.load %arg8[%c2_102, %c0_103, %c0_104] : memref<8x32x48xf32, #tpu.memory_space<vmem>>, vector<1x32x48xf32>
    %214 = vector.shape_cast %213 : vector<1x32x48xf32> to vector<32x48xf32>
    %c2_105 = arith.constant 2 : index
    %c0_106 = arith.constant 0 : index
    %c0_107 = arith.constant 0 : index
    %215 = vector.load %arg9[%c2_105, %c0_106, %c0_107] : memref<8x1x48xf32, #tpu.memory_space<vmem>>, vector<1x1x48xf32>
    %216 = vector.shape_cast %215 : vector<1x1x48xf32> to vector<1x48xf32>
    %cst_108 = arith.constant dense<0.000000e+00> : vector<64x48xf32>
    %217 = tpu.matmul %212, %214, %cst_108 {dimension_numbers = #tpu.dot_dimension_numbers<[1], [0], [0], [1], [0, 0, 1, 1], [], []>} : vector<64x32xf32>, vector<32x48xf32>, vector<64x48xf32> -> vector<64x48xf32>
    %218 = vector.broadcast %216 : vector<1x48xf32> to vector<64x48xf32>
    %219 = arith.addf %217, %218 : vector<64x48xf32>
    %220 = vector.extract_strided_slice %219 {offsets = [0, 0], sizes = [64, 16], strides = [1, 1]} : vector<64x48xf32> to vector<64x16xf32>
    %221 = vector.extract_strided_slice %219 {offsets = [0, 16], sizes = [64, 16], strides = [1, 1]} : vector<64x48xf32> to vector<64x16xf32>
    %222 = vector.extract_strided_slice %219 {offsets = [0, 32], sizes = [64, 16], strides = [1, 1]} : vector<64x48xf32> to vector<64x16xf32>
    %223 = vector.extract_strided_slice %220 {offsets = [0, 0], sizes = [64, 8], strides = [1, 1]} : vector<64x16xf32> to vector<64x8xf32>
    %224 = vector.extract_strided_slice %221 {offsets = [0, 0], sizes = [64, 8], strides = [1, 1]} : vector<64x16xf32> to vector<64x8xf32>
    %225 = tpu.transpose %224, [1, 0] : vector<64x8xf32> -> vector<8x64xf32>
    %cst_109 = arith.constant dense<0.000000e+00> : vector<64x64xf32>
    %226 = tpu.matmul %223, %225, %cst_109 {dimension_numbers = #tpu.dot_dimension_numbers<[1], [0], [0], [1], [0, 0, 1, 1], [], []>} : vector<64x8xf32>, vector<8x64xf32>, vector<64x64xf32> -> vector<64x64xf32>
    %227 = arith.addf %226, %10 : vector<64x64xf32>
    %cst_110 = arith.constant dense<0xFF800000> : vector<64xf32>
    %228 = vector.multi_reduction <maximumf>, %227, %cst_110 [1] : vector<64x64xf32> to vector<64xf32>
    %229 = vector.shape_cast %228 : vector<64xf32> to vector<64x1xf32>
    %230 = vector.broadcast %229 : vector<64x1xf32> to vector<64x64xf32>
    %231 = arith.subf %227, %230 : vector<64x64xf32>
    %232 = math.exp %231 : vector<64x64xf32>
    %cst_111 = arith.constant dense<0.000000e+00> : vector<64xf32>
    %233 = vector.multi_reduction <add>, %232, %cst_111 [1] : vector<64x64xf32> to vector<64xf32>
    %234 = vector.shape_cast %233 : vector<64xf32> to vector<64x1xf32>
    %235 = tpu.reciprocal %234 {approx = true} : vector<64x1xf32> -> vector<64x1xf32>
    %236 = vector.broadcast %235 : vector<64x1xf32> to vector<64x64xf32>
    %237 = arith.mulf %232, %236 : vector<64x64xf32>
    %238 = vector.extract_strided_slice %222 {offsets = [0, 0], sizes = [64, 8], strides = [1, 1]} : vector<64x16xf32> to vector<64x8xf32>
    %cst_112 = arith.constant dense<0.000000e+00> : vector<64x8xf32>
    %239 = tpu.matmul %237, %238, %cst_112 {dimension_numbers = #tpu.dot_dimension_numbers<[1], [0], [0], [1], [0, 0, 1, 1], [], []>} : vector<64x64xf32>, vector<64x8xf32>, vector<64x8xf32> -> vector<64x8xf32>
    %240 = vector.extract_strided_slice %220 {offsets = [0, 8], sizes = [64, 8], strides = [1, 1]} : vector<64x16xf32> to vector<64x8xf32>
    %241 = vector.extract_strided_slice %221 {offsets = [0, 8], sizes = [64, 8], strides = [1, 1]} : vector<64x16xf32> to vector<64x8xf32>
    %242 = tpu.transpose %241, [1, 0] : vector<64x8xf32> -> vector<8x64xf32>
    %cst_113 = arith.constant dense<0.000000e+00> : vector<64x64xf32>
    %243 = tpu.matmul %240, %242, %cst_113 {dimension_numbers = #tpu.dot_dimension_numbers<[1], [0], [0], [1], [0, 0, 1, 1], [], []>} : vector<64x8xf32>, vector<8x64xf32>, vector<64x64xf32> -> vector<64x64xf32>
    %244 = arith.addf %243, %10 : vector<64x64xf32>
    %cst_114 = arith.constant dense<0xFF800000> : vector<64xf32>
    %245 = vector.multi_reduction <maximumf>, %244, %cst_114 [1] : vector<64x64xf32> to vector<64xf32>
    %246 = vector.shape_cast %245 : vector<64xf32> to vector<64x1xf32>
    %247 = vector.broadcast %246 : vector<64x1xf32> to vector<64x64xf32>
    %248 = arith.subf %244, %247 : vector<64x64xf32>
    %249 = math.exp %248 : vector<64x64xf32>
    %cst_115 = arith.constant dense<0.000000e+00> : vector<64xf32>
    %250 = vector.multi_reduction <add>, %249, %cst_115 [1] : vector<64x64xf32> to vector<64xf32>
    %251 = vector.shape_cast %250 : vector<64xf32> to vector<64x1xf32>
    %252 = tpu.reciprocal %251 {approx = true} : vector<64x1xf32> -> vector<64x1xf32>
    %253 = vector.broadcast %252 : vector<64x1xf32> to vector<64x64xf32>
    %254 = arith.mulf %249, %253 : vector<64x64xf32>
    %255 = vector.extract_strided_slice %222 {offsets = [0, 8], sizes = [64, 8], strides = [1, 1]} : vector<64x16xf32> to vector<64x8xf32>
    %cst_116 = arith.constant dense<0.000000e+00> : vector<64x8xf32>
    %256 = tpu.matmul %254, %255, %cst_116 {dimension_numbers = #tpu.dot_dimension_numbers<[1], [0], [0], [1], [0, 0, 1, 1], [], []>} : vector<64x64xf32>, vector<64x8xf32>, vector<64x8xf32> -> vector<64x8xf32>
    %257 = tpu.concatenate %239, %256 in 1 : vector<64x8xf32>, vector<64x8xf32> -> vector<64x16xf32>
    %c2_117 = arith.constant 2 : index
    %c0_118 = arith.constant 0 : index
    %c0_119 = arith.constant 0 : index
    %258 = vector.load %arg10[%c2_117, %c0_118, %c0_119] : memref<8x16x32xf32, #tpu.memory_space<vmem>>, vector<1x16x32xf32>
    %259 = vector.shape_cast %258 : vector<1x16x32xf32> to vector<16x32xf32>
    %cst_120 = arith.constant dense<0.000000e+00> : vector<64x32xf32>
    %260 = tpu.matmul %257, %259, %cst_120 {dimension_numbers = #tpu.dot_dimension_numbers<[1], [0], [0], [1], [0, 0, 1, 1], [], []>} : vector<64x16xf32>, vector<16x32xf32>, vector<64x32xf32> -> vector<64x32xf32>
    %c2_121 = arith.constant 2 : index
    %c0_122 = arith.constant 0 : index
    %c0_123 = arith.constant 0 : index
    %261 = vector.load %arg11[%c2_121, %c0_122, %c0_123] : memref<8x1x32xf32, #tpu.memory_space<vmem>>, vector<1x1x32xf32>
    %262 = vector.shape_cast %261 : vector<1x1x32xf32> to vector<1x32xf32>
    %263 = vector.broadcast %262 : vector<1x32xf32> to vector<64x32xf32>
    %264 = arith.addf %260, %263 : vector<64x32xf32>
    %265 = arith.addf %212, %264 : vector<64x32xf32>
    %c3 = arith.constant 3 : index
    %c0_124 = arith.constant 0 : index
    %c0_125 = arith.constant 0 : index
    %266 = vector.load %arg16[%c3, %c0_124, %c0_125] : memref<12x1x32xf32, #tpu.memory_space<vmem>>, vector<1x1x32xf32>
    %267 = vector.shape_cast %266 : vector<1x1x32xf32> to vector<1x32xf32>
    %c3_126 = arith.constant 3 : index
    %c0_127 = arith.constant 0 : index
    %c0_128 = arith.constant 0 : index
    %268 = vector.load %arg17[%c3_126, %c0_127, %c0_128] : memref<12x1x32xf32, #tpu.memory_space<vmem>>, vector<1x1x32xf32>
    %269 = vector.shape_cast %268 : vector<1x1x32xf32> to vector<1x32xf32>
    %cst_129 = arith.constant dense<0.000000e+00> : vector<64xf32>
    %270 = vector.multi_reduction <add>, %265, %cst_129 [1] : vector<64x32xf32> to vector<64xf32>
    %271 = vector.shape_cast %270 : vector<64xf32> to vector<64x1xf32>
    %cst_130 = arith.constant 3.200000e+01 : f32
    %272 = vector.broadcast %cst_130 : f32 to vector<64x1xf32>
    %273 = arith.divf %271, %272 : vector<64x1xf32>
    %274 = vector.broadcast %273 : vector<64x1xf32> to vector<64x32xf32>
    %275 = arith.subf %265, %274 : vector<64x32xf32>
    %276 = arith.mulf %275, %275 : vector<64x32xf32>
    %cst_131 = arith.constant dense<0.000000e+00> : vector<64xf32>
    %277 = vector.multi_reduction <add>, %276, %cst_131 [1] : vector<64x32xf32> to vector<64xf32>
    %278 = vector.shape_cast %277 : vector<64xf32> to vector<64x1xf32>
    %cst_132 = arith.constant 3.200000e+01 : f32
    %279 = vector.broadcast %cst_132 : f32 to vector<64x1xf32>
    %280 = arith.divf %278, %279 : vector<64x1xf32>
    %cst_133 = arith.constant 9.99999974E-6 : f32
    %281 = vector.broadcast %cst_133 : f32 to vector<64x1xf32>
    %282 = arith.addf %280, %281 : vector<64x1xf32>
    %283 = math.rsqrt %282 : vector<64x1xf32>
    %284 = vector.broadcast %283 : vector<64x1xf32> to vector<64x32xf32>
    %285 = arith.mulf %275, %284 : vector<64x32xf32>
    %286 = vector.broadcast %267 : vector<1x32xf32> to vector<64x32xf32>
    %287 = arith.mulf %285, %286 : vector<64x32xf32>
    %288 = vector.broadcast %269 : vector<1x32xf32> to vector<64x32xf32>
    %289 = arith.addf %287, %288 : vector<64x32xf32>
    %c3_134 = arith.constant 3 : index
    %c0_135 = arith.constant 0 : index
    %c0_136 = arith.constant 0 : index
    %290 = vector.load %arg8[%c3_134, %c0_135, %c0_136] : memref<8x32x48xf32, #tpu.memory_space<vmem>>, vector<1x32x48xf32>
    %291 = vector.shape_cast %290 : vector<1x32x48xf32> to vector<32x48xf32>
    %c3_137 = arith.constant 3 : index
    %c0_138 = arith.constant 0 : index
    %c0_139 = arith.constant 0 : index
    %292 = vector.load %arg9[%c3_137, %c0_138, %c0_139] : memref<8x1x48xf32, #tpu.memory_space<vmem>>, vector<1x1x48xf32>
    %293 = vector.shape_cast %292 : vector<1x1x48xf32> to vector<1x48xf32>
    %cst_140 = arith.constant dense<0.000000e+00> : vector<64x48xf32>
    %294 = tpu.matmul %289, %291, %cst_140 {dimension_numbers = #tpu.dot_dimension_numbers<[1], [0], [0], [1], [0, 0, 1, 1], [], []>} : vector<64x32xf32>, vector<32x48xf32>, vector<64x48xf32> -> vector<64x48xf32>
    %295 = vector.broadcast %293 : vector<1x48xf32> to vector<64x48xf32>
    %296 = arith.addf %294, %295 : vector<64x48xf32>
    %297 = vector.extract_strided_slice %296 {offsets = [0, 0], sizes = [64, 16], strides = [1, 1]} : vector<64x48xf32> to vector<64x16xf32>
    %298 = vector.extract_strided_slice %296 {offsets = [0, 16], sizes = [64, 16], strides = [1, 1]} : vector<64x48xf32> to vector<64x16xf32>
    %299 = vector.extract_strided_slice %296 {offsets = [0, 32], sizes = [64, 16], strides = [1, 1]} : vector<64x48xf32> to vector<64x16xf32>
    %300 = vector.extract_strided_slice %297 {offsets = [0, 0], sizes = [64, 8], strides = [1, 1]} : vector<64x16xf32> to vector<64x8xf32>
    %301 = vector.extract_strided_slice %298 {offsets = [0, 0], sizes = [64, 8], strides = [1, 1]} : vector<64x16xf32> to vector<64x8xf32>
    %302 = tpu.transpose %301, [1, 0] : vector<64x8xf32> -> vector<8x64xf32>
    %cst_141 = arith.constant dense<0.000000e+00> : vector<64x64xf32>
    %303 = tpu.matmul %300, %302, %cst_141 {dimension_numbers = #tpu.dot_dimension_numbers<[1], [0], [0], [1], [0, 0, 1, 1], [], []>} : vector<64x8xf32>, vector<8x64xf32>, vector<64x64xf32> -> vector<64x64xf32>
    %304 = arith.addf %303, %11 : vector<64x64xf32>
    %cst_142 = arith.constant dense<0xFF800000> : vector<64xf32>
    %305 = vector.multi_reduction <maximumf>, %304, %cst_142 [1] : vector<64x64xf32> to vector<64xf32>
    %306 = vector.shape_cast %305 : vector<64xf32> to vector<64x1xf32>
    %307 = vector.broadcast %306 : vector<64x1xf32> to vector<64x64xf32>
    %308 = arith.subf %304, %307 : vector<64x64xf32>
    %309 = math.exp %308 : vector<64x64xf32>
    %cst_143 = arith.constant dense<0.000000e+00> : vector<64xf32>
    %310 = vector.multi_reduction <add>, %309, %cst_143 [1] : vector<64x64xf32> to vector<64xf32>
    %311 = vector.shape_cast %310 : vector<64xf32> to vector<64x1xf32>
    %312 = tpu.reciprocal %311 {approx = true} : vector<64x1xf32> -> vector<64x1xf32>
    %313 = vector.broadcast %312 : vector<64x1xf32> to vector<64x64xf32>
    %314 = arith.mulf %309, %313 : vector<64x64xf32>
    %315 = vector.extract_strided_slice %299 {offsets = [0, 0], sizes = [64, 8], strides = [1, 1]} : vector<64x16xf32> to vector<64x8xf32>
    %cst_144 = arith.constant dense<0.000000e+00> : vector<64x8xf32>
    %316 = tpu.matmul %314, %315, %cst_144 {dimension_numbers = #tpu.dot_dimension_numbers<[1], [0], [0], [1], [0, 0, 1, 1], [], []>} : vector<64x64xf32>, vector<64x8xf32>, vector<64x8xf32> -> vector<64x8xf32>
    %317 = vector.extract_strided_slice %297 {offsets = [0, 8], sizes = [64, 8], strides = [1, 1]} : vector<64x16xf32> to vector<64x8xf32>
    %318 = vector.extract_strided_slice %298 {offsets = [0, 8], sizes = [64, 8], strides = [1, 1]} : vector<64x16xf32> to vector<64x8xf32>
    %319 = tpu.transpose %318, [1, 0] : vector<64x8xf32> -> vector<8x64xf32>
    %cst_145 = arith.constant dense<0.000000e+00> : vector<64x64xf32>
    %320 = tpu.matmul %317, %319, %cst_145 {dimension_numbers = #tpu.dot_dimension_numbers<[1], [0], [0], [1], [0, 0, 1, 1], [], []>} : vector<64x8xf32>, vector<8x64xf32>, vector<64x64xf32> -> vector<64x64xf32>
    %321 = arith.addf %320, %11 : vector<64x64xf32>
    %cst_146 = arith.constant dense<0xFF800000> : vector<64xf32>
    %322 = vector.multi_reduction <maximumf>, %321, %cst_146 [1] : vector<64x64xf32> to vector<64xf32>
    %323 = vector.shape_cast %322 : vector<64xf32> to vector<64x1xf32>
    %324 = vector.broadcast %323 : vector<64x1xf32> to vector<64x64xf32>
    %325 = arith.subf %321, %324 : vector<64x64xf32>
    %326 = math.exp %325 : vector<64x64xf32>
    %cst_147 = arith.constant dense<0.000000e+00> : vector<64xf32>
    %327 = vector.multi_reduction <add>, %326, %cst_147 [1] : vector<64x64xf32> to vector<64xf32>
    %328 = vector.shape_cast %327 : vector<64xf32> to vector<64x1xf32>
    %329 = tpu.reciprocal %328 {approx = true} : vector<64x1xf32> -> vector<64x1xf32>
    %330 = vector.broadcast %329 : vector<64x1xf32> to vector<64x64xf32>
    %331 = arith.mulf %326, %330 : vector<64x64xf32>
    %332 = vector.extract_strided_slice %299 {offsets = [0, 8], sizes = [64, 8], strides = [1, 1]} : vector<64x16xf32> to vector<64x8xf32>
    %cst_148 = arith.constant dense<0.000000e+00> : vector<64x8xf32>
    %333 = tpu.matmul %331, %332, %cst_148 {dimension_numbers = #tpu.dot_dimension_numbers<[1], [0], [0], [1], [0, 0, 1, 1], [], []>} : vector<64x64xf32>, vector<64x8xf32>, vector<64x8xf32> -> vector<64x8xf32>
    %334 = tpu.concatenate %316, %333 in 1 : vector<64x8xf32>, vector<64x8xf32> -> vector<64x16xf32>
    %c3_149 = arith.constant 3 : index
    %c0_150 = arith.constant 0 : index
    %c0_151 = arith.constant 0 : index
    %335 = vector.load %arg10[%c3_149, %c0_150, %c0_151] : memref<8x16x32xf32, #tpu.memory_space<vmem>>, vector<1x16x32xf32>
    %336 = vector.shape_cast %335 : vector<1x16x32xf32> to vector<16x32xf32>
    %cst_152 = arith.constant dense<0.000000e+00> : vector<64x32xf32>
    %337 = tpu.matmul %334, %336, %cst_152 {dimension_numbers = #tpu.dot_dimension_numbers<[1], [0], [0], [1], [0, 0, 1, 1], [], []>} : vector<64x16xf32>, vector<16x32xf32>, vector<64x32xf32> -> vector<64x32xf32>
    %c3_153 = arith.constant 3 : index
    %c0_154 = arith.constant 0 : index
    %c0_155 = arith.constant 0 : index
    %338 = vector.load %arg11[%c3_153, %c0_154, %c0_155] : memref<8x1x32xf32, #tpu.memory_space<vmem>>, vector<1x1x32xf32>
    %339 = vector.shape_cast %338 : vector<1x1x32xf32> to vector<1x32xf32>
    %340 = vector.broadcast %339 : vector<1x32xf32> to vector<64x32xf32>
    %341 = arith.addf %337, %340 : vector<64x32xf32>
    %342 = arith.addf %289, %341 : vector<64x32xf32>
    %c4 = arith.constant 4 : index
    %c0_156 = arith.constant 0 : index
    %c0_157 = arith.constant 0 : index
    %343 = vector.load %arg16[%c4, %c0_156, %c0_157] : memref<12x1x32xf32, #tpu.memory_space<vmem>>, vector<1x1x32xf32>
    %344 = vector.shape_cast %343 : vector<1x1x32xf32> to vector<1x32xf32>
    %c4_158 = arith.constant 4 : index
    %c0_159 = arith.constant 0 : index
    %c0_160 = arith.constant 0 : index
    %345 = vector.load %arg17[%c4_158, %c0_159, %c0_160] : memref<12x1x32xf32, #tpu.memory_space<vmem>>, vector<1x1x32xf32>
    %346 = vector.shape_cast %345 : vector<1x1x32xf32> to vector<1x32xf32>
    %cst_161 = arith.constant dense<0.000000e+00> : vector<64xf32>
    %347 = vector.multi_reduction <add>, %342, %cst_161 [1] : vector<64x32xf32> to vector<64xf32>
    %348 = vector.shape_cast %347 : vector<64xf32> to vector<64x1xf32>
    %cst_162 = arith.constant 3.200000e+01 : f32
    %349 = vector.broadcast %cst_162 : f32 to vector<64x1xf32>
    %350 = arith.divf %348, %349 : vector<64x1xf32>
    %351 = vector.broadcast %350 : vector<64x1xf32> to vector<64x32xf32>
    %352 = arith.subf %342, %351 : vector<64x32xf32>
    %353 = arith.mulf %352, %352 : vector<64x32xf32>
    %cst_163 = arith.constant dense<0.000000e+00> : vector<64xf32>
    %354 = vector.multi_reduction <add>, %353, %cst_163 [1] : vector<64x32xf32> to vector<64xf32>
    %355 = vector.shape_cast %354 : vector<64xf32> to vector<64x1xf32>
    %cst_164 = arith.constant 3.200000e+01 : f32
    %356 = vector.broadcast %cst_164 : f32 to vector<64x1xf32>
    %357 = arith.divf %355, %356 : vector<64x1xf32>
    %cst_165 = arith.constant 9.99999974E-6 : f32
    %358 = vector.broadcast %cst_165 : f32 to vector<64x1xf32>
    %359 = arith.addf %357, %358 : vector<64x1xf32>
    %360 = math.rsqrt %359 : vector<64x1xf32>
    %361 = vector.broadcast %360 : vector<64x1xf32> to vector<64x32xf32>
    %362 = arith.mulf %352, %361 : vector<64x32xf32>
    %363 = vector.broadcast %344 : vector<1x32xf32> to vector<64x32xf32>
    %364 = arith.mulf %362, %363 : vector<64x32xf32>
    %365 = vector.broadcast %346 : vector<1x32xf32> to vector<64x32xf32>
    %366 = arith.addf %364, %365 : vector<64x32xf32>
    %c1_166 = arith.constant 1 : index
    %c0_167 = arith.constant 0 : index
    %c0_168 = arith.constant 0 : index
    %367 = vector.load %arg12[%c1_166, %c0_167, %c0_168] : memref<4x32x64xf32, #tpu.memory_space<vmem>>, vector<1x32x64xf32>
    %368 = vector.shape_cast %367 : vector<1x32x64xf32> to vector<32x64xf32>
    %cst_169 = arith.constant dense<0.000000e+00> : vector<64x64xf32>
    %369 = tpu.matmul %366, %368, %cst_169 {dimension_numbers = #tpu.dot_dimension_numbers<[1], [0], [0], [1], [0, 0, 1, 1], [], []>} : vector<64x32xf32>, vector<32x64xf32>, vector<64x64xf32> -> vector<64x64xf32>
    %c1_170 = arith.constant 1 : index
    %c0_171 = arith.constant 0 : index
    %c0_172 = arith.constant 0 : index
    %370 = vector.load %arg13[%c1_170, %c0_171, %c0_172] : memref<4x1x64xf32, #tpu.memory_space<vmem>>, vector<1x1x64xf32>
    %371 = vector.shape_cast %370 : vector<1x1x64xf32> to vector<1x64xf32>
    %372 = vector.broadcast %371 : vector<1x64xf32> to vector<64x64xf32>
    %373 = arith.addf %369, %372 : vector<64x64xf32>
    %cst_173 = arith.constant 0.000000e+00 : f32
    %374 = vector.broadcast %cst_173 : f32 to vector<64x64xf32>
    %375 = arith.cmpf ogt, %373, %374 : vector<64x64xf32>
    %cst_174 = arith.constant 0.000000e+00 : f32
    %376 = vector.broadcast %cst_174 : f32 to vector<64x64xf32>
    %377 = arith.minimumf %373, %376 : vector<64x64xf32>
    %378 = math.exp %377 : vector<64x64xf32>
    %cst_175 = arith.constant 1.000000e+00 : f32
    %379 = vector.broadcast %cst_175 : f32 to vector<64x64xf32>
    %380 = arith.subf %378, %379 : vector<64x64xf32>
    %381 = arith.select %375, %373, %380 : vector<64x64xi1>, vector<64x64xf32>
    %c1_176 = arith.constant 1 : index
    %c0_177 = arith.constant 0 : index
    %c0_178 = arith.constant 0 : index
    %382 = vector.load %arg14[%c1_176, %c0_177, %c0_178] : memref<4x64x32xf32, #tpu.memory_space<vmem>>, vector<1x64x32xf32>
    %383 = vector.shape_cast %382 : vector<1x64x32xf32> to vector<64x32xf32>
    %cst_179 = arith.constant dense<0.000000e+00> : vector<64x32xf32>
    %384 = tpu.matmul %381, %383, %cst_179 {dimension_numbers = #tpu.dot_dimension_numbers<[1], [0], [0], [1], [0, 0, 1, 1], [], []>} : vector<64x64xf32>, vector<64x32xf32>, vector<64x32xf32> -> vector<64x32xf32>
    %c1_180 = arith.constant 1 : index
    %c0_181 = arith.constant 0 : index
    %c0_182 = arith.constant 0 : index
    %385 = vector.load %arg15[%c1_180, %c0_181, %c0_182] : memref<4x1x32xf32, #tpu.memory_space<vmem>>, vector<1x1x32xf32>
    %386 = vector.shape_cast %385 : vector<1x1x32xf32> to vector<1x32xf32>
    %387 = vector.broadcast %386 : vector<1x32xf32> to vector<64x32xf32>
    %388 = arith.addf %384, %387 : vector<64x32xf32>
    %389 = arith.addf %366, %388 : vector<64x32xf32>
    %c5 = arith.constant 5 : index
    %c0_183 = arith.constant 0 : index
    %c0_184 = arith.constant 0 : index
    %390 = vector.load %arg16[%c5, %c0_183, %c0_184] : memref<12x1x32xf32, #tpu.memory_space<vmem>>, vector<1x1x32xf32>
    %391 = vector.shape_cast %390 : vector<1x1x32xf32> to vector<1x32xf32>
    %c5_185 = arith.constant 5 : index
    %c0_186 = arith.constant 0 : index
    %c0_187 = arith.constant 0 : index
    %392 = vector.load %arg17[%c5_185, %c0_186, %c0_187] : memref<12x1x32xf32, #tpu.memory_space<vmem>>, vector<1x1x32xf32>
    %393 = vector.shape_cast %392 : vector<1x1x32xf32> to vector<1x32xf32>
    %cst_188 = arith.constant dense<0.000000e+00> : vector<64xf32>
    %394 = vector.multi_reduction <add>, %389, %cst_188 [1] : vector<64x32xf32> to vector<64xf32>
    %395 = vector.shape_cast %394 : vector<64xf32> to vector<64x1xf32>
    %cst_189 = arith.constant 3.200000e+01 : f32
    %396 = vector.broadcast %cst_189 : f32 to vector<64x1xf32>
    %397 = arith.divf %395, %396 : vector<64x1xf32>
    %398 = vector.broadcast %397 : vector<64x1xf32> to vector<64x32xf32>
    %399 = arith.subf %389, %398 : vector<64x32xf32>
    %400 = arith.mulf %399, %399 : vector<64x32xf32>
    %cst_190 = arith.constant dense<0.000000e+00> : vector<64xf32>
    %401 = vector.multi_reduction <add>, %400, %cst_190 [1] : vector<64x32xf32> to vector<64xf32>
    %402 = vector.shape_cast %401 : vector<64xf32> to vector<64x1xf32>
    %cst_191 = arith.constant 3.200000e+01 : f32
    %403 = vector.broadcast %cst_191 : f32 to vector<64x1xf32>
    %404 = arith.divf %402, %403 : vector<64x1xf32>
    %cst_192 = arith.constant 9.99999974E-6 : f32
    %405 = vector.broadcast %cst_192 : f32 to vector<64x1xf32>
    %406 = arith.addf %404, %405 : vector<64x1xf32>
    %407 = math.rsqrt %406 : vector<64x1xf32>
    %408 = vector.broadcast %407 : vector<64x1xf32> to vector<64x32xf32>
    %409 = arith.mulf %399, %408 : vector<64x32xf32>
    %410 = vector.broadcast %391 : vector<1x32xf32> to vector<64x32xf32>
    %411 = arith.mulf %409, %410 : vector<64x32xf32>
    %412 = vector.broadcast %393 : vector<1x32xf32> to vector<64x32xf32>
    %413 = arith.addf %411, %412 : vector<64x32xf32>
    %c0_193 = arith.constant 0 : index
    %c0_194 = arith.constant 0 : index
    %414 = vector.load %arg18[%c0_193, %c0_194] : memref<1x32xf32, #tpu.memory_space<vmem>>, vector<1x32xf32>
    %415 = vector.broadcast %0 : vector<64x1xf32> to vector<64x32xf32>
    %416 = vector.broadcast %414 : vector<1x32xf32> to vector<64x32xf32>
    %417 = arith.mulf %415, %416 : vector<64x32xf32>
    %c0_195 = arith.constant 0 : index
    %c0_196 = arith.constant 0 : index
    %418 = vector.load %arg19[%c0_195, %c0_196] : memref<1x32xf32, #tpu.memory_space<vmem>>, vector<1x32xf32>
    %419 = vector.broadcast %418 : vector<1x32xf32> to vector<64x32xf32>
    %420 = arith.addf %417, %419 : vector<64x32xf32>
    %cst_197 = arith.constant 0.000000e+00 : f32
    %421 = vector.broadcast %cst_197 : f32 to vector<64x32xf32>
    %422 = arith.cmpf ogt, %420, %421 : vector<64x32xf32>
    %cst_198 = arith.constant 0.000000e+00 : f32
    %423 = vector.broadcast %cst_198 : f32 to vector<64x32xf32>
    %424 = arith.minimumf %420, %423 : vector<64x32xf32>
    %425 = math.exp %424 : vector<64x32xf32>
    %cst_199 = arith.constant 1.000000e+00 : f32
    %426 = vector.broadcast %cst_199 : f32 to vector<64x32xf32>
    %427 = arith.subf %425, %426 : vector<64x32xf32>
    %428 = arith.select %422, %420, %427 : vector<64x32xi1>, vector<64x32xf32>
    %c0_200 = arith.constant 0 : index
    %c0_201 = arith.constant 0 : index
    %429 = vector.load %arg20[%c0_200, %c0_201] : memref<8x64xf32, #tpu.memory_space<vmem>>, vector<8x64xf32>
    %cst_202 = arith.constant dense<0.000000e+00> : vector<8x32xf32>
    %430 = tpu.matmul %429, %428, %cst_202 {dimension_numbers = #tpu.dot_dimension_numbers<[1], [0], [0], [1], [0, 0, 1, 1], [], []>} : vector<8x64xf32>, vector<64x32xf32>, vector<8x32xf32> -> vector<8x32xf32>
    %c0_203 = arith.constant 0 : index
    %c0_204 = arith.constant 0 : index
    %431 = vector.load %arg21[%c0_203, %c0_204] : memref<8x1xf32, #tpu.memory_space<vmem>>, vector<8x1xf32>
    %432 = vector.broadcast %431 : vector<8x1xf32> to vector<8x32xf32>
    %433 = arith.addf %430, %432 : vector<8x32xf32>
    %c0_205 = arith.constant 0 : index
    %c0_206 = arith.constant 0 : index
    %434 = vector.load %arg22[%c0_205, %c0_206] : memref<8x64xf32, #tpu.memory_space<vmem>>, vector<8x64xf32>
    %cst_207 = arith.constant dense<0.000000e+00> : vector<8x32xf32>
    %435 = tpu.matmul %434, %413, %cst_207 {dimension_numbers = #tpu.dot_dimension_numbers<[1], [0], [0], [1], [0, 0, 1, 1], [], []>} : vector<8x64xf32>, vector<64x32xf32>, vector<8x32xf32> -> vector<8x32xf32>
    %c0_208 = arith.constant 0 : index
    %c0_209 = arith.constant 0 : index
    %436 = vector.load %arg23[%c0_208, %c0_209] : memref<8x1xf32, #tpu.memory_space<vmem>>, vector<8x1xf32>
    %437 = vector.broadcast %436 : vector<8x1xf32> to vector<8x32xf32>
    %438 = arith.addf %435, %437 : vector<8x32xf32>
    %439 = arith.addf %433, %438 : vector<8x32xf32>
    %c0_210 = arith.constant 0 : index
    %c0_211 = arith.constant 0 : index
    %440 = vector.load %arg24[%c0_210, %c0_211] : memref<8x32xf32, #tpu.memory_space<vmem>>, vector<8x32xf32>
    %441 = arith.addf %439, %440 : vector<8x32xf32>
    %c0_212 = arith.constant 0 : index
    %c0_213 = arith.constant 0 : index
    %442 = vector.load %arg6[%c0_212, %c0_213] : memref<8x8xf32, #tpu.memory_space<vmem>>, vector<8x8xf32>
    %c0_214 = arith.constant 0 : index
    %c0_215 = arith.constant 0 : index
    %443 = vector.load %arg7[%c0_214, %c0_215] : memref<8x64xf32, #tpu.memory_space<vmem>>, vector<8x64xf32>
    %c4_216 = arith.constant 4 : index
    %c0_217 = arith.constant 0 : index
    %c0_218 = arith.constant 0 : index
    %444 = vector.load %arg8[%c4_216, %c0_217, %c0_218] : memref<8x32x48xf32, #tpu.memory_space<vmem>>, vector<1x32x48xf32>
    %445 = vector.shape_cast %444 : vector<1x32x48xf32> to vector<32x48xf32>
    %c4_219 = arith.constant 4 : index
    %c0_220 = arith.constant 0 : index
    %c0_221 = arith.constant 0 : index
    %446 = vector.load %arg9[%c4_219, %c0_220, %c0_221] : memref<8x1x48xf32, #tpu.memory_space<vmem>>, vector<1x1x48xf32>
    %447 = vector.shape_cast %446 : vector<1x1x48xf32> to vector<1x48xf32>
    %cst_222 = arith.constant dense<0.000000e+00> : vector<8x48xf32>
    %448 = tpu.matmul %441, %445, %cst_222 {dimension_numbers = #tpu.dot_dimension_numbers<[1], [0], [0], [1], [0, 0, 1, 1], [], []>} : vector<8x32xf32>, vector<32x48xf32>, vector<8x48xf32> -> vector<8x48xf32>
    %449 = vector.broadcast %447 : vector<1x48xf32> to vector<8x48xf32>
    %450 = arith.addf %448, %449 : vector<8x48xf32>
    %451 = vector.extract_strided_slice %450 {offsets = [0, 0], sizes = [8, 16], strides = [1, 1]} : vector<8x48xf32> to vector<8x16xf32>
    %452 = vector.extract_strided_slice %450 {offsets = [0, 16], sizes = [8, 16], strides = [1, 1]} : vector<8x48xf32> to vector<8x16xf32>
    %453 = vector.extract_strided_slice %450 {offsets = [0, 32], sizes = [8, 16], strides = [1, 1]} : vector<8x48xf32> to vector<8x16xf32>
    %454 = vector.extract_strided_slice %451 {offsets = [0, 0], sizes = [8, 8], strides = [1, 1]} : vector<8x16xf32> to vector<8x8xf32>
    %455 = vector.extract_strided_slice %452 {offsets = [0, 0], sizes = [8, 8], strides = [1, 1]} : vector<8x16xf32> to vector<8x8xf32>
    %456 = tpu.transpose %455, [1, 0] : vector<8x8xf32> -> vector<8x8xf32>
    %cst_223 = arith.constant dense<0.000000e+00> : vector<8x8xf32>
    %457 = tpu.matmul %454, %456, %cst_223 {dimension_numbers = #tpu.dot_dimension_numbers<[1], [0], [0], [1], [0, 0, 1, 1], [], []>} : vector<8x8xf32>, vector<8x8xf32>, vector<8x8xf32> -> vector<8x8xf32>
    %458 = arith.addf %457, %442 : vector<8x8xf32>
    %cst_224 = arith.constant dense<0xFF800000> : vector<8xf32>
    %459 = vector.multi_reduction <maximumf>, %458, %cst_224 [1] : vector<8x8xf32> to vector<8xf32>
    %460 = vector.shape_cast %459 : vector<8xf32> to vector<8x1xf32>
    %461 = vector.broadcast %460 : vector<8x1xf32> to vector<8x8xf32>
    %462 = arith.subf %458, %461 : vector<8x8xf32>
    %463 = math.exp %462 : vector<8x8xf32>
    %cst_225 = arith.constant dense<0.000000e+00> : vector<8xf32>
    %464 = vector.multi_reduction <add>, %463, %cst_225 [1] : vector<8x8xf32> to vector<8xf32>
    %465 = vector.shape_cast %464 : vector<8xf32> to vector<8x1xf32>
    %466 = tpu.reciprocal %465 {approx = true} : vector<8x1xf32> -> vector<8x1xf32>
    %467 = vector.broadcast %466 : vector<8x1xf32> to vector<8x8xf32>
    %468 = arith.mulf %463, %467 : vector<8x8xf32>
    %469 = vector.extract_strided_slice %453 {offsets = [0, 0], sizes = [8, 8], strides = [1, 1]} : vector<8x16xf32> to vector<8x8xf32>
    %cst_226 = arith.constant dense<0.000000e+00> : vector<8x8xf32>
    %470 = tpu.matmul %468, %469, %cst_226 {dimension_numbers = #tpu.dot_dimension_numbers<[1], [0], [0], [1], [0, 0, 1, 1], [], []>} : vector<8x8xf32>, vector<8x8xf32>, vector<8x8xf32> -> vector<8x8xf32>
    %471 = vector.extract_strided_slice %451 {offsets = [0, 8], sizes = [8, 8], strides = [1, 1]} : vector<8x16xf32> to vector<8x8xf32>
    %472 = vector.extract_strided_slice %452 {offsets = [0, 8], sizes = [8, 8], strides = [1, 1]} : vector<8x16xf32> to vector<8x8xf32>
    %473 = tpu.transpose %472, [1, 0] : vector<8x8xf32> -> vector<8x8xf32>
    %cst_227 = arith.constant dense<0.000000e+00> : vector<8x8xf32>
    %474 = tpu.matmul %471, %473, %cst_227 {dimension_numbers = #tpu.dot_dimension_numbers<[1], [0], [0], [1], [0, 0, 1, 1], [], []>} : vector<8x8xf32>, vector<8x8xf32>, vector<8x8xf32> -> vector<8x8xf32>
    %475 = arith.addf %474, %442 : vector<8x8xf32>
    %cst_228 = arith.constant dense<0xFF800000> : vector<8xf32>
    %476 = vector.multi_reduction <maximumf>, %475, %cst_228 [1] : vector<8x8xf32> to vector<8xf32>
    %477 = vector.shape_cast %476 : vector<8xf32> to vector<8x1xf32>
    %478 = vector.broadcast %477 : vector<8x1xf32> to vector<8x8xf32>
    %479 = arith.subf %475, %478 : vector<8x8xf32>
    %480 = math.exp %479 : vector<8x8xf32>
    %cst_229 = arith.constant dense<0.000000e+00> : vector<8xf32>
    %481 = vector.multi_reduction <add>, %480, %cst_229 [1] : vector<8x8xf32> to vector<8xf32>
    %482 = vector.shape_cast %481 : vector<8xf32> to vector<8x1xf32>
    %483 = tpu.reciprocal %482 {approx = true} : vector<8x1xf32> -> vector<8x1xf32>
    %484 = vector.broadcast %483 : vector<8x1xf32> to vector<8x8xf32>
    %485 = arith.mulf %480, %484 : vector<8x8xf32>
    %486 = vector.extract_strided_slice %453 {offsets = [0, 8], sizes = [8, 8], strides = [1, 1]} : vector<8x16xf32> to vector<8x8xf32>
    %cst_230 = arith.constant dense<0.000000e+00> : vector<8x8xf32>
    %487 = tpu.matmul %485, %486, %cst_230 {dimension_numbers = #tpu.dot_dimension_numbers<[1], [0], [0], [1], [0, 0, 1, 1], [], []>} : vector<8x8xf32>, vector<8x8xf32>, vector<8x8xf32> -> vector<8x8xf32>
    %488 = tpu.concatenate %470, %487 in 1 : vector<8x8xf32>, vector<8x8xf32> -> vector<8x16xf32>
    %c4_231 = arith.constant 4 : index
    %c0_232 = arith.constant 0 : index
    %c0_233 = arith.constant 0 : index
    %489 = vector.load %arg10[%c4_231, %c0_232, %c0_233] : memref<8x16x32xf32, #tpu.memory_space<vmem>>, vector<1x16x32xf32>
    %490 = vector.shape_cast %489 : vector<1x16x32xf32> to vector<16x32xf32>
    %cst_234 = arith.constant dense<0.000000e+00> : vector<8x32xf32>
    %491 = tpu.matmul %488, %490, %cst_234 {dimension_numbers = #tpu.dot_dimension_numbers<[1], [0], [0], [1], [0, 0, 1, 1], [], []>} : vector<8x16xf32>, vector<16x32xf32>, vector<8x32xf32> -> vector<8x32xf32>
    %c4_235 = arith.constant 4 : index
    %c0_236 = arith.constant 0 : index
    %c0_237 = arith.constant 0 : index
    %492 = vector.load %arg11[%c4_235, %c0_236, %c0_237] : memref<8x1x32xf32, #tpu.memory_space<vmem>>, vector<1x1x32xf32>
    %493 = vector.shape_cast %492 : vector<1x1x32xf32> to vector<1x32xf32>
    %494 = vector.broadcast %493 : vector<1x32xf32> to vector<8x32xf32>
    %495 = arith.addf %491, %494 : vector<8x32xf32>
    %496 = arith.addf %441, %495 : vector<8x32xf32>
    %c6 = arith.constant 6 : index
    %c0_238 = arith.constant 0 : index
    %c0_239 = arith.constant 0 : index
    %497 = vector.load %arg16[%c6, %c0_238, %c0_239] : memref<12x1x32xf32, #tpu.memory_space<vmem>>, vector<1x1x32xf32>
    %498 = vector.shape_cast %497 : vector<1x1x32xf32> to vector<1x32xf32>
    %c6_240 = arith.constant 6 : index
    %c0_241 = arith.constant 0 : index
    %c0_242 = arith.constant 0 : index
    %499 = vector.load %arg17[%c6_240, %c0_241, %c0_242] : memref<12x1x32xf32, #tpu.memory_space<vmem>>, vector<1x1x32xf32>
    %500 = vector.shape_cast %499 : vector<1x1x32xf32> to vector<1x32xf32>
    %cst_243 = arith.constant dense<0.000000e+00> : vector<8xf32>
    %501 = vector.multi_reduction <add>, %496, %cst_243 [1] : vector<8x32xf32> to vector<8xf32>
    %502 = vector.shape_cast %501 : vector<8xf32> to vector<8x1xf32>
    %cst_244 = arith.constant 3.200000e+01 : f32
    %503 = vector.broadcast %cst_244 : f32 to vector<8x1xf32>
    %504 = arith.divf %502, %503 : vector<8x1xf32>
    %505 = vector.broadcast %504 : vector<8x1xf32> to vector<8x32xf32>
    %506 = arith.subf %496, %505 : vector<8x32xf32>
    %507 = arith.mulf %506, %506 : vector<8x32xf32>
    %cst_245 = arith.constant dense<0.000000e+00> : vector<8xf32>
    %508 = vector.multi_reduction <add>, %507, %cst_245 [1] : vector<8x32xf32> to vector<8xf32>
    %509 = vector.shape_cast %508 : vector<8xf32> to vector<8x1xf32>
    %cst_246 = arith.constant 3.200000e+01 : f32
    %510 = vector.broadcast %cst_246 : f32 to vector<8x1xf32>
    %511 = arith.divf %509, %510 : vector<8x1xf32>
    %cst_247 = arith.constant 9.99999974E-6 : f32
    %512 = vector.broadcast %cst_247 : f32 to vector<8x1xf32>
    %513 = arith.addf %511, %512 : vector<8x1xf32>
    %514 = math.rsqrt %513 : vector<8x1xf32>
    %515 = vector.broadcast %514 : vector<8x1xf32> to vector<8x32xf32>
    %516 = arith.mulf %506, %515 : vector<8x32xf32>
    %517 = vector.broadcast %498 : vector<1x32xf32> to vector<8x32xf32>
    %518 = arith.mulf %516, %517 : vector<8x32xf32>
    %519 = vector.broadcast %500 : vector<1x32xf32> to vector<8x32xf32>
    %520 = arith.addf %518, %519 : vector<8x32xf32>
    %c5_248 = arith.constant 5 : index
    %c0_249 = arith.constant 0 : index
    %c0_250 = arith.constant 0 : index
    %521 = vector.load %arg8[%c5_248, %c0_249, %c0_250] : memref<8x32x48xf32, #tpu.memory_space<vmem>>, vector<1x32x48xf32>
    %522 = vector.shape_cast %521 : vector<1x32x48xf32> to vector<32x48xf32>
    %c5_251 = arith.constant 5 : index
    %c0_252 = arith.constant 0 : index
    %c0_253 = arith.constant 0 : index
    %523 = vector.load %arg9[%c5_251, %c0_252, %c0_253] : memref<8x1x48xf32, #tpu.memory_space<vmem>>, vector<1x1x48xf32>
    %524 = vector.shape_cast %523 : vector<1x1x48xf32> to vector<1x48xf32>
    %525 = vector.extract_strided_slice %522 {offsets = [0, 0], sizes = [32, 16], strides = [1, 1]} : vector<32x48xf32> to vector<32x16xf32>
    %cst_254 = arith.constant dense<0.000000e+00> : vector<8x16xf32>
    %526 = tpu.matmul %520, %525, %cst_254 {dimension_numbers = #tpu.dot_dimension_numbers<[1], [0], [0], [1], [0, 0, 1, 1], [], []>} : vector<8x32xf32>, vector<32x16xf32>, vector<8x16xf32> -> vector<8x16xf32>
    %527 = vector.extract_strided_slice %524 {offsets = [0, 0], sizes = [1, 16], strides = [1, 1]} : vector<1x48xf32> to vector<1x16xf32>
    %528 = vector.broadcast %527 : vector<1x16xf32> to vector<8x16xf32>
    %529 = arith.addf %526, %528 : vector<8x16xf32>
    %530 = vector.extract_strided_slice %522 {offsets = [0, 16], sizes = [32, 32], strides = [1, 1]} : vector<32x48xf32> to vector<32x32xf32>
    %cst_255 = arith.constant dense<0.000000e+00> : vector<64x32xf32>
    %531 = tpu.matmul %413, %530, %cst_255 {dimension_numbers = #tpu.dot_dimension_numbers<[1], [0], [0], [1], [0, 0, 1, 1], [], []>} : vector<64x32xf32>, vector<32x32xf32>, vector<64x32xf32> -> vector<64x32xf32>
    %532 = vector.extract_strided_slice %524 {offsets = [0, 16], sizes = [1, 32], strides = [1, 1]} : vector<1x48xf32> to vector<1x32xf32>
    %533 = vector.broadcast %532 : vector<1x32xf32> to vector<64x32xf32>
    %534 = arith.addf %531, %533 : vector<64x32xf32>
    %535 = vector.extract_strided_slice %534 {offsets = [0, 0], sizes = [64, 16], strides = [1, 1]} : vector<64x32xf32> to vector<64x16xf32>
    %536 = vector.extract_strided_slice %534 {offsets = [0, 16], sizes = [64, 16], strides = [1, 1]} : vector<64x32xf32> to vector<64x16xf32>
    %537 = vector.extract_strided_slice %529 {offsets = [0, 0], sizes = [8, 8], strides = [1, 1]} : vector<8x16xf32> to vector<8x8xf32>
    %538 = vector.extract_strided_slice %535 {offsets = [0, 0], sizes = [64, 8], strides = [1, 1]} : vector<64x16xf32> to vector<64x8xf32>
    %539 = tpu.transpose %538, [1, 0] : vector<64x8xf32> -> vector<8x64xf32>
    %cst_256 = arith.constant dense<0.000000e+00> : vector<8x64xf32>
    %540 = tpu.matmul %537, %539, %cst_256 {dimension_numbers = #tpu.dot_dimension_numbers<[1], [0], [0], [1], [0, 0, 1, 1], [], []>} : vector<8x8xf32>, vector<8x64xf32>, vector<8x64xf32> -> vector<8x64xf32>
    %541 = arith.addf %540, %443 : vector<8x64xf32>
    %cst_257 = arith.constant dense<0xFF800000> : vector<8xf32>
    %542 = vector.multi_reduction <maximumf>, %541, %cst_257 [1] : vector<8x64xf32> to vector<8xf32>
    %543 = vector.shape_cast %542 : vector<8xf32> to vector<8x1xf32>
    %544 = vector.broadcast %543 : vector<8x1xf32> to vector<8x64xf32>
    %545 = arith.subf %541, %544 : vector<8x64xf32>
    %546 = math.exp %545 : vector<8x64xf32>
    %cst_258 = arith.constant dense<0.000000e+00> : vector<8xf32>
    %547 = vector.multi_reduction <add>, %546, %cst_258 [1] : vector<8x64xf32> to vector<8xf32>
    %548 = vector.shape_cast %547 : vector<8xf32> to vector<8x1xf32>
    %549 = tpu.reciprocal %548 {approx = true} : vector<8x1xf32> -> vector<8x1xf32>
    %550 = vector.broadcast %549 : vector<8x1xf32> to vector<8x64xf32>
    %551 = arith.mulf %546, %550 : vector<8x64xf32>
    %552 = vector.extract_strided_slice %536 {offsets = [0, 0], sizes = [64, 8], strides = [1, 1]} : vector<64x16xf32> to vector<64x8xf32>
    %cst_259 = arith.constant dense<0.000000e+00> : vector<8x8xf32>
    %553 = tpu.matmul %551, %552, %cst_259 {dimension_numbers = #tpu.dot_dimension_numbers<[1], [0], [0], [1], [0, 0, 1, 1], [], []>} : vector<8x64xf32>, vector<64x8xf32>, vector<8x8xf32> -> vector<8x8xf32>
    %554 = vector.extract_strided_slice %529 {offsets = [0, 8], sizes = [8, 8], strides = [1, 1]} : vector<8x16xf32> to vector<8x8xf32>
    %555 = vector.extract_strided_slice %535 {offsets = [0, 8], sizes = [64, 8], strides = [1, 1]} : vector<64x16xf32> to vector<64x8xf32>
    %556 = tpu.transpose %555, [1, 0] : vector<64x8xf32> -> vector<8x64xf32>
    %cst_260 = arith.constant dense<0.000000e+00> : vector<8x64xf32>
    %557 = tpu.matmul %554, %556, %cst_260 {dimension_numbers = #tpu.dot_dimension_numbers<[1], [0], [0], [1], [0, 0, 1, 1], [], []>} : vector<8x8xf32>, vector<8x64xf32>, vector<8x64xf32> -> vector<8x64xf32>
    %558 = arith.addf %557, %443 : vector<8x64xf32>
    %cst_261 = arith.constant dense<0xFF800000> : vector<8xf32>
    %559 = vector.multi_reduction <maximumf>, %558, %cst_261 [1] : vector<8x64xf32> to vector<8xf32>
    %560 = vector.shape_cast %559 : vector<8xf32> to vector<8x1xf32>
    %561 = vector.broadcast %560 : vector<8x1xf32> to vector<8x64xf32>
    %562 = arith.subf %558, %561 : vector<8x64xf32>
    %563 = math.exp %562 : vector<8x64xf32>
    %cst_262 = arith.constant dense<0.000000e+00> : vector<8xf32>
    %564 = vector.multi_reduction <add>, %563, %cst_262 [1] : vector<8x64xf32> to vector<8xf32>
    %565 = vector.shape_cast %564 : vector<8xf32> to vector<8x1xf32>
    %566 = tpu.reciprocal %565 {approx = true} : vector<8x1xf32> -> vector<8x1xf32>
    %567 = vector.broadcast %566 : vector<8x1xf32> to vector<8x64xf32>
    %568 = arith.mulf %563, %567 : vector<8x64xf32>
    %569 = vector.extract_strided_slice %536 {offsets = [0, 8], sizes = [64, 8], strides = [1, 1]} : vector<64x16xf32> to vector<64x8xf32>
    %cst_263 = arith.constant dense<0.000000e+00> : vector<8x8xf32>
    %570 = tpu.matmul %568, %569, %cst_263 {dimension_numbers = #tpu.dot_dimension_numbers<[1], [0], [0], [1], [0, 0, 1, 1], [], []>} : vector<8x64xf32>, vector<64x8xf32>, vector<8x8xf32> -> vector<8x8xf32>
    %571 = tpu.concatenate %553, %570 in 1 : vector<8x8xf32>, vector<8x8xf32> -> vector<8x16xf32>
    %c5_264 = arith.constant 5 : index
    %c0_265 = arith.constant 0 : index
    %c0_266 = arith.constant 0 : index
    %572 = vector.load %arg10[%c5_264, %c0_265, %c0_266] : memref<8x16x32xf32, #tpu.memory_space<vmem>>, vector<1x16x32xf32>
    %573 = vector.shape_cast %572 : vector<1x16x32xf32> to vector<16x32xf32>
    %cst_267 = arith.constant dense<0.000000e+00> : vector<8x32xf32>
    %574 = tpu.matmul %571, %573, %cst_267 {dimension_numbers = #tpu.dot_dimension_numbers<[1], [0], [0], [1], [0, 0, 1, 1], [], []>} : vector<8x16xf32>, vector<16x32xf32>, vector<8x32xf32> -> vector<8x32xf32>
    %c5_268 = arith.constant 5 : index
    %c0_269 = arith.constant 0 : index
    %c0_270 = arith.constant 0 : index
    %575 = vector.load %arg11[%c5_268, %c0_269, %c0_270] : memref<8x1x32xf32, #tpu.memory_space<vmem>>, vector<1x1x32xf32>
    %576 = vector.shape_cast %575 : vector<1x1x32xf32> to vector<1x32xf32>
    %577 = vector.broadcast %576 : vector<1x32xf32> to vector<8x32xf32>
    %578 = arith.addf %574, %577 : vector<8x32xf32>
    %579 = arith.addf %520, %578 : vector<8x32xf32>
    %c7 = arith.constant 7 : index
    %c0_271 = arith.constant 0 : index
    %c0_272 = arith.constant 0 : index
    %580 = vector.load %arg16[%c7, %c0_271, %c0_272] : memref<12x1x32xf32, #tpu.memory_space<vmem>>, vector<1x1x32xf32>
    %581 = vector.shape_cast %580 : vector<1x1x32xf32> to vector<1x32xf32>
    %c7_273 = arith.constant 7 : index
    %c0_274 = arith.constant 0 : index
    %c0_275 = arith.constant 0 : index
    %582 = vector.load %arg17[%c7_273, %c0_274, %c0_275] : memref<12x1x32xf32, #tpu.memory_space<vmem>>, vector<1x1x32xf32>
    %583 = vector.shape_cast %582 : vector<1x1x32xf32> to vector<1x32xf32>
    %cst_276 = arith.constant dense<0.000000e+00> : vector<8xf32>
    %584 = vector.multi_reduction <add>, %579, %cst_276 [1] : vector<8x32xf32> to vector<8xf32>
    %585 = vector.shape_cast %584 : vector<8xf32> to vector<8x1xf32>
    %cst_277 = arith.constant 3.200000e+01 : f32
    %586 = vector.broadcast %cst_277 : f32 to vector<8x1xf32>
    %587 = arith.divf %585, %586 : vector<8x1xf32>
    %588 = vector.broadcast %587 : vector<8x1xf32> to vector<8x32xf32>
    %589 = arith.subf %579, %588 : vector<8x32xf32>
    %590 = arith.mulf %589, %589 : vector<8x32xf32>
    %cst_278 = arith.constant dense<0.000000e+00> : vector<8xf32>
    %591 = vector.multi_reduction <add>, %590, %cst_278 [1] : vector<8x32xf32> to vector<8xf32>
    %592 = vector.shape_cast %591 : vector<8xf32> to vector<8x1xf32>
    %cst_279 = arith.constant 3.200000e+01 : f32
    %593 = vector.broadcast %cst_279 : f32 to vector<8x1xf32>
    %594 = arith.divf %592, %593 : vector<8x1xf32>
    %cst_280 = arith.constant 9.99999974E-6 : f32
    %595 = vector.broadcast %cst_280 : f32 to vector<8x1xf32>
    %596 = arith.addf %594, %595 : vector<8x1xf32>
    %597 = math.rsqrt %596 : vector<8x1xf32>
    %598 = vector.broadcast %597 : vector<8x1xf32> to vector<8x32xf32>
    %599 = arith.mulf %589, %598 : vector<8x32xf32>
    %600 = vector.broadcast %581 : vector<1x32xf32> to vector<8x32xf32>
    %601 = arith.mulf %599, %600 : vector<8x32xf32>
    %602 = vector.broadcast %583 : vector<1x32xf32> to vector<8x32xf32>
    %603 = arith.addf %601, %602 : vector<8x32xf32>
    %c2_281 = arith.constant 2 : index
    %c0_282 = arith.constant 0 : index
    %c0_283 = arith.constant 0 : index
    %604 = vector.load %arg12[%c2_281, %c0_282, %c0_283] : memref<4x32x64xf32, #tpu.memory_space<vmem>>, vector<1x32x64xf32>
    %605 = vector.shape_cast %604 : vector<1x32x64xf32> to vector<32x64xf32>
    %cst_284 = arith.constant dense<0.000000e+00> : vector<8x64xf32>
    %606 = tpu.matmul %603, %605, %cst_284 {dimension_numbers = #tpu.dot_dimension_numbers<[1], [0], [0], [1], [0, 0, 1, 1], [], []>} : vector<8x32xf32>, vector<32x64xf32>, vector<8x64xf32> -> vector<8x64xf32>
    %c2_285 = arith.constant 2 : index
    %c0_286 = arith.constant 0 : index
    %c0_287 = arith.constant 0 : index
    %607 = vector.load %arg13[%c2_285, %c0_286, %c0_287] : memref<4x1x64xf32, #tpu.memory_space<vmem>>, vector<1x1x64xf32>
    %608 = vector.shape_cast %607 : vector<1x1x64xf32> to vector<1x64xf32>
    %609 = vector.broadcast %608 : vector<1x64xf32> to vector<8x64xf32>
    %610 = arith.addf %606, %609 : vector<8x64xf32>
    %cst_288 = arith.constant 0.000000e+00 : f32
    %611 = vector.broadcast %cst_288 : f32 to vector<8x64xf32>
    %612 = arith.cmpf ogt, %610, %611 : vector<8x64xf32>
    %cst_289 = arith.constant 0.000000e+00 : f32
    %613 = vector.broadcast %cst_289 : f32 to vector<8x64xf32>
    %614 = arith.minimumf %610, %613 : vector<8x64xf32>
    %615 = math.exp %614 : vector<8x64xf32>
    %cst_290 = arith.constant 1.000000e+00 : f32
    %616 = vector.broadcast %cst_290 : f32 to vector<8x64xf32>
    %617 = arith.subf %615, %616 : vector<8x64xf32>
    %618 = arith.select %612, %610, %617 : vector<8x64xi1>, vector<8x64xf32>
    %c2_291 = arith.constant 2 : index
    %c0_292 = arith.constant 0 : index
    %c0_293 = arith.constant 0 : index
    %619 = vector.load %arg14[%c2_291, %c0_292, %c0_293] : memref<4x64x32xf32, #tpu.memory_space<vmem>>, vector<1x64x32xf32>
    %620 = vector.shape_cast %619 : vector<1x64x32xf32> to vector<64x32xf32>
    %cst_294 = arith.constant dense<0.000000e+00> : vector<8x32xf32>
    %621 = tpu.matmul %618, %620, %cst_294 {dimension_numbers = #tpu.dot_dimension_numbers<[1], [0], [0], [1], [0, 0, 1, 1], [], []>} : vector<8x64xf32>, vector<64x32xf32>, vector<8x32xf32> -> vector<8x32xf32>
    %c2_295 = arith.constant 2 : index
    %c0_296 = arith.constant 0 : index
    %c0_297 = arith.constant 0 : index
    %622 = vector.load %arg15[%c2_295, %c0_296, %c0_297] : memref<4x1x32xf32, #tpu.memory_space<vmem>>, vector<1x1x32xf32>
    %623 = vector.shape_cast %622 : vector<1x1x32xf32> to vector<1x32xf32>
    %624 = vector.broadcast %623 : vector<1x32xf32> to vector<8x32xf32>
    %625 = arith.addf %621, %624 : vector<8x32xf32>
    %626 = arith.addf %603, %625 : vector<8x32xf32>
    %c8 = arith.constant 8 : index
    %c0_298 = arith.constant 0 : index
    %c0_299 = arith.constant 0 : index
    %627 = vector.load %arg16[%c8, %c0_298, %c0_299] : memref<12x1x32xf32, #tpu.memory_space<vmem>>, vector<1x1x32xf32>
    %628 = vector.shape_cast %627 : vector<1x1x32xf32> to vector<1x32xf32>
    %c8_300 = arith.constant 8 : index
    %c0_301 = arith.constant 0 : index
    %c0_302 = arith.constant 0 : index
    %629 = vector.load %arg17[%c8_300, %c0_301, %c0_302] : memref<12x1x32xf32, #tpu.memory_space<vmem>>, vector<1x1x32xf32>
    %630 = vector.shape_cast %629 : vector<1x1x32xf32> to vector<1x32xf32>
    %cst_303 = arith.constant dense<0.000000e+00> : vector<8xf32>
    %631 = vector.multi_reduction <add>, %626, %cst_303 [1] : vector<8x32xf32> to vector<8xf32>
    %632 = vector.shape_cast %631 : vector<8xf32> to vector<8x1xf32>
    %cst_304 = arith.constant 3.200000e+01 : f32
    %633 = vector.broadcast %cst_304 : f32 to vector<8x1xf32>
    %634 = arith.divf %632, %633 : vector<8x1xf32>
    %635 = vector.broadcast %634 : vector<8x1xf32> to vector<8x32xf32>
    %636 = arith.subf %626, %635 : vector<8x32xf32>
    %637 = arith.mulf %636, %636 : vector<8x32xf32>
    %cst_305 = arith.constant dense<0.000000e+00> : vector<8xf32>
    %638 = vector.multi_reduction <add>, %637, %cst_305 [1] : vector<8x32xf32> to vector<8xf32>
    %639 = vector.shape_cast %638 : vector<8xf32> to vector<8x1xf32>
    %cst_306 = arith.constant 3.200000e+01 : f32
    %640 = vector.broadcast %cst_306 : f32 to vector<8x1xf32>
    %641 = arith.divf %639, %640 : vector<8x1xf32>
    %cst_307 = arith.constant 9.99999974E-6 : f32
    %642 = vector.broadcast %cst_307 : f32 to vector<8x1xf32>
    %643 = arith.addf %641, %642 : vector<8x1xf32>
    %644 = math.rsqrt %643 : vector<8x1xf32>
    %645 = vector.broadcast %644 : vector<8x1xf32> to vector<8x32xf32>
    %646 = arith.mulf %636, %645 : vector<8x32xf32>
    %647 = vector.broadcast %628 : vector<1x32xf32> to vector<8x32xf32>
    %648 = arith.mulf %646, %647 : vector<8x32xf32>
    %649 = vector.broadcast %630 : vector<1x32xf32> to vector<8x32xf32>
    %650 = arith.addf %648, %649 : vector<8x32xf32>
    %c6_308 = arith.constant 6 : index
    %c0_309 = arith.constant 0 : index
    %c0_310 = arith.constant 0 : index
    %651 = vector.load %arg8[%c6_308, %c0_309, %c0_310] : memref<8x32x48xf32, #tpu.memory_space<vmem>>, vector<1x32x48xf32>
    %652 = vector.shape_cast %651 : vector<1x32x48xf32> to vector<32x48xf32>
    %c6_311 = arith.constant 6 : index
    %c0_312 = arith.constant 0 : index
    %c0_313 = arith.constant 0 : index
    %653 = vector.load %arg9[%c6_311, %c0_312, %c0_313] : memref<8x1x48xf32, #tpu.memory_space<vmem>>, vector<1x1x48xf32>
    %654 = vector.shape_cast %653 : vector<1x1x48xf32> to vector<1x48xf32>
    %cst_314 = arith.constant dense<0.000000e+00> : vector<8x48xf32>
    %655 = tpu.matmul %650, %652, %cst_314 {dimension_numbers = #tpu.dot_dimension_numbers<[1], [0], [0], [1], [0, 0, 1, 1], [], []>} : vector<8x32xf32>, vector<32x48xf32>, vector<8x48xf32> -> vector<8x48xf32>
    %656 = vector.broadcast %654 : vector<1x48xf32> to vector<8x48xf32>
    %657 = arith.addf %655, %656 : vector<8x48xf32>
    %658 = vector.extract_strided_slice %657 {offsets = [0, 0], sizes = [8, 16], strides = [1, 1]} : vector<8x48xf32> to vector<8x16xf32>
    %659 = vector.extract_strided_slice %657 {offsets = [0, 16], sizes = [8, 16], strides = [1, 1]} : vector<8x48xf32> to vector<8x16xf32>
    %660 = vector.extract_strided_slice %657 {offsets = [0, 32], sizes = [8, 16], strides = [1, 1]} : vector<8x48xf32> to vector<8x16xf32>
    %661 = vector.extract_strided_slice %658 {offsets = [0, 0], sizes = [8, 8], strides = [1, 1]} : vector<8x16xf32> to vector<8x8xf32>
    %662 = vector.extract_strided_slice %659 {offsets = [0, 0], sizes = [8, 8], strides = [1, 1]} : vector<8x16xf32> to vector<8x8xf32>
    %663 = tpu.transpose %662, [1, 0] : vector<8x8xf32> -> vector<8x8xf32>
    %cst_315 = arith.constant dense<0.000000e+00> : vector<8x8xf32>
    %664 = tpu.matmul %661, %663, %cst_315 {dimension_numbers = #tpu.dot_dimension_numbers<[1], [0], [0], [1], [0, 0, 1, 1], [], []>} : vector<8x8xf32>, vector<8x8xf32>, vector<8x8xf32> -> vector<8x8xf32>
    %665 = arith.addf %664, %442 : vector<8x8xf32>
    %cst_316 = arith.constant dense<0xFF800000> : vector<8xf32>
    %666 = vector.multi_reduction <maximumf>, %665, %cst_316 [1] : vector<8x8xf32> to vector<8xf32>
    %667 = vector.shape_cast %666 : vector<8xf32> to vector<8x1xf32>
    %668 = vector.broadcast %667 : vector<8x1xf32> to vector<8x8xf32>
    %669 = arith.subf %665, %668 : vector<8x8xf32>
    %670 = math.exp %669 : vector<8x8xf32>
    %cst_317 = arith.constant dense<0.000000e+00> : vector<8xf32>
    %671 = vector.multi_reduction <add>, %670, %cst_317 [1] : vector<8x8xf32> to vector<8xf32>
    %672 = vector.shape_cast %671 : vector<8xf32> to vector<8x1xf32>
    %673 = tpu.reciprocal %672 {approx = true} : vector<8x1xf32> -> vector<8x1xf32>
    %674 = vector.broadcast %673 : vector<8x1xf32> to vector<8x8xf32>
    %675 = arith.mulf %670, %674 : vector<8x8xf32>
    %676 = vector.extract_strided_slice %660 {offsets = [0, 0], sizes = [8, 8], strides = [1, 1]} : vector<8x16xf32> to vector<8x8xf32>
    %cst_318 = arith.constant dense<0.000000e+00> : vector<8x8xf32>
    %677 = tpu.matmul %675, %676, %cst_318 {dimension_numbers = #tpu.dot_dimension_numbers<[1], [0], [0], [1], [0, 0, 1, 1], [], []>} : vector<8x8xf32>, vector<8x8xf32>, vector<8x8xf32> -> vector<8x8xf32>
    %678 = vector.extract_strided_slice %658 {offsets = [0, 8], sizes = [8, 8], strides = [1, 1]} : vector<8x16xf32> to vector<8x8xf32>
    %679 = vector.extract_strided_slice %659 {offsets = [0, 8], sizes = [8, 8], strides = [1, 1]} : vector<8x16xf32> to vector<8x8xf32>
    %680 = tpu.transpose %679, [1, 0] : vector<8x8xf32> -> vector<8x8xf32>
    %cst_319 = arith.constant dense<0.000000e+00> : vector<8x8xf32>
    %681 = tpu.matmul %678, %680, %cst_319 {dimension_numbers = #tpu.dot_dimension_numbers<[1], [0], [0], [1], [0, 0, 1, 1], [], []>} : vector<8x8xf32>, vector<8x8xf32>, vector<8x8xf32> -> vector<8x8xf32>
    %682 = arith.addf %681, %442 : vector<8x8xf32>
    %cst_320 = arith.constant dense<0xFF800000> : vector<8xf32>
    %683 = vector.multi_reduction <maximumf>, %682, %cst_320 [1] : vector<8x8xf32> to vector<8xf32>
    %684 = vector.shape_cast %683 : vector<8xf32> to vector<8x1xf32>
    %685 = vector.broadcast %684 : vector<8x1xf32> to vector<8x8xf32>
    %686 = arith.subf %682, %685 : vector<8x8xf32>
    %687 = math.exp %686 : vector<8x8xf32>
    %cst_321 = arith.constant dense<0.000000e+00> : vector<8xf32>
    %688 = vector.multi_reduction <add>, %687, %cst_321 [1] : vector<8x8xf32> to vector<8xf32>
    %689 = vector.shape_cast %688 : vector<8xf32> to vector<8x1xf32>
    %690 = tpu.reciprocal %689 {approx = true} : vector<8x1xf32> -> vector<8x1xf32>
    %691 = vector.broadcast %690 : vector<8x1xf32> to vector<8x8xf32>
    %692 = arith.mulf %687, %691 : vector<8x8xf32>
    %693 = vector.extract_strided_slice %660 {offsets = [0, 8], sizes = [8, 8], strides = [1, 1]} : vector<8x16xf32> to vector<8x8xf32>
    %cst_322 = arith.constant dense<0.000000e+00> : vector<8x8xf32>
    %694 = tpu.matmul %692, %693, %cst_322 {dimension_numbers = #tpu.dot_dimension_numbers<[1], [0], [0], [1], [0, 0, 1, 1], [], []>} : vector<8x8xf32>, vector<8x8xf32>, vector<8x8xf32> -> vector<8x8xf32>
    %695 = tpu.concatenate %677, %694 in 1 : vector<8x8xf32>, vector<8x8xf32> -> vector<8x16xf32>
    %c6_323 = arith.constant 6 : index
    %c0_324 = arith.constant 0 : index
    %c0_325 = arith.constant 0 : index
    %696 = vector.load %arg10[%c6_323, %c0_324, %c0_325] : memref<8x16x32xf32, #tpu.memory_space<vmem>>, vector<1x16x32xf32>
    %697 = vector.shape_cast %696 : vector<1x16x32xf32> to vector<16x32xf32>
    %cst_326 = arith.constant dense<0.000000e+00> : vector<8x32xf32>
    %698 = tpu.matmul %695, %697, %cst_326 {dimension_numbers = #tpu.dot_dimension_numbers<[1], [0], [0], [1], [0, 0, 1, 1], [], []>} : vector<8x16xf32>, vector<16x32xf32>, vector<8x32xf32> -> vector<8x32xf32>
    %c6_327 = arith.constant 6 : index
    %c0_328 = arith.constant 0 : index
    %c0_329 = arith.constant 0 : index
    %699 = vector.load %arg11[%c6_327, %c0_328, %c0_329] : memref<8x1x32xf32, #tpu.memory_space<vmem>>, vector<1x1x32xf32>
    %700 = vector.shape_cast %699 : vector<1x1x32xf32> to vector<1x32xf32>
    %701 = vector.broadcast %700 : vector<1x32xf32> to vector<8x32xf32>
    %702 = arith.addf %698, %701 : vector<8x32xf32>
    %703 = arith.addf %650, %702 : vector<8x32xf32>
    %c9 = arith.constant 9 : index
    %c0_330 = arith.constant 0 : index
    %c0_331 = arith.constant 0 : index
    %704 = vector.load %arg16[%c9, %c0_330, %c0_331] : memref<12x1x32xf32, #tpu.memory_space<vmem>>, vector<1x1x32xf32>
    %705 = vector.shape_cast %704 : vector<1x1x32xf32> to vector<1x32xf32>
    %c9_332 = arith.constant 9 : index
    %c0_333 = arith.constant 0 : index
    %c0_334 = arith.constant 0 : index
    %706 = vector.load %arg17[%c9_332, %c0_333, %c0_334] : memref<12x1x32xf32, #tpu.memory_space<vmem>>, vector<1x1x32xf32>
    %707 = vector.shape_cast %706 : vector<1x1x32xf32> to vector<1x32xf32>
    %cst_335 = arith.constant dense<0.000000e+00> : vector<8xf32>
    %708 = vector.multi_reduction <add>, %703, %cst_335 [1] : vector<8x32xf32> to vector<8xf32>
    %709 = vector.shape_cast %708 : vector<8xf32> to vector<8x1xf32>
    %cst_336 = arith.constant 3.200000e+01 : f32
    %710 = vector.broadcast %cst_336 : f32 to vector<8x1xf32>
    %711 = arith.divf %709, %710 : vector<8x1xf32>
    %712 = vector.broadcast %711 : vector<8x1xf32> to vector<8x32xf32>
    %713 = arith.subf %703, %712 : vector<8x32xf32>
    %714 = arith.mulf %713, %713 : vector<8x32xf32>
    %cst_337 = arith.constant dense<0.000000e+00> : vector<8xf32>
    %715 = vector.multi_reduction <add>, %714, %cst_337 [1] : vector<8x32xf32> to vector<8xf32>
    %716 = vector.shape_cast %715 : vector<8xf32> to vector<8x1xf32>
    %cst_338 = arith.constant 3.200000e+01 : f32
    %717 = vector.broadcast %cst_338 : f32 to vector<8x1xf32>
    %718 = arith.divf %716, %717 : vector<8x1xf32>
    %cst_339 = arith.constant 9.99999974E-6 : f32
    %719 = vector.broadcast %cst_339 : f32 to vector<8x1xf32>
    %720 = arith.addf %718, %719 : vector<8x1xf32>
    %721 = math.rsqrt %720 : vector<8x1xf32>
    %722 = vector.broadcast %721 : vector<8x1xf32> to vector<8x32xf32>
    %723 = arith.mulf %713, %722 : vector<8x32xf32>
    %724 = vector.broadcast %705 : vector<1x32xf32> to vector<8x32xf32>
    %725 = arith.mulf %723, %724 : vector<8x32xf32>
    %726 = vector.broadcast %707 : vector<1x32xf32> to vector<8x32xf32>
    %727 = arith.addf %725, %726 : vector<8x32xf32>
    %c7_340 = arith.constant 7 : index
    %c0_341 = arith.constant 0 : index
    %c0_342 = arith.constant 0 : index
    %728 = vector.load %arg8[%c7_340, %c0_341, %c0_342] : memref<8x32x48xf32, #tpu.memory_space<vmem>>, vector<1x32x48xf32>
    %729 = vector.shape_cast %728 : vector<1x32x48xf32> to vector<32x48xf32>
    %c7_343 = arith.constant 7 : index
    %c0_344 = arith.constant 0 : index
    %c0_345 = arith.constant 0 : index
    %730 = vector.load %arg9[%c7_343, %c0_344, %c0_345] : memref<8x1x48xf32, #tpu.memory_space<vmem>>, vector<1x1x48xf32>
    %731 = vector.shape_cast %730 : vector<1x1x48xf32> to vector<1x48xf32>
    %732 = vector.extract_strided_slice %729 {offsets = [0, 0], sizes = [32, 16], strides = [1, 1]} : vector<32x48xf32> to vector<32x16xf32>
    %cst_346 = arith.constant dense<0.000000e+00> : vector<8x16xf32>
    %733 = tpu.matmul %727, %732, %cst_346 {dimension_numbers = #tpu.dot_dimension_numbers<[1], [0], [0], [1], [0, 0, 1, 1], [], []>} : vector<8x32xf32>, vector<32x16xf32>, vector<8x16xf32> -> vector<8x16xf32>
    %734 = vector.extract_strided_slice %731 {offsets = [0, 0], sizes = [1, 16], strides = [1, 1]} : vector<1x48xf32> to vector<1x16xf32>
    %735 = vector.broadcast %734 : vector<1x16xf32> to vector<8x16xf32>
    %736 = arith.addf %733, %735 : vector<8x16xf32>
    %737 = vector.extract_strided_slice %729 {offsets = [0, 16], sizes = [32, 32], strides = [1, 1]} : vector<32x48xf32> to vector<32x32xf32>
    %cst_347 = arith.constant dense<0.000000e+00> : vector<64x32xf32>
    %738 = tpu.matmul %413, %737, %cst_347 {dimension_numbers = #tpu.dot_dimension_numbers<[1], [0], [0], [1], [0, 0, 1, 1], [], []>} : vector<64x32xf32>, vector<32x32xf32>, vector<64x32xf32> -> vector<64x32xf32>
    %739 = vector.extract_strided_slice %731 {offsets = [0, 16], sizes = [1, 32], strides = [1, 1]} : vector<1x48xf32> to vector<1x32xf32>
    %740 = vector.broadcast %739 : vector<1x32xf32> to vector<64x32xf32>
    %741 = arith.addf %738, %740 : vector<64x32xf32>
    %742 = vector.extract_strided_slice %741 {offsets = [0, 0], sizes = [64, 16], strides = [1, 1]} : vector<64x32xf32> to vector<64x16xf32>
    %743 = vector.extract_strided_slice %741 {offsets = [0, 16], sizes = [64, 16], strides = [1, 1]} : vector<64x32xf32> to vector<64x16xf32>
    %744 = vector.extract_strided_slice %736 {offsets = [0, 0], sizes = [8, 8], strides = [1, 1]} : vector<8x16xf32> to vector<8x8xf32>
    %745 = vector.extract_strided_slice %742 {offsets = [0, 0], sizes = [64, 8], strides = [1, 1]} : vector<64x16xf32> to vector<64x8xf32>
    %746 = tpu.transpose %745, [1, 0] : vector<64x8xf32> -> vector<8x64xf32>
    %cst_348 = arith.constant dense<0.000000e+00> : vector<8x64xf32>
    %747 = tpu.matmul %744, %746, %cst_348 {dimension_numbers = #tpu.dot_dimension_numbers<[1], [0], [0], [1], [0, 0, 1, 1], [], []>} : vector<8x8xf32>, vector<8x64xf32>, vector<8x64xf32> -> vector<8x64xf32>
    %748 = arith.addf %747, %443 : vector<8x64xf32>
    %cst_349 = arith.constant dense<0xFF800000> : vector<8xf32>
    %749 = vector.multi_reduction <maximumf>, %748, %cst_349 [1] : vector<8x64xf32> to vector<8xf32>
    %750 = vector.shape_cast %749 : vector<8xf32> to vector<8x1xf32>
    %751 = vector.broadcast %750 : vector<8x1xf32> to vector<8x64xf32>
    %752 = arith.subf %748, %751 : vector<8x64xf32>
    %753 = math.exp %752 : vector<8x64xf32>
    %cst_350 = arith.constant dense<0.000000e+00> : vector<8xf32>
    %754 = vector.multi_reduction <add>, %753, %cst_350 [1] : vector<8x64xf32> to vector<8xf32>
    %755 = vector.shape_cast %754 : vector<8xf32> to vector<8x1xf32>
    %756 = tpu.reciprocal %755 {approx = true} : vector<8x1xf32> -> vector<8x1xf32>
    %757 = vector.broadcast %756 : vector<8x1xf32> to vector<8x64xf32>
    %758 = arith.mulf %753, %757 : vector<8x64xf32>
    %759 = vector.extract_strided_slice %743 {offsets = [0, 0], sizes = [64, 8], strides = [1, 1]} : vector<64x16xf32> to vector<64x8xf32>
    %cst_351 = arith.constant dense<0.000000e+00> : vector<8x8xf32>
    %760 = tpu.matmul %758, %759, %cst_351 {dimension_numbers = #tpu.dot_dimension_numbers<[1], [0], [0], [1], [0, 0, 1, 1], [], []>} : vector<8x64xf32>, vector<64x8xf32>, vector<8x8xf32> -> vector<8x8xf32>
    %761 = vector.extract_strided_slice %736 {offsets = [0, 8], sizes = [8, 8], strides = [1, 1]} : vector<8x16xf32> to vector<8x8xf32>
    %762 = vector.extract_strided_slice %742 {offsets = [0, 8], sizes = [64, 8], strides = [1, 1]} : vector<64x16xf32> to vector<64x8xf32>
    %763 = tpu.transpose %762, [1, 0] : vector<64x8xf32> -> vector<8x64xf32>
    %cst_352 = arith.constant dense<0.000000e+00> : vector<8x64xf32>
    %764 = tpu.matmul %761, %763, %cst_352 {dimension_numbers = #tpu.dot_dimension_numbers<[1], [0], [0], [1], [0, 0, 1, 1], [], []>} : vector<8x8xf32>, vector<8x64xf32>, vector<8x64xf32> -> vector<8x64xf32>
    %765 = arith.addf %764, %443 : vector<8x64xf32>
    %cst_353 = arith.constant dense<0xFF800000> : vector<8xf32>
    %766 = vector.multi_reduction <maximumf>, %765, %cst_353 [1] : vector<8x64xf32> to vector<8xf32>
    %767 = vector.shape_cast %766 : vector<8xf32> to vector<8x1xf32>
    %768 = vector.broadcast %767 : vector<8x1xf32> to vector<8x64xf32>
    %769 = arith.subf %765, %768 : vector<8x64xf32>
    %770 = math.exp %769 : vector<8x64xf32>
    %cst_354 = arith.constant dense<0.000000e+00> : vector<8xf32>
    %771 = vector.multi_reduction <add>, %770, %cst_354 [1] : vector<8x64xf32> to vector<8xf32>
    %772 = vector.shape_cast %771 : vector<8xf32> to vector<8x1xf32>
    %773 = tpu.reciprocal %772 {approx = true} : vector<8x1xf32> -> vector<8x1xf32>
    %774 = vector.broadcast %773 : vector<8x1xf32> to vector<8x64xf32>
    %775 = arith.mulf %770, %774 : vector<8x64xf32>
    %776 = vector.extract_strided_slice %743 {offsets = [0, 8], sizes = [64, 8], strides = [1, 1]} : vector<64x16xf32> to vector<64x8xf32>
    %cst_355 = arith.constant dense<0.000000e+00> : vector<8x8xf32>
    %777 = tpu.matmul %775, %776, %cst_355 {dimension_numbers = #tpu.dot_dimension_numbers<[1], [0], [0], [1], [0, 0, 1, 1], [], []>} : vector<8x64xf32>, vector<64x8xf32>, vector<8x8xf32> -> vector<8x8xf32>
    %778 = tpu.concatenate %760, %777 in 1 : vector<8x8xf32>, vector<8x8xf32> -> vector<8x16xf32>
    %c7_356 = arith.constant 7 : index
    %c0_357 = arith.constant 0 : index
    %c0_358 = arith.constant 0 : index
    %779 = vector.load %arg10[%c7_356, %c0_357, %c0_358] : memref<8x16x32xf32, #tpu.memory_space<vmem>>, vector<1x16x32xf32>
    %780 = vector.shape_cast %779 : vector<1x16x32xf32> to vector<16x32xf32>
    %cst_359 = arith.constant dense<0.000000e+00> : vector<8x32xf32>
    %781 = tpu.matmul %778, %780, %cst_359 {dimension_numbers = #tpu.dot_dimension_numbers<[1], [0], [0], [1], [0, 0, 1, 1], [], []>} : vector<8x16xf32>, vector<16x32xf32>, vector<8x32xf32> -> vector<8x32xf32>
    %c7_360 = arith.constant 7 : index
    %c0_361 = arith.constant 0 : index
    %c0_362 = arith.constant 0 : index
    %782 = vector.load %arg11[%c7_360, %c0_361, %c0_362] : memref<8x1x32xf32, #tpu.memory_space<vmem>>, vector<1x1x32xf32>
    %783 = vector.shape_cast %782 : vector<1x1x32xf32> to vector<1x32xf32>
    %784 = vector.broadcast %783 : vector<1x32xf32> to vector<8x32xf32>
    %785 = arith.addf %781, %784 : vector<8x32xf32>
    %786 = arith.addf %727, %785 : vector<8x32xf32>
    %c10 = arith.constant 10 : index
    %c0_363 = arith.constant 0 : index
    %c0_364 = arith.constant 0 : index
    %787 = vector.load %arg16[%c10, %c0_363, %c0_364] : memref<12x1x32xf32, #tpu.memory_space<vmem>>, vector<1x1x32xf32>
    %788 = vector.shape_cast %787 : vector<1x1x32xf32> to vector<1x32xf32>
    %c10_365 = arith.constant 10 : index
    %c0_366 = arith.constant 0 : index
    %c0_367 = arith.constant 0 : index
    %789 = vector.load %arg17[%c10_365, %c0_366, %c0_367] : memref<12x1x32xf32, #tpu.memory_space<vmem>>, vector<1x1x32xf32>
    %790 = vector.shape_cast %789 : vector<1x1x32xf32> to vector<1x32xf32>
    %cst_368 = arith.constant dense<0.000000e+00> : vector<8xf32>
    %791 = vector.multi_reduction <add>, %786, %cst_368 [1] : vector<8x32xf32> to vector<8xf32>
    %792 = vector.shape_cast %791 : vector<8xf32> to vector<8x1xf32>
    %cst_369 = arith.constant 3.200000e+01 : f32
    %793 = vector.broadcast %cst_369 : f32 to vector<8x1xf32>
    %794 = arith.divf %792, %793 : vector<8x1xf32>
    %795 = vector.broadcast %794 : vector<8x1xf32> to vector<8x32xf32>
    %796 = arith.subf %786, %795 : vector<8x32xf32>
    %797 = arith.mulf %796, %796 : vector<8x32xf32>
    %cst_370 = arith.constant dense<0.000000e+00> : vector<8xf32>
    %798 = vector.multi_reduction <add>, %797, %cst_370 [1] : vector<8x32xf32> to vector<8xf32>
    %799 = vector.shape_cast %798 : vector<8xf32> to vector<8x1xf32>
    %cst_371 = arith.constant 3.200000e+01 : f32
    %800 = vector.broadcast %cst_371 : f32 to vector<8x1xf32>
    %801 = arith.divf %799, %800 : vector<8x1xf32>
    %cst_372 = arith.constant 9.99999974E-6 : f32
    %802 = vector.broadcast %cst_372 : f32 to vector<8x1xf32>
    %803 = arith.addf %801, %802 : vector<8x1xf32>
    %804 = math.rsqrt %803 : vector<8x1xf32>
    %805 = vector.broadcast %804 : vector<8x1xf32> to vector<8x32xf32>
    %806 = arith.mulf %796, %805 : vector<8x32xf32>
    %807 = vector.broadcast %788 : vector<1x32xf32> to vector<8x32xf32>
    %808 = arith.mulf %806, %807 : vector<8x32xf32>
    %809 = vector.broadcast %790 : vector<1x32xf32> to vector<8x32xf32>
    %810 = arith.addf %808, %809 : vector<8x32xf32>
    %c3_373 = arith.constant 3 : index
    %c0_374 = arith.constant 0 : index
    %c0_375 = arith.constant 0 : index
    %811 = vector.load %arg12[%c3_373, %c0_374, %c0_375] : memref<4x32x64xf32, #tpu.memory_space<vmem>>, vector<1x32x64xf32>
    %812 = vector.shape_cast %811 : vector<1x32x64xf32> to vector<32x64xf32>
    %cst_376 = arith.constant dense<0.000000e+00> : vector<8x64xf32>
    %813 = tpu.matmul %810, %812, %cst_376 {dimension_numbers = #tpu.dot_dimension_numbers<[1], [0], [0], [1], [0, 0, 1, 1], [], []>} : vector<8x32xf32>, vector<32x64xf32>, vector<8x64xf32> -> vector<8x64xf32>
    %c3_377 = arith.constant 3 : index
    %c0_378 = arith.constant 0 : index
    %c0_379 = arith.constant 0 : index
    %814 = vector.load %arg13[%c3_377, %c0_378, %c0_379] : memref<4x1x64xf32, #tpu.memory_space<vmem>>, vector<1x1x64xf32>
    %815 = vector.shape_cast %814 : vector<1x1x64xf32> to vector<1x64xf32>
    %816 = vector.broadcast %815 : vector<1x64xf32> to vector<8x64xf32>
    %817 = arith.addf %813, %816 : vector<8x64xf32>
    %cst_380 = arith.constant 0.000000e+00 : f32
    %818 = vector.broadcast %cst_380 : f32 to vector<8x64xf32>
    %819 = arith.cmpf ogt, %817, %818 : vector<8x64xf32>
    %cst_381 = arith.constant 0.000000e+00 : f32
    %820 = vector.broadcast %cst_381 : f32 to vector<8x64xf32>
    %821 = arith.minimumf %817, %820 : vector<8x64xf32>
    %822 = math.exp %821 : vector<8x64xf32>
    %cst_382 = arith.constant 1.000000e+00 : f32
    %823 = vector.broadcast %cst_382 : f32 to vector<8x64xf32>
    %824 = arith.subf %822, %823 : vector<8x64xf32>
    %825 = arith.select %819, %817, %824 : vector<8x64xi1>, vector<8x64xf32>
    %c3_383 = arith.constant 3 : index
    %c0_384 = arith.constant 0 : index
    %c0_385 = arith.constant 0 : index
    %826 = vector.load %arg14[%c3_383, %c0_384, %c0_385] : memref<4x64x32xf32, #tpu.memory_space<vmem>>, vector<1x64x32xf32>
    %827 = vector.shape_cast %826 : vector<1x64x32xf32> to vector<64x32xf32>
    %cst_386 = arith.constant dense<0.000000e+00> : vector<8x32xf32>
    %828 = tpu.matmul %825, %827, %cst_386 {dimension_numbers = #tpu.dot_dimension_numbers<[1], [0], [0], [1], [0, 0, 1, 1], [], []>} : vector<8x64xf32>, vector<64x32xf32>, vector<8x32xf32> -> vector<8x32xf32>
    %c3_387 = arith.constant 3 : index
    %c0_388 = arith.constant 0 : index
    %c0_389 = arith.constant 0 : index
    %829 = vector.load %arg15[%c3_387, %c0_388, %c0_389] : memref<4x1x32xf32, #tpu.memory_space<vmem>>, vector<1x1x32xf32>
    %830 = vector.shape_cast %829 : vector<1x1x32xf32> to vector<1x32xf32>
    %831 = vector.broadcast %830 : vector<1x32xf32> to vector<8x32xf32>
    %832 = arith.addf %828, %831 : vector<8x32xf32>
    %833 = arith.addf %810, %832 : vector<8x32xf32>
    %c11 = arith.constant 11 : index
    %c0_390 = arith.constant 0 : index
    %c0_391 = arith.constant 0 : index
    %834 = vector.load %arg16[%c11, %c0_390, %c0_391] : memref<12x1x32xf32, #tpu.memory_space<vmem>>, vector<1x1x32xf32>
    %835 = vector.shape_cast %834 : vector<1x1x32xf32> to vector<1x32xf32>
    %c11_392 = arith.constant 11 : index
    %c0_393 = arith.constant 0 : index
    %c0_394 = arith.constant 0 : index
    %836 = vector.load %arg17[%c11_392, %c0_393, %c0_394] : memref<12x1x32xf32, #tpu.memory_space<vmem>>, vector<1x1x32xf32>
    %837 = vector.shape_cast %836 : vector<1x1x32xf32> to vector<1x32xf32>
    %cst_395 = arith.constant dense<0.000000e+00> : vector<8xf32>
    %838 = vector.multi_reduction <add>, %833, %cst_395 [1] : vector<8x32xf32> to vector<8xf32>
    %839 = vector.shape_cast %838 : vector<8xf32> to vector<8x1xf32>
    %cst_396 = arith.constant 3.200000e+01 : f32
    %840 = vector.broadcast %cst_396 : f32 to vector<8x1xf32>
    %841 = arith.divf %839, %840 : vector<8x1xf32>
    %842 = vector.broadcast %841 : vector<8x1xf32> to vector<8x32xf32>
    %843 = arith.subf %833, %842 : vector<8x32xf32>
    %844 = arith.mulf %843, %843 : vector<8x32xf32>
    %cst_397 = arith.constant dense<0.000000e+00> : vector<8xf32>
    %845 = vector.multi_reduction <add>, %844, %cst_397 [1] : vector<8x32xf32> to vector<8xf32>
    %846 = vector.shape_cast %845 : vector<8xf32> to vector<8x1xf32>
    %cst_398 = arith.constant 3.200000e+01 : f32
    %847 = vector.broadcast %cst_398 : f32 to vector<8x1xf32>
    %848 = arith.divf %846, %847 : vector<8x1xf32>
    %cst_399 = arith.constant 9.99999974E-6 : f32
    %849 = vector.broadcast %cst_399 : f32 to vector<8x1xf32>
    %850 = arith.addf %848, %849 : vector<8x1xf32>
    %851 = math.rsqrt %850 : vector<8x1xf32>
    %852 = vector.broadcast %851 : vector<8x1xf32> to vector<8x32xf32>
    %853 = arith.mulf %843, %852 : vector<8x32xf32>
    %854 = vector.broadcast %835 : vector<1x32xf32> to vector<8x32xf32>
    %855 = arith.mulf %853, %854 : vector<8x32xf32>
    %856 = vector.broadcast %837 : vector<1x32xf32> to vector<8x32xf32>
    %857 = arith.addf %855, %856 : vector<8x32xf32>
    %858 = tpu.concatenate %857, %857, %857, %857 in 1 : vector<8x32xf32>, vector<8x32xf32>, vector<8x32xf32>, vector<8x32xf32> -> vector<8x128xf32>
    %c0_400 = arith.constant 0 : index
    %c0_401 = arith.constant 0 : index
    %859 = vector.load %arg25[%c0_400, %c0_401] : memref<8x128xf32, #tpu.memory_space<vmem>>, vector<8x128xf32>
    %860 = arith.mulf %858, %859 : vector<8x128xf32>
    %c0_402 = arith.constant 0 : index
    %c0_403 = arith.constant 0 : index
    %861 = vector.load %arg27[%c0_402, %c0_403] : memref<128x4xf32, #tpu.memory_space<vmem>>, vector<128x4xf32>
    %cst_404 = arith.constant dense<0.000000e+00> : vector<8x4xf32>
    %862 = tpu.matmul %860, %861, %cst_404 {dimension_numbers = #tpu.dot_dimension_numbers<[1], [0], [0], [1], [0, 0, 1, 1], [], []>} : vector<8x128xf32>, vector<128x4xf32>, vector<8x4xf32> -> vector<8x4xf32>
    %c0_405 = arith.constant 0 : index
    %c0_406 = arith.constant 0 : index
    %863 = vector.load %arg26[%c0_405, %c0_406] : memref<2x8xf32, #tpu.memory_space<vmem>>, vector<2x8xf32>
    %cst_407 = arith.constant dense<0.000000e+00> : vector<2x4xf32>
    %864 = tpu.matmul %863, %862, %cst_407 {dimension_numbers = #tpu.dot_dimension_numbers<[1], [0], [0], [1], [0, 0, 1, 1], [], []>} : vector<2x8xf32>, vector<8x4xf32>, vector<2x4xf32> -> vector<2x4xf32>
    %c0_408 = arith.constant 0 : index
    %c0_409 = arith.constant 0 : index
    %865 = vector.load %arg28[%c0_408, %c0_409] : memref<1x4xf32, #tpu.memory_space<vmem>>, vector<1x4xf32>
    %866 = vector.broadcast %865 : vector<1x4xf32> to vector<2x4xf32>
    %867 = arith.addf %864, %866 : vector<2x4xf32>
    %cst_410 = arith.constant 0.000000e+00 : f32
    %868 = vector.broadcast %cst_410 : f32 to vector<2x4xf32>
    %869 = arith.cmpf ogt, %867, %868 : vector<2x4xf32>
    %cst_411 = arith.constant 0.000000e+00 : f32
    %870 = vector.broadcast %cst_411 : f32 to vector<2x4xf32>
    %871 = arith.minimumf %867, %870 : vector<2x4xf32>
    %872 = math.exp %871 : vector<2x4xf32>
    %cst_412 = arith.constant 1.000000e+00 : f32
    %873 = vector.broadcast %cst_412 : f32 to vector<2x4xf32>
    %874 = arith.subf %872, %873 : vector<2x4xf32>
    %875 = arith.select %869, %867, %874 : vector<2x4xi1>, vector<2x4xf32>
    %c0_413 = arith.constant 0 : index
    %c0_414 = arith.constant 0 : index
    %876 = vector.load %arg29[%c0_413, %c0_414] : memref<2x4xf32, #tpu.memory_space<vmem>>, vector<2x4xf32>
    tpu.vector_store %arg29[%c0_413, %c0_414], %875 {strides = array<i32>} : memref<2x4xf32, #tpu.memory_space<vmem>>, vector<2x4xf32>,
    return
  }
}

</mosaic_0001>

<bundles_post_ra>
// kernel: forward.1
= control target key start
LH: loop header
LB: loop body
LE: loop exit
PB: predicated region body
PF: predicated region fallthrough
CT: control target
= control target key end

     0   :  { %s8399_s6 = smov 1   ;;  %s8400_s10 = smov 2   ;;  %s11472_s0 = inlined_call_operand.smem [shape: u32[30], index: -1, kind: input, shape index: {}] }
   0x1   :  { %s8459_s5 = sld [smem:[%s11472_s0]]   ;;  %s8401_s14 = smov 3  }
   0x2   :  { %s8464_s9 = sld [smem:[%s11472_s0 + %s8399_s6]]   ;;  %s8402_s18 = smov 4  }
   0x3   :  { %s8469_s13 = sld [smem:[%s11472_s0 + %s8400_s10]]   ;;  %s8403_s22 = smov 5  }
   0x4   :  { %s8474_s17 = sld [smem:[%s11472_s0 + %s8401_s14]]   ;;  %s8404_s26 = smov 6  }
   0x5   :  { %s8479_s21 = sld [smem:[%s11472_s0 + %s8402_s18]]   ;;  %s8405_s30 = smov 7  }
   0x6   :  { %s8484_s25 = sld [smem:[%s11472_s0 + %s8403_s22]]   ;;  %s8406_s4 = smov 8  }
   0x7   :  { %s8489_s29 = sld [smem:[%s11472_s0 + %s8404_s26]]   ;;  %s8407_s10 = smov 9  }
   0x8   :  { %s8494_s3 = sld [smem:[%s11472_s0 + %s8405_s30]]   ;;  %s8408_s15 = smov 10  }
   0x9   :  { %s8499_s8 = sld [smem:[%s11472_s0 + %s8406_s4]]   ;;  %s8409_s20 = smov 11  }
   0xa   :  { %s8504_s14 = sld [smem:[%s11472_s0 + %s8407_s10]]   ;;  %s8410_s26 = smov 12  }
   0xb   :  { %s8509_s19 = sld [smem:[%s11472_s0 + %s8408_s15]]   ;;  %s8411_s1 = smov 13  }
   0xc   :  { %s8514_s24 = sld [smem:[%s11472_s0 + %s8409_s20]]   ;;  %s8412_s7 = smov 14  }
   0xd   :  { %11479 = sst [smem:[#allocation24_spill]] %s8489_s29  ;;  %s8413_s15 = smov 15  }
   0xe   :  { %11480 = sst [smem:[#allocation25_spill]] %s8494_s3  ;;  %s8414_s22 = smov 16  }
   0xf   :  { %s8519_s30 = sld [smem:[%s11472_s0 + %s8410_s26]]   ;;  %s8415_s28 = smov 17  }
  0x10   :  { %s8524_s6 = sld [smem:[%s11472_s0 + %s8411_s1]]  }
  0x11   :  { %11481 = sst [smem:[#allocation26_spill]] %s8509_s19 }
  0x12   :  { %s8529_s12 = sld [smem:[%s11472_s0 + %s8412_s7]]   ;;  %s8416_s7 = smov 18  }
  0x13   :  { %s8534_s20 = sld [smem:[%s11472_s0 + %s8413_s15]]   ;;  %s8417_s15 = smov 19  }
  0x14   :  { %s8539_s27 = sld [smem:[%s11472_s0 + %s8414_s22]]   ;;  %s8418_s22 = smov 20  }
  0x15   :  { %11482 = sst [smem:[#allocation27_spill]] %s8519_s30 }
  0x16   :  { %11483 = sst [smem:[#allocation28_spill]] %s8524_s6 }
  0x17   :  { %s8544_s4 = sld [smem:[%s11472_s0 + %s8415_s28]]   ;;  %s8419_s28 = smov 21  }
  0x18   :  { %11484 = sst [smem:[#allocation29_spill]] %s8529_s12 }
  0x19   :  { %s8549_s3 = sld [smem:[%s11472_s0 + %s8416_s7]]   ;;  %s8420_s7 = smov 22  }
  0x1a   :  { %11485 = sst [smem:[#allocation30_spill]] %s8539_s27 }
  0x1b   :  { %s8554_s29 = sld [smem:[%s11472_s0 + %s8417_s15]]   ;;  %s8421_s15 = smov 23  }
  0x1c   :  { %s8559_s6 = sld [smem:[%s11472_s0 + %s8418_s22]]   ;;  %s8422_s22 = smov 24  }
  0x1d   :  { %11486 = sst [smem:[#allocation31_spill]] %s8544_s4 }
  0x1e   :  { %s8564_s12 = sld [smem:[%s11472_s0 + %s8419_s28]]   ;;  %s8423_s28 = smov 25  }
  0x1f   :  { %s8569_s30 = sld [smem:[%s11472_s0 + %s8420_s7]]   ;;  %s8424_s7 = smov 26  }
  0x20   :  { %s8574_s4 = sld [smem:[%s11472_s0 + %s8421_s15]]   ;;  %s8425_s15 = smov 27  }
  0x22   :  { %11487 = sst [smem:[#allocation32_spill]] %s8559_s6 }
  0x23   :  { %s8579_s6 = sld [smem:[%s11472_s0 + %s8422_s22]]   ;;  %s8426_s22 = smov 28  }
  0x24   :  { %11488 = sst [smem:[#allocation33_spill]] %s8564_s12 }
  0x25   :  { %11489 = sst [smem:[#allocation34_spill]] %s8569_s30 }
  0x26   :  { %11490 = sst [smem:[#allocation35_spill]] %s8574_s4 }
  0x27   :  { %s8584_s12 = sld [smem:[%s11472_s0 + %s8423_s28]]   ;;  %s8427_s28 = smov 29  }
  0x28   :  { %s8589_s30 = sld [smem:[%s11472_s0 + %s8424_s7]]  }
  0x29   :  { %s8594_s4 = sld [smem:[%s11472_s0 + %s8425_s15]]  }
  0x2a   :  { %s8599_s27 = sld [smem:[%s11472_s0 + %s8426_s22]]  }
  0x2b   :  { %s8604_s19 = sld [smem:[%s11472_s0 + %s8427_s28]]  }
  0x2c   :  { %64 = vsyncpa [#allocation3], 0 }
  0x2d   :  { %65 = vsyncpa [#allocation6], 0 }
  0x2e   :  { %66 = vsyncpa [#allocation9], 0 }
  0x2f   :  { %67 = vsyncpa [#allocation12], 0 }
  0x30   :  { %68 = vsyncpa [#allocation15], 0 }
  0x31   :  { %69 = vsyncpa [#allocation4], 0  ;;  %s95_s7 = sshll.u32 %s8484_s25, 4  ;;  %s8428_s10 = smov [#allocation5]   ;;  %s96_s7 = int_to_ptr.hbm [resolvable:$true] %s95_s7 }
  0x32   :  { %s97_s11 = sshll.u32 %s8428_s10, 4  ;;  %s8147_s15 = sshra.s32 %s96_s7, 4  ;;  %s98_s11 = int_to_ptr.vmem [resolvable:$true] %s97_s11  ;;  %s8148_s15 = int_to_ptr.hbm [resolvable:$true] %s8147_s15 }
  0x33   :  { %s8149_s16 = scalar_lea.hbm %s8148_s15, 64  ;;  %s8151_s0 = scalar_lea.hbm %s8484_s25, 64 }
  0x34   :  { %p8150_p0 = scmp.ne.s32.totalorder %s8148_s15, %s8149_s16  ;;  %p8152_p1 = scmp.lt.s32.totalorder %s8148_s15, %s8484_s25 }
  0x35   :  { %p8153_p2 = scmp.lt.s32.totalorder %s8151_s0, %s8149_s16 }
  0x37   :  { %p8154_p3 = por %p8153_p2, %p8152_p1 }
  0x39   :  { %p8155_p4 = pnand %p8154_p3, %p8150_p0 }
  0x3b   :  { %8158 = shalt.err (!%p8155_p4)
}
  0x3c   :  { %s8429_s18 = smov 128   ;;  %s8430_s22 = smov 8  }
  0x3d   :  { %103 = dma.hbm_to_vmem [thread:$0]  %s96_s7, 1024, %s98_s11, [#allocation6], %s8429_s18, %s8429_s18, %s8430_s22  }
  0x3e   :  { %s137_s23 = sshll.u32 %s8534_s20, 4  ;;  %s8431_s26 = smov [#allocation8]   ;;  %s138_s23 = int_to_ptr.hbm [resolvable:$true] %s137_s23 }
  0x3f   :  { %s139_s28 = sshll.u32 %s8431_s26, 4  ;;  %s166_s1 = sshll.u32 %s8554_s29, 4  ;;  %s140_s28 = int_to_ptr.vmem [resolvable:$true] %s139_s28  ;;  %s8614_s1 = int_to_ptr.hbm [resolvable:$true] %s166_s1 }
  0x40   :  { %s8171_s25 = sshra.s32 %s138_s23, 4  ;;  %s8175_s10 = scalar_lea.hbm %s8534_s20, 4  ;;  %s8172_s25 = int_to_ptr.hbm [resolvable:$true] %s8171_s25 }
  0x41   :  { %s8173_s2 = scalar_lea.hbm %s8172_s25, 4  ;;  %p8176_p6 = scmp.lt.s32.totalorder %s8172_s25, %s8534_s20 }
  0x42   :  { %p8174_p5 = scmp.ne.s32.totalorder %s8172_s25, %s8173_s2  ;;  %p8177_p7 = scmp.lt.s32.totalorder %s8175_s10, %s8173_s2 }
  0x44   :  { %p8178_p8 = por %p8177_p7, %p8176_p6 }
  0x46   :  { %p8179_p9 = pnand %p8178_p8, %p8174_p5 }
  0x48   :  { %8182 = shalt.err (!%p8179_p9)
}
  0x49   :  { %s8432_s15 = smov 16   ;;  %s8433_s7 = smov 1  }
  0x4a   :  { %145 = dma.hbm_to_vmem [thread:$0]  %s138_s23, 64, %s140_s28, [#allocation9], %s8432_s15, %s8432_s15, %s8433_s7  }
  0x4b   :  { %s196_s11 = sshll.u32 %s8584_s12, 4  ;;  %s8434_s16 = smov [#allocation11]   ;;  %s197_s11 = int_to_ptr.hbm [resolvable:$true] %s196_s11 }
  0x4c   :  { %s168_s0 = sshll.u32 %s8434_s16, 4  ;;  %s8195_s20 = sshra.s32 %s8614_s1, 4  ;;  %s169_s0 = int_to_ptr.vmem [resolvable:$true] %s168_s0  ;;  %s8196_s20 = int_to_ptr.hbm [resolvable:$true] %s8195_s20 }
  0x4d   :  { %s8197_s26 = scalar_lea.hbm %s8196_s20, 1  ;;  %s8199_s25 = scalar_lea.hbm %s8554_s29, 1 }
  0x4e   :  { %p8198_p10 = scmp.ne.s32.totalorder %s8196_s20, %s8197_s26  ;;  %p8200_p11 = scmp.lt.s32.totalorder %s8196_s20, %s8554_s29 }
  0x4f   :  { %p8201_p12 = scmp.lt.s32.totalorder %s8199_s25, %s8197_s26 }
  0x51   :  { %p8202_p13 = por %p8201_p12, %p8200_p11 }
  0x53   :  { %p8203_p0 = pnand %p8202_p13, %p8198_p10 }
  0x55   :  { %8206 = shalt.err (!%p8203_p0)
}
  0x56   :  { %171 = dma.hbm_to_vmem [thread:$0]  %s8614_s1, 16, %s169_s0, [#allocation12]  }
  0x57   :  { %s8435_s23 = smov [#allocation14]   ;;  %s82_s2 = sshll.u32 %s8479_s21, 4  ;;  %s8627_s2 = int_to_ptr.hbm [resolvable:$true] %s82_s2 }
  0x58   :  { %s198_s28 = sshll.u32 %s8435_s23, 4  ;;  %s8219_s10 = sshra.s32 %s197_s11, 4  ;;  %s199_s28 = int_to_ptr.vmem [resolvable:$true] %s198_s28  ;;  %s8220_s10 = int_to_ptr.hbm [resolvable:$true] %s8219_s10 }
  0x59   :  { %s8221_s16 = scalar_lea.hbm %s8220_s10, 8  ;;  %s8223_s29 = scalar_lea.hbm %s8584_s12, 8 }
  0x5a   :  { %p8222_p1 = scmp.ne.s32.totalorder %s8220_s10, %s8221_s16  ;;  %p8224_p2 = scmp.lt.s32.totalorder %s8220_s10, %s8584_s12 }
  0x5b   :  { %p8225_p3 = scmp.lt.s32.totalorder %s8223_s29, %s8221_s16 }
  0x5d   :  { %p8226_p4 = por %p8225_p3, %p8224_p2 }
  0x5f   :  { %p8227_p5 = pnand %p8226_p4, %p8222_p1 }
  0x61   :  { %8230 = shalt.err (!%p8227_p5)
}
  0x62   :  { %201 = dma.hbm_to_vmem [thread:$0]  %s197_s11, 128, %s199_s28, [#allocation15]  }
  0x63   :  { %s118_s1 = sshll.u32 %s8514_s24, 4  ;;  %s8436_s0 = smov [#allocation2]   ;;  %s8632_s1 = int_to_ptr.hbm [resolvable:$true] %s118_s1 }
  0x64   :  { %s84_s20 = sshll.u32 %s8436_s0, 4  ;;  %s8243_s26 = sshra.s32 %s8627_s2, 4  ;;  %s85_s20 = int_to_ptr.vmem [resolvable:$true] %s84_s20  ;;  %s8244_s26 = int_to_ptr.hbm [resolvable:$true] %s8243_s26 }
  0x65   :  { %s8245_s25 = scalar_lea.hbm %s8244_s26, 64  ;;  %s8247_s12 = scalar_lea.hbm %s8479_s21, 64 }
  0x66   :  { %p8246_p6 = scmp.ne.s32.totalorder %s8244_s26, %s8245_s25  ;;  %p8248_p7 = scmp.lt.s32.totalorder %s8244_s26, %s8479_s21 }
  0x67   :  { %p8249_p8 = scmp.lt.s32.totalorder %s8247_s12, %s8245_s25 }
  0x69   :  { %p8250_p9 = por %p8249_p8, %p8248_p7 }
  0x6b   :  { %p8251_p10 = pnand %p8250_p9, %p8246_p6 }
  0x6d   :  { %8254 = shalt.err (!%p8251_p10)
}
  0x6e   :  { %90 = dma.hbm_to_vmem [thread:$0]  %s8627_s2, 1024, %s85_s20, [#allocation3], %s8429_s18, %s8429_s18, %s8430_s22  }
  0x6f   :  { %s8437_s11 = smov [#allocation7]   ;;  %s155_s28 = sshll.u32 %s8549_s3, 4  ;;  %s156_s28 = int_to_ptr.hbm [resolvable:$true] %s155_s28 }
  0x70   :  { %s120_s23 = sshll.u32 %s8437_s11, 4  ;;  %s8267_s10 = sshra.s32 %s8632_s1, 4  ;;  %s121_s23 = int_to_ptr.vmem [resolvable:$true] %s120_s23  ;;  %s8268_s10 = int_to_ptr.hbm [resolvable:$true] %s8267_s10 }
  0x71   :  { %s8269_s21 = scalar_lea.hbm %s8268_s10, 8  ;;  %s8271_s16 = scalar_lea.hbm %s8514_s24, 8 }
  0x72   :  { %p8270_p11 = scmp.ne.s32.totalorder %s8268_s10, %s8269_s21  ;;  %p8272_p12 = scmp.lt.s32.totalorder %s8268_s10, %s8514_s24 }
  0x73   :  { %p8273_p13 = scmp.lt.s32.totalorder %s8271_s16, %s8269_s21 }
  0x75   :  { %p8274_p0 = por %p8273_p13, %p8272_p12 }
  0x77   :  { %p8275_p1 = pnand %p8274_p0, %p8270_p11 }
  0x79   :  { %8278 = shalt.err (!%p8275_p1)
}
  0x7a   :  { %126 = dma.hbm_to_vmem [thread:$0]  %s8632_s1, 128, %s121_s23, [#allocation6], %s8432_s15, %s8432_s15, %s8433_s7  }
  0x7b   :  { %s185_s18 = sshll.u32 %s8579_s6, 4  ;;  %s8438_s2 = smov [#allocation10]   ;;  %s186_s18 = int_to_ptr.hbm [resolvable:$true] %s185_s18 }
  0x7c   :  { %s157_s29 = sshll.u32 %s8438_s2, 4  ;;  %s8291_s0 = sshra.s32 %s156_s28, 4  ;;  %s158_s29 = int_to_ptr.vmem [resolvable:$true] %s157_s29  ;;  %s8292_s0 = int_to_ptr.hbm [resolvable:$true] %s8291_s0 }
  0x7d   :  { %s8293_s24 = scalar_lea.hbm %s8292_s0, 1  ;;  %s8295_s20 = scalar_lea.hbm %s8549_s3, 1 }
  0x7e   :  { %p8294_p2 = scmp.ne.s32.totalorder %s8292_s0, %s8293_s24  ;;  %p8296_p3 = scmp.lt.s32.totalorder %s8292_s0, %s8549_s3 }
  0x7f   :  { %p8297_p4 = scmp.lt.s32.totalorder %s8295_s20, %s8293_s24 }
  0x81   :  { %p8298_p5 = por %p8297_p4, %p8296_p3 }
  0x83   :  { %p8299_p6 = pnand %p8298_p5, %p8294_p2 }
  0x85   :  { %8302 = shalt.err (!%p8299_p6)
}
  0x86   :  { %160 = dma.hbm_to_vmem [thread:$0]  %s156_s28, 16, %s158_s29, [#allocation9]  }
  0x87   :  { %s8439_s15 = smov [#allocation13]   ;;  %s211_s1 = sshll.u32 %s8599_s27, 4  ;;  %s212_s1 = int_to_ptr.hbm [resolvable:$true] %s211_s1 }
  0x88   :  { %s187_s7 = sshll.u32 %s8439_s15, 4  ;;  %s8315_s26 = sshra.s32 %s186_s18, 4  ;;  %s188_s7 = int_to_ptr.vmem [resolvable:$true] %s187_s7  ;;  %s8316_s26 = int_to_ptr.hbm [resolvable:$true] %s8315_s26 }
  0x89   :  { %s8317_s25 = scalar_lea.hbm %s8316_s26, 8  ;;  %s8319_s12 = scalar_lea.hbm %s8579_s6, 8 }
  0x8a   :  { %p8318_p7 = scmp.ne.s32.totalorder %s8316_s26, %s8317_s25  ;;  %p8320_p8 = scmp.lt.s32.totalorder %s8316_s26, %s8579_s6 }
  0x8b   :  { %p8321_p9 = scmp.lt.s32.totalorder %s8319_s12, %s8317_s25 }
  0x8d   :  { %p8322_p10 = por %p8321_p9, %p8320_p8 }
  0x8f   :  { %p8323_p11 = pnand %p8322_p10, %p8318_p7 }
  0x91   :  { %8326 = shalt.err (!%p8323_p11)
}
  0x92   :  { %190 = dma.hbm_to_vmem [thread:$0]  %s186_s18, 128, %s188_s7, [#allocation12]  }
  0x93   :  { %s8440_s3 = smov [#allocation16]   ;;  %s8339_s23 = sshra.s32 %s212_s1, 4  ;;  %s8340_s23 = int_to_ptr.hbm [resolvable:$true] %s8339_s23 }
  0x94   :  { %s213_s11 = sshll.u32 %s8440_s3, 4  ;;  %s8341_s28 = scalar_lea.hbm %s8340_s23, 1  ;;  %s214_s11 = int_to_ptr.vmem [resolvable:$true] %s213_s11 }
  0x95   :  { %p8342_p12 = scmp.ne.s32.totalorder %s8340_s23, %s8341_s28  ;;  %s8343_s10 = scalar_lea.hbm %s8599_s27, 1 }
  0x96   :  { %p8344_p13 = scmp.lt.s32.totalorder %s8340_s23, %s8599_s27  ;;  %p8345_p0 = scmp.lt.s32.totalorder %s8343_s10, %s8341_s28 }
  0x98   :  { %p8346_p1 = por %p8345_p0, %p8344_p13 }
  0x9a   :  { %p8347_p2 = pnand %p8346_p1, %p8342_p12 }
  0x9c   :  { %8350 = shalt.err (!%p8347_p2)
}
  0x9d   :  { %216 = dma.hbm_to_vmem [thread:$0]  %s212_s1, 16, %s214_s11, [#allocation15]  }
  0x9e   :  { %8387 = dma.done.wait [#allocation3], 1024  }
  0x9f   :  { %8388 = vsyncadd [#allocation3], 4294966272 }
  0xa0   :  { %8389 = dma.done.wait [#allocation6], 1152  }
  0xa1   :  { %8390 = vsyncadd [#allocation6], 4294966144 }
  0xa2   :  { %8391 = dma.done.wait [#allocation9], 80  }
  0xa3   :  { %8392 = vsyncadd [#allocation9], 4294967216 }
  0xa4   :  { %8393 = dma.done.wait [#allocation12], 144  }
  0xa5   :  { %8394 = vsyncadd [#allocation12], 4294967152 }
  0xa6   :  { %8395 = dma.done.wait [#allocation15], 144  }
  0xa7   :  { %8396 = vsyncadd [#allocation15], 4294967152  ;;  %v8441_v0 = vmov 0   ;;  %v255_v1 = vld [vmem:[%s8459_s5 + $0x10] sm:$0xff]  ;;  %v253_v3 = vld [vmem:[%s8459_s5] sm:$0xff]  ;;  %vm365_vm0 = vcmask 261120  }
  0xa8   :  { %7356 = vset.pattern.permute.xlu1 %v8441_v0  ;;  %7355 = vset.pattern.permute.xlu0 %v8441_v0  ;;  %v263_v2 = vld [vmem:[%s8464_s9 + $0x10] sm:$0xff]  ;;  %v261_v5 = vld [vmem:[%s8464_s9] sm:$0xff]  ;;  %v256_v7 = vld [vmem:[%s8459_s5 + $0x18] sm:$0xff]  ;;  %s8445_s6 = smov 88   ;;  %vm455_vm1 = vcmask 64512   ;;  %vm529_vm2 = vcmask 523264  }
  0xa9   :  { %7357 = vset.pattern.permute.xlu2 %v8441_v0  ;;  %v271_v4 = vadd.f32 %v263_v2, %v255_v1  ;;  %v269_v6 = vadd.f32 %v261_v5, %v253_v3  ;;  %v264_v8 = vld [vmem:[%s8464_s9 + $0x18] sm:$0xff]  ;;  %v254_v9 = vld [vmem:[%s8459_s5 + $0x8] sm:$0xff]  ;;  %v257_v10 = vld [vmem:[%s8459_s5 + $0x20] sm:$0xff]  ;;  %s8446_s27 = smov 96   ;;  %s11491_s21 = sld [smem:[#allocation26_spill]]  ;;  %vm1035_vm3 = vcmask 130048  }
  0xaa   :  { %v265_v11 = vld [vmem:[%s8464_s9 + $0x20] sm:$0xff]  ;;  %v262_v12 = vld [vmem:[%s8464_s9 + $0x8] sm:$0xff]  ;;  %v360_v14 = vld [vmem:[%s8499_s8 + $0x18] sm:$0xff]  ;;  %v272_v17 = vadd.f32 %v264_v8, %v256_v7  ;;  %s11492_s16 = sld [smem:[#allocation30_spill]]  ;;  %s6748_s26 = sshll.u32 %s8604_s19, 4  ;;  %s6749_s26 = int_to_ptr.hbm [resolvable:$true] %s6748_s26 }
  0xab   :  { %290 = vperm.xlu1 %7356, %v271_v4   ;;  %280 = vperm.xlu0 %7355, %v269_v6   ;;  %v273_v13 = vadd.f32 %v265_v11, %v257_v10  ;;  %v359_v15 = vld [vmem:[%s8499_s8 + $0x10] sm:$0xff]  ;;  %v258_v16 = vld [vmem:[%s8459_s5 + $0x28] sm:$0xff]  ;;  %v270_v19 = vadd.f32 %v262_v12, %v254_v9  ;;  %v260_v20 = vld [vmem:[%s8459_s5 + $0x38] sm:$0xff]  ;;  %s11493_s18 = sld [smem:[#allocation31_spill]]  ;;  %s8379_s12 = scalar_lea.hbm %s8604_s19, 2 }
  0xac   :  { %402 = vmatpush.msra.mxu0 %v360_v14  ;;  %v266_v18 = vld [vmem:[%s8464_s9 + $0x28] sm:$0xff]  ;;  %v268_v21 = vld [vmem:[%s8464_s9 + $0x38] sm:$0xff]  ;;  %v259_v22 = vld [vmem:[%s8459_s5 + $0x30] sm:$0xff]  ;;  %s11494_s2 = sld [smem:[#allocation27_spill]] }
  0xad   :  { %300 = vperm.xlu2 %7357, %v273_v13   ;;  %v267_v23 = vld [vmem:[%s8464_s9 + $0x30] sm:$0xff]  ;;  %v274_v24 = vadd.f32 %v266_v18, %v258_v16  ;;  %v276_v25 = vadd.f32 %v268_v21, %v260_v20  ;;  %v358_v27 = vld [vmem:[%s8499_s8 + $0x8] sm:$0xff]  ;;  %v357_v28 = vld [vmem:[%s8499_s8] sm:$0xff]  ;;  %s8442_s9 = smov 104   ;;  %s11495_s29 = sld [smem:[#allocation29_spill]] }
  0xae   :  { %403 = vmatpush.msra.mxu0 %v359_v15  ;;  %v275_v26 = vadd.f32 %v267_v23, %v259_v22  ;;  %v7618_v29 = vld [vmem:[%s8469_s13] ss:$0 sm:$0xff]  ;;  %s8443_s13 = smov 120   ;;  %s11496_s0 = sld [smem:[#allocation28_spill]] }
  0xaf   :  { %v7619_v30 = vld [vmem:[%s8474_s17] ss:$0 sm:$0xff]  ;;  %s8444_s17 = smov 112   ;;  %s11497_s24 = sld [smem:[#allocation33_spill]] }
  0xb0   :  { %404 = vmatpush.msra.mxu0 %v358_v27  ;;  %v7620_v60 = vld [vmem:[%s8504_s14] ss:$0 sm:$0xff]  ;;  %s11498_s20 = sld [smem:[#allocation35_spill]] }
  0xb1   :  { %s11512_s15 = sld [smem:[#allocation34_spill]] }
  0xb2   :  { %405 = vmatpush.msra.mxu0 %v357_v28  ;;  %s11513_s7 = sld [smem:[#allocation24_spill]] }
  0xb3   :  { %295 = vperm.xlu1 %7356, %v272_v17   ;;  %285 = vperm.xlu0 %7355, %v270_v19   ;;  %s11514_s1 = sld [smem:[#allocation25_spill]] }
  0xb5   :  { %305 = vperm.xlu2 %7357, %v274_v24  }
  0xbb   :  { %315 = vperm.xlu1 %7356, %v276_v25   ;;  %310 = vperm.xlu0 %7355, %v275_v26  }
 0x107   :  { %v301_v42 = vpop.permute.xlu2 %300 }
 0x108   :  { %v325_v44 = vmul.f32 %v7618_v29, %v301_v42 }
 0x10a   :  { %v8695_v45 = vadd.f32 %v7619_v30, %v325_v44 }
 0x10f   :  { %v306_v46 = vpop.permute.xlu2 %305 }
 0x110   :  { %v326_v47 = vmul.f32 %v7618_v29, %v306_v46 }
 0x112   :  { %v8699_v48 = vadd.f32 %v7619_v30, %v326_v47 }
 0x11d   :  { %v281_v31 = vpop.permute.xlu0 %280  ;;  %v291_v37 = vpop.permute.xlu1 %290 }
 0x11e   :  { %v321_v32 = vmul.f32 %v7618_v29, %v281_v31  ;;  %v323_v38 = vmul.f32 %v7618_v29, %v291_v37 }
 0x120   :  { %v8679_v33 = vadd.f32 %v7619_v30, %v321_v32  ;;  %v8687_v39 = vadd.f32 %v7619_v30, %v323_v38 }
 0x122   :  { %6791 = vmatmul.msk.f32.vlgmr.msra.gmra.mxu0 %vm365_vm0, %v8679_v33 }
 0x125   :  { %v286_v34 = vpop.permute.xlu0 %285  ;;  %v296_v40 = vpop.permute.xlu1 %295 }
 0x126   :  { %v322_v35 = vmul.f32 %v7618_v29, %v286_v34  ;;  %v324_v41 = vmul.f32 %v7618_v29, %v296_v40 }
 0x128   :  { %v8683_v36 = vadd.f32 %v7619_v30, %v322_v35  ;;  %v8691_v43 = vadd.f32 %v7619_v30, %v324_v41 }
 0x12a   :  { %6792 = vmatmul.msk.f32.gmra.mxu0 %vm365_vm0, %v8683_v36 }
 0x12d   :  { %v311_v49 = vpop.permute.xlu0 %310  ;;  %v316_v52 = vpop.permute.xlu1 %315 }
 0x12e   :  { %v327_v50 = vmul.f32 %v7618_v29, %v311_v49  ;;  %v328_v53 = vmul.f32 %v7618_v29, %v316_v52 }
 0x130   :  { %v8703_v51 = vadd.f32 %v7619_v30, %v327_v50  ;;  %v8707_v54 = vadd.f32 %v7619_v30, %v328_v53 }
 0x132   :  { %6793 = vmatmul.msk.f32.gmra.mxu0 %vm365_vm0, %v8687_v39 }
 0x13a   :  { %6794 = vmatmul.msk.f32.gmra.mxu0 %vm365_vm0, %v8691_v43 }
 0x142   :  { %6795 = vmatmul.msk.f32.gmra.mxu0 %vm365_vm0, %v8695_v45 }
 0x14a   :  { %6796 = vmatmul.msk.f32.gmra.mxu0 %vm365_vm0, %v8699_v48 }
 0x152   :  { %6797 = vmatmul.msk.f32.gmra.mxu0 %vm365_vm0, %v8703_v51 }
 0x15a   :  { %6798 = vmatmul.msk.f32.gmra.mxu0 %vm365_vm0, %v8707_v54 }
 0x19f   :  { %v407_v55 = vpop.f32.mrf.mxu0 }
 0x1a0   :  { %v8724_v3 = vadd.f32 %v7620_v60, %v407_v55 }
 0x1a7   :  { %v410_v56 = vpop.f32.mrf.mxu0 }
 0x1a8   :  { %v8744_v7 = vadd.f32 %v7620_v60, %v410_v56  ;;  %v341_v56 = vld [vmem:[#allocation2] sm:$0xff] }
 0x1aa   :  { %v8790_v10 = vpack.i.bf16 %v8724_v3, %v8744_v7 }
 0x1af   :  { %v413_v57 = vpop.f32.mrf.mxu0 }
 0x1b0   :  { %v8716_v0 = vadd.f32 %v7620_v60, %v413_v57 }
 0x1b7   :  { %v416_v58 = vpop.f32.mrf.mxu0 }
 0x1b8   :  { %v8728_v5 = vadd.f32 %v7620_v60, %v416_v58 }
 0x1ba   :  { %v8782_v9 = vpack.i.bf16 %v8716_v0, %v8728_v5 }
 0x1bf   :  { %v419_v59 = vpop.f32.mrf.mxu0 }
 0x1c0   :  { %v8736_v6 = vadd.f32 %v7620_v60, %v419_v59 }
 0x1c7   :  { %v422_v61 = vpop.f32.mrf.mxu0 }
 0x1c8   :  { %v8712_v62 = vadd.f32 %v7620_v60, %v422_v61 }
 0x1ca   :  { %733 = vrot.lane.b32.xlu1 %v8712_v62, %s8442_s9  ;;  %v8772_v8 = vpack.i.bf16 %v8736_v6, %v8712_v62 }
 0x1cf   :  { %v425_v63 = vpop.f32.mrf.mxu0 }
 0x1d0   :  { %v8718_v1 = vadd.f32 %v7620_v60, %v425_v63 }
 0x1d2   :  { %727 = vrot.lane.b32.xlu1 %v8716_v0, %s8442_s9  ;;  %735 = vrot.lane.b32.xlu0 %v8718_v1, %s8442_s9 }
 0x1d7   :  { %v428_v2 = vpop.f32.mrf.mxu0 }
 0x1d8   :  { %v8726_v4 = vadd.f32 %v7620_v60, %v428_v2 }
 0x1da   :  { %707 = vrot.lane.b32.xlu1 %v8724_v3, %s8443_s13  ;;  %737 = vrot.lane.b32.xlu2 %v8726_v4, %s8442_s9  ;;  %v8794_v11 = vpack.i.bf16 %v8718_v1, %v8726_v4 }
 0x1db   :  { %729 = vrot.lane.b32.xlu0 %v8728_v5, %s8442_s9 }
 0x1e2   :  { %731 = vrot.lane.b32.xlu2 %v8736_v6, %s8442_s9  ;;  %451 = vrot.lane.b32.xlu1 %v8718_v1, %s8444_s17 }
 0x1e3   :  { %723 = vrot.lane.b32.xlu0 %v8724_v3, %s8442_s9 }
 0x1ea   :  { %725 = vrot.lane.b32.xlu2 %v8744_v7, %s8442_s9  ;;  %447 = vrot.lane.b32.xlu1 %v8736_v6, %s8444_s17 }
 0x1eb   :  { %709 = vrot.lane.b32.xlu0 %v8744_v7, %s8443_s13 }
 0x1f2   :  { %453 = vrot.lane.b32.xlu2 %v8726_v4, %s8444_s17  ;;  %443 = vrot.lane.b32.xlu1 %v8716_v0, %s8444_s17 }
 0x1f3   :  { %711 = vrot.lane.b32.xlu0 %v8716_v0, %s8443_s13 }
 0x1fa   :  { %449 = vrot.lane.b32.xlu2 %v8712_v62, %s8444_s17  ;;  %439 = vrot.lane.b32.xlu1 %v8724_v3, %s8444_s17 }
 0x1fb   :  { %713 = vrot.lane.b32.xlu0 %v8728_v5, %s8443_s13 }
 0x202   :  { %445 = vrot.lane.b32.xlu2 %v8728_v5, %s8444_s17  ;;  %721 = vrot.lane.b32.xlu1 %v8726_v4, %s8443_s13 }
 0x203   :  { %715 = vrot.lane.b32.xlu0 %v8736_v6, %s8443_s13 }
 0x20a   :  { %441 = vrot.lane.b32.xlu2 %v8744_v7, %s8444_s17  ;;  %7359 = vrot.lane.b32.xlu1 %v8772_v8, %s8445_s6 }
 0x20b   :  { %719 = vrot.lane.b32.xlu0 %v8718_v1, %s8443_s13 }
 0x212   :  { %717 = vrot.lane.b32.xlu2 %v8712_v62, %s8443_s13 }
 0x213   :  { %7364 = vrot.lane.b32.xlu0 %v8782_v9, %s8445_s6 }
 0x21a   :  { %7369 = vrot.lane.b32.xlu2 %v8790_v10, %s8445_s6 }
 0x21b   :  { %7374 = vrot.lane.b32.xlu0 %v8794_v11, %s8445_s6 }
 0x234   :  { %v738_v12 = vpop.permute.xlu2 %737 }
 0x235   :  { %6823 = vmatpush.xpose.msk.msra.mxu3 %vm455_vm1, %v738_v12 }
 0x23c   :  { %v734_v13 = vpop.permute.xlu1 %733  ;;  %v732_v14 = vpop.permute.xlu2 %731 }
 0x244   :  { %v728_v15 = vpop.permute.xlu1 %727  ;;  %v726_v16 = vpop.permute.xlu2 %725 }
 0x245   :  { %v736_v17 = vpop.permute.xlu0 %735 }
 0x246   :  { %6824 = vmatpush.xpose.msk.msra.mxu3 %vm455_vm1, %v736_v17 }
 0x24a   :  { %6825 = vmatpush.xpose.msk.msra.mxu3 %vm455_vm1, %v734_v13 }
 0x24c   :  { %v708_v18 = vpop.permute.xlu1 %707  ;;  %v454_v19 = vpop.permute.xlu2 %453 }
 0x24d   :  { %v730_v20 = vpop.permute.xlu0 %729  ;;  %6799 = vmatpush.xpose.msk.msra.mxu1 %vm455_vm1, %v454_v19 }
 0x24e   :  { %6826 = vmatpush.xpose.msk.msra.mxu3 %vm455_vm1, %v732_v14 }
 0x252   :  { %6827 = vmatpush.xpose.msk.msra.mxu3 %vm455_vm1, %v730_v20 }
 0x254   :  { %v450_v21 = vpop.permute.xlu2 %449  ;;  %v452_v22 = vpop.permute.xlu1 %451 }
 0x255   :  { %v724_v23 = vpop.permute.xlu0 %723  ;;  %6800 = vmatpush.xpose.msk.msra.mxu1 %vm455_vm1, %v452_v22 }
 0x256   :  { %6828 = vmatpush.xpose.msk.msra.mxu3 %vm455_vm1, %v728_v15 }
 0x259   :  { %6801 = vmatpush.xpose.msk.msra.mxu1 %vm455_vm1, %v450_v21 }
 0x25a   :  { %6829 = vmatpush.xpose.msk.msra.mxu3 %vm455_vm1, %v726_v16 }
 0x25c   :  { %v448_v24 = vpop.permute.xlu1 %447  ;;  %v446_v26 = vpop.permute.xlu2 %445 }
 0x25d   :  { %v710_v25 = vpop.permute.xlu0 %709  ;;  %6802 = vmatpush.xpose.msk.msra.mxu1 %vm455_vm1, %v448_v24 }
 0x25e   :  { %6830 = vmatpush.xpose.msk.msra.mxu3 %vm455_vm1, %v724_v23 }
 0x261   :  { %6831 = vmatmul.msk.f32.vlgmr.msra.gmra.mxu3 %vm455_vm1, %v708_v18  ;;  %6803 = vmatpush.xpose.msk.msra.mxu1 %vm455_vm1, %v446_v26  ;;  %v344_v18 = vld [vmem:[#allocation2 + $0x18] sm:$0xff]  ;;  %v346_v26 = vld [vmem:[#allocation2 + $0x28] sm:$0xff] }
 0x264   :  { %v444_v27 = vpop.permute.xlu1 %443  ;;  %v442_v29 = vpop.permute.xlu2 %441 }
 0x265   :  { %v712_v28 = vpop.permute.xlu0 %711  ;;  %6804 = vmatpush.xpose.msk.msra.mxu1 %vm455_vm1, %v444_v27 }
 0x269   :  { %6832 = vmatmul.msk.f32.gmra.mxu3 %vm455_vm1, %v710_v25  ;;  %6805 = vmatpush.xpose.msk.msra.mxu1 %vm455_vm1, %v442_v29  ;;  %v345_v25 = vld [vmem:[#allocation2 + $0x20] sm:$0xff] }
 0x26c   :  { %v440_v30 = vpop.permute.xlu1 %439  ;;  %v718_v38 = vpop.permute.xlu2 %717 }
 0x26d   :  { %v714_v31 = vpop.permute.xlu0 %713  ;;  %6806 = vmatpush.xpose.msk.msra.mxu1 %vm455_vm1, %v440_v30 }
 0x270   :  { %6807 = vmatmul.msk.f32.vlgmr.msra.gmra.mxu1 %vm455_vm1, %v8724_v3 }
 0x271   :  { %6833 = vmatmul.msk.f32.gmra.mxu3 %vm455_vm1, %v712_v28 }
 0x274   :  { %v722_v35 = vpop.permute.xlu1 %721  ;;  %v7370_v50 = vpop.permute.xlu2 %7369 }
 0x275   :  { %v716_v32 = vpop.permute.xlu0 %715  ;;  %v7371_v53 = vunpack.i.l.bf16 %v7370_v50  ;;  %v7372_v55 = vunpack.i.h.bf16 %v7370_v50 }
 0x278   :  { %6808 = vmatmul.msk.f32.gmra.mxu1 %vm455_vm1, %v8744_v7 }
 0x279   :  { %6834 = vmatmul.msk.f32.gmra.mxu3 %vm455_vm1, %v714_v31 }
 0x27c   :  { %v7360_v42 = vpop.permute.xlu1 %7359 }
 0x27d   :  { %v720_v34 = vpop.permute.xlu0 %719  ;;  %v7361_v46 = vunpack.i.l.bf16 %v7360_v42  ;;  %v7362_v47 = vunpack.i.h.bf16 %v7360_v42 }
 0x280   :  { %6809 = vmatmul.msk.f32.gmra.mxu1 %vm455_vm1, %v8716_v0  ;;  %v342_v0 = vld [vmem:[#allocation2 + $0x8] sm:$0xff] }
 0x281   :  { %6835 = vmatmul.msk.f32.gmra.mxu3 %vm455_vm1, %v716_v32 }
 0x285   :  { %v7365_v37 = vpop.permute.xlu0 %7364 }
 0x286   :  { %v7366_v49 = vunpack.i.l.bf16 %v7365_v37  ;;  %v7367_v52 = vunpack.i.h.bf16 %v7365_v37 }
 0x288   :  { %6810 = vmatmul.msk.f32.gmra.mxu1 %vm455_vm1, %v8728_v5 }
 0x289   :  { %6836 = vmatmul.msk.f32.gmra.mxu3 %vm455_vm1, %v718_v38 }
 0x28d   :  { %v7375_v40 = vpop.permute.xlu0 %7374 }
 0x28e   :  { %v7376_v41 = vunpack.i.l.bf16 %v7375_v40  ;;  %v7377_v44 = vunpack.i.h.bf16 %v7375_v40 }
 0x290   :  { %956 = vmatpush.msrb.mxu0 %v7376_v41  ;;  %6811 = vmatmul.msk.f32.gmra.mxu1 %vm455_vm1, %v8736_v6  ;;  %v348_v41 = vld [vmem:[#allocation2 + $0x38] sm:$0xff] }
 0x291   :  { %6837 = vmatmul.msk.f32.gmra.mxu3 %vm455_vm1, %v720_v34  ;;  %v347_v34 = vld [vmem:[#allocation2 + $0x30] sm:$0xff] }
 0x292   :  { %957 = vmatpush.msrb.mxu0 %v7377_v44 }
 0x294   :  { %958 = vmatpush.msrb.mxu0 %v7361_v46 }
 0x296   :  { %959 = vmatpush.msrb.mxu0 %v7362_v47 }
 0x298   :  { %960 = vmatpush.msrb.mxu0 %v7366_v49  ;;  %6812 = vmatmul.msk.f32.gmra.mxu1 %vm455_vm1, %v8712_v62 }
 0x299   :  { %6838 = vmatmul.msk.f32.gmra.mxu3 %vm455_vm1, %v722_v35 }
 0x29a   :  { %961 = vmatpush.msrb.mxu0 %v7367_v52 }
 0x29c   :  { %962 = vmatpush.msrb.mxu0 %v7371_v53 }
 0x29e   :  { %963 = vmatpush.msrb.mxu0 %v7372_v55 }
 0x2a0   :  { %6813 = vmatmul.msk.f32.gmra.mxu1 %vm455_vm1, %v8718_v1  ;;  %v343_v1 = vld [vmem:[#allocation2 + $0x10] sm:$0xff] }
 0x2a8   :  { %6814 = vmatmul.msk.f32.gmra.mxu1 %vm455_vm1, %v8726_v4 }
 0x2e4   :  { %v788_v57 = vpop.f32.mrf.mxu3 }
 0x2e5   :  { %v8840_v58 = vadd.f32 %v788_v57, %v341_v56 }
 0x2e7   :  { %v812_v59 = vsel %vm529_vm2, %v8840_v58, -inf }
 0x2e8   :  { %813 = vmax.xlane.f32.xlu2 %v812_v59 }
 0x2ec   :  { %v791_v60 = vpop.f32.mrf.mxu3 }
 0x2ed   :  { %v505_v61 = vpop.f32.mrf.mxu1  ;;  %v8848_v2 = vadd.f32 %v791_v60, %v342_v0 }
 0x2ee   :  { %v8844_v62 = vadd.f32 %v505_v61, %v341_v56 }
 0x2ef   :  { %v815_v13 = vsel %vm529_vm2, %v8848_v2, -inf }
 0x2f0   :  { %v530_v63 = vsel %vm529_vm2, %v8844_v62, -inf }
 0x2f1   :  { %531 = vmax.xlane.f32.xlu0 %v530_v63 }
 0x2f4   :  { %v794_v3 = vpop.f32.mrf.mxu3 }
 0x2f5   :  { %v8850_v4 = vadd.f32 %v794_v3, %v343_v1  ;;  %v508_v5 = vpop.f32.mrf.mxu1 }
 0x2f6   :  { %v8852_v6 = vadd.f32 %v508_v5, %v342_v0 }
 0x2f7   :  { %v818_v7 = vsel %vm529_vm2, %v8850_v4, -inf }
 0x2f8   :  { %819 = vmax.xlane.f32.xlu1 %v818_v7  ;;  %v533_v12 = vsel %vm529_vm2, %v8852_v6, -inf }
 0x2f9   :  { %534 = vmax.xlane.f32.xlu2 %v533_v12  ;;  %816 = vmax.xlane.f32.xlu0 %v815_v13 }
 0x2fc   :  { %v797_v14 = vpop.f32.mrf.mxu3 }
 0x2fd   :  { %v511_v15 = vpop.f32.mrf.mxu1  ;;  %v8864_v19 = vadd.f32 %v797_v14, %v344_v18 }
 0x2fe   :  { %v8860_v16 = vadd.f32 %v511_v15, %v343_v1 }
 0x2ff   :  { %v821_v24 = vsel %vm529_vm2, %v8864_v19, -inf }
 0x300   :  { %v536_v17 = vsel %vm529_vm2, %v8860_v16, -inf }
 0x301   :  { %537 = vmax.xlane.f32.xlu2 %v536_v17 }
 0x304   :  { %v800_v20 = vpop.f32.mrf.mxu3 }
 0x305   :  { %v514_v21 = vpop.f32.mrf.mxu1  ;;  %v8872_v27 = vadd.f32 %v800_v20, %v345_v25 }
 0x306   :  { %v8866_v22 = vadd.f32 %v514_v21, %v344_v18 }
 0x307   :  { %v824_v32 = vsel %vm529_vm2, %v8872_v27, -inf }
 0x308   :  { %v539_v23 = vsel %vm529_vm2, %v8866_v22, -inf }
 0x309   :  { %540 = vmax.xlane.f32.xlu0 %v539_v23  ;;  %822 = vmax.xlane.f32.xlu2 %v821_v24 }
 0x30c   :  { %v803_v28 = vpop.f32.mrf.mxu3 }
 0x30d   :  { %v8874_v29 = vadd.f32 %v803_v28, %v346_v26  ;;  %v517_v30 = vpop.f32.mrf.mxu1 }
 0x30e   :  { %v8906_v1 = vadd.f32 %v517_v30, %v345_v25 }
 0x30f   :  { %v827_v31 = vsel %vm529_vm2, %v8874_v29, -inf }
 0x310   :  { %828 = vmax.xlane.f32.xlu1 %v827_v31 }
 0x311   :  { %825 = vmax.xlane.f32.xlu2 %v824_v32 }
 0x314   :  { %v806_v35 = vpop.f32.mrf.mxu3 }
 0x315   :  { %v8880_v37 = vadd.f32 %v806_v35, %v347_v34  ;;  %v520_v38 = vpop.f32.mrf.mxu1 }
 0x316   :  { %v8884_v42 = vadd.f32 %v520_v38, %v346_v26 }
 0x317   :  { %v830_v40 = vsel %vm529_vm2, %v8880_v37, -inf }
 0x318   :  { %831 = vmax.xlane.f32.xlu1 %v830_v40  ;;  %v545_v52 = vsel %vm529_vm2, %v8884_v42, -inf }
 0x31c   :  { %v809_v44 = vpop.f32.mrf.mxu3 }
 0x31d   :  { %v8886_v46 = vadd.f32 %v809_v44, %v348_v41  ;;  %v523_v47 = vpop.f32.mrf.mxu1 }
 0x31e   :  { %v8888_v49 = vadd.f32 %v523_v47, %v347_v34 }
 0x31f   :  { %v833_v50 = vsel %vm529_vm2, %v8886_v46, -inf }
 0x320   :  { %834 = vmax.xlane.f32.xlu2 %v833_v50  ;;  %546 = vmax.xlane.f32.xlu1 %v545_v52  ;;  %v548_v53 = vsel %vm529_vm2, %v8888_v49, -inf }
 0x321   :  { %549 = vmax.xlane.f32.xlu0 %v548_v53 }
 0x325   :  { %v526_v18 = vpop.f32.mrf.mxu1 }
 0x326   :  { %v8924_v21 = vadd.f32 %v526_v18, %v348_v41 }
 0x328   :  { %v551_v26 = vsel %vm529_vm2, %v8924_v21, -inf }
 0x335   :  { %7384 = vrot.lane.b32.xlu0 %v8772_v8, %s8446_s27 }
 0x339   :  { %7379 = vrot.lane.b32.xlu1 %v8794_v11, %s8446_s27 }
 0x35b   :  { %v814_v55 = vpop.xlane.xlu2 %813 }
 0x35c   :  { %v836_v56 = vsub.f32 %v8840_v58, %v814_v55 }
 0x35e   :  { %v844_v57 = vmul.f32 1.442695, %v836_v56 }
 0x360   :  { %7671 = vpow2.f32 %v844_v57 }
 0x364   :  { %v532_v59 = vpop.xlane.xlu0 %531 }
 0x365   :  { %v554_v61 = vsub.f32 %v8844_v62, %v532_v59  ;;  %v542_v62 = vsel %vm529_vm2, %v8906_v1, -inf }
 0x366   :  { %v8901_v60 = vpop.eup %7671 }
 0x367   :  { %v860_v63 = vsel %vm529_vm2, %v8901_v60, 0.0  ;;  %v562_v0 = vmul.f32 1.442695, %v554_v61 }
 0x368   :  { %861 = vadd.xlane.f32.xlu2 %v860_v63 }
 0x369   :  { %7673 = vpow2.f32 %v562_v0 }
 0x36b   :  { %v820_v8 = vpop.xlane.xlu1 %819 }
 0x36c   :  { %v838_v11 = vsub.f32 %v8850_v4, %v820_v8  ;;  %v535_v3 = vpop.xlane.xlu2 %534  ;;  %v817_v5 = vpop.xlane.xlu0 %816 }
 0x36d   :  { %v837_v58 = vsub.f32 %v8848_v2, %v817_v5  ;;  %v555_v32 = vsub.f32 %v8852_v6, %v535_v3 }
 0x36e   :  { %v848_v7 = vmul.f32 1.442695, %v838_v11 }
 0x36f   :  { %v846_v12 = vmul.f32 1.442695, %v837_v58  ;;  %v8912_v13 = vpop.eup %7673 }
 0x370   :  { %7675 = vpow2.f32 %v848_v7  ;;  %543 = vmax.xlane.f32.xlu2 %v542_v62  ;;  %v578_v2 = vsel %vm529_vm2, %v8912_v13, 0.0 }
 0x371   :  { %7677 = vpow2.f32 %v846_v12 }
 0x374   :  { %v538_v14 = vpop.xlane.xlu2 %537 }
 0x375   :  { %v556_v40 = vsub.f32 %v8860_v16, %v538_v14 }
 0x376   :  { %v8914_v15 = vpop.eup %7675 }
 0x377   :  { %v866_v4 = vsel %vm529_vm2, %v8914_v15, 0.0  ;;  %v8920_v17 = vpop.eup %7677  ;;  %v566_v44 = vmul.f32 1.442695, %v556_v40 }
 0x378   :  { %867 = vadd.xlane.f32.xlu0 %v866_v4  ;;  %579 = vadd.xlane.f32.xlu2 %v578_v2  ;;  %v863_v20 = vsel %vm529_vm2, %v8920_v17, 0.0 }
 0x379   :  { %864 = vadd.xlane.f32.xlu1 %v863_v20 }
 0x37c   :  { %v823_v23 = vpop.xlane.xlu2 %822  ;;  %v541_v55 = vpop.xlane.xlu0 %540 }
 0x37d   :  { %v839_v24 = vsub.f32 %v8864_v19, %v823_v23  ;;  %v564_v19 = vmul.f32 1.442695, %v555_v32 }
 0x37f   :  { %v850_v25 = vmul.f32 1.442695, %v839_v24 }
 0x380   :  { %552 = vmax.xlane.f32.xlu2 %v551_v26 }
 0x381   :  { %7679 = vpow2.f32 %v850_v25 }
 0x383   :  { %v829_v41 = vpop.xlane.xlu1 %828 }
 0x384   :  { %v826_v28 = vpop.xlane.xlu2 %825  ;;  %v841_v8 = vsub.f32 %v8874_v29, %v829_v41 }
 0x385   :  { %v840_v30 = vsub.f32 %v8872_v27, %v826_v28 }
 0x386   :  { %v854_v58 = vmul.f32 1.442695, %v841_v8 }
 0x387   :  { %v8930_v31 = vpop.eup %7679  ;;  %v852_v34 = vmul.f32 1.442695, %v840_v30 }
 0x388   :  { %v869_v35 = vsel %vm529_vm2, %v8930_v31, 0.0 }
 0x389   :  { %7681 = vpow2.f32 %v852_v34  ;;  %870 = vadd.xlane.f32.xlu0 %v869_v35 }
 0x38a   :  { %7683 = vpow2.f32 %v564_v19 }
 0x38b   :  { %7685 = vpow2.f32 %v566_v44  ;;  %v832_v53 = vpop.xlane.xlu1 %831 }
 0x38c   :  { %v842_v29 = vsub.f32 %v8880_v37, %v832_v53 }
 0x38e   :  { %v856_v18 = vmul.f32 1.442695, %v842_v29 }
 0x38f   :  { %v8935_v38 = vpop.eup %7681 }
 0x390   :  { %v872_v27 = vsel %vm529_vm2, %v8935_v38, 0.0  ;;  %v8942_v47 = vpop.eup %7683 }
 0x391   :  { %873 = vadd.xlane.f32.xlu2 %v872_v27  ;;  %v581_v52 = vsel %vm529_vm2, %v8942_v47, 0.0  ;;  %v8947_v56 = vpop.eup %7685 }
 0x392   :  { %7389 = vrot.lane.b32.xlu1 %v8782_v9, %s8446_s27  ;;  %v557_v9 = vsub.f32 %v8866_v22, %v541_v55  ;;  %v584_v57 = vsel %vm529_vm2, %v8947_v56, 0.0 }
 0x393   :  { %v835_v6 = vpop.xlane.xlu2 %834  ;;  %v547_v59 = vpop.xlane.xlu1 %546 }
 0x394   :  { %v843_v50 = vsub.f32 %v8886_v46, %v835_v6  ;;  %v568_v46 = vmul.f32 1.442695, %v557_v9  ;;  %v550_v63 = vpop.xlane.xlu0 %549  ;;  %v559_v14 = vsub.f32 %v8884_v42, %v547_v59 }
 0x395   :  { %v560_v34 = vsub.f32 %v8888_v49, %v550_v63 }
 0x396   :  { %v858_v16 = vmul.f32 1.442695, %v843_v50  ;;  %v572_v4 = vmul.f32 1.442695, %v559_v14 }
 0x397   :  { %v574_v19 = vmul.f32 1.442695, %v560_v34 }
 0x398   :  { %7687 = vpow2.f32 %v858_v16 }
 0x399   :  { %582 = vadd.xlane.f32.xlu2 %v581_v52  ;;  %7689 = vpow2.f32 %v568_v46 }
 0x39a   :  { %7691 = vpow2.f32 %v854_v58 }
 0x39b   :  { %7693 = vpow2.f32 %v572_v4 }
 0x39c   :  { %7695 = vpow2.f32 %v856_v18 }
 0x39d   :  { %7394 = vrot.lane.b32.xlu0 %v8790_v10, %s8446_s27 }
 0x39e   :  { %v8954_v61 = vpop.eup %7687 }
 0x39f   :  { %v881_v0 = vsel %vm529_vm2, %v8954_v61, 0.0  ;;  %v8959_v22 = vpop.eup %7689 }
 0x3a0   :  { %v587_v7 = vsel %vm529_vm2, %v8959_v22, 0.0  ;;  %v8965_v2 = vpop.eup %7691 }
 0x3a1   :  { %585 = vadd.xlane.f32.xlu2 %v584_v57  ;;  %v875_v20 = vsel %vm529_vm2, %v8965_v2, 0.0  ;;  %v8969_v23 = vpop.eup %7693 }
 0x3a2   :  { %v8971_v24 = vpop.eup %7695  ;;  %v593_v42 = vsel %vm529_vm2, %v8969_v23, 0.0 }
 0x3a3   :  { %v878_v37 = vsel %vm529_vm2, %v8971_v24, 0.0 }
 0x3a7   :  { %v7385_v3 = vpop.permute.xlu0 %7384 }
 0x3a8   :  { %v7386_v12 = vunpack.i.l.bf16 %v7385_v3  ;;  %v7387_v62 = vunpack.i.h.bf16 %v7385_v3 }
 0x3a9   :  { %882 = vadd.xlane.f32.xlu2 %v881_v0 }
 0x3ab   :  { %v7380_v10 = vpop.permute.xlu1 %7379 }
 0x3ac   :  { %v7381_v11 = vunpack.i.l.bf16 %v7380_v10  ;;  %v7382_v5 = vunpack.i.h.bf16 %v7380_v10 }
 0x3ae   :  { %674 = vmatpush.msra.mxu2 %v7381_v11 }
 0x3b0   :  { %675 = vmatpush.msra.mxu2 %v7382_v5 }
 0x3b1   :  { %588 = vadd.xlane.f32.xlu2 %v587_v7 }
 0x3b2   :  { %676 = vmatpush.msra.mxu2 %v7386_v12 }
 0x3b4   :  { %677 = vmatpush.msra.mxu2 %v7387_v62 }
 0x3bc   :  { %876 = vadd.xlane.f32.xlu1 %v875_v20 }
 0x3c4   :  { %594 = vadd.xlane.f32.xlu1 %v593_v42 }
 0x3c7   :  { %879 = vadd.xlane.f32.xlu0 %v878_v37 }
 0x3db   :  { %v862_v25 = vpop.xlane.xlu2 %861 }
 0x3dc   :  { %7697 = vrcp.f32 %v862_v25 }
 0x3e2   :  { %v7698_v26 = vpop.eup %7697 }
 0x3e3   :  { %v544_v28 = vpop.xlane.xlu2 %543  ;;  %v892_v30 = vmul.f32 %v7698_v26, %v8901_v60 }
 0x3e4   :  { %v558_v32 = vsub.f32 %v8906_v1, %v544_v28 }
 0x3e5   :  { %6839 = vmatmul.msk.f32.vlgmr.msrb.gmra.mxu0 %vm529_vm2, %v892_v30 }
 0x3e6   :  { %v570_v35 = vmul.f32 1.442695, %v558_v32 }
 0x3e8   :  { %7699 = vpow2.f32 %v570_v35 }
 0x3e9   :  { %7701 = vpow2.f32 %v574_v19 }
 0x3eb   :  { %v580_v40 = vpop.xlane.xlu2 %579  ;;  %v868_v60 = vpop.xlane.xlu0 %867 }
 0x3ec   :  { %v865_v41 = vpop.xlane.xlu1 %864 }
 0x3ed   :  { %7703 = vrcp.f32 %v865_v41 }
 0x3ee   :  { %v8981_v27 = vpop.eup %7699  ;;  %7705 = vrcp.f32 %v868_v60 }
 0x3ef   :  { %v590_v44 = vsel %vm529_vm2, %v8981_v27, 0.0  ;;  %v8985_v6 = vpop.eup %7701 }
 0x3f0   :  { %591 = vadd.xlane.f32.xlu2 %v590_v44  ;;  %v596_v16 = vsel %vm529_vm2, %v8985_v6, 0.0 }
 0x3f3   :  { %v553_v1 = vpop.xlane.xlu2 %552  ;;  %v7704_v49 = vpop.eup %7703 }
 0x3f4   :  { %v561_v50 = vsub.f32 %v8924_v21, %v553_v1  ;;  %v893_v52 = vmul.f32 %v7704_v49, %v8920_v17  ;;  %v7706_v55 = vpop.eup %7705 }
 0x3f5   :  { %v894_v57 = vmul.f32 %v7706_v55, %v8914_v15 }
 0x3f6   :  { %v576_v53 = vmul.f32 1.442695, %v561_v50  ;;  %6840 = vmatmul.msk.f32.gmra.mxu0 %vm529_vm2, %v893_v52 }
 0x3f8   :  { %7707 = vpow2.f32 %v576_v53  ;;  %597 = vadd.xlane.f32.xlu2 %v596_v16  ;;  %v1030_v53 = vld [vmem:[%s11491_s21 + $0x8] sm:$0xff]  ;;  %v1029_v16 = vld [vmem:[%s11491_s21] sm:$0xff] }
 0x3fc   :  { %v871_v9 = vpop.xlane.xlu0 %870 }
 0x3fd   :  { %7709 = vrcp.f32 %v871_v9 }
 0x3fe   :  { %v8993_v46 = vpop.eup %7707  ;;  %6841 = vmatmul.msk.f32.gmra.mxu0 %vm529_vm2, %v894_v57 }
 0x3ff   :  { %v599_v17 = vsel %vm529_vm2, %v8993_v46, 0.0 }
 0x400   :  { %600 = vadd.xlane.f32.xlu0 %v599_v17 }
 0x403   :  { %v7710_v21 = vpop.eup %7709 }
 0x404   :  { %v874_v59 = vpop.xlane.xlu2 %873  ;;  %v895_v63 = vmul.f32 %v7710_v21, %v8930_v31  ;;  %v7390_v0 = vpop.permute.xlu1 %7389 }
 0x405   :  { %7711 = vrcp.f32 %v874_v59  ;;  %v7391_v8 = vunpack.i.l.bf16 %v7390_v0  ;;  %v7392_v10 = vunpack.i.h.bf16 %v7390_v0 }
 0x406   :  { %6842 = vmatmul.msk.f32.gmra.mxu0 %vm529_vm2, %v895_v63  ;;  %7713 = vrcp.f32 %v580_v40 }
 0x407   :  { %678 = vmatpush.msra.mxu2 %v7391_v8 }
 0x409   :  { %679 = vmatpush.msra.mxu2 %v7392_v10 }
 0x40b   :  { %v7712_v15 = vpop.eup %7711 }
 0x40c   :  { %v583_v11 = vpop.xlane.xlu2 %582  ;;  %v896_v3 = vmul.f32 %v7712_v15, %v8935_v38  ;;  %v7714_v58 = vpop.eup %7713 }
 0x40d   :  { %7715 = vrcp.f32 %v583_v11  ;;  %v610_v12 = vmul.f32 %v7714_v58, %v8912_v13 }
 0x40e   :  { %6843 = vmatmul.msk.f32.gmra.mxu0 %vm529_vm2, %v896_v3 }
 0x40f   :  { %v7395_v5 = vpop.permute.xlu0 %7394 }
 0x410   :  { %v7396_v7 = vunpack.i.l.bf16 %v7395_v5  ;;  %v7397_v31 = vunpack.i.h.bf16 %v7395_v5 }
 0x412   :  { %680 = vmatpush.msra.mxu2 %v7396_v7 }
 0x413   :  { %v7716_v14 = vpop.eup %7715 }
 0x414   :  { %v586_v62 = vpop.xlane.xlu2 %585  ;;  %681 = vmatpush.msra.mxu2 %v7397_v31  ;;  %v611_v29 = vmul.f32 %v7716_v14, %v8942_v47 }
 0x415   :  { %6815 = vmatmul.msk.f32.vlgmr.msra.gmra.mxu2 %vm529_vm2, %v610_v12  ;;  %7717 = vrcp.f32 %v586_v62 }
 0x416   :  { %1074 = vmatpush.msrb.mxu2 %v1030_v53 }
 0x418   :  { %1075 = vmatpush.msrb.mxu2 %v1029_v16 }
 0x41b   :  { %v7718_v38 = vpop.eup %7717 }
 0x41c   :  { %v883_v4 = vpop.xlane.xlu2 %882  ;;  %v612_v18 = vmul.f32 %v7718_v38, %v8947_v56 }
 0x41d   :  { %6816 = vmatmul.msk.f32.gmra.mxu2 %vm529_vm2, %v611_v29 }
 0x424   :  { %v589_v20 = vpop.xlane.xlu2 %588 }
 0x425   :  { %7719 = vrcp.f32 %v589_v20  ;;  %6817 = vmatmul.msk.f32.gmra.mxu2 %vm529_vm2, %v612_v18 }
 0x42b   :  { %v7720_v42 = vpop.eup %7719 }
 0x42c   :  { %v613_v13 = vmul.f32 %v7720_v42, %v8959_v22  ;;  %v7621_v42 = vld [vmem:[#allocation7] ss:$0 sm:$0xff] }
 0x42e   :  { %6818 = vmatmul.msk.f32.gmra.mxu2 %vm529_vm2, %v613_v13 }
 0x42f   :  { %v877_v37 = vpop.xlane.xlu1 %876 }
 0x430   :  { %7721 = vrcp.f32 %v877_v37 }
 0x436   :  { %v7722_v25 = vpop.eup %7721 }
 0x437   :  { %v897_v47 = vmul.f32 %v7722_v25, %v8965_v2  ;;  %v595_v2 = vpop.xlane.xlu1 %594 }
 0x439   :  { %6844 = vmatmul.msk.f32.gmra.mxu0 %vm529_vm2, %v897_v47 }
 0x43a   :  { %v880_v26 = vpop.xlane.xlu0 %879 }
 0x43b   :  { %7723 = vrcp.f32 %v880_v26 }
 0x43c   :  { %7725 = vrcp.f32 %v883_v4 }
 0x441   :  { %v7724_v28 = vpop.eup %7723 }
 0x442   :  { %v898_v56 = vmul.f32 %v7724_v28, %v8971_v24  ;;  %v7726_v30 = vpop.eup %7725 }
 0x443   :  { %v899_v22 = vmul.f32 %v7726_v30, %v8954_v61 }
 0x444   :  { %6845 = vmatmul.msk.f32.gmra.mxu0 %vm529_vm2, %v898_v56 }
 0x44c   :  { %6846 = vmatmul.msk.f32.gmra.mxu0 %vm529_vm2, %v899_v22 }
 0x462   :  { %v965_v32 = vpop.f32.mrf.mxu0 }
 0x463   :  { %v592_v34 = vpop.xlane.xlu2 %591  ;;  %997 = vrot.lane.b32.xlu1 %v965_v32, %s8430_s22 }
 0x464   :  { %7727 = vrcp.f32 %v592_v34 }
 0x465   :  { %7729 = vrcp.f32 %v595_v2 }
 0x46a   :  { %v7728_v35 = vpop.eup %7727 }
 0x46b   :  { %v614_v19 = vmul.f32 %v7728_v35, %v8981_v27  ;;  %v598_v24 = vpop.xlane.xlu2 %597  ;;  %v7730_v40 = vpop.eup %7729 }
 0x46c   :  { %7731 = vrcp.f32 %v598_v24  ;;  %v615_v41 = vmul.f32 %v7730_v40, %v8969_v23 }
 0x46d   :  { %6819 = vmatmul.msk.f32.gmra.mxu2 %vm529_vm2, %v614_v19 }
 0x472   :  { %v7732_v60 = vpop.eup %7731 }
 0x473   :  { %v968_v61 = vpop.f32.mrf.mxu0  ;;  %v601_v44 = vpop.xlane.xlu0 %600  ;;  %v616_v1 = vmul.f32 %v7732_v60, %v8985_v6 }
 0x474   :  { %999 = vrot.lane.b32.xlu2 %v968_v61, %s8430_s22  ;;  %7733 = vrcp.f32 %v601_v44 }
 0x475   :  { %6820 = vmatmul.msk.f32.gmra.mxu2 %vm529_vm2, %v615_v41 }
 0x47a   :  { %v7734_v49 = vpop.eup %7733 }
 0x47b   :  { %v971_v27 = vpop.f32.mrf.mxu0  ;;  %v617_v23 = vmul.f32 %v7734_v49, %v8993_v46 }
 0x47c   :  { %1001 = vrot.lane.b32.xlu0 %v971_v27, %s8430_s22  ;;  %v8447_v27 = vmov 32.0  }
 0x47d   :  { %6821 = vmatmul.msk.f32.gmra.mxu2 %vm529_vm2, %v616_v1  ;;  %7735 = vrcp.f32 %v8447_v27 }
 0x483   :  { %v974_v50 = vpop.f32.mrf.mxu0 }
 0x484   :  { %1003 = vrot.lane.b32.xlu1 %v974_v50, %s8430_s22  ;;  %v7736_v50 = vpop.eup %7735 }
 0x485   :  { %6822 = vmatmul.msk.f32.gmra.mxu2 %vm529_vm2, %v617_v23  ;;  %vm1140_vm4 = vweird.f32 %v7736_v50 }
 0x48b   :  { %v977_v52 = vpop.f32.mrf.mxu0 }
 0x48c   :  { %1005 = vrot.lane.b32.xlu0 %v977_v52, %s8430_s22 }
 0x498   :  { %v683_v57 = vpop.f32.mrf.mxu2 }
 0x4a0   :  { %v686_v59 = vpop.f32.mrf.mxu2 }
 0x4a8   :  { %v689_v0 = vpop.f32.mrf.mxu2 }
 0x4b1   :  { %v692_v15 = vpop.f32.mrf.mxu2 }
 0x4b6   :  { %v980_v6 = vpop.f32.mrf.mxu0 }
 0x4b7   :  { %1007 = vrot.lane.b32.xlu2 %v980_v6, %s8430_s22 }
 0x4c1   :  { %v983_v55 = vpop.f32.mrf.mxu0 }
 0x4c2   :  { %1009 = vrot.lane.b32.xlu1 %v983_v55, %s8430_s22 }
 0x4c9   :  { %v986_v9 = vpop.f32.mrf.mxu0 }
 0x4ca   :  { %1011 = vrot.lane.b32.xlu0 %v986_v9, %s8430_s22 }
 0x4ce   :  { %v1000_v21 = vpop.permute.xlu2 %999 }
 0x4cf   :  { %v1022_v63 = vsel %vm455_vm1, %v686_v59, %v1000_v21 }
 0x4d5   :  { %v998_v46 = vpop.permute.xlu1 %997 }
 0x4d6   :  { %v1021_v17 = vsel %vm455_vm1, %v683_v57, %v998_v46 }
 0x4d7   :  { %6847 = vmatmul.msk.f32.vlgmr.msrb.gmra.mxu2 %vm1035_vm3, %v1021_v17 }
 0x4df   :  { %6848 = vmatmul.msk.f32.gmra.mxu2 %vm1035_vm3, %v1022_v63 }
 0x4ee   :  { %v1002_v8 = vpop.permute.xlu0 %1001 }
 0x4ef   :  { %v1023_v10 = vsel %vm455_vm1, %v689_v0, %v1002_v8 }
 0x4f0   :  { %6849 = vmatmul.msk.f32.gmra.mxu2 %vm1035_vm3, %v1023_v10  ;;  %v695_v5 = vpop.f32.mrf.mxu2 }
 0x4f6   :  { %v1004_v11 = vpop.permute.xlu1 %1003 }
 0x4f7   :  { %v1024_v3 = vsel %vm455_vm1, %v692_v15, %v1004_v11 }
 0x4f8   :  { %6850 = vmatmul.msk.f32.gmra.mxu2 %vm1035_vm3, %v1024_v3  ;;  %v698_v31 = vpop.f32.mrf.mxu2 }
 0x4fe   :  { %v1006_v58 = vpop.permute.xlu0 %1005 }
 0x4ff   :  { %v1025_v7 = vsel %vm455_vm1, %v695_v5, %v1006_v58 }
 0x500   :  { %6851 = vmatmul.msk.f32.gmra.mxu2 %vm1035_vm3, %v1025_v7  ;;  %v701_v14 = vpop.f32.mrf.mxu2 }
 0x508   :  { %v704_v38 = vpop.f32.mrf.mxu2 }
 0x511   :  { %v1008_v12 = vpop.permute.xlu2 %1007 }
 0x512   :  { %v1026_v62 = vsel %vm455_vm1, %v698_v31, %v1008_v12 }
 0x513   :  { %6852 = vmatmul.msk.f32.gmra.mxu2 %vm1035_vm3, %v1026_v62 }
 0x534   :  { %v1010_v29 = vpop.permute.xlu1 %1009 }
 0x535   :  { %v1027_v4 = vsel %vm455_vm1, %v701_v14, %v1010_v29 }
 0x536   :  { %6853 = vmatmul.msk.f32.gmra.mxu2 %vm1035_vm3, %v1027_v4 }
 0x53c   :  { %v1012_v18 = vpop.permute.xlu0 %1011 }
 0x53d   :  { %v1028_v20 = vsel %vm455_vm1, %v704_v38, %v1012_v18 }
 0x53e   :  { %6854 = vmatmul.msk.f32.gmra.mxu2 %vm1035_vm3, %v1028_v20 }
 0x55a   :  { %v1077_v13 = vpop.f32.mrf.mxu2 }
 0x55b   :  { %v1078_v37 = vadd.f32 %v7621_v42, %v1077_v13 }
 0x55d   :  { %v1101_v25 = vadd.f32 %v1078_v37, %v8679_v33 }
 0x55f   :  { %v1111_v47 = vsel %vm365_vm0, %v1101_v25, 0.0 }
 0x560   :  { %1112 = vadd.xlane.f32.xlu2 %v1111_v47 }
 0x562   :  { %v1080_v26 = vpop.f32.mrf.mxu2 }
 0x563   :  { %v1081_v28 = vadd.f32 %v7621_v42, %v1080_v26 }
 0x565   :  { %v1102_v56 = vadd.f32 %v1081_v28, %v8683_v36 }
 0x567   :  { %v1114_v30 = vsel %vm365_vm0, %v1102_v56, 0.0 }
 0x568   :  { %1115 = vadd.xlane.f32.xlu1 %v1114_v30 }
 0x573   :  { %v1083_v22 = vpop.f32.mrf.mxu2 }
 0x574   :  { %v1084_v32 = vadd.f32 %v7621_v42, %v1083_v22 }
 0x576   :  { %v1103_v34 = vadd.f32 %v1084_v32, %v8687_v39 }
 0x578   :  { %v1117_v2 = vsel %vm365_vm0, %v1103_v34, 0.0 }
 0x579   :  { %1118 = vadd.xlane.f32.xlu0 %v1117_v2  ;;  %v6857_v2 = vld [vmem:[%s8499_s8 + $0x30] sm:$0xff] }
 0x57b   :  { %v1086_v35 = vpop.f32.mrf.mxu2 }
 0x57c   :  { %v1087_v19 = vadd.f32 %v7621_v42, %v1086_v35  ;;  %v6856_v35 = vld [vmem:[%s8499_s8 + $0x28] sm:$0xff] }
 0x57e   :  { %v1104_v33 = vadd.f32 %v1087_v19, %v8691_v43  ;;  %v6855_v19 = vld [vmem:[%s8499_s8 + $0x20] sm:$0xff] }
 0x580   :  { %v1120_v24 = vsel %vm365_vm0, %v1104_v33, 0.0 }
 0x581   :  { %1121 = vadd.xlane.f32.xlu2 %v1120_v24 }
 0x583   :  { %v1089_v40 = vpop.f32.mrf.mxu2 }
 0x584   :  { %v1090_v41 = vadd.f32 %v7621_v42, %v1089_v40 }
 0x586   :  { %v1105_v36 = vadd.f32 %v1090_v41, %v8695_v45  ;;  %v1136_v45 = vmul.f32 32.0, %v7736_v50 }
 0x588   :  { %v1123_v61 = vsel %vm365_vm0, %v1105_v36, 0.0  ;;  %v1137_v53 = vsub.f32 1.0, %v1136_v45 }
 0x589   :  { %1124 = vadd.xlane.f32.xlu1 %v1123_v61 }
 0x58a   :  { %v1138_v16 = vmul.f32 %v7736_v50, %v1137_v53 }
 0x58c   :  { %v1139_v6 = vadd.f32 %v7736_v50, %v1138_v16 }
 0x58e   :  { %v9064_v55 = vsel %vm1140_vm4, %v7736_v50, %v1139_v6  ;;  %v9123_v6 = vld [vmem:[%s11492_s16] ss:$0 sm:$0xff] }
 0x596   :  { %v1092_v44 = vpop.f32.mrf.mxu2 }
 0x597   :  { %v1093_v60 = vadd.f32 %v7621_v42, %v1092_v44 }
 0x599   :  { %v1106_v39 = vadd.f32 %v1093_v60, %v8699_v48 }
 0x59b   :  { %v1126_v1 = vsel %vm365_vm0, %v1106_v39, 0.0 }
 0x59c   :  { %1127 = vadd.xlane.f32.xlu2 %v1126_v1 }
 0x5b9   :  { %v1095_v43 = vpop.f32.mrf.mxu2 }
 0x5ba   :  { %v1096_v49 = vadd.f32 %v7621_v42, %v1095_v43 }
 0x5bc   :  { %v1107_v23 = vadd.f32 %v1096_v49, %v8703_v51 }
 0x5be   :  { %v1129_v52 = vsel %vm365_vm0, %v1107_v23, 0.0 }
 0x5bf   :  { %1130 = vadd.xlane.f32.xlu1 %v1129_v52 }
 0x5c1   :  { %v1098_v46 = vpop.f32.mrf.mxu2 }
 0x5c2   :  { %v1099_v17 = vadd.f32 %v7621_v42, %v1098_v46 }
 0x5c4   :  { %v1108_v8 = vadd.f32 %v1099_v17, %v8707_v54 }
 0x5c6   :  { %v1132_v11 = vsel %vm365_vm0, %v1108_v8, 0.0 }
 0x5d3   :  { %v1113_v48 = vpop.xlane.xlu2 %1112 }
 0x5d4   :  { %v1142_v9 = vmul.f32 %v9064_v55, %v1113_v48 }
 0x5d6   :  { %v9067_v57 = vsub.f32 %v1101_v25, %v1142_v9 }
 0x5d8   :  { %v1158_v51 = vmul.f32 %v9067_v57, %v9067_v57 }
 0x5da   :  { %v1166_v21 = vsel %vm365_vm0, %v1158_v51, 0.0  ;;  %v9127_v51 = vld [vmem:[%s11493_s18] ss:$0 sm:$0xff] }
 0x5db   :  { %v1116_v59 = vpop.xlane.xlu1 %1115  ;;  %1167 = vadd.xlane.f32.xlu0 %v1166_v21 }
 0x5dc   :  { %v1143_v63 = vmul.f32 %v9064_v55, %v1116_v59 }
 0x5de   :  { %v9073_v0 = vsub.f32 %v1102_v56, %v1143_v63 }
 0x5e0   :  { %v1159_v10 = vmul.f32 %v9073_v0, %v9073_v0 }
 0x5e2   :  { %v1169_v15 = vsel %vm365_vm0, %v1159_v10, 0.0 }
 0x5e3   :  { %1170 = vadd.xlane.f32.xlu2 %v1169_v15  ;;  %1133 = vadd.xlane.f32.xlu0 %v1132_v11 }
 0x5ec   :  { %v1119_v3 = vpop.xlane.xlu0 %1118 }
 0x5ed   :  { %v1144_v5 = vmul.f32 %v9064_v55, %v1119_v3 }
 0x5ef   :  { %v9081_v58 = vsub.f32 %v1103_v34, %v1144_v5  ;;  %v6858_v34 = vld [vmem:[%s8499_s8 + $0x38] sm:$0xff] }
 0x5f0   :  { %1362 = vmatpush.msrb.mxu1 %v6858_v34 }
 0x5f1   :  { %v1160_v7 = vmul.f32 %v9081_v58, %v9081_v58 }
 0x5f2   :  { %1363 = vmatpush.msrb.mxu1 %v6857_v2 }
 0x5f3   :  { %v1172_v31 = vsel %vm365_vm0, %v1160_v7, 0.0 }
 0x5f4   :  { %v1122_v54 = vpop.xlane.xlu2 %1121  ;;  %1173 = vadd.xlane.f32.xlu1 %v1172_v31  ;;  %1364 = vmatpush.msrb.mxu1 %v6856_v35 }
 0x5f5   :  { %v1145_v12 = vmul.f32 %v9064_v55, %v1122_v54 }
 0x5f6   :  { %1365 = vmatpush.msrb.mxu1 %v6855_v19 }
 0x5f7   :  { %v9087_v62 = vsub.f32 %v1104_v33, %v1145_v12 }
 0x5f9   :  { %v1161_v14 = vmul.f32 %v9087_v62, %v9087_v62 }
 0x5fb   :  { %v1175_v29 = vsel %vm365_vm0, %v1161_v14, 0.0 }
 0x5fc   :  { %1176 = vadd.xlane.f32.xlu2 %v1175_v29  ;;  %v1125_v4 = vpop.xlane.xlu1 %1124 }
 0x5fd   :  { %v1146_v38 = vmul.f32 %v9064_v55, %v1125_v4 }
 0x5ff   :  { %v9093_v18 = vsub.f32 %v1105_v36, %v1146_v38 }
 0x601   :  { %v1162_v20 = vmul.f32 %v9093_v18, %v9093_v18 }
 0x603   :  { %v1178_v42 = vsel %vm365_vm0, %v1162_v20, 0.0 }
 0x604   :  { %1179 = vadd.xlane.f32.xlu0 %v1178_v42 }
 0x60f   :  { %v1128_v13 = vpop.xlane.xlu2 %1127 }
 0x610   :  { %v1147_v37 = vmul.f32 %v9064_v55, %v1128_v13 }
 0x612   :  { %v9099_v25 = vsub.f32 %v1106_v39, %v1147_v37 }
 0x614   :  { %v1163_v47 = vmul.f32 %v9099_v25, %v9099_v25 }
 0x616   :  { %v1181_v26 = vsel %vm365_vm0, %v1163_v47, 0.0 }
 0x617   :  { %1182 = vadd.xlane.f32.xlu1 %v1181_v26 }
 0x632   :  { %v1131_v28 = vpop.xlane.xlu1 %1130 }
 0x633   :  { %v1148_v56 = vmul.f32 %v9064_v55, %v1131_v28 }
 0x635   :  { %v9105_v30 = vsub.f32 %v1107_v23, %v1148_v56 }
 0x637   :  { %v1164_v22 = vmul.f32 %v9105_v30, %v9105_v30 }
 0x639   :  { %v1184_v32 = vsel %vm365_vm0, %v1164_v22, 0.0 }
 0x63a   :  { %1185 = vadd.xlane.f32.xlu2 %v1184_v32 }
 0x64e   :  { %v1168_v33 = vpop.xlane.xlu0 %1167 }
 0x64f   :  { %v1190_v24 = vmul.f32 %v1168_v33, %v9064_v55 }
 0x651   :  { %v1198_v40 = vadd.f32 1e-05, %v1190_v24 }
 0x653   :  { %7737 = vrsqrt.f32 %v1198_v40  ;;  %vm1212_vm6 = vweird.f32 %v1198_v40 }
 0x656   :  { %v1171_v41 = vpop.xlane.xlu2 %1170  ;;  %v1134_v36 = vpop.xlane.xlu0 %1133 }
 0x657   :  { %v1191_v61 = vmul.f32 %v1171_v41, %v9064_v55  ;;  %v1149_v44 = vmul.f32 %v9064_v55, %v1134_v36 }
 0x659   :  { %v7738_v60 = vpop.eup %7737  ;;  %v1199_v39 = vadd.f32 1e-05, %v1191_v61  ;;  %v9117_v1 = vsub.f32 %v1108_v8, %v1149_v44 }
 0x65a   :  { %v1207_v27 = vmul.f32 %v7738_v60, %v1198_v40  ;;  %vm1213_vm5 = vweird.f32 %v7738_v60 }
 0x65b   :  { %7739 = vrsqrt.f32 %v1199_v39  ;;  %v1165_v43 = vmul.f32 %v9117_v1, %v9117_v1  ;;  %vm1214_vm7 = vmor %vm1212_vm6, %vm1213_vm5  ;;  %vm1222_vm9 = vweird.f32 %v1199_v39 }
 0x65c   :  { %v1208_v49 = vmul.f32 %v7738_v60, %v1207_v27 }
 0x65d   :  { %v1187_v23 = vsel %vm365_vm0, %v1165_v43, 0.0 }
 0x65e   :  { %v1209_v50 = vmul.f32 0.5, %v1208_v49  ;;  %1188 = vadd.xlane.f32.xlu0 %v1187_v23 }
 0x660   :  { %v1210_v52 = vsub.f32 1.5, %v1209_v50 }
 0x661   :  { %v7740_v45 = vpop.eup %7739 }
 0x662   :  { %v1211_v53 = vmul.f32 %v7738_v60, %v1210_v52  ;;  %v1217_v16 = vmul.f32 %v7740_v45, %v1199_v39  ;;  %vm1223_vm8 = vweird.f32 %v7740_v45 }
 0x663   :  { %vm1224_vm10 = vmor %vm1222_vm9, %vm1223_vm8 }
 0x664   :  { %v1215_v48 = vsel %vm1214_vm7, %v7738_v60, %v1211_v53  ;;  %v1218_v9 = vmul.f32 %v7740_v45, %v1217_v16 }
 0x665   :  { %v1286_v46 = vmul.f32 %v1215_v48, %v9067_v57 }
 0x666   :  { %v1219_v17 = vmul.f32 0.5, %v1218_v9 }
 0x667   :  { %v1297_v21 = vmul.f32 %v9123_v6, %v1286_v46  ;;  %v1174_v63 = vpop.xlane.xlu1 %1173 }
 0x668   :  { %v1220_v59 = vsub.f32 1.5, %v1219_v17  ;;  %v1192_v8 = vmul.f32 %v1174_v63, %v9064_v55 }
 0x669   :  { %v9132_v10 = vadd.f32 %v9127_v51, %v1297_v21 }
 0x66a   :  { %v1221_v15 = vmul.f32 %v7740_v45, %v1220_v59  ;;  %v1200_v11 = vadd.f32 1e-05, %v1192_v8 }
 0x66b   :  { %6860 = vmatmul.msk.f32.vlgmr.msrb.gmra.mxu1 %vm365_vm0, %v9132_v10 }
 0x66c   :  { %v1225_v57 = vsel %vm1224_vm10, %v7740_v45, %v1221_v15  ;;  %7741 = vrsqrt.f32 %v1200_v11  ;;  %vm1232_vm12 = vweird.f32 %v1200_v11 }
 0x66d   :  { %v1287_v3 = vmul.f32 %v1225_v57, %v9073_v0 }
 0x66f   :  { %v1298_v5 = vmul.f32 %v9123_v6, %v1287_v3  ;;  %v1177_v7 = vpop.xlane.xlu2 %1176 }
 0x670   :  { %v1193_v31 = vmul.f32 %v1177_v7, %v9064_v55 }
 0x671   :  { %v9140_v54 = vadd.f32 %v9127_v51, %v1298_v5 }
 0x672   :  { %v7742_v12 = vpop.eup %7741  ;;  %v1201_v14 = vadd.f32 1e-05, %v1193_v31 }
 0x673   :  { %6861 = vmatmul.msk.f32.gmra.mxu1 %vm365_vm0, %v9140_v54  ;;  %v1227_v29 = vmul.f32 %v7742_v12, %v1200_v11  ;;  %vm1233_vm11 = vweird.f32 %v7742_v12 }
 0x674   :  { %7743 = vrsqrt.f32 %v1201_v14  ;;  %vm1234_vm13 = vmor %vm1232_vm12, %vm1233_vm11  ;;  %vm1242_vm15 = vweird.f32 %v1201_v14 }
 0x675   :  { %v1228_v4 = vmul.f32 %v7742_v12, %v1227_v29 }
 0x677   :  { %v1229_v38 = vmul.f32 0.5, %v1228_v4  ;;  %v1180_v20 = vpop.xlane.xlu0 %1179 }
 0x678   :  { %v1194_v0 = vmul.f32 %v1180_v20, %v9064_v55 }
 0x679   :  { %v1230_v42 = vsub.f32 1.5, %v1229_v38 }
 0x67a   :  { %v7744_v13 = vpop.eup %7743  ;;  %v1202_v37 = vadd.f32 1e-05, %v1194_v0 }
 0x67b   :  { %v1231_v47 = vmul.f32 %v7742_v12, %v1230_v42  ;;  %v1237_v26 = vmul.f32 %v7744_v13, %v1201_v14  ;;  %vm1243_vm14 = vweird.f32 %v7744_v13 }
 0x67c   :  { %7745 = vrsqrt.f32 %v1202_v37  ;;  %vm1244_vm4 = vmor %vm1242_vm15, %vm1243_vm14  ;;  %vm1252_vm6 = vweird.f32 %v1202_v37 }
 0x67d   :  { %v1238_v28 = vmul.f32 %v7744_v13, %v1237_v26  ;;  %v1235_v56 = vsel %vm1234_vm13, %v7742_v12, %v1231_v47 }
 0x67e   :  { %v1288_v22 = vmul.f32 %v1235_v56, %v9081_v58 }
 0x67f   :  { %v1239_v32 = vmul.f32 0.5, %v1238_v28 }
 0x680   :  { %v1299_v34 = vmul.f32 %v9123_v6, %v1288_v22 }
 0x681   :  { %v1240_v2 = vsub.f32 1.5, %v1239_v32 }
 0x682   :  { %v7746_v35 = vpop.eup %7745  ;;  %v9148_v19 = vadd.f32 %v9127_v51, %v1299_v34 }
 0x683   :  { %v1241_v33 = vmul.f32 %v7744_v13, %v1240_v2  ;;  %v1247_v24 = vmul.f32 %v7746_v35, %v1202_v37  ;;  %vm1253_vm5 = vweird.f32 %v7746_v35 }
 0x684   :  { %6862 = vmatmul.msk.f32.gmra.mxu1 %vm365_vm0, %v9148_v19  ;;  %vm1254_vm7 = vmor %vm1252_vm6, %vm1253_vm5 }
 0x685   :  { %v1248_v40 = vmul.f32 %v7746_v35, %v1247_v24  ;;  %v1245_v41 = vsel %vm1244_vm4, %v7744_v13, %v1241_v33  ;;  %v7624_v24 = vld [vmem:[%s8504_s14 + $0x1] ss:$0 sm:$0xff] }
 0x686   :  { %v1289_v58 = vmul.f32 %v1245_v41, %v9087_v62 }
 0x687   :  { %v1249_v36 = vmul.f32 0.5, %v1248_v40 }
 0x688   :  { %v1300_v61 = vmul.f32 %v9123_v6, %v1289_v58 }
 0x689   :  { %v1250_v44 = vsub.f32 1.5, %v1249_v36 }
 0x68a   :  { %v1183_v60 = vpop.xlane.xlu1 %1182  ;;  %v9155_v39 = vadd.f32 %v9127_v51, %v1300_v61 }
 0x68b   :  { %v1251_v27 = vmul.f32 %v7746_v35, %v1250_v44  ;;  %v1195_v43 = vmul.f32 %v1183_v60, %v9064_v55 }
 0x68c   :  { %6863 = vmatmul.msk.f32.gmra.mxu1 %vm365_vm0, %v9155_v39 }
 0x68d   :  { %v1203_v49 = vadd.f32 1e-05, %v1195_v43  ;;  %v1255_v23 = vsel %vm1254_vm7, %v7746_v35, %v1251_v27 }
 0x68e   :  { %v1290_v62 = vmul.f32 %v1255_v23, %v9093_v18 }
 0x68f   :  { %7747 = vrsqrt.f32 %v1203_v49  ;;  %vm1262_vm9 = vweird.f32 %v1203_v49 }
 0x690   :  { %v1301_v50 = vmul.f32 %v9123_v6, %v1290_v62 }
 0x692   :  { %v9163_v52 = vadd.f32 %v9127_v51, %v1301_v50 }
 0x694   :  { %6864 = vmatmul.msk.f32.gmra.mxu1 %vm365_vm0, %v9163_v52 }
 0x695   :  { %v7748_v45 = vpop.eup %7747 }
 0x696   :  { %v1257_v53 = vmul.f32 %v7748_v45, %v1203_v49  ;;  %vm1263_vm8 = vweird.f32 %v7748_v45 }
 0x697   :  { %vm1264_vm10 = vmor %vm1262_vm9, %vm1263_vm8 }
 0x698   :  { %v1258_v16 = vmul.f32 %v7748_v45, %v1257_v53 }
 0x69a   :  { %v1259_v48 = vmul.f32 0.5, %v1258_v16 }
 0x69c   :  { %v1260_v9 = vsub.f32 1.5, %v1259_v48 }
 0x69e   :  { %v1261_v46 = vmul.f32 %v7748_v45, %v1260_v9 }
 0x6a0   :  { %v1265_v17 = vsel %vm1264_vm10, %v7748_v45, %v1261_v46 }
 0x6a1   :  { %v1291_v18 = vmul.f32 %v1265_v17, %v9099_v25 }
 0x6a3   :  { %v1302_v21 = vmul.f32 %v9123_v6, %v1291_v18 }
 0x6a5   :  { %v9170_v59 = vadd.f32 %v9127_v51, %v1302_v21 }
 0x6a7   :  { %6865 = vmatmul.msk.f32.gmra.mxu1 %vm365_vm0, %v9170_v59 }
 0x6ad   :  { %v1186_v63 = vpop.xlane.xlu2 %1185 }
 0x6ae   :  { %v1196_v8 = vmul.f32 %v1186_v63, %v9064_v55 }
 0x6b0   :  { %v1204_v15 = vadd.f32 1e-05, %v1196_v8 }
 0x6b2   :  { %7749 = vrsqrt.f32 %v1204_v15  ;;  %vm1272_vm12 = vweird.f32 %v1204_v15 }
 0x6b8   :  { %v7750_v11 = vpop.eup %7749 }
 0x6b9   :  { %v1267_v57 = vmul.f32 %v7750_v11, %v1204_v15  ;;  %vm1273_vm11 = vweird.f32 %v7750_v11 }
 0x6ba   :  { %vm1274_vm13 = vmor %vm1272_vm12, %vm1273_vm11 }
 0x6bb   :  { %v1268_v3 = vmul.f32 %v7750_v11, %v1267_v57 }
 0x6bd   :  { %v1269_v5 = vmul.f32 0.5, %v1268_v3 }
 0x6bf   :  { %v1270_v7 = vsub.f32 1.5, %v1269_v5 }
 0x6c1   :  { %v1271_v25 = vmul.f32 %v7750_v11, %v1270_v7 }
 0x6c3   :  { %v1275_v31 = vsel %vm1274_vm13, %v7750_v11, %v1271_v25 }
 0x6c4   :  { %v1292_v12 = vmul.f32 %v1275_v31, %v9105_v30 }
 0x6c6   :  { %v1303_v14 = vmul.f32 %v9123_v6, %v1292_v12 }
 0x6c8   :  { %v9178_v29 = vadd.f32 %v9127_v51, %v1303_v14 }
 0x6ca   :  { %6866 = vmatmul.msk.f32.gmra.mxu1 %vm365_vm0, %v9178_v29 }
 0x6d1   :  { %v1189_v4 = vpop.xlane.xlu0 %1188 }
 0x6d2   :  { %v1197_v38 = vmul.f32 %v1189_v4, %v9064_v55 }
 0x6d4   :  { %v1205_v20 = vadd.f32 1e-05, %v1197_v38 }
 0x6d6   :  { %7751 = vrsqrt.f32 %v1205_v20  ;;  %vm1282_vm15 = vweird.f32 %v1205_v20 }
 0x6dc   :  { %v7752_v0 = vpop.eup %7751 }
 0x6dd   :  { %v1277_v42 = vmul.f32 %v7752_v0, %v1205_v20  ;;  %vm1283_vm14 = vweird.f32 %v7752_v0 }
 0x6de   :  { %vm1284_vm4 = vmor %vm1282_vm15, %vm1283_vm14 }
 0x6df   :  { %v1278_v13 = vmul.f32 %v7752_v0, %v1277_v42 }
 0x6e1   :  { %v1279_v37 = vmul.f32 0.5, %v1278_v13 }
 0x6e3   :  { %v1280_v47 = vsub.f32 1.5, %v1279_v37  ;;  %v349_v37 = vld [vmem:[#allocation5] sm:$0xff] }
 0x6e5   :  { %v1281_v30 = vmul.f32 %v7752_v0, %v1280_v47 }
 0x6e7   :  { %v1285_v26 = vsel %vm1284_vm4, %v7752_v0, %v1281_v30 }
 0x6e8   :  { %v1293_v28 = vmul.f32 %v1285_v26, %v9117_v1  ;;  %v1367_v32 = vpop.f32.mrf.mxu1 }
 0x6e9   :  { %v9211_v61 = vadd.f32 %v7624_v24, %v1367_v32 }
 0x6ea   :  { %v1304_v56 = vmul.f32 %v9123_v6, %v1293_v28  ;;  %v350_v28 = vld [vmem:[#allocation5 + $0x8] sm:$0xff] }
 0x6ec   :  { %v9186_v22 = vadd.f32 %v9127_v51, %v1304_v56 }
 0x6ee   :  { %6867 = vmatmul.msk.f32.gmra.mxu1 %vm365_vm0, %v9186_v22 }
 0x6f0   :  { %v1370_v34 = vpop.f32.mrf.mxu1 }
 0x6f1   :  { %v9199_v6 = vadd.f32 %v7624_v24, %v1370_v34 }
 0x701   :  { %v1373_v2 = vpop.f32.mrf.mxu1 }
 0x702   :  { %v9217_v44 = vadd.f32 %v7624_v24, %v1373_v2 }
 0x709   :  { %v1376_v35 = vpop.f32.mrf.mxu1 }
 0x70a   :  { %v9207_v36 = vadd.f32 %v7624_v24, %v1376_v35 }
 0x711   :  { %v1379_v33 = vpop.f32.mrf.mxu1 }
 0x712   :  { %v9195_v1 = vadd.f32 %v7624_v24, %v1379_v33 }
 0x724   :  { %v1382_v40 = vpop.f32.mrf.mxu1 }
 0x725   :  { %v9191_v41 = vadd.f32 %v7624_v24, %v1382_v40 }
 0x727   :  { %1691 = vrot.lane.b32.xlu0 %v9191_v41, %s8442_s9  ;;  %v9247_v43 = vpack.i.bf16 %v9195_v1, %v9191_v41 }
 0x72f   :  { %1689 = vrot.lane.b32.xlu0 %v9195_v1, %s8442_s9 }
 0x737   :  { %1683 = vrot.lane.b32.xlu0 %v9199_v6, %s8442_s9 }
 0x747   :  { %v1385_v51 = vpop.f32.mrf.mxu1 }
 0x748   :  { %v9203_v58 = vadd.f32 %v7624_v24, %v1385_v51 }
 0x74a   :  { %1693 = vrot.lane.b32.xlu2 %v9203_v58, %s8442_s9 }
 0x752   :  { %1687 = vrot.lane.b32.xlu2 %v9207_v36, %s8442_s9 }
 0x75a   :  { %1681 = vrot.lane.b32.xlu2 %v9211_v61, %s8442_s9 }
 0x762   :  { %1667 = vrot.lane.b32.xlu2 %v9199_v6, %s8443_s13 }
 0x76a   :  { %1669 = vrot.lane.b32.xlu2 %v9217_v44, %s8443_s13 }
 0x76b   :  { %v1388_v60 = vpop.f32.mrf.mxu1 }
 0x76c   :  { %v9221_v27 = vadd.f32 %v7624_v24, %v1388_v60  ;;  %v351_v24 = vld [vmem:[#allocation5 + $0x10] sm:$0xff] }
 0x76e   :  { %1413 = vrot.lane.b32.xlu0 %v9221_v27, %s8444_s17  ;;  %1695 = vrot.lane.b32.xlu1 %v9221_v27, %s8442_s9  ;;  %v9263_v49 = vpack.i.bf16 %v9203_v58, %v9221_v27 }
 0x772   :  { %1671 = vrot.lane.b32.xlu2 %v9207_v36, %s8443_s13 }
 0x776   :  { %1409 = vrot.lane.b32.xlu0 %v9191_v41, %s8444_s17  ;;  %1685 = vrot.lane.b32.xlu1 %v9217_v44, %s8442_s9 }
 0x77a   :  { %1673 = vrot.lane.b32.xlu2 %v9195_v1, %s8443_s13 }
 0x77e   :  { %1405 = vrot.lane.b32.xlu0 %v9207_v36, %s8444_s17  ;;  %1665 = vrot.lane.b32.xlu1 %v9211_v61, %s8443_s13 }
 0x782   :  { %1677 = vrot.lane.b32.xlu2 %v9203_v58, %s8443_s13 }
 0x786   :  { %1401 = vrot.lane.b32.xlu0 %v9199_v6, %s8444_s17  ;;  %1411 = vrot.lane.b32.xlu1 %v9203_v58, %s8444_s17 }
 0x78a   :  { %7399 = vrot.lane.b32.xlu2 %v9247_v43, %s8445_s6 }
 0x78e   :  { %1675 = vrot.lane.b32.xlu0 %v9191_v41, %s8443_s13  ;;  %1407 = vrot.lane.b32.xlu1 %v9195_v1, %s8444_s17 }
 0x796   :  { %1403 = vrot.lane.b32.xlu1 %v9217_v44, %s8444_s17 }
 0x799   :  { %v1692_v23 = vpop.permute.xlu0 %1691 }
 0x79e   :  { %1399 = vrot.lane.b32.xlu1 %v9211_v61, %s8444_s17 }
 0x7a1   :  { %v1690_v62 = vpop.permute.xlu0 %1689 }
 0x7a4   :  { %v1694_v50 = vpop.permute.xlu2 %1693 }
 0x7a6   :  { %1679 = vrot.lane.b32.xlu1 %v9221_v27, %s8443_s13 }
 0x7a9   :  { %v1684_v45 = vpop.permute.xlu0 %1683 }
 0x7ac   :  { %v1688_v53 = vpop.permute.xlu2 %1687 }
 0x7ae   :  { %7404 = vrot.lane.b32.xlu1 %v9263_v49, %s8445_s6 }
 0x7b4   :  { %v1682_v9 = vpop.permute.xlu2 %1681 }
 0x7bc   :  { %v1668_v17 = vpop.permute.xlu2 %1667 }
 0x7c4   :  { %v1670_v8 = vpop.permute.xlu2 %1669 }
 0x7cc   :  { %v1672_v57 = vpop.permute.xlu2 %1671 }
 0x7d4   :  { %v1674_v7 = vpop.permute.xlu2 %1673 }
 0x7dc   :  { %v1678_v31 = vpop.permute.xlu2 %1677 }
 0x7e0   :  { %v1696_v16 = vpop.permute.xlu1 %1695  ;;  %v1414_v48 = vpop.permute.xlu0 %1413 }
 0x7e1   :  { %6868 = vmatpush.xpose.msk.msrb.mxu3 %vm455_vm1, %v1414_v48  ;;  %6892 = vmatpush.xpose.msk.msra.mxu2 %vm455_vm1, %v1696_v16 }
 0x7e4   :  { %v7400_v38 = vpop.permute.xlu2 %7399 }
 0x7e5   :  { %6893 = vmatpush.xpose.msk.msra.mxu2 %vm455_vm1, %v1694_v50  ;;  %v7401_v0 = vunpack.i.l.bf16 %v7400_v38  ;;  %v7402_v42 = vunpack.i.h.bf16 %v7400_v38  ;;  %v352_v50 = vld [vmem:[#allocation5 + $0x18] sm:$0xff] }
 0x7e8   :  { %v1686_v46 = vpop.permute.xlu1 %1685  ;;  %v1410_v21 = vpop.permute.xlu0 %1409 }
 0x7e9   :  { %6894 = vmatpush.xpose.msk.msra.mxu2 %vm455_vm1, %v1692_v23 }
 0x7ed   :  { %6895 = vmatpush.xpose.msk.msra.mxu2 %vm455_vm1, %v1690_v62 }
 0x7f0   :  { %v1666_v18 = vpop.permute.xlu1 %1665  ;;  %v1406_v11 = vpop.permute.xlu0 %1405 }
 0x7f1   :  { %6896 = vmatpush.xpose.msk.msra.mxu2 %vm455_vm1, %v1688_v53 }
 0x7f5   :  { %6897 = vmatpush.xpose.msk.msra.mxu2 %vm455_vm1, %v1686_v46 }
 0x7f8   :  { %v1412_v63 = vpop.permute.xlu1 %1411  ;;  %v1402_v5 = vpop.permute.xlu0 %1401 }
 0x7f9   :  { %6869 = vmatpush.xpose.msk.msrb.mxu3 %vm455_vm1, %v1412_v63  ;;  %6898 = vmatpush.xpose.msk.msra.mxu2 %vm455_vm1, %v1684_v45 }
 0x7fd   :  { %6870 = vmatpush.xpose.msk.msrb.mxu3 %vm455_vm1, %v1410_v21  ;;  %6899 = vmatpush.xpose.msk.msra.mxu2 %vm455_vm1, %v1682_v9  ;;  %v9345_v21 = vpack.i.bf16 %v9217_v44, %v9207_v36 }
 0x800   :  { %v1408_v15 = vpop.permute.xlu1 %1407  ;;  %6900 = vmatmul.msk.f32.vlgmr.msra.gmra.mxu2 %vm455_vm1, %v1666_v18  ;;  %v1676_v13 = vpop.permute.xlu0 %1675 }
 0x801   :  { %6871 = vmatpush.xpose.msk.msrb.mxu3 %vm455_vm1, %v1408_v15 }
 0x805   :  { %6872 = vmatpush.xpose.msk.msrb.mxu3 %vm455_vm1, %v1406_v11 }
 0x808   :  { %v1404_v3 = vpop.permute.xlu1 %1403  ;;  %6901 = vmatmul.msk.f32.gmra.mxu2 %vm455_vm1, %v1668_v17  ;;  %v9339_v17 = vpack.i.bf16 %v9211_v61, %v9199_v6 }
 0x809   :  { %6873 = vmatpush.xpose.msk.msrb.mxu3 %vm455_vm1, %v1404_v3 }
 0x80d   :  { %6874 = vmatpush.xpose.msk.msrb.mxu3 %vm455_vm1, %v1402_v5 }
 0x810   :  { %v1400_v25 = vpop.permute.xlu1 %1399  ;;  %6902 = vmatmul.msk.f32.gmra.mxu2 %vm455_vm1, %v1670_v8  ;;  %v353_v8 = vld [vmem:[#allocation5 + $0x20] sm:$0xff] }
 0x811   :  { %6875 = vmatpush.xpose.msk.msrb.mxu3 %vm455_vm1, %v1400_v25  ;;  %v355_v25 = vld [vmem:[#allocation5 + $0x30] sm:$0xff] }
 0x814   :  { %6876 = vmatmul.msk.f32.vlgmr.msrb.gmra.mxu3 %vm455_vm1, %v9211_v61  ;;  %v354_v61 = vld [vmem:[#allocation5 + $0x28] sm:$0xff] }
 0x818   :  { %v1680_v12 = vpop.permute.xlu1 %1679  ;;  %6903 = vmatmul.msk.f32.gmra.mxu2 %vm455_vm1, %v1672_v57 }
 0x81c   :  { %6877 = vmatmul.msk.f32.gmra.mxu3 %vm455_vm1, %v9199_v6 }
 0x820   :  { %v7405_v14 = vpop.permute.xlu1 %7404  ;;  %6904 = vmatmul.msk.f32.gmra.mxu2 %vm455_vm1, %v1674_v7 }
 0x821   :  { %v7406_v4 = vunpack.i.l.bf16 %v7405_v14  ;;  %v7407_v20 = vunpack.i.h.bf16 %v7405_v14  ;;  %v9367_v14 = vld [vmem:[#allocation5 + $0x38] sm:$0xff] }
 0x823   :  { %1914 = vmatpush.msra.mxu1 %v7406_v4 }
 0x824   :  { %6878 = vmatmul.msk.f32.gmra.mxu3 %vm455_vm1, %v9217_v44 }
 0x825   :  { %1915 = vmatpush.msra.mxu1 %v7407_v20 }
 0x827   :  { %1916 = vmatpush.msra.mxu1 %v7401_v0 }
 0x828   :  { %6905 = vmatmul.msk.f32.gmra.mxu2 %vm455_vm1, %v1676_v13 }
 0x829   :  { %1917 = vmatpush.msra.mxu1 %v7402_v42 }
 0x82c   :  { %6879 = vmatmul.msk.f32.gmra.mxu3 %vm455_vm1, %v9207_v36 }
 0x830   :  { %6906 = vmatmul.msk.f32.gmra.mxu2 %vm455_vm1, %v1678_v31 }
 0x834   :  { %6880 = vmatmul.msk.f32.gmra.mxu3 %vm455_vm1, %v9195_v1 }
 0x838   :  { %6907 = vmatmul.msk.f32.gmra.mxu2 %vm455_vm1, %v1680_v12 }
 0x83c   :  { %6881 = vmatmul.msk.f32.gmra.mxu3 %vm455_vm1, %v9191_v41 }
 0x844   :  { %6882 = vmatmul.msk.f32.gmra.mxu3 %vm455_vm1, %v9203_v58 }
 0x84c   :  { %6883 = vmatmul.msk.f32.gmra.mxu3 %vm455_vm1, %v9221_v27 }
 0x883   :  { %v1746_v47 = vpop.f32.mrf.mxu2 }
 0x884   :  { %v9307_v30 = vadd.f32 %v1746_v47, %v349_v37 }
 0x886   :  { %v1770_v26 = vsel %vm529_vm2, %v9307_v30, -inf }
 0x887   :  { %1771 = vmax.xlane.f32.xlu0 %v1770_v26 }
 0x88b   :  { %v1749_v56 = vpop.f32.mrf.mxu2 }
 0x88c   :  { %v9311_v32 = vadd.f32 %v1749_v56, %v350_v28 }
 0x88e   :  { %v1773_v34 = vsel %vm529_vm2, %v9311_v32, -inf }
 0x88f   :  { %1774 = vmax.xlane.f32.xlu2 %v1773_v34 }
 0x893   :  { %v1752_v40 = vpop.f32.mrf.mxu2 }
 0x894   :  { %v9319_v41 = vadd.f32 %v1752_v40, %v351_v24 }
 0x896   :  { %v1776_v60 = vsel %vm529_vm2, %v9319_v41, -inf }
 0x897   :  { %v1464_v2 = vpop.f32.mrf.mxu3 }
 0x898   :  { %v9315_v35 = vadd.f32 %v1464_v2, %v349_v37 }
 0x89a   :  { %v1488_v33 = vsel %vm529_vm2, %v9315_v35, -inf }
 0x89b   :  { %1489 = vmax.xlane.f32.xlu1 %v1488_v33  ;;  %v1755_v45 = vpop.f32.mrf.mxu2 }
 0x89c   :  { %v9331_v53 = vadd.f32 %v1755_v45, %v352_v50 }
 0x89e   :  { %v1779_v48 = vsel %vm529_vm2, %v9331_v53, -inf }
 0x89f   :  { %v1467_v1 = vpop.f32.mrf.mxu3 }
 0x8a0   :  { %v9321_v51 = vadd.f32 %v1467_v1, %v350_v28 }
 0x8a2   :  { %v1491_v58 = vsel %vm529_vm2, %v9321_v51, -inf }
 0x8a3   :  { %1492 = vmax.xlane.f32.xlu2 %v1491_v58  ;;  %1777 = vmax.xlane.f32.xlu1 %v1776_v60  ;;  %v1758_v46 = vpop.f32.mrf.mxu2 }
 0x8a4   :  { %v9372_v20 = vadd.f32 %v1758_v46, %v353_v8 }
 0x8a6   :  { %v1782_v42 = vsel %vm529_vm2, %v9372_v20, -inf }
 0x8a7   :  { %v1470_v27 = vpop.f32.mrf.mxu3 }
 0x8a8   :  { %v9327_v23 = vadd.f32 %v1470_v27, %v351_v24 }
 0x8aa   :  { %v1494_v62 = vsel %vm529_vm2, %v9327_v23, -inf }
 0x8ab   :  { %1495 = vmax.xlane.f32.xlu0 %v1494_v62  ;;  %v1761_v11 = vpop.f32.mrf.mxu2 }
 0x8ac   :  { %v9355_v57 = vadd.f32 %v1761_v11, %v354_v61 }
 0x8ae   :  { %v1785_v36 = vsel %vm529_vm2, %v9355_v57, -inf }
 0x8af   :  { %v1473_v16 = vpop.f32.mrf.mxu3 }
 0x8b0   :  { %v9335_v9 = vadd.f32 %v1473_v16, %v352_v50 }
 0x8b2   :  { %v1497_v18 = vsel %vm529_vm2, %v9335_v9, -inf }
 0x8b3   :  { %1780 = vmax.xlane.f32.xlu0 %v1779_v48  ;;  %v1764_v5 = vpop.f32.mrf.mxu2 }
 0x8b4   :  { %v9363_v31 = vadd.f32 %v1764_v5, %v355_v25 }
 0x8b6   :  { %v1788_v12 = vsel %vm529_vm2, %v9363_v31, -inf }
 0x8b7   :  { %v1476_v63 = vpop.f32.mrf.mxu3 }
 0x8b8   :  { %v9351_v15 = vadd.f32 %v1476_v63, %v353_v8 }
 0x8ba   :  { %v1500_v6 = vsel %vm529_vm2, %v9351_v15, -inf }
 0x8bb   :  { %1498 = vmax.xlane.f32.xlu0 %v1497_v18  ;;  %7414 = vrot.lane.b32.xlu2 %v9339_v17, %s8445_s6  ;;  %v1767_v4 = vpop.f32.mrf.mxu2 }
 0x8bc   :  { %7409 = vrot.lane.b32.xlu1 %v9345_v21, %s8445_s6  ;;  %v9370_v38 = vadd.f32 %v1767_v4, %v9367_v14 }
 0x8be   :  { %v1791_v0 = vsel %vm529_vm2, %v9370_v38, -inf }
 0x8bf   :  { %v1479_v44 = vpop.f32.mrf.mxu3 }
 0x8c0   :  { %v9359_v3 = vadd.f32 %v1479_v44, %v354_v61 }
 0x8c2   :  { %v1503_v7 = vsel %vm529_vm2, %v9359_v3, -inf }
 0x8c3   :  { %1501 = vmax.xlane.f32.xlu0 %v1500_v6 }
 0x8c7   :  { %v1482_v33 = vpop.f32.mrf.mxu3 }
 0x8c8   :  { %v9386_v24 = vadd.f32 %v1482_v33, %v355_v25 }
 0x8cb   :  { %1786 = vmax.xlane.f32.xlu0 %v1785_v36 }
 0x8d3   :  { %1504 = vmax.xlane.f32.xlu0 %v1503_v7 }
 0x8db   :  { %1789 = vmax.xlane.f32.xlu0 %v1788_v12  ;;  %v1485_v12 = vpop.f32.mrf.mxu3 }
 0x8e3   :  { %1792 = vmax.xlane.f32.xlu0 %v1791_v0  ;;  %v9413_v0 = vadd.f32 %v1485_v12, %v9367_v14 }
 0x8e4   :  { %1783 = vmax.xlane.f32.xlu2 %v1782_v42 }
 0x8fa   :  { %v1772_v13 = vpop.xlane.xlu0 %1771 }
 0x8fb   :  { %v1794_v37 = vsub.f32 %v9307_v30, %v1772_v13  ;;  %v1509_v13 = vsel %vm529_vm2, %v9413_v0, -inf }
 0x8fc   :  { %7424 = vrot.lane.b32.xlu2 %v9247_v43, %s8446_s27 }
 0x8fd   :  { %v1802_v47 = vmul.f32 1.442695, %v1794_v37 }
 0x8ff   :  { %7753 = vpow2.f32 %v1802_v47 }
 0x902   :  { %v1775_v26 = vpop.xlane.xlu2 %1774 }
 0x903   :  { %v1795_v28 = vsub.f32 %v9311_v32, %v1775_v26  ;;  %v1506_v32 = vsel %vm529_vm2, %v9386_v24, -inf }
 0x905   :  { %v9382_v56 = vpop.eup %7753  ;;  %v1804_v34 = vmul.f32 1.442695, %v1795_v28 }
 0x906   :  { %v1818_v2 = vsel %vm529_vm2, %v9382_v56, 0.0 }
 0x907   :  { %7755 = vpow2.f32 %v1804_v34  ;;  %1819 = vadd.xlane.f32.xlu0 %v1818_v2 }
 0x90d   :  { %v9388_v30 = vpop.eup %7755 }
 0x90e   :  { %v1490_v40 = vpop.xlane.xlu1 %1489  ;;  %v1821_v43 = vsel %vm529_vm2, %v9388_v30, 0.0 }
 0x90f   :  { %v1512_v1 = vsub.f32 %v9315_v35, %v1490_v40  ;;  %1822 = vadd.xlane.f32.xlu1 %v1821_v43  ;;  %1507 = vmax.xlane.f32.xlu0 %v1506_v32 }
 0x911   :  { %v1520_v58 = vmul.f32 1.442695, %v1512_v1 }
 0x913   :  { %7757 = vpow2.f32 %v1520_v58 }
 0x916   :  { %v1778_v60 = vpop.xlane.xlu1 %1777  ;;  %v1493_v46 = vpop.xlane.xlu2 %1492 }
 0x917   :  { %v1796_v27 = vsub.f32 %v9319_v41, %v1778_v60 }
 0x919   :  { %v9396_v62 = vpop.eup %7757  ;;  %v1806_v50 = vmul.f32 1.442695, %v1796_v27 }
 0x91a   :  { %v1536_v45 = vsel %vm529_vm2, %v9396_v62, 0.0 }
 0x91b   :  { %1537 = vadd.xlane.f32.xlu0 %v1536_v45  ;;  %7759 = vpow2.f32 %v1806_v50 }
 0x91e   :  { %v1496_v16 = vpop.xlane.xlu0 %1495  ;;  %v7415_v6 = vpop.permute.xlu2 %7414 }
 0x91f   :  { %v7416_v11 = vunpack.i.l.bf16 %v7415_v6  ;;  %v7417_v36 = vunpack.i.h.bf16 %v7415_v6  ;;  %v1514_v25 = vsub.f32 %v9327_v23, %v1496_v16 }
 0x921   :  { %v9400_v48 = vpop.eup %7759  ;;  %v1524_v4 = vmul.f32 1.442695, %v1514_v25 }
 0x922   :  { %v1824_v35 = vsel %vm529_vm2, %v9400_v48, 0.0 }
 0x925   :  { %1825 = vadd.xlane.f32.xlu2 %v1824_v35 }
 0x926   :  { %v1781_v18 = vpop.xlane.xlu0 %1780 }
 0x927   :  { %v1797_v7 = vsub.f32 %v9331_v53, %v1781_v18 }
 0x928   :  { %7419 = vrot.lane.b32.xlu1 %v9263_v49, %s8446_s27 }
 0x92e   :  { %v7410_v41 = vpop.permute.xlu1 %7409  ;;  %v1499_v63 = vpop.xlane.xlu0 %1498 }
 0x92f   :  { %v7411_v8 = vunpack.i.l.bf16 %v7410_v41  ;;  %7429 = vrot.lane.b32.xlu0 %v9345_v21, %s8446_s27  ;;  %v7412_v61 = vunpack.i.h.bf16 %v7410_v41  ;;  %v1808_v21 = vmul.f32 1.442695, %v1797_v7 }
 0x931   :  { %1918 = vmatpush.msra.mxu1 %v7411_v8  ;;  %7761 = vpow2.f32 %v1808_v21 }
 0x932   :  { %7763 = vpow2.f32 %v1524_v4 }
 0x933   :  { %1919 = vmatpush.msra.mxu1 %v7412_v61 }
 0x935   :  { %1920 = vmatpush.msra.mxu1 %v7416_v11 }
 0x936   :  { %v1502_v44 = vpop.xlane.xlu0 %1501 }
 0x937   :  { %1921 = vmatpush.msra.mxu1 %v7417_v36  ;;  %v9418_v37 = vpop.eup %7761  ;;  %v1516_v2 = vsub.f32 %v9351_v15, %v1502_v44 }
 0x938   :  { %v9420_v53 = vpop.eup %7763  ;;  %v1827_v34 = vsel %vm529_vm2, %v9418_v37, 0.0 }
 0x93d   :  { %7434 = vrot.lane.b32.xlu2 %v9339_v17, %s8446_s27  ;;  %v1513_v17 = vsub.f32 %v9321_v51, %v1493_v46  ;;  %v1542_v51 = vsel %vm529_vm2, %v9420_v53, 0.0 }
 0x93e   :  { %v1787_v5 = vpop.xlane.xlu0 %1786 }
 0x93f   :  { %v1522_v23 = vmul.f32 1.442695, %v1513_v17  ;;  %v1799_v40 = vsub.f32 %v9355_v57, %v1787_v5 }
 0x941   :  { %7765 = vpow2.f32 %v1522_v23  ;;  %v1812_v32 = vmul.f32 1.442695, %v1799_v40 }
 0x946   :  { %v1505_v49 = vpop.xlane.xlu0 %1504 }
 0x947   :  { %v9431_v1 = vpop.eup %7765  ;;  %v1517_v50 = vsub.f32 %v9359_v3, %v1505_v49 }
 0x948   :  { %v1539_v45 = vsel %vm529_vm2, %v9431_v1, 0.0 }
 0x94e   :  { %v1790_v42 = vpop.xlane.xlu0 %1789 }
 0x94f   :  { %v1800_v27 = vsub.f32 %v9363_v31, %v1790_v42  ;;  %v1530_v31 = vmul.f32 1.442695, %v1517_v50 }
 0x951   :  { %v1814_v16 = vmul.f32 1.442695, %v1800_v27 }
 0x952   :  { %1510 = vmax.xlane.f32.xlu1 %v1509_v13 }
 0x956   :  { %v1793_v47 = vpop.xlane.xlu0 %1792 }
 0x957   :  { %v1801_v26 = vsub.f32 %v9370_v38, %v1793_v47  ;;  %v1784_v28 = vpop.xlane.xlu2 %1783  ;;  %v1515_v38 = vsub.f32 %v9335_v9, %v1499_v63 }
 0x958   :  { %v1798_v14 = vsub.f32 %v9372_v20, %v1784_v28  ;;  %v1528_v20 = vmul.f32 1.442695, %v1516_v2 }
 0x959   :  { %v1816_v33 = vmul.f32 1.442695, %v1801_v26  ;;  %1828 = vadd.xlane.f32.xlu0 %v1827_v34  ;;  %v1526_v58 = vmul.f32 1.442695, %v1515_v38 }
 0x95a   :  { %v1810_v43 = vmul.f32 1.442695, %v1798_v14  ;;  %1543 = vadd.xlane.f32.xlu1 %v1542_v51 }
 0x95b   :  { %7767 = vpow2.f32 %v1816_v33 }
 0x95c   :  { %7769 = vpow2.f32 %v1810_v43 }
 0x95d   :  { %7771 = vpow2.f32 %v1528_v20 }
 0x95e   :  { %7773 = vpow2.f32 %v1812_v32 }
 0x95f   :  { %7775 = vpow2.f32 %v1526_v58 }
 0x960   :  { %7777 = vpow2.f32 %v1814_v16 }
 0x961   :  { %v9433_v15 = vpop.eup %7767  ;;  %7779 = vpow2.f32 %v1530_v31 }
 0x962   :  { %v9435_v60 = vpop.eup %7769  ;;  %v1839_v57 = vsel %vm529_vm2, %v9433_v15, 0.0 }
 0x963   :  { %1840 = vadd.xlane.f32.xlu1 %v1839_v57  ;;  %v1830_v9 = vsel %vm529_vm2, %v9435_v60, 0.0  ;;  %v9445_v35 = vpop.eup %7771 }
 0x964   :  { %1831 = vadd.xlane.f32.xlu0 %v1830_v9  ;;  %v9447_v46 = vpop.eup %7773  ;;  %v1548_v41 = vsel %vm529_vm2, %v9445_v35, 0.0 }
 0x965   :  { %v9449_v18 = vpop.eup %7775  ;;  %v1833_v3 = vsel %vm529_vm2, %v9447_v46, 0.0 }
 0x966   :  { %1540 = vadd.xlane.f32.xlu2 %v1539_v45  ;;  %v1545_v63 = vsel %vm529_vm2, %v9449_v18, 0.0  ;;  %v9457_v8 = vpop.eup %7777 }
 0x967   :  { %v9459_v6 = vpop.eup %7779  ;;  %v1836_v61 = vsel %vm529_vm2, %v9457_v8, 0.0 }
 0x968   :  { %v1551_v11 = vsel %vm529_vm2, %v9459_v6, 0.0 }
 0x96b   :  { %1549 = vadd.xlane.f32.xlu1 %v1548_v41 }
 0x96c   :  { %1834 = vadd.xlane.f32.xlu0 %v1833_v3 }
 0x96e   :  { %1546 = vadd.xlane.f32.xlu2 %v1545_v63 }
 0x974   :  { %1837 = vadd.xlane.f32.xlu0 %v1836_v61 }
 0x976   :  { %1552 = vadd.xlane.f32.xlu2 %v1551_v11 }
 0x97a   :  { %v1820_v36 = vpop.xlane.xlu0 %1819 }
 0x97b   :  { %7781 = vrcp.f32 %v1820_v36 }
 0x981   :  { %v7782_v44 = vpop.eup %7781 }
 0x982   :  { %v1850_v5 = vmul.f32 %v7782_v44, %v9382_v56  ;;  %v1823_v49 = vpop.xlane.xlu1 %1822  ;;  %v1508_v7 = vpop.xlane.xlu0 %1507 }
 0x983   :  { %7783 = vrcp.f32 %v1823_v49  ;;  %v1518_v25 = vsub.f32 %v9386_v24, %v1508_v7  ;;  %v7425_v56 = vpop.permute.xlu2 %7424 }
 0x984   :  { %6908 = vmatmul.msk.f32.vlgmr.msra.gmra.mxu1 %vm529_vm2, %v1850_v5  ;;  %v7426_v14 = vunpack.i.l.bf16 %v7425_v56  ;;  %v7427_v34 = vunpack.i.h.bf16 %v7425_v56 }
 0x985   :  { %v1532_v12 = vmul.f32 1.442695, %v1518_v25 }
 0x987   :  { %7785 = vpow2.f32 %v1532_v12 }
 0x989   :  { %v7784_v21 = vpop.eup %7783 }
 0x98a   :  { %v1851_v4 = vmul.f32 %v7784_v21, %v9388_v30 }
 0x98c   :  { %6909 = vmatmul.msk.f32.gmra.mxu1 %vm529_vm2, %v1851_v4 }
 0x98d   :  { %v9470_v42 = vpop.eup %7785 }
 0x98e   :  { %v1554_v13 = vsel %vm529_vm2, %v9470_v42, 0.0  ;;  %v1538_v23 = vpop.xlane.xlu0 %1537 }
 0x98f   :  { %1555 = vadd.xlane.f32.xlu0 %v1554_v13 }
 0x998   :  { %v1826_v17 = vpop.xlane.xlu2 %1825 }
 0x999   :  { %7787 = vrcp.f32 %v1826_v17 }
 0x99a   :  { %v7420_v24 = vpop.permute.xlu1 %7419  ;;  %7789 = vrcp.f32 %v1538_v23 }
 0x99b   :  { %v7421_v47 = vunpack.i.l.bf16 %v7420_v24  ;;  %v7422_v26 = vunpack.i.h.bf16 %v7420_v24 }
 0x99d   :  { %1632 = vmatpush.msra.mxu0 %v7421_v47 }
 0x99f   :  { %v7788_v28 = vpop.eup %7787  ;;  %1633 = vmatpush.msra.mxu0 %v7422_v26 }
 0x9a0   :  { %v1852_v30 = vmul.f32 %v7788_v28, %v9400_v48  ;;  %v7435_v51 = vpop.permute.xlu2 %7434  ;;  %v7790_v43 = vpop.eup %7789  ;;  %v6917_v28 = vld [vmem:[%s11491_s21 + $0x18] sm:$0xff] }
 0x9a1   :  { %1634 = vmatpush.msra.mxu0 %v7426_v14  ;;  %v7430_v2 = vpop.permute.xlu0 %7429  ;;  %v7436_v38 = vunpack.i.l.bf16 %v7435_v51  ;;  %v7437_v20 = vunpack.i.h.bf16 %v7435_v51  ;;  %v1568_v32 = vmul.f32 %v7790_v43, %v9396_v62  ;;  %2033 = vmatpush.msra.mxu3 %v6917_v28 }
 0x9a2   :  { %v7431_v33 = vunpack.i.l.bf16 %v7430_v2  ;;  %6910 = vmatmul.msk.f32.gmra.mxu1 %vm529_vm2, %v1852_v30  ;;  %v7432_v40 = vunpack.i.h.bf16 %v7430_v2 }
 0x9a3   :  { %1635 = vmatpush.msra.mxu0 %v7427_v34 }
 0x9a5   :  { %1636 = vmatpush.msra.mxu0 %v7431_v33 }
 0x9a7   :  { %1637 = vmatpush.msra.mxu0 %v7432_v40 }
 0x9a9   :  { %1638 = vmatpush.msra.mxu0 %v7436_v38 }
 0x9ab   :  { %1639 = vmatpush.msra.mxu0 %v7437_v20 }
 0x9ac   :  { %6884 = vmatmul.msk.f32.vlgmr.msra.gmra.mxu0 %vm529_vm2, %v1568_v32 }
 0x9c5   :  { %v1511_v48 = vpop.xlane.xlu1 %1510 }
 0x9c6   :  { %v1519_v58 = vsub.f32 %v9413_v0, %v1511_v48 }
 0x9c8   :  { %v1534_v27 = vmul.f32 1.442695, %v1519_v58 }
 0x9ca   :  { %7791 = vpow2.f32 %v1534_v27 }
 0x9cc   :  { %v1829_v57 = vpop.xlane.xlu0 %1828 }
 0x9cd   :  { %7793 = vrcp.f32 %v1829_v57  ;;  %v1544_v31 = vpop.xlane.xlu1 %1543 }
 0x9d0   :  { %v9479_v9 = vpop.eup %7791 }
 0x9d1   :  { %v1557_v50 = vsel %vm529_vm2, %v9479_v9, 0.0 }
 0x9d2   :  { %1558 = vadd.xlane.f32.xlu1 %v1557_v50 }
 0x9d3   :  { %v7794_v45 = vpop.eup %7793 }
 0x9d4   :  { %v1853_v16 = vmul.f32 %v7794_v45, %v9418_v37 }
 0x9d6   :  { %6911 = vmatmul.msk.f32.gmra.mxu1 %vm529_vm2, %v1853_v16  ;;  %v1841_v36 = vpop.xlane.xlu1 %1840 }
 0x9d7   :  { %v1832_v62 = vpop.xlane.xlu0 %1831 }
 0x9d8   :  { %7795 = vrcp.f32 %v1832_v62 }
 0x9d9   :  { %v1541_v41 = vpop.xlane.xlu2 %1540 }
 0x9da   :  { %7797 = vrcp.f32 %v1541_v41 }
 0x9db   :  { %7799 = vrcp.f32 %v1544_v31 }
 0x9de   :  { %v7796_v0 = vpop.eup %7795  ;;  %v1550_v12 = vpop.xlane.xlu1 %1549 }
 0x9df   :  { %v1835_v3 = vpop.xlane.xlu0 %1834  ;;  %v1854_v63 = vmul.f32 %v7796_v0, %v9435_v60 }
 0x9e0   :  { %v7798_v61 = vpop.eup %7797  ;;  %7801 = vrcp.f32 %v1835_v3 }
 0x9e1   :  { %6912 = vmatmul.msk.f32.gmra.mxu1 %vm529_vm2, %v1854_v63  ;;  %v1569_v11 = vmul.f32 %v7798_v61, %v9431_v1  ;;  %v1547_v37 = vpop.xlane.xlu2 %1546  ;;  %v7800_v44 = vpop.eup %7799  ;;  %v7625_v61 = vld [vmem:[#allocation7 + $0x1] ss:$0 sm:$0xff] }
 0x9e2   :  { %7803 = vrcp.f32 %v1547_v37  ;;  %v1570_v60 = vmul.f32 %v7800_v44, %v9420_v53 }
 0x9e3   :  { %6885 = vmatmul.msk.f32.gmra.mxu0 %vm529_vm2, %v1569_v11 }
 0x9e6   :  { %v7802_v5 = vpop.eup %7801 }
 0x9e7   :  { %v1838_v49 = vpop.xlane.xlu0 %1837  ;;  %v1855_v7 = vmul.f32 %v7802_v5, %v9447_v46 }
 0x9e8   :  { %7805 = vrcp.f32 %v1838_v49  ;;  %v7804_v25 = vpop.eup %7803 }
 0x9e9   :  { %6913 = vmatmul.msk.f32.gmra.mxu1 %vm529_vm2, %v1855_v7  ;;  %7807 = vrcp.f32 %v1841_v36  ;;  %v1571_v4 = vmul.f32 %v7804_v25, %v9449_v18  ;;  %v1553_v13 = vpop.xlane.xlu2 %1552 }
 0x9ea   :  { %7809 = vrcp.f32 %v1550_v12 }
 0x9eb   :  { %6886 = vmatmul.msk.f32.gmra.mxu0 %vm529_vm2, %v1570_v60  ;;  %7811 = vrcp.f32 %v1553_v13 }
 0x9ee   :  { %v7806_v1 = vpop.eup %7805 }
 0x9ef   :  { %v1856_v21 = vmul.f32 %v7806_v1, %v9457_v8  ;;  %v7808_v46 = vpop.eup %7807 }
 0x9f0   :  { %v7810_v56 = vpop.eup %7809  ;;  %v1857_v53 = vmul.f32 %v7808_v46, %v9433_v15 }
 0x9f1   :  { %6914 = vmatmul.msk.f32.gmra.mxu1 %vm529_vm2, %v1856_v21  ;;  %v1572_v17 = vmul.f32 %v7810_v56, %v9445_v35  ;;  %v7812_v8 = vpop.eup %7811 }
 0x9f2   :  { %v1573_v18 = vmul.f32 %v7812_v8, %v9459_v6  ;;  %v6916_v6 = vld [vmem:[%s11491_s21 + $0x10] sm:$0xff] }
 0x9f3   :  { %6887 = vmatmul.msk.f32.gmra.mxu0 %vm529_vm2, %v1571_v4  ;;  %2034 = vmatpush.msra.mxu3 %v6916_v6 }
 0x9f9   :  { %6915 = vmatmul.msk.f32.gmra.mxu1 %vm529_vm2, %v1857_v53 }
 0x9fb   :  { %6888 = vmatmul.msk.f32.gmra.mxu0 %vm529_vm2, %v1572_v17 }
 0xa01   :  { %v1923_v23 = vpop.f32.mrf.mxu1 }
 0xa02   :  { %1955 = vrot.lane.b32.xlu2 %v1923_v23, %s8430_s22  ;;  %v1556_v24 = vpop.xlane.xlu0 %1555 }
 0xa03   :  { %7813 = vrcp.f32 %v1556_v24  ;;  %6889 = vmatmul.msk.f32.gmra.mxu0 %vm529_vm2, %v1573_v18 }
 0xa09   :  { %v7814_v15 = vpop.eup %7813  ;;  %v1926_v47 = vpop.f32.mrf.mxu1 }
 0xa0a   :  { %1957 = vrot.lane.b32.xlu0 %v1926_v47, %s8430_s22  ;;  %v1574_v35 = vmul.f32 %v7814_v15, %v9470_v42 }
 0xa0c   :  { %6890 = vmatmul.msk.f32.gmra.mxu0 %vm529_vm2, %v1574_v35 }
 0xa1f   :  { %v1929_v26 = vpop.f32.mrf.mxu1 }
 0xa20   :  { %1959 = vrot.lane.b32.xlu1 %v1929_v26, %s8430_s22 }
 0xa29   :  { %v1641_v42 = vpop.f32.mrf.mxu0 }
 0xa45   :  { %v1559_v14 = vpop.xlane.xlu1 %1558 }
 0xa46   :  { %7815 = vrcp.f32 %v1559_v14 }
 0xa4c   :  { %v7816_v30 = vpop.eup %7815 }
 0xa4d   :  { %v1575_v34 = vmul.f32 %v7816_v30, %v9479_v9 }
 0xa4f   :  { %6891 = vmatmul.msk.f32.gmra.mxu0 %vm529_vm2, %v1575_v34 }
 0xa53   :  { %v1932_v2 = vpop.f32.mrf.mxu1 }
 0xa54   :  { %1961 = vrot.lane.b32.xlu0 %v1932_v2, %s8430_s22 }
 0xa5c   :  { %v1956_v33 = vpop.permute.xlu2 %1955 }
 0xa5d   :  { %v1979_v51 = vsel %vm455_vm1, %v1641_v42, %v1956_v33 }
 0xa5e   :  { %v1935_v40 = vpop.f32.mrf.mxu1  ;;  %6918 = vmatmul.msk.f32.vlgmr.msra.gmra.mxu3 %vm1035_vm3, %v1979_v51 }
 0xa5f   :  { %1963 = vrot.lane.b32.xlu2 %v1935_v40, %s8430_s22 }
 0xa60   :  { %v1644_v32 = vpop.f32.mrf.mxu0 }
 0xa66   :  { %v1938_v43 = vpop.f32.mrf.mxu1 }
 0xa67   :  { %1965 = vrot.lane.b32.xlu0 %v1938_v43, %s8430_s22 }
 0xa68   :  { %v1647_v27 = vpop.f32.mrf.mxu0 }
 0xa6e   :  { %v1941_v38 = vpop.f32.mrf.mxu1 }
 0xa6f   :  { %1967 = vrot.lane.b32.xlu1 %v1941_v38, %s8430_s22 }
 0xa70   :  { %v1650_v50 = vpop.f32.mrf.mxu0 }
 0xa76   :  { %v1944_v20 = vpop.f32.mrf.mxu1 }
 0xa77   :  { %1969 = vrot.lane.b32.xlu2 %v1944_v20, %s8430_s22 }
 0xa78   :  { %v1653_v62 = vpop.f32.mrf.mxu0 }
 0xa7c   :  { %v1958_v48 = vpop.permute.xlu0 %1957 }
 0xa7d   :  { %v1980_v58 = vsel %vm455_vm1, %v1644_v32, %v1958_v48 }
 0xa7e   :  { %6919 = vmatmul.msk.f32.gmra.mxu3 %vm1035_vm3, %v1980_v58 }
 0xa80   :  { %v1656_v0 = vpop.f32.mrf.mxu0 }
 0xa89   :  { %v1659_v11 = vpop.f32.mrf.mxu0 }
 0xa92   :  { %v1960_v57 = vpop.permute.xlu1 %1959 }
 0xa93   :  { %v1981_v9 = vsel %vm455_vm1, %v1647_v27, %v1960_v57 }
 0xa94   :  { %6920 = vmatmul.msk.f32.gmra.mxu3 %vm1035_vm3, %v1981_v9 }
 0xab9   :  { %v1964_v31 = vpop.permute.xlu2 %1963 }
 0xaba   :  { %v1983_v41 = vsel %vm455_vm1, %v1653_v62, %v1964_v31 }
 0xac6   :  { %v1962_v45 = vpop.permute.xlu0 %1961 }
 0xac7   :  { %v1982_v16 = vsel %vm455_vm1, %v1650_v50, %v1962_v45 }
 0xac8   :  { %6921 = vmatmul.msk.f32.gmra.mxu3 %vm1035_vm3, %v1982_v16 }
 0xacc   :  { %v1662_v25 = vpop.f32.mrf.mxu0 }
 0xad0   :  { %6922 = vmatmul.msk.f32.gmra.mxu3 %vm1035_vm3, %v1983_v41  ;;  %v2273_v41 = vld [vmem:[%s11494_s2 + $0x18] sm:$0xff] }
 0xad1   :  { %v1970_v60 = vpop.permute.xlu2 %1969  ;;  %2314 = vmatpush.msrb.mxu0 %v2273_v41 }
 0xad2   :  { %v1986_v12 = vsel %vm455_vm1, %v1662_v25, %v1970_v60 }
 0xad9   :  { %v1966_v3 = vpop.permute.xlu0 %1965 }
 0xada   :  { %v1984_v63 = vsel %vm455_vm1, %v1656_v0, %v1966_v3 }
 0xadb   :  { %6923 = vmatmul.msk.f32.gmra.mxu3 %vm1035_vm3, %v1984_v63  ;;  %v2272_v63 = vld [vmem:[%s11494_s2 + $0x10] sm:$0xff] }
 0xadc   :  { %2315 = vmatpush.msrb.mxu0 %v2272_v63 }
 0xae1   :  { %v1968_v36 = vpop.permute.xlu1 %1967  ;;  %v2036_v37 = vpop.f32.mrf.mxu3 }
 0xae2   :  { %v2037_v44 = vadd.f32 %v7625_v61, %v2036_v37  ;;  %v1985_v5 = vsel %vm455_vm1, %v1659_v11, %v1968_v36  ;;  %v2271_v11 = vld [vmem:[%s11494_s2 + $0x8] sm:$0xff]  ;;  %v2270_v36 = vld [vmem:[%s11494_s2] sm:$0xff] }
 0xae3   :  { %6924 = vmatmul.msk.f32.gmra.mxu3 %vm1035_vm3, %v1985_v5  ;;  %2316 = vmatpush.msrb.mxu0 %v2271_v11 }
 0xae4   :  { %v2060_v49 = vadd.f32 %v2037_v44, %v9132_v10 }
 0xae5   :  { %2317 = vmatpush.msrb.mxu0 %v2270_v36 }
 0xae6   :  { %v2072_v7 = vsel %vm365_vm0, %v2060_v49, 0.0 }
 0xae7   :  { %2073 = vadd.xlane.f32.xlu0 %v2072_v7 }
 0xaeb   :  { %6925 = vmatmul.msk.f32.gmra.mxu3 %vm1035_vm3, %v1986_v12 }
 0xb01   :  { %v2039_v1 = vpop.f32.mrf.mxu3 }
 0xb02   :  { %v2040_v21 = vadd.f32 %v7625_v61, %v2039_v1 }
 0xb04   :  { %v2061_v4 = vadd.f32 %v2040_v21, %v9140_v54 }
 0xb06   :  { %v2075_v46 = vsel %vm365_vm0, %v2061_v4, 0.0 }
 0xb07   :  { %2076 = vadd.xlane.f32.xlu1 %v2075_v46 }
 0xb17   :  { %v2042_v13 = vpop.f32.mrf.mxu3 }
 0xb18   :  { %v2043_v56 = vadd.f32 %v7625_v61, %v2042_v13 }
 0xb1a   :  { %v2062_v10 = vadd.f32 %v2043_v56, %v9148_v19 }
 0xb1c   :  { %v2078_v53 = vsel %vm365_vm0, %v2062_v10, 0.0 }
 0xb1d   :  { %2079 = vadd.xlane.f32.xlu2 %v2078_v53 }
 0xb4b   :  { %v2045_v17 = vpop.f32.mrf.mxu3 }
 0xb4c   :  { %v2046_v8 = vadd.f32 %v7625_v61, %v2045_v17 }
 0xb4e   :  { %v2063_v23 = vadd.f32 %v2046_v8, %v9155_v39 }
 0xb50   :  { %v2081_v18 = vsel %vm365_vm0, %v2063_v23, 0.0 }
 0xb51   :  { %2082 = vadd.xlane.f32.xlu0 %v2081_v18 }
 0xb53   :  { %v2048_v24 = vpop.f32.mrf.mxu3 }
 0xb54   :  { %v2049_v15 = vadd.f32 %v7625_v61, %v2048_v24 }
 0xb56   :  { %v2064_v54 = vadd.f32 %v2049_v15, %v9163_v52 }
 0xb58   :  { %v2084_v47 = vsel %vm365_vm0, %v2064_v54, 0.0 }
 0xb59   :  { %2085 = vadd.xlane.f32.xlu1 %v2084_v47  ;;  %v9601_v47 = vld [vmem:[%s11492_s16 + $0x1] ss:$0 sm:$0xff] }
 0xb5a   :  { %v2074_v35 = vpop.xlane.xlu0 %2073 }
 0xb5b   :  { %v2096_v19 = vmul.f32 %v2074_v35, %v9064_v55 }
 0xb5d   :  { %v9544_v26 = vsub.f32 %v2060_v49, %v2096_v19 }
 0xb5e   :  { %v2051_v28 = vpop.f32.mrf.mxu3 }
 0xb5f   :  { %v2052_v6 = vadd.f32 %v7625_v61, %v2051_v28  ;;  %v2112_v39 = vmul.f32 %v9544_v26, %v9544_v26  ;;  %v9607_v28 = vld [vmem:[%s11493_s18 + $0x1] ss:$0 sm:$0xff] }
 0xb61   :  { %v2120_v14 = vsel %vm365_vm0, %v2112_v39, 0.0  ;;  %v2065_v30 = vadd.f32 %v2052_v6, %v9170_v59 }
 0xb62   :  { %2121 = vadd.xlane.f32.xlu0 %v2120_v14 }
 0xb63   :  { %v2087_v52 = vsel %vm365_vm0, %v2065_v30, 0.0 }
 0xb64   :  { %2088 = vadd.xlane.f32.xlu2 %v2087_v52 }
 0xb66   :  { %v2054_v34 = vpop.f32.mrf.mxu3 }
 0xb67   :  { %v2055_v2 = vadd.f32 %v7625_v61, %v2054_v34 }
 0xb69   :  { %v2066_v42 = vadd.f32 %v2055_v2, %v9178_v29 }
 0xb6b   :  { %v2090_v33 = vsel %vm365_vm0, %v2066_v42, 0.0 }
 0xb6c   :  { %2091 = vadd.xlane.f32.xlu1 %v2090_v33 }
 0xb6e   :  { %v2057_v51 = vpop.f32.mrf.mxu3 }
 0xb6f   :  { %v2058_v40 = vadd.f32 %v7625_v61, %v2057_v51 }
 0xb71   :  { %v9554_v43 = vadd.f32 %v2058_v40, %v9186_v22 }
 0xb73   :  { %v2093_v38 = vsel %vm365_vm0, %v9554_v43, 0.0 }
 0xb74   :  { %2094 = vadd.xlane.f32.xlu0 %v2093_v38 }
 0xb7a   :  { %v2077_v59 = vpop.xlane.xlu1 %2076 }
 0xb7b   :  { %v2097_v20 = vmul.f32 %v2077_v59, %v9064_v55 }
 0xb7d   :  { %v9559_v32 = vsub.f32 %v2061_v4, %v2097_v20 }
 0xb7f   :  { %v2113_v29 = vmul.f32 %v9559_v32, %v9559_v32 }
 0xb81   :  { %v2123_v48 = vsel %vm365_vm0, %v2113_v29, 0.0 }
 0xb82   :  { %2124 = vadd.xlane.f32.xlu2 %v2123_v48 }
 0xb90   :  { %v2080_v58 = vpop.xlane.xlu2 %2079 }
 0xb91   :  { %v2098_v22 = vmul.f32 %v2080_v58, %v9064_v55 }
 0xb93   :  { %v9565_v27 = vsub.f32 %v2062_v10, %v2098_v22 }
 0xb95   :  { %v2114_v57 = vmul.f32 %v9565_v27, %v9565_v27 }
 0xb97   :  { %v2126_v9 = vsel %vm365_vm0, %v2114_v57, 0.0 }
 0xb98   :  { %2127 = vadd.xlane.f32.xlu1 %v2126_v9 }
 0xbc4   :  { %v2083_v50 = vpop.xlane.xlu0 %2082 }
 0xbc5   :  { %v2099_v45 = vmul.f32 %v2083_v50, %v9064_v55 }
 0xbc7   :  { %v9571_v16 = vsub.f32 %v2063_v23, %v2099_v45 }
 0xbc9   :  { %v2115_v62 = vmul.f32 %v9571_v16, %v9571_v16 }
 0xbcb   :  { %v2129_v31 = vsel %vm365_vm0, %v2115_v62, 0.0 }
 0xbcc   :  { %v2086_v0 = vpop.xlane.xlu1 %2085  ;;  %2130 = vadd.xlane.f32.xlu2 %v2129_v31 }
 0xbcd   :  { %v2100_v3 = vmul.f32 %v2086_v0, %v9064_v55 }
 0xbcf   :  { %v9579_v61 = vsub.f32 %v2064_v54, %v2100_v3 }
 0xbd1   :  { %v2116_v37 = vmul.f32 %v9579_v61, %v9579_v61 }
 0xbd3   :  { %v2132_v44 = vsel %vm365_vm0, %v2116_v37, 0.0 }
 0xbd4   :  { %2133 = vadd.xlane.f32.xlu0 %v2132_v44 }
 0xbd5   :  { %v2122_v5 = vpop.xlane.xlu0 %2121 }
 0xbd6   :  { %v2144_v49 = vmul.f32 %v2122_v5, %v9064_v55 }
 0xbd7   :  { %v2089_v7 = vpop.xlane.xlu2 %2088 }
 0xbd8   :  { %v2152_v60 = vadd.f32 1e-05, %v2144_v49  ;;  %v2101_v25 = vmul.f32 %v2089_v7, %v9064_v55 }
 0xbda   :  { %7817 = vrsqrt.f32 %v2152_v60  ;;  %v9588_v12 = vsub.f32 %v2065_v30, %v2101_v25  ;;  %vm2166_vm6 = vweird.f32 %v2152_v60 }
 0xbdc   :  { %v2117_v1 = vmul.f32 %v9588_v12, %v9588_v12 }
 0xbde   :  { %v2135_v21 = vsel %vm365_vm0, %v2117_v1, 0.0 }
 0xbdf   :  { %2136 = vadd.xlane.f32.xlu1 %v2135_v21  ;;  %v2092_v4 = vpop.xlane.xlu1 %2091  ;;  %v2398_v21 = vld [vmem:[%s11495_s29 + $0x38] sm:$0xff] }
 0xbe0   :  { %v7818_v46 = vpop.eup %7817  ;;  %v2102_v13 = vmul.f32 %v2092_v4, %v9064_v55  ;;  %2435 = vmatpush.msrb.mxu2 %v2398_v21 }
 0xbe1   :  { %v2161_v56 = vmul.f32 %v7818_v46, %v2152_v60  ;;  %vm2167_vm5 = vweird.f32 %v7818_v46 }
 0xbe2   :  { %v9594_v10 = vsub.f32 %v2066_v42, %v2102_v13  ;;  %vm2168_vm7 = vmor %vm2166_vm6, %vm2167_vm5 }
 0xbe3   :  { %v2162_v53 = vmul.f32 %v7818_v46, %v2161_v56 }
 0xbe4   :  { %v2118_v17 = vmul.f32 %v9594_v10, %v9594_v10 }
 0xbe5   :  { %v2163_v8 = vmul.f32 0.5, %v2162_v53 }
 0xbe6   :  { %v2138_v23 = vsel %vm365_vm0, %v2118_v17, 0.0  ;;  %v2397_v17 = vld [vmem:[%s11495_s29 + $0x30] sm:$0xff] }
 0xbe7   :  { %v2164_v18 = vsub.f32 1.5, %v2163_v8  ;;  %2139 = vadd.xlane.f32.xlu2 %v2138_v23  ;;  %v2095_v24 = vpop.xlane.xlu0 %2094  ;;  %2436 = vmatpush.msrb.mxu2 %v2397_v17 }
 0xbe8   :  { %v2103_v15 = vmul.f32 %v2095_v24, %v9064_v55  ;;  %v2396_v24 = vld [vmem:[%s11495_s29 + $0x28] sm:$0xff] }
 0xbe9   :  { %v2165_v54 = vmul.f32 %v7818_v46, %v2164_v18  ;;  %2437 = vmatpush.msrb.mxu2 %v2396_v24 }
 0xbea   :  { %v9604_v35 = vsub.f32 %v9554_v43, %v2103_v15 }
 0xbeb   :  { %v2169_v19 = vsel %vm2168_vm7, %v7818_v46, %v2165_v54 }
 0xbec   :  { %v2240_v6 = vmul.f32 %v2169_v19, %v9544_v26  ;;  %v2119_v39 = vmul.f32 %v9604_v35, %v9604_v35  ;;  %v2395_v19 = vld [vmem:[%s11495_s29 + $0x20] sm:$0xff] }
 0xbed   :  { %2438 = vmatpush.msrb.mxu2 %v2395_v19 }
 0xbee   :  { %v2251_v14 = vmul.f32 %v9601_v47, %v2240_v6  ;;  %v2141_v30 = vsel %vm365_vm0, %v2119_v39, 0.0 }
 0xbef   :  { %2142 = vadd.xlane.f32.xlu0 %v2141_v30 }
 0xbf0   :  { %v9615_v52 = vadd.f32 %v9607_v28, %v2251_v14  ;;  %v2394_v14 = vld [vmem:[%s11495_s29 + $0x18] sm:$0xff] }
 0xbf1   :  { %2439 = vmatpush.msrb.mxu2 %v2394_v14 }
 0xbf2   :  { %6928 = vmatmul.msk.f32.vlgmr.msrb.gmra.mxu0 %vm365_vm0, %v9615_v52 }
 0xbf5   :  { %v2125_v34 = vpop.xlane.xlu2 %2124 }
 0xbf6   :  { %v2145_v2 = vmul.f32 %v2125_v34, %v9064_v55 }
 0xbf8   :  { %v2153_v42 = vadd.f32 1e-05, %v2145_v2 }
 0xbfa   :  { %7819 = vrsqrt.f32 %v2153_v42  ;;  %vm2176_vm9 = vweird.f32 %v2153_v42 }
 0xc00   :  { %v7820_v26 = vpop.eup %7819 }
 0xc01   :  { %v2171_v33 = vmul.f32 %v7820_v26, %v2153_v42  ;;  %vm2177_vm8 = vweird.f32 %v7820_v26  ;;  %v2393_v42 = vld [vmem:[%s11495_s29 + $0x10] sm:$0xff] }
 0xc02   :  { %vm2178_vm10 = vmor %vm2176_vm9, %vm2177_vm8  ;;  %2440 = vmatpush.msrb.mxu2 %v2393_v42 }
 0xc03   :  { %v2172_v51 = vmul.f32 %v7820_v26, %v2171_v33 }
 0xc05   :  { %v2173_v40 = vmul.f32 0.5, %v2172_v51 }
 0xc07   :  { %v2174_v43 = vsub.f32 1.5, %v2173_v40  ;;  %v2392_v40 = vld [vmem:[%s11495_s29 + $0x8] sm:$0xff] }
 0xc08   :  { %2441 = vmatpush.msrb.mxu2 %v2392_v40 }
 0xc09   :  { %v2175_v38 = vmul.f32 %v7820_v26, %v2174_v43 }
 0xc0b   :  { %v2179_v59 = vsel %vm2178_vm10, %v7820_v26, %v2175_v38  ;;  %v2128_v20 = vpop.xlane.xlu1 %2127 }
 0xc0c   :  { %v2241_v29 = vmul.f32 %v2179_v59, %v9559_v32  ;;  %v2146_v48 = vmul.f32 %v2128_v20, %v9064_v55  ;;  %v2391_v59 = vld [vmem:[%s11495_s29] sm:$0xff] }
 0xc0d   :  { %2442 = vmatpush.msrb.mxu2 %v2391_v59 }
 0xc0e   :  { %v2154_v58 = vadd.f32 1e-05, %v2146_v48  ;;  %v2252_v22 = vmul.f32 %v9601_v47, %v2241_v29 }
 0xc10   :  { %7821 = vrsqrt.f32 %v2154_v58  ;;  %v9624_v57 = vadd.f32 %v9607_v28, %v2252_v22  ;;  %vm2186_vm12 = vweird.f32 %v2154_v58 }
 0xc12   :  { %6929 = vmatmul.msk.f32.gmra.mxu0 %vm365_vm0, %v9624_v57 }
 0xc16   :  { %v7822_v9 = vpop.eup %7821 }
 0xc17   :  { %v2181_v50 = vmul.f32 %v7822_v9, %v2154_v58  ;;  %vm2187_vm11 = vweird.f32 %v7822_v9 }
 0xc18   :  { %vm2188_vm13 = vmor %vm2186_vm12, %vm2187_vm11 }
 0xc19   :  { %v2182_v45 = vmul.f32 %v7822_v9, %v2181_v50 }
 0xc1b   :  { %v2183_v62 = vmul.f32 0.5, %v2182_v45 }
 0xc1d   :  { %v2184_v31 = vsub.f32 1.5, %v2183_v62 }
 0xc1f   :  { %v2185_v41 = vmul.f32 %v7822_v9, %v2184_v31 }
 0xc21   :  { %v2189_v32 = vsel %vm2188_vm13, %v7822_v9, %v2185_v41 }
 0xc22   :  { %v2242_v0 = vmul.f32 %v2189_v32, %v9565_v27 }
 0xc24   :  { %v2253_v3 = vmul.f32 %v9601_v47, %v2242_v0 }
 0xc26   :  { %v9631_v63 = vadd.f32 %v9607_v28, %v2253_v3 }
 0xc28   :  { %6930 = vmatmul.msk.f32.gmra.mxu0 %vm365_vm0, %v9631_v63 }
 0xc3f   :  { %v2131_v11 = vpop.xlane.xlu2 %2130 }
 0xc40   :  { %v2147_v36 = vmul.f32 %v2131_v11, %v9064_v55 }
 0xc42   :  { %v2155_v37 = vadd.f32 1e-05, %v2147_v36 }
 0xc44   :  { %7823 = vrsqrt.f32 %v2155_v37  ;;  %vm2196_vm15 = vweird.f32 %v2155_v37 }
 0xc47   :  { %v2134_v44 = vpop.xlane.xlu0 %2133 }
 0xc48   :  { %v2148_v5 = vmul.f32 %v2134_v44, %v9064_v55 }
 0xc4a   :  { %v7824_v49 = vpop.eup %7823  ;;  %v2156_v27 = vadd.f32 1e-05, %v2148_v5 }
 0xc4b   :  { %v2191_v7 = vmul.f32 %v7824_v49, %v2155_v37  ;;  %vm2197_vm14 = vweird.f32 %v7824_v49  ;;  %v9665_v37 = vld [vmem:[%s11496_s0] ss:$0 sm:$0xff] }
 0xc4c   :  { %7825 = vrsqrt.f32 %v2156_v27  ;;  %vm2198_vm4 = vmor %vm2196_vm15, %vm2197_vm14  ;;  %vm2206_vm6 = vweird.f32 %v2156_v27 }
 0xc4d   :  { %v2192_v60 = vmul.f32 %v7824_v49, %v2191_v7 }
 0xc4f   :  { %v2193_v25 = vmul.f32 0.5, %v2192_v60 }
 0xc51   :  { %v2194_v1 = vsub.f32 1.5, %v2193_v25 }
 0xc52   :  { %v7826_v4 = vpop.eup %7825  ;;  %v2137_v46 = vpop.xlane.xlu1 %2136 }
 0xc53   :  { %v2195_v13 = vmul.f32 %v7824_v49, %v2194_v1  ;;  %v2201_v56 = vmul.f32 %v7826_v4, %v2156_v27  ;;  %v2149_v53 = vmul.f32 %v2137_v46, %v9064_v55  ;;  %vm2207_vm5 = vweird.f32 %v7826_v4 }
 0xc54   :  { %vm2208_vm7 = vmor %vm2206_vm6, %vm2207_vm5 }
 0xc55   :  { %v2199_v8 = vsel %vm2198_vm4, %v7824_v49, %v2195_v13  ;;  %v2202_v23 = vmul.f32 %v7826_v4, %v2201_v56  ;;  %v2157_v18 = vadd.f32 1e-05, %v2149_v53 }
 0xc56   :  { %v2243_v15 = vmul.f32 %v2199_v8, %v9571_v16 }
 0xc57   :  { %v2203_v54 = vmul.f32 0.5, %v2202_v23  ;;  %7827 = vrsqrt.f32 %v2157_v18  ;;  %vm2216_vm9 = vweird.f32 %v2157_v18 }
 0xc58   :  { %v2254_v6 = vmul.f32 %v9601_v47, %v2243_v15 }
 0xc59   :  { %v2204_v39 = vsub.f32 1.5, %v2203_v54 }
 0xc5a   :  { %v2140_v30 = vpop.xlane.xlu2 %2139  ;;  %v9646_v34 = vadd.f32 %v9607_v28, %v2254_v6 }
 0xc5b   :  { %v2205_v2 = vmul.f32 %v7826_v4, %v2204_v39  ;;  %v2150_v16 = vmul.f32 %v2140_v30, %v9064_v55 }
 0xc5c   :  { %6931 = vmatmul.msk.f32.gmra.mxu0 %vm365_vm0, %v9646_v34 }
 0xc5d   :  { %v7828_v26 = vpop.eup %7827  ;;  %v2209_v33 = vsel %vm2208_vm7, %v7826_v4, %v2205_v2  ;;  %v2158_v51 = vadd.f32 1e-05, %v2150_v16 }
 0xc5e   :  { %v2244_v43 = vmul.f32 %v2209_v33, %v9579_v61  ;;  %v2211_v38 = vmul.f32 %v7828_v26, %v2157_v18  ;;  %vm2217_vm8 = vweird.f32 %v7828_v26 }
 0xc5f   :  { %7829 = vrsqrt.f32 %v2158_v51  ;;  %vm2218_vm10 = vmor %vm2216_vm9, %vm2217_vm8  ;;  %vm2226_vm12 = vweird.f32 %v2158_v51 }
 0xc60   :  { %v2212_v20 = vmul.f32 %v7828_v26, %v2211_v38  ;;  %v2255_v29 = vmul.f32 %v9601_v47, %v2244_v43 }
 0xc62   :  { %v2213_v48 = vmul.f32 0.5, %v2212_v20  ;;  %v2143_v58 = vpop.xlane.xlu0 %2142  ;;  %v9657_v22 = vadd.f32 %v9607_v28, %v2255_v29 }
 0xc63   :  { %v2151_v9 = vmul.f32 %v2143_v58, %v9064_v55 }
 0xc64   :  { %v2214_v50 = vsub.f32 1.5, %v2213_v48  ;;  %6932 = vmatmul.msk.f32.gmra.mxu0 %vm365_vm0, %v9657_v22 }
 0xc65   :  { %v7830_v61 = vpop.eup %7829  ;;  %v2159_v45 = vadd.f32 1e-05, %v2151_v9 }
 0xc66   :  { %v2215_v62 = vmul.f32 %v7828_v26, %v2214_v50  ;;  %v2221_v31 = vmul.f32 %v7830_v61, %v2158_v51  ;;  %vm2227_vm11 = vweird.f32 %v7830_v61 }
 0xc67   :  { %7831 = vrsqrt.f32 %v2159_v45  ;;  %vm2228_vm13 = vmor %vm2226_vm12, %vm2227_vm11  ;;  %vm2236_vm15 = vweird.f32 %v2159_v45 }
 0xc68   :  { %v2219_v41 = vsel %vm2218_vm10, %v7828_v26, %v2215_v62  ;;  %v2222_v32 = vmul.f32 %v7830_v61, %v2221_v31 }
 0xc69   :  { %v2245_v0 = vmul.f32 %v2219_v41, %v9588_v12 }
 0xc6a   :  { %v2223_v3 = vmul.f32 0.5, %v2222_v32 }
 0xc6b   :  { %v2256_v11 = vmul.f32 %v9601_v47, %v2245_v0 }
 0xc6c   :  { %v2224_v36 = vsub.f32 1.5, %v2223_v3 }
 0xc6d   :  { %v7832_v44 = vpop.eup %7831  ;;  %v9668_v5 = vadd.f32 %v9607_v28, %v2256_v11 }
 0xc6e   :  { %v2225_v49 = vmul.f32 %v7830_v61, %v2224_v36  ;;  %v2231_v27 = vmul.f32 %v7832_v44, %v2159_v45  ;;  %vm2237_vm14 = vweird.f32 %v7832_v44 }
 0xc6f   :  { %v2319_v7 = vpop.f32.mrf.mxu0  ;;  %6933 = vmatmul.msk.f32.gmra.mxu0 %vm365_vm0, %v9668_v5  ;;  %vm2238_vm4 = vmor %vm2236_vm15, %vm2237_vm14 }
 0xc70   :  { %v2229_v12 = vsel %vm2228_vm13, %v7830_v61, %v2225_v49  ;;  %v2232_v60 = vmul.f32 %v7832_v44, %v2231_v27  ;;  %v2320_v25 = vadd.f32 %v9665_v37, %v2319_v7 }
 0xc71   :  { %v2246_v1 = vmul.f32 %v2229_v12, %v9594_v10 }
 0xc72   :  { %v2233_v21 = vmul.f32 0.5, %v2232_v60  ;;  %v2351_v4 = vmin.f32 %v2320_v25, 0.0  ;;  %vm2343_vm5 = vcmp.gt.f32.partialorder %v2320_v25, 0.0 }
 0xc73   :  { %v2257_v46 = vmul.f32 %v9601_v47, %v2246_v1 }
 0xc74   :  { %v2234_v13 = vsub.f32 1.5, %v2233_v21  ;;  %v2359_v56 = vmul.f32 1.442695, %v2351_v4  ;;  %v7629_v21 = vld [vmem:[#allocation8] ss:$0 sm:$0xff] }
 0xc75   :  { %v9676_v53 = vadd.f32 %v9607_v28, %v2257_v46 }
 0xc76   :  { %v2235_v17 = vmul.f32 %v7832_v44, %v2234_v13  ;;  %7833 = vpow2.f32 %v2359_v56 }
 0xc77   :  { %6934 = vmatmul.msk.f32.gmra.mxu0 %vm365_vm0, %v9676_v53 }
 0xc78   :  { %v2239_v8 = vsel %vm2238_vm4, %v7832_v44, %v2235_v17 }
 0xc79   :  { %v2247_v10 = vmul.f32 %v2239_v8, %v9604_v35 }
 0xc7b   :  { %v2258_v23 = vmul.f32 %v9601_v47, %v2247_v10 }
 0xc7c   :  { %v7834_v18 = vpop.eup %7833 }
 0xc7d   :  { %v6936_v24 = vadd.f32 -1.0, %v7834_v18  ;;  %v9683_v15 = vadd.f32 %v9607_v28, %v2258_v23 }
 0xc7f   :  { %v2383_v54 = vsel %vm2343_vm5, %v2320_v25, %v6936_v24  ;;  %6935 = vmatmul.msk.f32.gmra.mxu0 %vm365_vm0, %v9683_v15 }
 0xc80   :  { %6944 = vmatmul.msk.f32.vlgmr.msrb.gmra.mxu2 %vm529_vm2, %v2383_v54 }
 0xc8f   :  { %v2322_v19 = vpop.f32.mrf.mxu0 }
 0xc90   :  { %v2323_v6 = vadd.f32 %v9665_v37, %v2322_v19 }
 0xc92   :  { %v2352_v39 = vmin.f32 %v2323_v6, 0.0  ;;  %vm2344_vm6 = vcmp.gt.f32.partialorder %v2323_v6, 0.0 }
 0xc94   :  { %v2361_v14 = vmul.f32 1.442695, %v2352_v39 }
 0xc96   :  { %7835 = vpow2.f32 %v2361_v14 }
 0xc9c   :  { %v7836_v35 = vpop.eup %7835 }
 0xc9d   :  { %v6937_v47 = vadd.f32 -1.0, %v7836_v35 }
 0xc9f   :  { %v2384_v30 = vsel %vm2344_vm6, %v2323_v6, %v6937_v47 }
 0xca0   :  { %6945 = vmatmul.msk.f32.gmra.mxu2 %vm529_vm2, %v2384_v30 }
 0xca5   :  { %v2325_v28 = vpop.f32.mrf.mxu0 }
 0xca6   :  { %v2326_v2 = vadd.f32 %v9665_v37, %v2325_v28 }
 0xca8   :  { %v2353_v16 = vmin.f32 %v2326_v2, 0.0  ;;  %vm2345_vm7 = vcmp.gt.f32.partialorder %v2326_v2, 0.0 }
 0xcaa   :  { %v2363_v42 = vmul.f32 1.442695, %v2353_v16 }
 0xcac   :  { %7837 = vpow2.f32 %v2363_v42 }
 0xcb2   :  { %v7838_v26 = vpop.eup %7837 }
 0xcb3   :  { %v6938_v33 = vadd.f32 -1.0, %v7838_v26 }
 0xcb5   :  { %v2385_v51 = vsel %vm2345_vm7, %v2326_v2, %v6938_v33 }
 0xcb6   :  { %6946 = vmatmul.msk.f32.gmra.mxu2 %vm529_vm2, %v2385_v51 }
 0xcd9   :  { %v2328_v40 = vpop.f32.mrf.mxu0 }
 0xcda   :  { %v2329_v43 = vadd.f32 %v9665_v37, %v2328_v40 }
 0xcdc   :  { %v2354_v38 = vmin.f32 %v2329_v43, 0.0  ;;  %vm2346_vm8 = vcmp.gt.f32.partialorder %v2329_v43, 0.0 }
 0xcde   :  { %v2365_v59 = vmul.f32 1.442695, %v2354_v38 }
 0xce0   :  { %7839 = vpow2.f32 %v2365_v59 }
 0xce1   :  { %v2331_v20 = vpop.f32.mrf.mxu0 }
 0xce2   :  { %v2332_v29 = vadd.f32 %v9665_v37, %v2331_v20 }
 0xce4   :  { %v2355_v48 = vmin.f32 %v2332_v29, 0.0  ;;  %vm2347_vm9 = vcmp.gt.f32.partialorder %v2332_v29, 0.0 }
 0xce6   :  { %v7840_v58 = vpop.eup %7839  ;;  %v2367_v9 = vmul.f32 1.442695, %v2355_v48 }
 0xce7   :  { %v6939_v50 = vadd.f32 -1.0, %v7840_v58 }
 0xce8   :  { %7841 = vpow2.f32 %v2367_v9 }
 0xce9   :  { %v2386_v61 = vsel %vm2346_vm8, %v2329_v43, %v6939_v50 }
 0xcea   :  { %6947 = vmatmul.msk.f32.gmra.mxu2 %vm529_vm2, %v2386_v61 }
 0xcec   :  { %v2334_v45 = vpop.f32.mrf.mxu0 }
 0xced   :  { %v2335_v62 = vadd.f32 %v9665_v37, %v2334_v45 }
 0xcee   :  { %v7842_v31 = vpop.eup %7841 }
 0xcef   :  { %v2356_v41 = vmin.f32 %v2335_v62, 0.0  ;;  %v6940_v32 = vadd.f32 -1.0, %v7842_v31  ;;  %vm2348_vm10 = vcmp.gt.f32.partialorder %v2335_v62, 0.0 }
 0xcf1   :  { %v2369_v0 = vmul.f32 1.442695, %v2356_v41  ;;  %v2387_v3 = vsel %vm2347_vm9, %v2332_v29, %v6940_v32 }
 0xcf2   :  { %6948 = vmatmul.msk.f32.gmra.mxu2 %vm529_vm2, %v2387_v3 }
 0xcf3   :  { %7843 = vpow2.f32 %v2369_v0 }
 0xcf4   :  { %v2337_v11 = vpop.f32.mrf.mxu0 }
 0xcf5   :  { %v2338_v36 = vadd.f32 %v9665_v37, %v2337_v11 }
 0xcf7   :  { %v2357_v44 = vmin.f32 %v2338_v36, 0.0  ;;  %vm2349_vm11 = vcmp.gt.f32.partialorder %v2338_v36, 0.0 }
 0xcf9   :  { %v7844_v49 = vpop.eup %7843  ;;  %v2371_v27 = vmul.f32 1.442695, %v2357_v44 }
 0xcfa   :  { %v6941_v7 = vadd.f32 -1.0, %v7844_v49 }
 0xcfb   :  { %7845 = vpow2.f32 %v2371_v27 }
 0xcfc   :  { %v2340_v12 = vpop.f32.mrf.mxu0  ;;  %v2388_v60 = vsel %vm2348_vm10, %v2335_v62, %v6941_v7 }
 0xcfd   :  { %v2341_v25 = vadd.f32 %v9665_v37, %v2340_v12  ;;  %6949 = vmatmul.msk.f32.gmra.mxu2 %vm529_vm2, %v2388_v60  ;;  %v6957_v60 = vld [vmem:[%s8499_s8 + $0x58] sm:$0xff] }
 0xcfe   :  { %2724 = vmatpush.msrb.mxu1 %v6957_v60 }
 0xcff   :  { %v2358_v1 = vmin.f32 %v2341_v25, 0.0  ;;  %vm2350_vm12 = vcmp.gt.f32.partialorder %v2341_v25, 0.0 }
 0xd01   :  { %v7846_v4 = vpop.eup %7845  ;;  %v2373_v46 = vmul.f32 1.442695, %v2358_v1 }
 0xd02   :  { %v6942_v13 = vadd.f32 -1.0, %v7846_v4 }
 0xd03   :  { %7847 = vpow2.f32 %v2373_v46  ;;  %v2444_v56 = vpop.f32.mrf.mxu2  ;;  %v6955_v46 = vld [vmem:[%s8499_s8 + $0x48] sm:$0xff] }
 0xd04   :  { %v2445_v17 = vadd.f32 %v7629_v21, %v2444_v56  ;;  %v2389_v8 = vsel %vm2349_vm11, %v2338_v36, %v6942_v13  ;;  %v6954_v13 = vld [vmem:[%s8499_s8 + $0x40] sm:$0xff] }
 0xd05   :  { %6950 = vmatmul.msk.f32.gmra.mxu2 %vm529_vm2, %v2389_v8 }
 0xd06   :  { %v2468_v10 = vadd.f32 %v2445_v17, %v9615_v52 }
 0xd08   :  { %v2480_v23 = vsel %vm365_vm0, %v2468_v10, 0.0 }
 0xd09   :  { %v7848_v18 = vpop.eup %7847  ;;  %2481 = vadd.xlane.f32.xlu1 %v2480_v23 }
 0xd0a   :  { %v6943_v37 = vadd.f32 -1.0, %v7848_v18 }
 0xd0c   :  { %v2390_v24 = vsel %vm2350_vm12, %v2341_v25, %v6943_v37 }
 0xd0d   :  { %6951 = vmatmul.msk.f32.gmra.mxu2 %vm529_vm2, %v2390_v24 }
 0xd23   :  { %v2447_v54 = vpop.f32.mrf.mxu2 }
 0xd24   :  { %v2448_v19 = vadd.f32 %v7629_v21, %v2447_v54 }
 0xd26   :  { %v2469_v6 = vadd.f32 %v2448_v19, %v9624_v57 }
 0xd28   :  { %v2483_v39 = vsel %vm365_vm0, %v2469_v6, 0.0 }
 0xd29   :  { %2484 = vadd.xlane.f32.xlu2 %v2483_v39 }
 0xd39   :  { %v2450_v14 = vpop.f32.mrf.mxu2 }
 0xd3a   :  { %v2451_v35 = vadd.f32 %v7629_v21, %v2450_v14 }
 0xd3c   :  { %v2470_v52 = vadd.f32 %v2451_v35, %v9631_v63 }
 0xd3e   :  { %v2486_v47 = vsel %vm365_vm0, %v2470_v52, 0.0 }
 0xd3f   :  { %2487 = vadd.xlane.f32.xlu0 %v2486_v47 }
 0xd6d   :  { %v2453_v30 = vpop.f32.mrf.mxu2 }
 0xd6e   :  { %v2454_v28 = vadd.f32 %v7629_v21, %v2453_v30 }
 0xd70   :  { %v2471_v2 = vadd.f32 %v2454_v28, %v9646_v34 }
 0xd72   :  { %v2489_v16 = vsel %vm365_vm0, %v2471_v2, 0.0 }
 0xd73   :  { %2490 = vadd.xlane.f32.xlu1 %v2489_v16 }
 0xd75   :  { %v2456_v42 = vpop.f32.mrf.mxu2 }
 0xd76   :  { %v2457_v26 = vadd.f32 %v7629_v21, %v2456_v42 }
 0xd78   :  { %v2472_v57 = vadd.f32 %v2457_v26, %v9657_v22 }
 0xd7a   :  { %v2492_v33 = vsel %vm365_vm0, %v2472_v57, 0.0 }
 0xd7b   :  { %2493 = vadd.xlane.f32.xlu2 %v2492_v33  ;;  %v9770_v33 = vld [vmem:[%s11492_s16 + $0x2] ss:$0 sm:$0xff] }
 0xd7c   :  { %v2482_v51 = vpop.xlane.xlu1 %2481 }
 0xd7d   :  { %v2504_v63 = vmul.f32 %v2482_v51, %v9064_v55 }
 0xd7f   :  { %v9713_v40 = vsub.f32 %v2468_v10, %v2504_v63 }
 0xd80   :  { %v2459_v43 = vpop.f32.mrf.mxu2 }
 0xd81   :  { %v2460_v38 = vadd.f32 %v7629_v21, %v2459_v43  ;;  %v2520_v34 = vmul.f32 %v9713_v40, %v9713_v40  ;;  %v9776_v43 = vld [vmem:[%s11493_s18 + $0x2] ss:$0 sm:$0xff] }
 0xd83   :  { %v2528_v59 = vsel %vm365_vm0, %v2520_v34, 0.0  ;;  %v2473_v20 = vadd.f32 %v2460_v38, %v9668_v5 }
 0xd84   :  { %2529 = vadd.xlane.f32.xlu1 %v2528_v59 }
 0xd85   :  { %v2495_v22 = vsel %vm365_vm0, %v2473_v20, 0.0 }
 0xd86   :  { %2496 = vadd.xlane.f32.xlu0 %v2495_v22 }
 0xd88   :  { %v2462_v29 = vpop.f32.mrf.mxu2 }
 0xd89   :  { %v2463_v48 = vadd.f32 %v7629_v21, %v2462_v29 }
 0xd8b   :  { %v2474_v58 = vadd.f32 %v2463_v48, %v9676_v53 }
 0xd8d   :  { %v2498_v9 = vsel %vm365_vm0, %v2474_v58, 0.0 }
 0xd8e   :  { %2499 = vadd.xlane.f32.xlu2 %v2498_v9 }
 0xd90   :  { %v2465_v50 = vpop.f32.mrf.mxu2 }
 0xd91   :  { %v2466_v61 = vadd.f32 %v7629_v21, %v2465_v50  ;;  %v6956_v21 = vld [vmem:[%s8499_s8 + $0x50] sm:$0xff] }
 0xd92   :  { %2725 = vmatpush.msrb.mxu1 %v6956_v21 }
 0xd93   :  { %v9723_v45 = vadd.f32 %v2466_v61, %v9683_v15 }
 0xd94   :  { %2726 = vmatpush.msrb.mxu1 %v6955_v46 }
 0xd95   :  { %v2501_v62 = vsel %vm365_vm0, %v9723_v45, 0.0 }
 0xd96   :  { %2502 = vadd.xlane.f32.xlu1 %v2501_v62  ;;  %2727 = vmatpush.msrb.mxu1 %v6954_v13 }
 0xd9c   :  { %v2485_v5 = vpop.xlane.xlu2 %2484 }
 0xd9d   :  { %v2505_v31 = vmul.f32 %v2485_v5, %v9064_v55 }
 0xd9f   :  { %v9728_v41 = vsub.f32 %v2469_v6, %v2505_v31 }
 0xda1   :  { %v2521_v53 = vmul.f32 %v9728_v41, %v9728_v41 }
 0xda3   :  { %v2531_v32 = vsel %vm365_vm0, %v2521_v53, 0.0 }
 0xda4   :  { %2532 = vadd.xlane.f32.xlu0 %v2531_v32 }
 0xdb2   :  { %v2488_v0 = vpop.xlane.xlu0 %2487 }
 0xdb3   :  { %v2506_v15 = vmul.f32 %v2488_v0, %v9064_v55 }
 0xdb5   :  { %v9734_v3 = vsub.f32 %v2470_v52, %v2506_v15 }
 0xdb7   :  { %v2522_v11 = vmul.f32 %v9734_v3, %v9734_v3 }
 0xdb9   :  { %v2534_v36 = vsel %vm365_vm0, %v2522_v11, 0.0 }
 0xdba   :  { %2535 = vadd.xlane.f32.xlu2 %v2534_v36 }
 0xde6   :  { %v2491_v44 = vpop.xlane.xlu1 %2490 }
 0xde7   :  { %v2507_v49 = vmul.f32 %v2491_v44, %v9064_v55 }
 0xde9   :  { %v9740_v27 = vsub.f32 %v2471_v2, %v2507_v49 }
 0xdeb   :  { %v2523_v7 = vmul.f32 %v9740_v27, %v9740_v27 }
 0xded   :  { %v2537_v12 = vsel %vm365_vm0, %v2523_v7, 0.0 }
 0xdee   :  { %2538 = vadd.xlane.f32.xlu0 %v2537_v12  ;;  %v2494_v25 = vpop.xlane.xlu2 %2493 }
 0xdef   :  { %v2508_v1 = vmul.f32 %v2494_v25, %v9064_v55 }
 0xdf1   :  { %v9748_v4 = vsub.f32 %v2472_v57, %v2508_v1 }
 0xdf3   :  { %v2524_v56 = vmul.f32 %v9748_v4, %v9748_v4 }
 0xdf5   :  { %v2540_v17 = vsel %vm365_vm0, %v2524_v56, 0.0 }
 0xdf6   :  { %2541 = vadd.xlane.f32.xlu1 %v2540_v17 }
 0xdf7   :  { %v2530_v8 = vpop.xlane.xlu1 %2529 }
 0xdf8   :  { %v2552_v10 = vmul.f32 %v2530_v8, %v9064_v55 }
 0xdf9   :  { %v2497_v23 = vpop.xlane.xlu0 %2496 }
 0xdfa   :  { %v2560_v18 = vadd.f32 1e-05, %v2552_v10  ;;  %v2509_v37 = vmul.f32 %v2497_v23, %v9064_v55 }
 0xdfc   :  { %7849 = vrsqrt.f32 %v2560_v18  ;;  %v9757_v24 = vsub.f32 %v2473_v20, %v2509_v37  ;;  %vm2574_vm14 = vweird.f32 %v2560_v18 }
 0xdfe   :  { %v2525_v54 = vmul.f32 %v9757_v24, %v9757_v24 }
 0xe00   :  { %v2543_v19 = vsel %vm365_vm0, %v2525_v54, 0.0 }
 0xe01   :  { %v2500_v6 = vpop.xlane.xlu2 %2499  ;;  %2544 = vadd.xlane.f32.xlu2 %v2543_v19 }
 0xe02   :  { %v7850_v39 = vpop.eup %7849  ;;  %v2510_v14 = vmul.f32 %v2500_v6, %v9064_v55 }
 0xe03   :  { %v2569_v35 = vmul.f32 %v7850_v39, %v2560_v18  ;;  %vm2575_vm13 = vweird.f32 %v7850_v39 }
 0xe04   :  { %v9763_v52 = vsub.f32 %v2474_v58, %v2510_v14  ;;  %vm2576_vm15 = vmor %vm2574_vm14, %vm2575_vm13 }
 0xe05   :  { %v2570_v47 = vmul.f32 %v7850_v39, %v2569_v35 }
 0xe06   :  { %v2526_v30 = vmul.f32 %v9763_v52, %v9763_v52 }
 0xe07   :  { %v2571_v28 = vmul.f32 0.5, %v2570_v47 }
 0xe08   :  { %v2546_v2 = vsel %vm365_vm0, %v2526_v30, 0.0 }
 0xe09   :  { %v2572_v16 = vsub.f32 1.5, %v2571_v28  ;;  %2547 = vadd.xlane.f32.xlu0 %v2546_v2  ;;  %v2503_v42 = vpop.xlane.xlu1 %2502 }
 0xe0a   :  { %v2511_v26 = vmul.f32 %v2503_v42, %v9064_v55 }
 0xe0b   :  { %v2573_v57 = vmul.f32 %v7850_v39, %v2572_v16 }
 0xe0c   :  { %v9773_v51 = vsub.f32 %v9723_v45, %v2511_v26 }
 0xe0d   :  { %v2577_v63 = vsel %vm2576_vm15, %v7850_v39, %v2573_v57 }
 0xe0e   :  { %v2648_v38 = vmul.f32 %v2577_v63, %v9713_v40  ;;  %v2527_v34 = vmul.f32 %v9773_v51, %v9773_v51 }
 0xe10   :  { %v2659_v59 = vmul.f32 %v9770_v33, %v2648_v38  ;;  %v2549_v20 = vsel %vm365_vm0, %v2527_v34, 0.0 }
 0xe11   :  { %2550 = vadd.xlane.f32.xlu1 %v2549_v20 }
 0xe12   :  { %v9784_v22 = vadd.f32 %v9776_v43, %v2659_v59 }
 0xe14   :  { %6959 = vmatmul.msk.f32.vlgmr.msrb.gmra.mxu1 %vm365_vm0, %v9784_v22 }
 0xe17   :  { %v2533_v29 = vpop.xlane.xlu0 %2532 }
 0xe18   :  { %v2553_v48 = vmul.f32 %v2533_v29, %v9064_v55 }
 0xe1a   :  { %v2561_v58 = vadd.f32 1e-05, %v2553_v48 }
 0xe1c   :  { %7851 = vrsqrt.f32 %v2561_v58  ;;  %vm2584_vm5 = vweird.f32 %v2561_v58 }
 0xe22   :  { %v7852_v40 = vpop.eup %7851 }
 0xe23   :  { %v2579_v9 = vmul.f32 %v7852_v40, %v2561_v58  ;;  %vm2585_vm4 = vweird.f32 %v7852_v40 }
 0xe24   :  { %vm2586_vm6 = vmor %vm2584_vm5, %vm2585_vm4 }
 0xe25   :  { %v2580_v50 = vmul.f32 %v7852_v40, %v2579_v9 }
 0xe27   :  { %v2581_v61 = vmul.f32 0.5, %v2580_v50 }
 0xe29   :  { %v2582_v45 = vsub.f32 1.5, %v2581_v61 }
 0xe2b   :  { %v2583_v62 = vmul.f32 %v7852_v40, %v2582_v45 }
 0xe2d   :  { %v2587_v5 = vsel %vm2586_vm6, %v7852_v40, %v2583_v62  ;;  %v2536_v31 = vpop.xlane.xlu2 %2535 }
 0xe2e   :  { %v2649_v53 = vmul.f32 %v2587_v5, %v9728_v41  ;;  %v2554_v32 = vmul.f32 %v2536_v31, %v9064_v55 }
 0xe30   :  { %v2562_v0 = vadd.f32 1e-05, %v2554_v32  ;;  %v2660_v15 = vmul.f32 %v9770_v33, %v2649_v53 }
 0xe32   :  { %7853 = vrsqrt.f32 %v2562_v0  ;;  %v9793_v11 = vadd.f32 %v9776_v43, %v2660_v15  ;;  %vm2594_vm8 = vweird.f32 %v2562_v0 }
 0xe34   :  { %6960 = vmatmul.msk.f32.gmra.mxu1 %vm365_vm0, %v9793_v11 }
 0xe38   :  { %v7854_v36 = vpop.eup %7853 }
 0xe39   :  { %v2589_v44 = vmul.f32 %v7854_v36, %v2562_v0  ;;  %vm2595_vm7 = vweird.f32 %v7854_v36 }
 0xe3a   :  { %vm2596_vm9 = vmor %vm2594_vm8, %vm2595_vm7 }
 0xe3b   :  { %v2590_v49 = vmul.f32 %v7854_v36, %v2589_v44 }
 0xe3d   :  { %v2591_v7 = vmul.f32 0.5, %v2590_v49 }
 0xe3f   :  { %v2592_v12 = vsub.f32 1.5, %v2591_v7 }
 0xe41   :  { %v2593_v60 = vmul.f32 %v7854_v36, %v2592_v12 }
 0xe43   :  { %v2597_v41 = vsel %vm2596_vm9, %v7854_v36, %v2593_v60 }
 0xe44   :  { %v2650_v25 = vmul.f32 %v2597_v41, %v9734_v3 }
 0xe46   :  { %v2661_v1 = vmul.f32 %v9770_v33, %v2650_v25 }
 0xe48   :  { %v9800_v21 = vadd.f32 %v9776_v43, %v2661_v1 }
 0xe4a   :  { %6961 = vmatmul.msk.f32.gmra.mxu1 %vm365_vm0, %v9800_v21 }
 0xe61   :  { %v2539_v46 = vpop.xlane.xlu0 %2538 }
 0xe62   :  { %v2555_v13 = vmul.f32 %v2539_v46, %v9064_v55 }
 0xe64   :  { %v2563_v56 = vadd.f32 1e-05, %v2555_v13 }
 0xe66   :  { %7855 = vrsqrt.f32 %v2563_v56  ;;  %vm2604_vm11 = vweird.f32 %v2563_v56 }
 0xe69   :  { %v2542_v17 = vpop.xlane.xlu1 %2541 }
 0xe6a   :  { %v2556_v8 = vmul.f32 %v2542_v17, %v9064_v55 }
 0xe6c   :  { %v7856_v10 = vpop.eup %7855  ;;  %v2564_v23 = vadd.f32 1e-05, %v2556_v8 }
 0xe6d   :  { %v2599_v18 = vmul.f32 %v7856_v10, %v2563_v56  ;;  %vm2605_vm10 = vweird.f32 %v7856_v10 }
 0xe6e   :  { %7857 = vrsqrt.f32 %v2564_v23  ;;  %vm2606_vm12 = vmor %vm2604_vm11, %vm2605_vm10  ;;  %vm2614_vm14 = vweird.f32 %v2564_v23 }
 0xe6f   :  { %v2600_v3 = vmul.f32 %v7856_v10, %v2599_v18 }
 0xe71   :  { %v2601_v37 = vmul.f32 0.5, %v2600_v3 }
 0xe73   :  { %v2602_v54 = vsub.f32 1.5, %v2601_v37 }
 0xe74   :  { %v7858_v19 = vpop.eup %7857  ;;  %v2545_v6 = vpop.xlane.xlu2 %2544 }
 0xe75   :  { %v2603_v39 = vmul.f32 %v7856_v10, %v2602_v54  ;;  %v2609_v14 = vmul.f32 %v7858_v19, %v2564_v23  ;;  %v2557_v35 = vmul.f32 %v2545_v6, %v9064_v55  ;;  %vm2615_vm13 = vweird.f32 %v7858_v19 }
 0xe76   :  { %vm2616_vm15 = vmor %vm2614_vm14, %vm2615_vm13 }
 0xe77   :  { %v2607_v47 = vsel %vm2606_vm12, %v7856_v10, %v2603_v39  ;;  %v2610_v30 = vmul.f32 %v7858_v19, %v2609_v14  ;;  %v2565_v28 = vadd.f32 1e-05, %v2557_v35  ;;  %v7632_v39 = vld [vmem:[%s8504_s14 + $0x2] ss:$0 sm:$0xff] }
 0xe78   :  { %v2651_v2 = vmul.f32 %v2607_v47, %v9740_v27 }
 0xe79   :  { %v2611_v16 = vmul.f32 0.5, %v2610_v30  ;;  %7859 = vrsqrt.f32 %v2565_v28  ;;  %vm2624_vm5 = vweird.f32 %v2565_v28 }
 0xe7a   :  { %v2662_v42 = vmul.f32 %v9770_v33, %v2651_v2 }
 0xe7b   :  { %v2612_v26 = vsub.f32 1.5, %v2611_v16 }
 0xe7c   :  { %v2548_v57 = vpop.xlane.xlu0 %2547  ;;  %v9810_v63 = vadd.f32 %v9776_v43, %v2662_v42 }
 0xe7d   :  { %v2613_v38 = vmul.f32 %v7858_v19, %v2612_v26  ;;  %v2558_v34 = vmul.f32 %v2548_v57, %v9064_v55 }
 0xe7e   :  { %6962 = vmatmul.msk.f32.gmra.mxu1 %vm365_vm0, %v9810_v63 }
 0xe7f   :  { %v7860_v59 = vpop.eup %7859  ;;  %v2617_v27 = vsel %vm2616_vm15, %v7858_v19, %v2613_v38  ;;  %v2566_v20 = vadd.f32 1e-05, %v2558_v34 }
 0xe80   :  { %v2652_v29 = vmul.f32 %v2617_v27, %v9748_v4  ;;  %v2619_v48 = vmul.f32 %v7860_v59, %v2565_v28  ;;  %vm2625_vm4 = vweird.f32 %v7860_v59 }
 0xe81   :  { %7861 = vrsqrt.f32 %v2566_v20  ;;  %vm2626_vm6 = vmor %vm2624_vm5, %vm2625_vm4  ;;  %vm2634_vm8 = vweird.f32 %v2566_v20 }
 0xe82   :  { %v2620_v58 = vmul.f32 %v7860_v59, %v2619_v48  ;;  %v2663_v40 = vmul.f32 %v9770_v33, %v2652_v29 }
 0xe84   :  { %v2621_v9 = vmul.f32 0.5, %v2620_v58  ;;  %v2551_v50 = vpop.xlane.xlu1 %2550  ;;  %v9818_v61 = vadd.f32 %v9776_v43, %v2663_v40 }
 0xe85   :  { %v2559_v45 = vmul.f32 %v2551_v50, %v9064_v55 }
 0xe86   :  { %v2622_v62 = vsub.f32 1.5, %v2621_v9  ;;  %6963 = vmatmul.msk.f32.gmra.mxu1 %vm365_vm0, %v9818_v61 }
 0xe87   :  { %v7862_v5 = vpop.eup %7861  ;;  %v2567_v31 = vadd.f32 1e-05, %v2559_v45 }
 0xe88   :  { %v2623_v4 = vmul.f32 %v7860_v59, %v2622_v62  ;;  %v2629_v53 = vmul.f32 %v7862_v5, %v2566_v20  ;;  %vm2635_vm7 = vweird.f32 %v7862_v5 }
 0xe89   :  { %7863 = vrsqrt.f32 %v2567_v31  ;;  %vm2636_vm9 = vmor %vm2634_vm8, %vm2635_vm7  ;;  %vm2644_vm11 = vweird.f32 %v2567_v31 }
 0xe8a   :  { %v2627_v32 = vsel %vm2626_vm6, %v7860_v59, %v2623_v4  ;;  %v2630_v0 = vmul.f32 %v7862_v5, %v2629_v53 }
 0xe8b   :  { %v2653_v15 = vmul.f32 %v2627_v32, %v9757_v24 }
 0xe8c   :  { %v2631_v36 = vmul.f32 0.5, %v2630_v0 }
 0xe8d   :  { %v2664_v44 = vmul.f32 %v9770_v33, %v2653_v15 }
 0xe8e   :  { %v2632_v49 = vsub.f32 1.5, %v2631_v36 }
 0xe8f   :  { %v7864_v7 = vpop.eup %7863  ;;  %v9826_v12 = vadd.f32 %v9776_v43, %v2664_v44 }
 0xe90   :  { %v2633_v60 = vmul.f32 %v7862_v5, %v2632_v49  ;;  %v2639_v41 = vmul.f32 %v7864_v7, %v2567_v31  ;;  %vm2645_vm10 = vweird.f32 %v7864_v7 }
 0xe91   :  { %6964 = vmatmul.msk.f32.gmra.mxu1 %vm365_vm0, %v9826_v12  ;;  %vm2646_vm12 = vmor %vm2644_vm11, %vm2645_vm10  ;;  %v2729_v3 = vpop.f32.mrf.mxu1 }
 0xe92   :  { %v2637_v25 = vsel %vm2636_vm9, %v7862_v5, %v2633_v60  ;;  %v2640_v1 = vmul.f32 %v7864_v7, %v2639_v41  ;;  %v9869_v16 = vadd.f32 %v7632_v39, %v2729_v3 }
 0xe93   :  { %v2654_v24 = vmul.f32 %v2637_v25, %v9763_v52 }
 0xe94   :  { %v2641_v46 = vmul.f32 0.5, %v2640_v1 }
 0xe95   :  { %v2665_v13 = vmul.f32 %v9770_v33, %v2654_v24 }
 0xe96   :  { %v2642_v56 = vsub.f32 1.5, %v2641_v46 }
 0xe97   :  { %v9833_v17 = vadd.f32 %v9776_v43, %v2665_v13 }
 0xe98   :  { %v2643_v8 = vmul.f32 %v7864_v7, %v2642_v56  ;;  %v8123_v56 = vld [vmem:[#allocation2] sm:$0xff] }
 0xe99   :  { %6965 = vmatmul.msk.f32.gmra.mxu1 %vm365_vm0, %v9833_v17 }
 0xe9a   :  { %v2647_v10 = vsel %vm2646_vm12, %v7864_v7, %v2643_v8 }
 0xe9b   :  { %v2655_v23 = vmul.f32 %v2647_v10, %v9773_v51 }
 0xe9d   :  { %v2666_v52 = vmul.f32 %v9770_v33, %v2655_v23 }
 0xe9f   :  { %v9840_v18 = vadd.f32 %v9776_v43, %v2666_v52  ;;  %v8124_v52 = vld [vmem:[#allocation2 + $0x8] sm:$0xff] }
 0xea1   :  { %6966 = vmatmul.msk.f32.gmra.mxu1 %vm365_vm0, %v9840_v18 }
 0xeb1   :  { %v2732_v37 = vpop.f32.mrf.mxu1 }
 0xeb2   :  { %v9849_v33 = vadd.f32 %v7632_v39, %v2732_v37 }
 0xec7   :  { %v2735_v54 = vpop.f32.mrf.mxu1 }
 0xec8   :  { %v9877_v42 = vadd.f32 %v7632_v39, %v2735_v54 }
 0xefb   :  { %v2738_v19 = vpop.f32.mrf.mxu1 }
 0xefc   :  { %v9859_v28 = vadd.f32 %v7632_v39, %v2738_v19 }
 0xf03   :  { %v2741_v6 = vpop.f32.mrf.mxu1 }
 0xf04   :  { %v9867_v2 = vadd.f32 %v7632_v39, %v2741_v6 }
 0xf0e   :  { %v2744_v14 = vpop.f32.mrf.mxu1 }
 0xf0f   :  { %v9845_v35 = vadd.f32 %v7632_v39, %v2744_v14 }
 0xf11   :  { %3053 = vrot.lane.b32.xlu1 %v9845_v35, %s8442_s9  ;;  %v9907_v26 = vpack.i.bf16 %v9867_v2, %v9845_v35 }
 0xf16   :  { %v2747_v51 = vpop.f32.mrf.mxu1 }
 0xf17   :  { %v9851_v43 = vadd.f32 %v7632_v39, %v2747_v51 }
 0xf19   :  { %3045 = vrot.lane.b32.xlu1 %v9849_v33, %s8442_s9  ;;  %3055 = vrot.lane.b32.xlu0 %v9851_v43, %s8442_s9 }
 0xf1e   :  { %v2750_v47 = vpop.f32.mrf.mxu1 }
 0xf1f   :  { %v9857_v30 = vadd.f32 %v7632_v39, %v2750_v47 }
 0xf21   :  { %2771 = vrot.lane.b32.xlu1 %v9845_v35, %s8444_s17  ;;  %3057 = vrot.lane.b32.xlu2 %v9857_v30, %s8442_s9  ;;  %v9917_v57 = vpack.i.bf16 %v9851_v43, %v9857_v30 }
 0xf22   :  { %3049 = vrot.lane.b32.xlu0 %v9859_v28, %s8442_s9 }
 0xf29   :  { %2767 = vrot.lane.b32.xlu1 %v9859_v28, %s8444_s17  ;;  %3051 = vrot.lane.b32.xlu2 %v9867_v2, %s8442_s9 }
 0xf2a   :  { %3043 = vrot.lane.b32.xlu0 %v9869_v16, %s8442_s9 }
 0xf31   :  { %2775 = vrot.lane.b32.xlu1 %v9857_v30, %s8444_s17  ;;  %3047 = vrot.lane.b32.xlu2 %v9877_v42, %s8442_s9 }
 0xf32   :  { %3029 = vrot.lane.b32.xlu0 %v9849_v33, %s8443_s13 }
 0xf39   :  { %2763 = vrot.lane.b32.xlu1 %v9849_v33, %s8444_s17  ;;  %3027 = vrot.lane.b32.xlu2 %v9869_v16, %s8443_s13 }
 0xf3a   :  { %3031 = vrot.lane.b32.xlu0 %v9877_v42, %s8443_s13 }
 0xf41   :  { %3037 = vrot.lane.b32.xlu1 %v9845_v35, %s8443_s13  ;;  %2773 = vrot.lane.b32.xlu2 %v9851_v43, %s8444_s17 }
 0xf42   :  { %3033 = vrot.lane.b32.xlu0 %v9859_v28, %s8443_s13 }
 0xf49   :  { %2769 = vrot.lane.b32.xlu2 %v9867_v2, %s8444_s17 }
 0xf4a   :  { %3035 = vrot.lane.b32.xlu0 %v9867_v2, %s8443_s13 }
 0xf51   :  { %2765 = vrot.lane.b32.xlu2 %v9877_v42, %s8444_s17 }
 0xf52   :  { %3039 = vrot.lane.b32.xlu0 %v9851_v43, %s8443_s13 }
 0xf59   :  { %2761 = vrot.lane.b32.xlu2 %v9869_v16, %s8444_s17 }
 0xf5a   :  { %7439 = vrot.lane.b32.xlu0 %v9907_v26, %s8445_s6 }
 0xf61   :  { %3041 = vrot.lane.b32.xlu2 %v9857_v30, %s8443_s13 }
 0xf69   :  { %7444 = vrot.lane.b32.xlu2 %v9917_v57, %s8445_s6 }
 0xf7b   :  { %v3058_v38 = vpop.permute.xlu2 %3057 }
 0xf7c   :  { %6991 = vmatpush.xpose.msk.msra.mxu2 %vm455_vm1, %v3058_v38 }
 0xf83   :  { %v3054_v34 = vpop.permute.xlu1 %3053  ;;  %v3052_v59 = vpop.permute.xlu2 %3051 }
 0xf8b   :  { %v3046_v27 = vpop.permute.xlu1 %3045  ;;  %v3048_v20 = vpop.permute.xlu2 %3047 }
 0xf8c   :  { %v3056_v29 = vpop.permute.xlu0 %3055 }
 0xf8d   :  { %6992 = vmatpush.xpose.msk.msra.mxu2 %vm455_vm1, %v3056_v29 }
 0xf91   :  { %6993 = vmatpush.xpose.msk.msra.mxu2 %vm455_vm1, %v3054_v34  ;;  %v8126_v34 = vld [vmem:[#allocation2 + $0x20] sm:$0xff] }
 0xf93   :  { %v2772_v48 = vpop.permute.xlu1 %2771  ;;  %v3028_v58 = vpop.permute.xlu2 %3027 }
 0xf94   :  { %v3050_v40 = vpop.permute.xlu0 %3049 }
 0xf95   :  { %6994 = vmatpush.xpose.msk.msra.mxu2 %vm455_vm1, %v3052_v59 }
 0xf99   :  { %6995 = vmatpush.xpose.msk.msra.mxu2 %vm455_vm1, %v3050_v40 }
 0xf9b   :  { %v2768_v9 = vpop.permute.xlu1 %2767  ;;  %v2774_v50 = vpop.permute.xlu2 %2773 }
 0xf9c   :  { %v3044_v45 = vpop.permute.xlu0 %3043 }
 0xf9d   :  { %6996 = vmatpush.xpose.msk.msra.mxu2 %vm455_vm1, %v3048_v20 }
 0xfa1   :  { %6997 = vmatpush.xpose.msk.msra.mxu2 %vm455_vm1, %v3046_v27 }
 0xfa3   :  { %v2776_v62 = vpop.permute.xlu1 %2775  ;;  %v2770_v5 = vpop.permute.xlu2 %2769 }
 0xfa4   :  { %v3030_v31 = vpop.permute.xlu0 %3029  ;;  %6967 = vmatpush.xpose.msk.msrb.mxu3 %vm455_vm1, %v2776_v62  ;;  %v9997_v62 = vpack.i.bf16 %v9869_v16, %v9849_v33 }
 0xfa5   :  { %6998 = vmatpush.xpose.msk.msra.mxu2 %vm455_vm1, %v3044_v45 }
 0xfa8   :  { %6999 = vmatmul.msk.f32.vlgmr.msra.gmra.mxu2 %vm455_vm1, %v3028_v58  ;;  %6968 = vmatpush.xpose.msk.msrb.mxu3 %vm455_vm1, %v2774_v50  ;;  %v8127_v58 = vld [vmem:[#allocation2 + $0x18] sm:$0xff]  ;;  %v9991_v50 = vpack.i.bf16 %v9877_v42, %v9859_v28 }
 0xfab   :  { %v2766_v4 = vpop.permute.xlu2 %2765  ;;  %v2764_v15 = vpop.permute.xlu1 %2763 }
 0xfac   :  { %v3032_v53 = vpop.permute.xlu0 %3031  ;;  %6969 = vmatpush.xpose.msk.msrb.mxu3 %vm455_vm1, %v2772_v48 }
 0xfb0   :  { %7000 = vmatmul.msk.f32.gmra.mxu2 %vm455_vm1, %v3030_v31  ;;  %6970 = vmatpush.xpose.msk.msrb.mxu3 %vm455_vm1, %v2770_v5 }
 0xfb3   :  { %v2762_v32 = vpop.permute.xlu2 %2761  ;;  %v3038_v24 = vpop.permute.xlu1 %3037 }
 0xfb4   :  { %v3034_v0 = vpop.permute.xlu0 %3033  ;;  %6971 = vmatpush.xpose.msk.msrb.mxu3 %vm455_vm1, %v2768_v9 }
 0xfb8   :  { %7001 = vmatmul.msk.f32.gmra.mxu2 %vm455_vm1, %v3032_v53  ;;  %6972 = vmatpush.xpose.msk.msrb.mxu3 %vm455_vm1, %v2766_v4 }
 0xfbb   :  { %v3042_v36 = vpop.permute.xlu2 %3041 }
 0xfbc   :  { %v3036_v44 = vpop.permute.xlu0 %3035  ;;  %6973 = vmatpush.xpose.msk.msrb.mxu3 %vm455_vm1, %v2764_v15 }
 0xfc0   :  { %7002 = vmatmul.msk.f32.gmra.mxu2 %vm455_vm1, %v3034_v0  ;;  %6974 = vmatpush.xpose.msk.msrb.mxu3 %vm455_vm1, %v2762_v32  ;;  %v10009_v32 = vld [vmem:[#allocation2 + $0x30] sm:$0xff] }
 0xfc3   :  { %6975 = vmatmul.msk.f32.vlgmr.msrb.gmra.mxu3 %vm455_vm1, %v9869_v16  ;;  %v7445_v49 = vpop.permute.xlu2 %7444  ;;  %v8129_v16 = vld [vmem:[#allocation2 + $0x28] sm:$0xff] }
 0xfc4   :  { %v7446_v7 = vunpack.i.l.bf16 %v7445_v49  ;;  %v3040_v60 = vpop.permute.xlu0 %3039  ;;  %v7447_v41 = vunpack.i.h.bf16 %v7445_v49  ;;  %v8130_v49 = vld [vmem:[#allocation2 + $0x38] sm:$0xff] }
 0xfc6   :  { %3276 = vmatpush.msra.mxu1 %v7446_v7 }
 0xfc8   :  { %7003 = vmatmul.msk.f32.gmra.mxu2 %vm455_vm1, %v3036_v44  ;;  %3277 = vmatpush.msra.mxu1 %v7447_v41 }
 0xfcb   :  { %6976 = vmatmul.msk.f32.gmra.mxu3 %vm455_vm1, %v9849_v33 }
 0xfcc   :  { %v7440_v25 = vpop.permute.xlu0 %7439 }
 0xfcd   :  { %v7441_v1 = vunpack.i.l.bf16 %v7440_v25  ;;  %v7442_v46 = vunpack.i.h.bf16 %v7440_v25 }
 0xfcf   :  { %3278 = vmatpush.msra.mxu1 %v7441_v1 }
 0xfd0   :  { %7004 = vmatmul.msk.f32.gmra.mxu2 %vm455_vm1, %v3038_v24 }
 0xfd1   :  { %3279 = vmatpush.msra.mxu1 %v7442_v46 }
 0xfd3   :  { %6977 = vmatmul.msk.f32.gmra.mxu3 %vm455_vm1, %v9877_v42 }
 0xfd8   :  { %7005 = vmatmul.msk.f32.gmra.mxu2 %vm455_vm1, %v3040_v60 }
 0xfdb   :  { %6978 = vmatmul.msk.f32.gmra.mxu3 %vm455_vm1, %v9859_v28 }
 0xfe0   :  { %7006 = vmatmul.msk.f32.gmra.mxu2 %vm455_vm1, %v3042_v36 }
 0xfe3   :  { %6979 = vmatmul.msk.f32.gmra.mxu3 %vm455_vm1, %v9867_v2 }
 0xfeb   :  { %6980 = vmatmul.msk.f32.gmra.mxu3 %vm455_vm1, %v9845_v35  ;;  %v8125_v35 = vld [vmem:[#allocation2 + $0x10] sm:$0xff] }
 0xff3   :  { %6981 = vmatmul.msk.f32.gmra.mxu3 %vm455_vm1, %v9851_v43 }
 0xffb   :  { %6982 = vmatmul.msk.f32.gmra.mxu3 %vm455_vm1, %v9857_v30 }
0x102b   :  { %v3108_v13 = vpop.f32.mrf.mxu2 }
0x102c   :  { %v9961_v8 = vadd.f32 %v8123_v56, %v3108_v13 }
0x102e   :  { %v3132_v10 = vsel %vm529_vm2, %v9961_v8, -inf }
0x102f   :  { %3133 = vmax.xlane.f32.xlu1 %v3132_v10 }
0x1033   :  { %v3111_v23 = vpop.f32.mrf.mxu2 }
0x1034   :  { %v9965_v3 = vadd.f32 %v8124_v52, %v3111_v23 }
0x1036   :  { %v3135_v37 = vsel %vm529_vm2, %v9965_v3, -inf }
0x1037   :  { %3136 = vmax.xlane.f32.xlu0 %v3135_v37 }
0x103b   :  { %v3114_v54 = vpop.f32.mrf.mxu2 }
0x103c   :  { %v3115_v51 = vadd.f32 %v8125_v35, %v3114_v54 }
0x103e   :  { %v3138_v2 = vsel %vm529_vm2, %v3115_v51, -inf }
0x1043   :  { %v3117_v39 = vpop.f32.mrf.mxu2 }
0x1044   :  { %v9983_v40 = vadd.f32 %v8127_v58, %v3117_v39 }
0x1046   :  { %v2826_v19 = vpop.f32.mrf.mxu3  ;;  %v3141_v9 = vsel %vm529_vm2, %v9983_v40, -inf }
0x1047   :  { %v2827_v6 = vadd.f32 %v8123_v56, %v2826_v19 }
0x1049   :  { %v2850_v14 = vsel %vm529_vm2, %v2827_v6, -inf }
0x104a   :  { %2851 = vmax.xlane.f32.xlu2 %v2850_v14 }
0x104b   :  { %v3120_v38 = vpop.f32.mrf.mxu2 }
0x104c   :  { %v9975_v59 = vadd.f32 %v8126_v34, %v3120_v38 }
0x104e   :  { %v2829_v43 = vpop.f32.mrf.mxu3  ;;  %v3144_v48 = vsel %vm529_vm2, %v9975_v59, -inf }
0x104f   :  { %v9970_v47 = vadd.f32 %v8124_v52, %v2829_v43 }
0x1051   :  { %v2853_v30 = vsel %vm529_vm2, %v9970_v47, -inf }
0x1052   :  { %2854 = vmax.xlane.f32.xlu0 %v2853_v30  ;;  %3139 = vmax.xlane.f32.xlu2 %v3138_v2 }
0x1053   :  { %v10001_v4 = vpop.f32.mrf.mxu2 }
0x1056   :  { %v2832_v27 = vpop.f32.mrf.mxu3 }
0x1057   :  { %v9977_v20 = vadd.f32 %v8125_v35, %v2832_v27 }
0x1059   :  { %v2856_v29 = vsel %vm529_vm2, %v9977_v20, -inf }
0x105a   :  { %2857 = vmax.xlane.f32.xlu1 %v2856_v29  ;;  %3145 = vmax.xlane.f32.xlu0 %v3144_v48 }
0x105b   :  { %v10005_v28 = vpop.f32.mrf.mxu2 }
0x105e   :  { %v2835_v45 = vpop.f32.mrf.mxu3 }
0x105f   :  { %v10022_v60 = vadd.f32 %v8127_v58, %v2835_v45 }
0x1061   :  { %v2859_v25 = vsel %vm529_vm2, %v10022_v60, -inf }
0x1062   :  { %3142 = vmax.xlane.f32.xlu1 %v3141_v9 }
0x1063   :  { %v3129_v44 = vpop.f32.mrf.mxu2 }
0x1064   :  { %v10020_v7 = vadd.f32 %v8130_v49, %v3129_v44 }
0x1066   :  { %v2838_v5 = vpop.f32.mrf.mxu3  ;;  %v3153_v41 = vsel %vm529_vm2, %v10020_v7, -inf }
0x106a   :  { %7459 = vrot.lane.b32.xlu2 %v9917_v57, %s8446_s27  ;;  %v10003_v57 = vadd.f32 %v8126_v34, %v2838_v5 }
0x106c   :  { %v2862_v42 = vsel %vm529_vm2, %v10003_v57, -inf }
0x106e   :  { %7449 = vrot.lane.b32.xlu0 %v9991_v50, %s8445_s6  ;;  %v2841_v31 = vpop.f32.mrf.mxu3 }
0x106f   :  { %v10014_v0 = vadd.f32 %v8129_v16, %v2841_v31 }
0x1071   :  { %v2865_v36 = vsel %vm529_vm2, %v10014_v0, -inf }
0x1076   :  { %v2844_v53 = vpop.f32.mrf.mxu3 }
0x1077   :  { %v10012_v33 = vadd.f32 %v10009_v32, %v2844_v53 }
0x1079   :  { %v2868_v15 = vsel %vm529_vm2, %v10012_v33, -inf }
0x107b   :  { %7454 = vrot.lane.b32.xlu1 %v9997_v62, %s8445_s6 }
0x107e   :  { %v2847_v38 = vpop.f32.mrf.mxu3 }
0x107f   :  { %v10045_v27 = vadd.f32 %v8130_v49, %v2847_v38 }
0x1081   :  { %v2871_v45 = vsel %vm529_vm2, %v10045_v27, -inf }
0x1093   :  { %2863 = vmax.xlane.f32.xlu2 %v2862_v42 }
0x1098   :  { %2869 = vmax.xlane.f32.xlu0 %v2868_v15 }
0x109b   :  { %2866 = vmax.xlane.f32.xlu2 %v2865_v36  ;;  %v10056_v36 = vadd.f32 %v8129_v16, %v10001_v4  ;;  %v3127_v16 = vadd.f32 %v10009_v32, %v10005_v28 }
0x109d   :  { %v3147_v49 = vsel %vm529_vm2, %v10056_v36, -inf }
0x10a2   :  { %v3134_v10 = vpop.xlane.xlu1 %3133 }
0x10a3   :  { %3154 = vmax.xlane.f32.xlu2 %v3153_v41 }
0x10a5   :  { %2860 = vmax.xlane.f32.xlu1 %v2859_v25 }
0x10aa   :  { %v3137_v24 = vpop.xlane.xlu0 %3136 }
0x10ab   :  { %v3157_v56 = vsub.f32 %v9965_v3, %v3137_v24 }
0x10ad   :  { %v3166_v23 = vmul.f32 1.442695, %v3157_v56 }
0x10bd   :  { %v2852_v1 = vpop.xlane.xlu2 %2851 }
0x10be   :  { %v2874_v46 = vsub.f32 %v2827_v6, %v2852_v1  ;;  %7464 = vrot.lane.b32.xlu1 %v9907_v26, %s8446_s27  ;;  %v3150_v1 = vsel %vm529_vm2, %v3127_v16, -inf }
0x10c0   :  { %v2882_v13 = vmul.f32 1.442695, %v2874_v46 }
0x10c2   :  { %7865 = vpow2.f32 %v2882_v13 }
0x10c3   :  { %7867 = vpow2.f32 %v3166_v23 }
0x10c5   :  { %v3140_v52 = vpop.xlane.xlu2 %3139  ;;  %v2855_v6 = vpop.xlane.xlu0 %2854 }
0x10c6   :  { %v3158_v37 = vsub.f32 %v3115_v51, %v3140_v52  ;;  %v2875_v13 = vsub.f32 %v9970_v47, %v2855_v6 }
0x10c8   :  { %v10031_v54 = vpop.eup %7865  ;;  %v3168_v19 = vmul.f32 1.442695, %v3158_v37  ;;  %v2884_v56 = vmul.f32 1.442695, %v2875_v13 }
0x10c9   :  { %v2898_v39 = vsel %vm529_vm2, %v10031_v54, 0.0  ;;  %v10037_v3 = vpop.eup %7867 }
0x10ca   :  { %7869 = vpow2.f32 %v3168_v19  ;;  %2899 = vadd.xlane.f32.xlu0 %v2898_v39  ;;  %v3183_v2 = vsel %vm529_vm2, %v10037_v3, 0.0 }
0x10cd   :  { %v10035_v14 = vpop.xlane.xlu1 %2857  ;;  %v7460_v26 = vpop.permute.xlu2 %7459 }
0x10ce   :  { %v7461_v35 = vunpack.i.l.bf16 %v7460_v26  ;;  %v7462_v30 = vunpack.i.h.bf16 %v7460_v26  ;;  %v3146_v29 = vpop.xlane.xlu0 %3145  ;;  %v2876_v23 = vsub.f32 %v9977_v20, %v10035_v14 }
0x10cf   :  { %v3160_v9 = vsub.f32 %v9975_v59, %v3146_v29  ;;  %v3156_v59 = vsub.f32 %v9961_v8, %v3134_v10 }
0x10d0   :  { %v10039_v43 = vpop.eup %7869  ;;  %2994 = vmatpush.msra.mxu0 %v7461_v35  ;;  %v2886_v37 = vmul.f32 1.442695, %v2876_v23 }
0x10d1   :  { %v3186_v51 = vsel %vm529_vm2, %v10039_v43, 0.0  ;;  %v3172_v5 = vmul.f32 1.442695, %v3160_v9  ;;  %v3164_v41 = vmul.f32 1.442695, %v3156_v59 }
0x10d2   :  { %2995 = vmatpush.msra.mxu0 %v7462_v30  ;;  %3187 = vadd.xlane.f32.xlu2 %v3186_v51 }
0x10d3   :  { %3184 = vadd.xlane.f32.xlu0 %v3183_v2 }
0x10d5   :  { %v3143_v34 = vpop.xlane.xlu1 %3142 }
0x10d6   :  { %v3159_v48 = vsub.f32 %v9983_v40, %v3143_v34 }
0x10d8   :  { %v3170_v58 = vmul.f32 1.442695, %v3159_v48 }
0x10da   :  { %7871 = vpow2.f32 %v3170_v58 }
0x10db   :  { %2872 = vmax.xlane.f32.xlu0 %v2871_v45  ;;  %7873 = vpow2.f32 %v3172_v5 }
0x10dc   :  { %7875 = vpow2.f32 %v3164_v41 }
0x10dd   :  { %7877 = vpow2.f32 %v2884_v56 }
0x10de   :  { %7879 = vpow2.f32 %v2886_v37 }
0x10e0   :  { %v10051_v31 = vpop.eup %7871  ;;  %v7450_v53 = vpop.permute.xlu0 %7449 }
0x10e1   :  { %v7451_v42 = vunpack.i.l.bf16 %v7450_v53  ;;  %v3189_v15 = vsel %vm529_vm2, %v10051_v31, 0.0  ;;  %v7452_v40 = vunpack.i.h.bf16 %v7450_v53  ;;  %v10059_v44 = vpop.eup %7873 }
0x10e2   :  { %v3192_v4 = vsel %vm529_vm2, %v10059_v44, 0.0  ;;  %v10070_v46 = vpop.eup %7875 }
0x10e3   :  { %3190 = vadd.xlane.f32.xlu0 %v3189_v15  ;;  %3280 = vmatpush.msra.mxu1 %v7451_v42  ;;  %v10075_v28 = vpop.eup %7877 }
0x10e4   :  { %v2901_v32 = vsel %vm529_vm2, %v10075_v28, 0.0 }
0x10e5   :  { %3281 = vmatpush.msra.mxu1 %v7452_v40 }
0x10e8   :  { %3148 = vmax.xlane.f32.xlu1 %v3147_v49 }
0x10ea   :  { %7469 = vrot.lane.b32.xlu2 %v9991_v50, %s8446_s27  ;;  %v3180_v50 = vsel %vm529_vm2, %v10070_v46, 0.0 }
0x10eb   :  { %3193 = vadd.xlane.f32.xlu0 %v3192_v4 }
0x10ed   :  { %v7455_v25 = vpop.permute.xlu1 %7454 }
0x10ee   :  { %v7456_v8 = vunpack.i.l.bf16 %v7455_v25  ;;  %v7457_v24 = vunpack.i.h.bf16 %v7455_v25 }
0x10f0   :  { %3151 = vmax.xlane.f32.xlu1 %v3150_v1  ;;  %3282 = vmatpush.msra.mxu1 %v7456_v8 }
0x10f2   :  { %3283 = vmatpush.msra.mxu1 %v7457_v24 }
0x10f8   :  { %3181 = vadd.xlane.f32.xlu1 %v3180_v50 }
0x1106   :  { %v2864_v52 = vpop.xlane.xlu2 %2863 }
0x1107   :  { %v2878_v13 = vsub.f32 %v10003_v57, %v2864_v52 }
0x110b   :  { %v10085_v26 = vpop.xlane.xlu0 %2869 }
0x110e   :  { %v10083_v39 = vpop.xlane.xlu2 %2866 }
0x110f   :  { %v2879_v57 = vsub.f32 %v10014_v0, %v10083_v39  ;;  %v2880_v0 = vsub.f32 %v10012_v33, %v10085_v26 }
0x1111   :  { %7474 = vrot.lane.b32.xlu1 %v9997_v62, %s8446_s27  ;;  %v10087_v62 = vpop.eup %7879 }
0x1112   :  { %v2904_v35 = vsel %vm529_vm2, %v10087_v62, 0.0 }
0x1113   :  { %2902 = vadd.xlane.f32.xlu2 %v2901_v32  ;;  %v2890_v32 = vmul.f32 1.442695, %v2878_v13 }
0x1116   :  { %v3155_v30 = vpop.xlane.xlu2 %3154 }
0x1118   :  { %v2861_v10 = vpop.xlane.xlu1 %2860 }
0x1130   :  { %v7465_v19 = vpop.permute.xlu1 %7464 }
0x1131   :  { %v7466_v47 = vunpack.i.l.bf16 %v7465_v19  ;;  %v7467_v6 = vunpack.i.h.bf16 %v7465_v19  ;;  %v2892_v19 = vmul.f32 1.442695, %v2879_v57 }
0x1133   :  { %2996 = vmatpush.msra.mxu0 %v7466_v47 }
0x1135   :  { %2997 = vmatpush.msra.mxu0 %v7467_v6 }
0x113b   :  { %2905 = vadd.xlane.f32.xlu1 %v2904_v35 }
0x113d   :  { %v2900_v20 = vpop.xlane.xlu0 %2899 }
0x1145   :  { %v3188_v14 = vpop.xlane.xlu2 %3187 }
0x1146   :  { %v3185_v51 = vpop.xlane.xlu0 %3184 }
0x114d   :  { %v7470_v2 = vpop.permute.xlu2 %7469 }
0x114e   :  { %v7471_v38 = vunpack.i.l.bf16 %v7470_v2  ;;  %v2873_v34 = vpop.xlane.xlu0 %2872  ;;  %v7472_v48 = vunpack.i.h.bf16 %v7470_v2 }
0x114f   :  { %v2881_v29 = vsub.f32 %v10045_v27, %v2873_v34  ;;  %v3163_v27 = vsub.f32 %v10020_v7, %v3155_v30 }
0x1150   :  { %2998 = vmatpush.msra.mxu0 %v7471_v38 }
0x1151   :  { %v2896_v58 = vmul.f32 1.442695, %v2881_v29  ;;  %v3178_v4 = vmul.f32 1.442695, %v3163_v27 }
0x1152   :  { %2999 = vmatpush.msra.mxu0 %v7472_v48 }
0x1153   :  { %7881 = vpow2.f32 %v2896_v58 }
0x1159   :  { %v10092_v9 = vpop.eup %7881 }
0x115a   :  { %v2919_v45 = vsel %vm529_vm2, %v10092_v9, 0.0 }
0x115b   :  { %2920 = vadd.xlane.f32.xlu2 %v2919_v45  ;;  %v3149_v5 = vpop.xlane.xlu1 %3148 }
0x115c   :  { %v3161_v53 = vsub.f32 %v10056_v36, %v3149_v5  ;;  %v2877_v36 = vsub.f32 %v10022_v60, %v2861_v10 }
0x115e   :  { %v3174_v42 = vmul.f32 1.442695, %v3161_v53  ;;  %v2888_v7 = vmul.f32 1.442695, %v2877_v36 }
0x1160   :  { %7883 = vpow2.f32 %v3174_v42 }
0x1163   :  { %v3152_v15 = vpop.xlane.xlu1 %3151 }
0x1164   :  { %v3162_v40 = vsub.f32 %v3127_v16, %v3152_v15 }
0x1166   :  { %v10097_v59 = vpop.eup %7883  ;;  %v3176_v49 = vmul.f32 1.442695, %v3162_v40 }
0x1167   :  { %v3195_v41 = vsel %vm529_vm2, %v10097_v59, 0.0 }
0x1168   :  { %7885 = vpow2.f32 %v3176_v49  ;;  %3196 = vadd.xlane.f32.xlu0 %v3195_v41 }
0x116b   :  { %v3182_v25 = vpop.xlane.xlu1 %3181 }
0x116c   :  { %7887 = vrcp.f32 %v3182_v25 }
0x116d   :  { %7889 = vpow2.f32 %v3178_v4 }
0x116e   :  { %v10102_v8 = vpop.eup %7885  ;;  %7891 = vrcp.f32 %v3185_v51 }
0x116f   :  { %v3198_v16 = vsel %vm529_vm2, %v10102_v8, 0.0  ;;  %7893 = vpow2.f32 %v2888_v7 }
0x1170   :  { %3199 = vadd.xlane.f32.xlu0 %v3198_v16  ;;  %7895 = vrcp.f32 %v3188_v14 }
0x1171   :  { %7897 = vpow2.f32 %v2890_v32 }
0x1172   :  { %v7888_v1 = vpop.eup %7887  ;;  %7899 = vrcp.f32 %v2900_v20 }
0x1173   :  { %v3212_v24 = vmul.f32 %v7888_v1, %v10070_v46  ;;  %v10108_v50 = vpop.eup %7889  ;;  %v3191_v46 = vpop.xlane.xlu0 %3190 }
0x1174   :  { %v3201_v56 = vsel %vm529_vm2, %v10108_v50, 0.0  ;;  %v7892_v60 = vpop.eup %7891  ;;  %7901 = vrcp.f32 %v3191_v46 }
0x1175   :  { %7007 = vmatmul.msk.f32.vlgmr.msra.gmra.mxu1 %vm529_vm2, %v3212_v24  ;;  %v3213_v10 = vmul.f32 %v7892_v60, %v10037_v3  ;;  %v10115_v23 = vpop.eup %7893  ;;  %7903 = vpow2.f32 %v2892_v19 }
0x1176   :  { %v2907_v52 = vsel %vm529_vm2, %v10115_v23, 0.0  ;;  %v7896_v37 = vpop.eup %7895 }
0x1177   :  { %v10122_v47 = vpop.eup %7897  ;;  %v3214_v6 = vmul.f32 %v7896_v37, %v10039_v43  ;;  %v2894_v43 = vmul.f32 1.442695, %v2880_v0  ;;  %v7016_v37 = vld [vmem:[%s11491_s21 + $0x28] sm:$0xff] }
0x1178   :  { %3202 = vadd.xlane.f32.xlu0 %v3201_v56  ;;  %v7900_v35 = vpop.eup %7899  ;;  %v2910_v2 = vsel %vm529_vm2, %v10122_v47, 0.0  ;;  %3395 = vmatpush.msra.mxu3 %v7016_v37 }
0x1179   :  { %v2930_v14 = vmul.f32 %v7900_v35, %v10031_v54 }
0x117a   :  { %v7902_v38 = vpop.eup %7901 }
0x117b   :  { %v3194_v51 = vpop.xlane.xlu0 %3193  ;;  %v3215_v33 = vmul.f32 %v7902_v38, %v10051_v31  ;;  %v7904_v26 = vpop.eup %7903 }
0x117c   :  { %v2913_v29 = vsel %vm529_vm2, %v7904_v26, 0.0 }
0x117d   :  { %7008 = vmatmul.msk.f32.gmra.mxu1 %vm529_vm2, %v3213_v10 }
0x1180   :  { %2908 = vadd.xlane.f32.xlu0 %v2907_v52 }
0x1183   :  { %v7475_v3 = vpop.permute.xlu1 %7474 }
0x1184   :  { %v7476_v30 = vunpack.i.l.bf16 %v7475_v3  ;;  %v7477_v39 = vunpack.i.h.bf16 %v7475_v3  ;;  %v7015_v3 = vld [vmem:[%s11491_s21 + $0x20] sm:$0xff] }
0x1185   :  { %7009 = vmatmul.msk.f32.gmra.mxu1 %vm529_vm2, %v3214_v6  ;;  %3396 = vmatpush.msra.mxu3 %v7015_v3 }
0x1186   :  { %3000 = vmatpush.msra.mxu0 %v7476_v30  ;;  %v2903_v20 = vpop.xlane.xlu2 %2902 }
0x1187   :  { %7905 = vrcp.f32 %v2903_v20 }
0x1188   :  { %3001 = vmatpush.msra.mxu0 %v7477_v39  ;;  %2911 = vadd.xlane.f32.xlu0 %v2910_v2  ;;  %7907 = vrcp.f32 %v3194_v51 }
0x1189   :  { %6983 = vmatmul.msk.f32.vlgmr.msra.gmra.mxu0 %vm529_vm2, %v2930_v14  ;;  %7909 = vpow2.f32 %v2894_v43 }
0x118d   :  { %v7906_v34 = vpop.eup %7905  ;;  %7010 = vmatmul.msk.f32.gmra.mxu1 %vm529_vm2, %v3215_v33 }
0x118e   :  { %v2931_v54 = vmul.f32 %v7906_v34, %v10075_v28  ;;  %v7908_v48 = vpop.eup %7907 }
0x118f   :  { %v3216_v58 = vmul.f32 %v7908_v48, %v10059_v44  ;;  %v7910_v45 = vpop.eup %7909 }
0x1190   :  { %2914 = vadd.xlane.f32.xlu0 %v2913_v29  ;;  %v2916_v31 = vsel %vm529_vm2, %v7910_v45, 0.0 }
0x1191   :  { %6984 = vmatmul.msk.f32.gmra.mxu0 %vm529_vm2, %v2931_v54 }
0x1195   :  { %7011 = vmatmul.msk.f32.gmra.mxu1 %vm529_vm2, %v3216_v58 }
0x1198   :  { %2917 = vadd.xlane.f32.xlu0 %v2916_v31 }
0x11ae   :  { %v2906_v5 = vpop.xlane.xlu1 %2905 }
0x11af   :  { %7911 = vrcp.f32 %v2906_v5 }
0x11b5   :  { %v7912_v53 = vpop.eup %7911 }
0x11b6   :  { %v2932_v42 = vmul.f32 %v7912_v53, %v10087_v62 }
0x11b8   :  { %6985 = vmatmul.msk.f32.gmra.mxu0 %vm529_vm2, %v2932_v42 }
0x11db   :  { %v3197_v28 = vpop.xlane.xlu0 %3196 }
0x11dc   :  { %7913 = vrcp.f32 %v3197_v28 }
0x11e2   :  { %v7914_v15 = vpop.eup %7913 }
0x11e3   :  { %v3200_v40 = vpop.xlane.xlu0 %3199  ;;  %v3217_v27 = vmul.f32 %v7914_v15, %v10097_v59 }
0x11e4   :  { %7915 = vrcp.f32 %v3200_v40 }
0x11e5   :  { %7012 = vmatmul.msk.f32.gmra.mxu1 %vm529_vm2, %v3217_v27  ;;  %v7633_v27 = vld [vmem:[#allocation7 + $0x2] ss:$0 sm:$0xff] }
0x11ea   :  { %v7916_v44 = vpop.eup %7915 }
0x11eb   :  { %v3203_v49 = vpop.xlane.xlu0 %3202  ;;  %v3218_v41 = vmul.f32 %v7916_v44, %v10102_v8 }
0x11ec   :  { %7917 = vrcp.f32 %v3203_v49 }
0x11ed   :  { %7013 = vmatmul.msk.f32.gmra.mxu1 %vm529_vm2, %v3218_v41 }
0x11f2   :  { %v7918_v4 = vpop.eup %7917  ;;  %v3285_v62 = vpop.f32.mrf.mxu1 }
0x11f3   :  { %v2909_v25 = vpop.xlane.xlu0 %2908  ;;  %3317 = vrot.lane.b32.xlu1 %v3285_v62, %s8430_s22  ;;  %v3219_v36 = vmul.f32 %v7918_v4, %v10108_v50 }
0x11f4   :  { %7919 = vrcp.f32 %v2909_v25 }
0x11f5   :  { %7014 = vmatmul.msk.f32.gmra.mxu1 %vm529_vm2, %v3219_v36 }
0x11fa   :  { %v7920_v59 = vpop.eup %7919  ;;  %v3288_v16 = vpop.f32.mrf.mxu1 }
0x11fb   :  { %v2912_v1 = vpop.xlane.xlu0 %2911  ;;  %3319 = vrot.lane.b32.xlu0 %v3288_v16, %s8430_s22  ;;  %v2933_v8 = vmul.f32 %v7920_v59, %v10115_v23  ;;  %v2921_v23 = vpop.xlane.xlu2 %2920 }
0x11fc   :  { %7921 = vrcp.f32 %v2912_v1 }
0x11fd   :  { %6986 = vmatmul.msk.f32.gmra.mxu0 %vm529_vm2, %v2933_v8 }
0x1202   :  { %v7922_v7 = vpop.eup %7921  ;;  %v3291_v24 = vpop.f32.mrf.mxu1 }
0x1203   :  { %v2915_v13 = vpop.xlane.xlu0 %2914  ;;  %3321 = vrot.lane.b32.xlu2 %v3291_v24, %s8430_s22  ;;  %v2934_v50 = vmul.f32 %v7922_v7, %v10122_v47 }
0x1204   :  { %7923 = vrcp.f32 %v2915_v13 }
0x1205   :  { %6987 = vmatmul.msk.f32.gmra.mxu0 %vm529_vm2, %v2934_v50 }
0x1206   :  { %v3003_v6 = vpop.f32.mrf.mxu0 }
0x120a   :  { %v7924_v56 = vpop.eup %7923  ;;  %v3294_v60 = vpop.f32.mrf.mxu1 }
0x120b   :  { %v2918_v32 = vpop.xlane.xlu0 %2917  ;;  %3323 = vrot.lane.b32.xlu0 %v3294_v60, %s8430_s22  ;;  %v2935_v10 = vmul.f32 %v7924_v56, %v7904_v26 }
0x120c   :  { %7925 = vrcp.f32 %v2918_v32 }
0x120d   :  { %6988 = vmatmul.msk.f32.gmra.mxu0 %vm529_vm2, %v2935_v10  ;;  %7927 = vrcp.f32 %v2921_v23 }
0x120e   :  { %v3006_v20 = vpop.f32.mrf.mxu0 }
0x1212   :  { %v7926_v46 = vpop.eup %7925  ;;  %v3297_v57 = vpop.f32.mrf.mxu1 }
0x1213   :  { %3325 = vrot.lane.b32.xlu1 %v3297_v57, %s8430_s22  ;;  %v2936_v52 = vmul.f32 %v7926_v46, %v7910_v45  ;;  %v7928_v19 = vpop.eup %7927 }
0x1214   :  { %v2937_v47 = vmul.f32 %v7928_v19, %v10092_v9 }
0x1215   :  { %6989 = vmatmul.msk.f32.gmra.mxu0 %vm529_vm2, %v2936_v52 }
0x121d   :  { %6990 = vmatmul.msk.f32.gmra.mxu0 %vm529_vm2, %v2937_v47 }
0x1235   :  { %v3009_v2 = vpop.f32.mrf.mxu0 }
0x125d   :  { %v3322_v38 = vpop.permute.xlu2 %3321 }
0x125e   :  { %v3343_v43 = vsel %vm455_vm1, %v3009_v2, %v3322_v38 }
0x1262   :  { %v3300_v35 = vpop.f32.mrf.mxu1 }
0x1263   :  { %3327 = vrot.lane.b32.xlu2 %v3300_v35, %s8430_s22 }
0x1265   :  { %v3318_v30 = vpop.permute.xlu1 %3317 }
0x1266   :  { %v3341_v0 = vsel %vm455_vm1, %v3003_v6, %v3318_v30 }
0x1267   :  { %7017 = vmatmul.msk.f32.vlgmr.msra.gmra.mxu3 %vm1035_vm3, %v3341_v0 }
0x126a   :  { %v3303_v39 = vpop.f32.mrf.mxu1 }
0x126b   :  { %3329 = vrot.lane.b32.xlu0 %v3303_v39, %s8430_s22 }
0x126d   :  { %v3320_v14 = vpop.permute.xlu0 %3319 }
0x126e   :  { %v3342_v9 = vsel %vm455_vm1, %v3006_v20, %v3320_v14 }
0x126f   :  { %7018 = vmatmul.msk.f32.gmra.mxu3 %vm1035_vm3, %v3342_v9 }
0x1272   :  { %v3306_v51 = vpop.f32.mrf.mxu1 }
0x1273   :  { %3331 = vrot.lane.b32.xlu1 %v3306_v51, %s8430_s22 }
0x1277   :  { %7019 = vmatmul.msk.f32.gmra.mxu3 %vm1035_vm3, %v3343_v43 }
0x127a   :  { %v3012_v33 = vpop.f32.mrf.mxu0 }
0x127d   :  { %v3324_v26 = vpop.permute.xlu0 %3323 }
0x127e   :  { %v3344_v34 = vsel %vm455_vm1, %v3012_v33, %v3324_v26 }
0x127f   :  { %7020 = vmatmul.msk.f32.gmra.mxu3 %vm1035_vm3, %v3344_v34 }
0x1282   :  { %v3015_v54 = vpop.f32.mrf.mxu0 }
0x1285   :  { %v3326_v29 = vpop.permute.xlu1 %3325 }
0x1286   :  { %v3345_v48 = vsel %vm455_vm1, %v3015_v54, %v3326_v29 }
0x1287   :  { %7021 = vmatmul.msk.f32.gmra.mxu3 %vm1035_vm3, %v3345_v48 }
0x128a   :  { %v3018_v58 = vpop.f32.mrf.mxu0 }
0x1292   :  { %v3021_v5 = vpop.f32.mrf.mxu0 }
0x129a   :  { %v3024_v28 = vpop.f32.mrf.mxu0 }
0x12bd   :  { %v3328_v45 = vpop.permute.xlu2 %3327 }
0x12be   :  { %v3346_v31 = vsel %vm455_vm1, %v3018_v58, %v3328_v45 }
0x12bf   :  { %7022 = vmatmul.msk.f32.gmra.mxu3 %vm1035_vm3, %v3346_v31 }
0x12dd   :  { %v3330_v53 = vpop.permute.xlu0 %3329 }
0x12de   :  { %v3347_v42 = vsel %vm455_vm1, %v3021_v5, %v3330_v53 }
0x12df   :  { %7023 = vmatmul.msk.f32.gmra.mxu3 %vm1035_vm3, %v3347_v42 }
0x12e5   :  { %v3332_v15 = vpop.permute.xlu1 %3331 }
0x12e6   :  { %v3348_v40 = vsel %vm455_vm1, %v3024_v28, %v3332_v15 }
0x12e7   :  { %7024 = vmatmul.msk.f32.gmra.mxu3 %vm1035_vm3, %v3348_v40 }
0x12ea   :  { %v3398_v44 = vpop.f32.mrf.mxu3 }
0x12eb   :  { %v3399_v49 = vadd.f32 %v7633_v27, %v3398_v44  ;;  %v7029_v44 = vld [vmem:[%s8499_s8 + $0x70] sm:$0xff] }
0x12ed   :  { %v3422_v41 = vadd.f32 %v3399_v49, %v9784_v22  ;;  %v7028_v49 = vld [vmem:[%s8499_s8 + $0x68] sm:$0xff] }
0x12ef   :  { %v3434_v4 = vsel %vm365_vm0, %v3422_v41, 0.0 }
0x12f0   :  { %3435 = vadd.xlane.f32.xlu2 %v3434_v4 }
0x12f2   :  { %v3401_v62 = vpop.f32.mrf.mxu3 }
0x12f3   :  { %v3402_v25 = vadd.f32 %v7633_v27, %v3401_v62 }
0x12f5   :  { %v3423_v36 = vadd.f32 %v3402_v25, %v9793_v11 }
0x12f7   :  { %v3437_v59 = vsel %vm365_vm0, %v3423_v36, 0.0 }
0x12f8   :  { %3438 = vadd.xlane.f32.xlu0 %v3437_v59 }
0x12fa   :  { %v3404_v16 = vpop.f32.mrf.mxu3 }
0x12fb   :  { %v3405_v1 = vadd.f32 %v7633_v27, %v3404_v16 }
0x12fd   :  { %v3424_v8 = vadd.f32 %v3405_v1, %v9800_v21 }
0x12ff   :  { %v3440_v7 = vsel %vm365_vm0, %v3424_v8, 0.0 }
0x1300   :  { %3441 = vadd.xlane.f32.xlu1 %v3440_v7 }
0x1302   :  { %v3407_v24 = vpop.f32.mrf.mxu3 }
0x1303   :  { %v3408_v13 = vadd.f32 %v7633_v27, %v3407_v24 }
0x1305   :  { %v3425_v22 = vadd.f32 %v3408_v13, %v9810_v63 }
0x1307   :  { %v3443_v50 = vsel %vm365_vm0, %v3425_v22, 0.0 }
0x1308   :  { %3444 = vadd.xlane.f32.xlu2 %v3443_v50 }
0x130a   :  { %v3410_v56 = vpop.f32.mrf.mxu3 }
0x130b   :  { %v3411_v60 = vadd.f32 %v7633_v27, %v3410_v56 }
0x130d   :  { %v3426_v11 = vadd.f32 %v3411_v60, %v9818_v61 }
0x130f   :  { %v3446_v32 = vsel %vm365_vm0, %v3426_v11, 0.0 }
0x1310   :  { %3447 = vadd.xlane.f32.xlu0 %v3446_v32 }
0x1342   :  { %v3413_v10 = vpop.f32.mrf.mxu3 }
0x1343   :  { %v3414_v23 = vadd.f32 %v7633_v27, %v3413_v10 }
0x1345   :  { %v3427_v21 = vadd.f32 %v3414_v23, %v9826_v12 }
0x1347   :  { %v3449_v46 = vsel %vm365_vm0, %v3427_v21, 0.0 }
0x1348   :  { %3450 = vadd.xlane.f32.xlu1 %v3449_v46 }
0x1362   :  { %v3416_v57 = vpop.f32.mrf.mxu3 }
0x1363   :  { %v3417_v52 = vadd.f32 %v7633_v27, %v3416_v57  ;;  %v3436_v63 = vpop.xlane.xlu2 %3435 }
0x1364   :  { %v3458_v37 = vmul.f32 %v3436_v63, %v9064_v55 }
0x1365   :  { %v3428_v19 = vadd.f32 %v3417_v52, %v9833_v17 }
0x1366   :  { %v10196_v47 = vsub.f32 %v3422_v41, %v3458_v37  ;;  %v7027_v41 = vld [vmem:[%s8499_s8 + $0x60] sm:$0xff] }
0x1367   :  { %v3452_v61 = vsel %vm365_vm0, %v3428_v19, 0.0 }
0x1368   :  { %3453 = vadd.xlane.f32.xlu0 %v3452_v61  ;;  %v3474_v3 = vmul.f32 %v10196_v47, %v10196_v47 }
0x136a   :  { %v3419_v6 = vpop.f32.mrf.mxu3  ;;  %v3482_v12 = vsel %vm365_vm0, %v3474_v3, 0.0  ;;  %v10254_v3 = vld [vmem:[%s11492_s16 + $0x3] ss:$0 sm:$0xff] }
0x136b   :  { %v3420_v35 = vadd.f32 %v7633_v27, %v3419_v6  ;;  %3483 = vadd.xlane.f32.xlu2 %v3482_v12  ;;  %v3439_v30 = vpop.xlane.xlu0 %3438  ;;  %v7030_v27 = vld [vmem:[%s8499_s8 + $0x78] sm:$0xff] }
0x136c   :  { %v3459_v0 = vmul.f32 %v3439_v30, %v9064_v55  ;;  %3678 = vmatpush.msrb.mxu0 %v7030_v27 }
0x136d   :  { %v3429_v17 = vadd.f32 %v3420_v35, %v9840_v18  ;;  %v10257_v35 = vld [vmem:[%s11493_s18 + $0x3] ss:$0 sm:$0xff] }
0x136e   :  { %v10203_v39 = vsub.f32 %v3423_v36, %v3459_v0  ;;  %3679 = vmatpush.msrb.mxu0 %v7029_v44 }
0x136f   :  { %v3455_v9 = vsel %vm365_vm0, %v3429_v17, 0.0 }
0x1370   :  { %v3475_v20 = vmul.f32 %v10203_v39, %v10203_v39  ;;  %3680 = vmatpush.msrb.mxu0 %v7028_v49 }
0x1372   :  { %v3485_v14 = vsel %vm365_vm0, %v3475_v20, 0.0  ;;  %3681 = vmatpush.msrb.mxu0 %v7027_v41 }
0x1373   :  { %3486 = vadd.xlane.f32.xlu1 %v3485_v14  ;;  %3456 = vadd.xlane.f32.xlu2 %v3455_v9  ;;  %v3442_v51 = vpop.xlane.xlu1 %3441 }
0x1374   :  { %v3460_v2 = vmul.f32 %v3442_v51, %v9064_v55 }
0x1376   :  { %v10211_v38 = vsub.f32 %v3424_v8, %v3460_v2 }
0x1378   :  { %v3476_v43 = vmul.f32 %v10211_v38, %v10211_v38 }
0x137a   :  { %v3488_v33 = vsel %vm365_vm0, %v3476_v43, 0.0 }
0x137b   :  { %v3445_v18 = vpop.xlane.xlu2 %3444  ;;  %3489 = vadd.xlane.f32.xlu0 %v3488_v33 }
0x137c   :  { %v3461_v26 = vmul.f32 %v3445_v18, %v9064_v55 }
0x137e   :  { %v10217_v34 = vsub.f32 %v3425_v22, %v3461_v26 }
0x1380   :  { %v3477_v54 = vmul.f32 %v10217_v34, %v10217_v34 }
0x1382   :  { %v3491_v29 = vsel %vm365_vm0, %v3477_v54, 0.0 }
0x1383   :  { %v3448_v48 = vpop.xlane.xlu0 %3447  ;;  %3492 = vadd.xlane.f32.xlu1 %v3491_v29 }
0x1384   :  { %v3462_v58 = vmul.f32 %v3448_v48, %v9064_v55 }
0x1386   :  { %v10223_v45 = vsub.f32 %v3426_v11, %v3462_v58 }
0x1388   :  { %v3478_v31 = vmul.f32 %v10223_v45, %v10223_v45 }
0x138a   :  { %v3494_v5 = vsel %vm365_vm0, %v3478_v31, 0.0 }
0x138b   :  { %3495 = vadd.xlane.f32.xlu2 %v3494_v5 }
0x13bb   :  { %v3451_v53 = vpop.xlane.xlu1 %3450 }
0x13bc   :  { %v3463_v42 = vmul.f32 %v3451_v53, %v9064_v55 }
0x13be   :  { %v10229_v28 = vsub.f32 %v3427_v21, %v3463_v42 }
0x13c0   :  { %v3479_v15 = vmul.f32 %v10229_v28, %v10229_v28 }
0x13c2   :  { %v3497_v40 = vsel %vm365_vm0, %v3479_v15, 0.0 }
0x13c3   :  { %3498 = vadd.xlane.f32.xlu0 %v3497_v40 }
0x13db   :  { %v3454_v4 = vpop.xlane.xlu0 %3453 }
0x13dc   :  { %v3464_v62 = vmul.f32 %v3454_v4, %v9064_v55 }
0x13de   :  { %v10239_v25 = vsub.f32 %v3428_v19, %v3464_v62  ;;  %v3484_v36 = vpop.xlane.xlu2 %3483 }
0x13df   :  { %v3506_v59 = vmul.f32 %v3484_v36, %v9064_v55 }
0x13e0   :  { %v3480_v16 = vmul.f32 %v10239_v25, %v10239_v25 }
0x13e1   :  { %v3514_v1 = vadd.f32 1e-05, %v3506_v59 }
0x13e2   :  { %v3500_v8 = vsel %vm365_vm0, %v3480_v16, 0.0 }
0x13e3   :  { %7929 = vrsqrt.f32 %v3514_v1  ;;  %3501 = vadd.xlane.f32.xlu1 %v3500_v8  ;;  %vm3528_vm14 = vweird.f32 %v3514_v1 }
0x13e6   :  { %v3457_v7 = vpop.xlane.xlu2 %3456  ;;  %v3487_v24 = vpop.xlane.xlu1 %3486 }
0x13e7   :  { %v3465_v13 = vmul.f32 %v3457_v7, %v9064_v55  ;;  %v3507_v22 = vmul.f32 %v3487_v24, %v9064_v55 }
0x13e9   :  { %v7930_v50 = vpop.eup %7929  ;;  %v10247_v56 = vsub.f32 %v3429_v17, %v3465_v13  ;;  %v3515_v60 = vadd.f32 1e-05, %v3507_v22 }
0x13ea   :  { %v3523_v11 = vmul.f32 %v7930_v50, %v3514_v1  ;;  %vm3529_vm13 = vweird.f32 %v7930_v50 }
0x13eb   :  { %7931 = vrsqrt.f32 %v3515_v60  ;;  %v3481_v32 = vmul.f32 %v10247_v56, %v10247_v56  ;;  %vm3530_vm15 = vmor %vm3528_vm14, %vm3529_vm13  ;;  %vm3538_vm5 = vweird.f32 %v3515_v60 }
0x13ec   :  { %v3524_v10 = vmul.f32 %v7930_v50, %v3523_v11 }
0x13ed   :  { %v3503_v23 = vsel %vm365_vm0, %v3481_v32, 0.0 }
0x13ee   :  { %v3525_v21 = vmul.f32 0.5, %v3524_v10  ;;  %3504 = vadd.xlane.f32.xlu2 %v3503_v23  ;;  %v3490_v46 = vpop.xlane.xlu0 %3489 }
0x13ef   :  { %v3508_v57 = vmul.f32 %v3490_v46, %v9064_v55 }
0x13f0   :  { %v3526_v52 = vsub.f32 1.5, %v3525_v21 }
0x13f1   :  { %v7932_v63 = vpop.eup %7931  ;;  %v3516_v37 = vadd.f32 1e-05, %v3508_v57 }
0x13f2   :  { %v3527_v19 = vmul.f32 %v7930_v50, %v3526_v52  ;;  %v3533_v61 = vmul.f32 %v7932_v63, %v3515_v60  ;;  %vm3539_vm4 = vweird.f32 %v7932_v63 }
0x13f3   :  { %7933 = vrsqrt.f32 %v3516_v37  ;;  %vm3540_vm6 = vmor %vm3538_vm5, %vm3539_vm4  ;;  %vm3548_vm8 = vweird.f32 %v3516_v37 }
0x13f4   :  { %v3531_v6 = vsel %vm3530_vm15, %v7930_v50, %v3527_v19  ;;  %v3534_v12 = vmul.f32 %v7932_v63, %v3533_v61 }
0x13f5   :  { %v3602_v30 = vmul.f32 %v3531_v6, %v10196_v47 }
0x13f6   :  { %v3535_v0 = vmul.f32 0.5, %v3534_v12  ;;  %v3493_v17 = vpop.xlane.xlu1 %3492 }
0x13f7   :  { %v3613_v20 = vmul.f32 %v10254_v3, %v3602_v30  ;;  %v3509_v14 = vmul.f32 %v3493_v17, %v9064_v55 }
0x13f8   :  { %v3536_v9 = vsub.f32 1.5, %v3535_v0 }
0x13f9   :  { %v7934_v51 = vpop.eup %7933  ;;  %v10263_v2 = vadd.f32 %v10257_v35, %v3613_v20  ;;  %v3517_v43 = vadd.f32 1e-05, %v3509_v14 }
0x13fa   :  { %v3537_v33 = vmul.f32 %v7932_v63, %v3536_v9  ;;  %v3543_v18 = vmul.f32 %v7934_v51, %v3516_v37  ;;  %vm3549_vm7 = vweird.f32 %v7934_v51 }
0x13fb   :  { %7935 = vrsqrt.f32 %v3517_v43  ;;  %7032 = vmatmul.msk.f32.vlgmr.msrb.gmra.mxu0 %vm365_vm0, %v10263_v2  ;;  %vm3550_vm9 = vmor %vm3548_vm8, %vm3549_vm7  ;;  %vm3558_vm11 = vweird.f32 %v3517_v43 }
0x13fc   :  { %v3541_v47 = vsel %vm3540_vm6, %v7932_v63, %v3537_v33  ;;  %v3544_v26 = vmul.f32 %v7934_v51, %v3543_v18 }
0x13fd   :  { %v3603_v54 = vmul.f32 %v3541_v47, %v10203_v39 }
0x13fe   :  { %v3545_v29 = vmul.f32 0.5, %v3544_v26  ;;  %v3496_v48 = vpop.xlane.xlu2 %3495 }
0x13ff   :  { %v3510_v58 = vmul.f32 %v3496_v48, %v9064_v55  ;;  %v3614_v31 = vmul.f32 %v10254_v3, %v3603_v54 }
0x1400   :  { %v3546_v5 = vsub.f32 1.5, %v3545_v29 }
0x1401   :  { %v7936_v53 = vpop.eup %7935  ;;  %v3518_v42 = vadd.f32 1e-05, %v3510_v58  ;;  %v10271_v15 = vadd.f32 %v10257_v35, %v3614_v31 }
0x1402   :  { %v3547_v40 = vmul.f32 %v7934_v51, %v3546_v5  ;;  %v3553_v27 = vmul.f32 %v7936_v53, %v3517_v43  ;;  %vm3559_vm10 = vweird.f32 %v7936_v53 }
0x1403   :  { %7937 = vrsqrt.f32 %v3518_v42  ;;  %7033 = vmatmul.msk.f32.gmra.mxu0 %vm365_vm0, %v10271_v15  ;;  %vm3560_vm12 = vmor %vm3558_vm11, %vm3559_vm10  ;;  %vm3568_vm14 = vweird.f32 %v3518_v42 }
0x1404   :  { %v3551_v39 = vsel %vm3550_vm9, %v7934_v51, %v3547_v40  ;;  %v3554_v44 = vmul.f32 %v7936_v53, %v3553_v27 }
0x1405   :  { %v3604_v49 = vmul.f32 %v3551_v39, %v10211_v38 }
0x1406   :  { %v3555_v41 = vmul.f32 0.5, %v3554_v44 }
0x1407   :  { %v3615_v4 = vmul.f32 %v10254_v3, %v3604_v49 }
0x1408   :  { %v3556_v62 = vsub.f32 1.5, %v3555_v41 }
0x1409   :  { %v7938_v36 = vpop.eup %7937  ;;  %v10278_v59 = vadd.f32 %v10257_v35, %v3615_v4 }
0x140a   :  { %v3557_v16 = vmul.f32 %v7936_v53, %v3556_v62  ;;  %v3563_v1 = vmul.f32 %v7938_v36, %v3518_v42  ;;  %vm3569_vm13 = vweird.f32 %v7938_v36 }
0x140b   :  { %7034 = vmatmul.msk.f32.gmra.mxu0 %vm365_vm0, %v10278_v59  ;;  %vm3570_vm15 = vmor %vm3568_vm14, %vm3569_vm13 }
0x140c   :  { %v3561_v8 = vsel %vm3560_vm12, %v7936_v53, %v3557_v16  ;;  %v3564_v7 = vmul.f32 %v7938_v36, %v3563_v1  ;;  %v7636_v1 = vld [vmem:[%s8504_s14 + $0x3] ss:$0 sm:$0xff] }
0x140d   :  { %v3605_v38 = vmul.f32 %v3561_v8, %v10217_v34 }
0x140e   :  { %v3565_v24 = vmul.f32 0.5, %v3564_v7 }
0x140f   :  { %v3616_v13 = vmul.f32 %v10254_v3, %v3605_v38 }
0x1410   :  { %v3566_v22 = vsub.f32 1.5, %v3565_v24 }
0x1411   :  { %v10285_v50 = vadd.f32 %v10257_v35, %v3616_v13 }
0x1412   :  { %v3567_v60 = vmul.f32 %v7938_v36, %v3566_v22 }
0x1413   :  { %7035 = vmatmul.msk.f32.gmra.mxu0 %vm365_vm0, %v10285_v50 }
0x1414   :  { %v3571_v11 = vsel %vm3570_vm15, %v7938_v36, %v3567_v60 }
0x1415   :  { %v3606_v32 = vmul.f32 %v3571_v11, %v10223_v45 }
0x1417   :  { %v3617_v10 = vmul.f32 %v10254_v3, %v3606_v32 }
0x1419   :  { %v10292_v34 = vadd.f32 %v10257_v35, %v3617_v10 }
0x141b   :  { %7036 = vmatmul.msk.f32.gmra.mxu0 %vm365_vm0, %v10292_v34 }
0x1436   :  { %v3499_v23 = vpop.xlane.xlu0 %3498 }
0x1437   :  { %v3511_v21 = vmul.f32 %v3499_v23, %v9064_v55 }
0x1439   :  { %v3519_v46 = vadd.f32 1e-05, %v3511_v21 }
0x143b   :  { %7939 = vrsqrt.f32 %v3519_v46  ;;  %vm3578_vm5 = vweird.f32 %v3519_v46 }
0x1441   :  { %v7940_v57 = vpop.eup %7939 }
0x1442   :  { %v3573_v52 = vmul.f32 %v7940_v57, %v3519_v46  ;;  %vm3579_vm4 = vweird.f32 %v7940_v57 }
0x1443   :  { %vm3580_vm6 = vmor %vm3578_vm5, %vm3579_vm4 }
0x1444   :  { %v3574_v63 = vmul.f32 %v7940_v57, %v3573_v52 }
0x1446   :  { %v3575_v37 = vmul.f32 0.5, %v3574_v63 }
0x1448   :  { %v3576_v19 = vsub.f32 1.5, %v3575_v37 }
0x144a   :  { %v3577_v45 = vmul.f32 %v7940_v57, %v3576_v19 }
0x144c   :  { %v3581_v61 = vsel %vm3580_vm6, %v7940_v57, %v3577_v45 }
0x144d   :  { %v3607_v6 = vmul.f32 %v3581_v61, %v10229_v28 }
0x144f   :  { %v3618_v12 = vmul.f32 %v10254_v3, %v3607_v6 }
0x1451   :  { %v10300_v30 = vadd.f32 %v10257_v35, %v3618_v12 }
0x1453   :  { %7037 = vmatmul.msk.f32.gmra.mxu0 %vm365_vm0, %v10300_v30 }
0x1456   :  { %v3502_v0 = vpop.xlane.xlu1 %3501 }
0x1457   :  { %v3512_v17 = vmul.f32 %v3502_v0, %v9064_v55 }
0x1459   :  { %v3520_v20 = vadd.f32 1e-05, %v3512_v17 }
0x145b   :  { %7941 = vrsqrt.f32 %v3520_v20  ;;  %vm3588_vm8 = vweird.f32 %v3520_v20 }
0x1461   :  { %v7942_v14 = vpop.eup %7941  ;;  %v3505_v9 = vpop.xlane.xlu2 %3504 }
0x1462   :  { %v3583_v51 = vmul.f32 %v7942_v14, %v3520_v20  ;;  %v3513_v43 = vmul.f32 %v3505_v9, %v9064_v55  ;;  %vm3589_vm7 = vweird.f32 %v7942_v14 }
0x1463   :  { %vm3590_vm9 = vmor %vm3588_vm8, %vm3589_vm7 }
0x1464   :  { %v3584_v33 = vmul.f32 %v7942_v14, %v3583_v51  ;;  %v3521_v28 = vadd.f32 1e-05, %v3513_v43 }
0x1466   :  { %v3585_v18 = vmul.f32 0.5, %v3584_v33  ;;  %7943 = vrsqrt.f32 %v3521_v28  ;;  %vm3598_vm11 = vweird.f32 %v3521_v28 }
0x1468   :  { %v3586_v47 = vsub.f32 1.5, %v3585_v18 }
0x146a   :  { %v3587_v26 = vmul.f32 %v7942_v14, %v3586_v47 }
0x146c   :  { %v7944_v54 = vpop.eup %7943  ;;  %v3591_v29 = vsel %vm3590_vm9, %v7942_v14, %v3587_v26 }
0x146d   :  { %v3608_v48 = vmul.f32 %v3591_v29, %v10239_v25  ;;  %v3593_v58 = vmul.f32 %v7944_v54, %v3521_v28  ;;  %vm3599_vm10 = vweird.f32 %v7944_v54 }
0x146e   :  { %vm3600_vm12 = vmor %vm3598_vm11, %vm3599_vm10 }
0x146f   :  { %v3594_v31 = vmul.f32 %v7944_v54, %v3593_v58  ;;  %v3619_v5 = vmul.f32 %v10254_v3, %v3608_v48 }
0x1471   :  { %v3595_v53 = vmul.f32 0.5, %v3594_v31  ;;  %v10309_v42 = vadd.f32 %v10257_v35, %v3619_v5 }
0x1473   :  { %v3596_v40 = vsub.f32 1.5, %v3595_v53  ;;  %7038 = vmatmul.msk.f32.gmra.mxu0 %vm365_vm0, %v10309_v42 }
0x1475   :  { %v3597_v27 = vmul.f32 %v7944_v54, %v3596_v40 }
0x1477   :  { %v3601_v39 = vsel %vm3600_vm12, %v7944_v54, %v3597_v27 }
0x1478   :  { %v3609_v25 = vmul.f32 %v3601_v39, %v10247_v56  ;;  %v3683_v41 = vpop.f32.mrf.mxu0 }
0x147a   :  { %v3620_v44 = vmul.f32 %v10254_v3, %v3609_v25  ;;  %v10329_v3 = vadd.f32 %v7636_v1, %v3683_v41 }
0x147c   :  { %v10316_v49 = vadd.f32 %v10257_v35, %v3620_v44 }
0x147e   :  { %7039 = vmatmul.msk.f32.gmra.mxu0 %vm365_vm0, %v10316_v49 }
0x1480   :  { %v3686_v4 = vpop.f32.mrf.mxu0 }
0x1481   :  { %v10333_v35 = vadd.f32 %v7636_v1, %v3686_v4 }
0x1483   :  { %v10399_v23 = vpack.i.bf16 %v10329_v3, %v10333_v35 }
0x1488   :  { %v3689_v62 = vpop.f32.mrf.mxu0 }
0x1489   :  { %v10337_v24 = vadd.f32 %v7636_v1, %v3689_v62 }
0x1490   :  { %v3692_v36 = vpop.f32.mrf.mxu0 }
0x1491   :  { %v10325_v56 = vadd.f32 %v7636_v1, %v3692_v36  ;;  %v8131_v36 = vld [vmem:[#allocation5] sm:$0xff] }
0x1493   :  { %v10393_v10 = vpack.i.bf16 %v10337_v24, %v10325_v56 }
0x1498   :  { %v3695_v16 = vpop.f32.mrf.mxu0 }
0x1499   :  { %v10353_v11 = vadd.f32 %v7636_v1, %v3695_v16 }
0x14d0   :  { %v3698_v8 = vpop.f32.mrf.mxu0 }
0x14d1   :  { %v10321_v7 = vadd.f32 %v7636_v1, %v3698_v8 }
0x14d3   :  { %4007 = vrot.lane.b32.xlu2 %v10321_v7, %s8442_s9  ;;  %v10369_v32 = vpack.i.bf16 %v10353_v11, %v10321_v7 }
0x14db   :  { %4003 = vrot.lane.b32.xlu2 %v10325_v56, %s8442_s9 }
0x14e3   :  { %3997 = vrot.lane.b32.xlu2 %v10329_v3, %s8442_s9 }
0x14eb   :  { %3983 = vrot.lane.b32.xlu2 %v10333_v35, %s8443_s13 }
0x14f0   :  { %v3701_v38 = vpop.f32.mrf.mxu0 }
0x14f1   :  { %v10339_v13 = vadd.f32 %v7636_v1, %v3701_v38 }
0x14f3   :  { %3985 = vrot.lane.b32.xlu2 %v10337_v24, %s8443_s13  ;;  %4009 = vrot.lane.b32.xlu1 %v10339_v13, %s8442_s9 }
0x14fb   :  { %3987 = vrot.lane.b32.xlu2 %v10325_v56, %s8443_s13  ;;  %v3704_v22 = vpop.f32.mrf.mxu0  ;;  %3999 = vrot.lane.b32.xlu1 %v10333_v35, %s8442_s9 }
0x14fc   :  { %v10349_v60 = vadd.f32 %v7636_v1, %v3704_v22  ;;  %v8133_v22 = vld [vmem:[#allocation5 + $0x10] sm:$0xff] }
0x14fe   :  { %4011 = vrot.lane.b32.xlu0 %v10349_v60, %s8442_s9  ;;  %v10405_v21 = vpack.i.bf16 %v10339_v13, %v10349_v60 }
0x1503   :  { %3989 = vrot.lane.b32.xlu2 %v10353_v11, %s8443_s13  ;;  %3729 = vrot.lane.b32.xlu1 %v10349_v60, %s8444_s17 }
0x1506   :  { %4005 = vrot.lane.b32.xlu0 %v10353_v11, %s8442_s9 }
0x150b   :  { %3993 = vrot.lane.b32.xlu2 %v10339_v13, %s8443_s13  ;;  %3725 = vrot.lane.b32.xlu1 %v10321_v7, %s8444_s17 }
0x150e   :  { %4001 = vrot.lane.b32.xlu0 %v10337_v24, %s8442_s9 }
0x1513   :  { %7479 = vrot.lane.b32.xlu2 %v10369_v32, %s8445_s6  ;;  %3721 = vrot.lane.b32.xlu1 %v10325_v56, %s8444_s17 }
0x1516   :  { %3981 = vrot.lane.b32.xlu0 %v10329_v3, %s8443_s13 }
0x151b   :  { %3717 = vrot.lane.b32.xlu1 %v10333_v35, %s8444_s17 }
0x151e   :  { %3727 = vrot.lane.b32.xlu0 %v10339_v13, %s8444_s17 }
0x1523   :  { %3991 = vrot.lane.b32.xlu1 %v10321_v7, %s8443_s13 }
0x1526   :  { %3723 = vrot.lane.b32.xlu0 %v10353_v11, %s8444_s17 }
0x152d   :  { %v4008_v63 = vpop.permute.xlu2 %4007 }
0x152e   :  { %3719 = vrot.lane.b32.xlu0 %v10337_v24, %s8444_s17 }
0x1535   :  { %v4004_v45 = vpop.permute.xlu2 %4003 }
0x1536   :  { %3715 = vrot.lane.b32.xlu0 %v10329_v3, %s8444_s17 }
0x153d   :  { %v3998_v6 = vpop.permute.xlu2 %3997 }
0x153e   :  { %3995 = vrot.lane.b32.xlu0 %v10349_v60, %s8443_s13 }
0x1545   :  { %v3984_v20 = vpop.permute.xlu2 %3983 }
0x1546   :  { %7484 = vrot.lane.b32.xlu0 %v10393_v10, %s8445_s6 }
0x154d   :  { %v3986_v51 = vpop.permute.xlu2 %3985 }
0x154e   :  { %7489 = vrot.lane.b32.xlu0 %v10399_v23, %s8445_s6 }
0x1555   :  { %v3988_v28 = vpop.permute.xlu2 %3987 }
0x1556   :  { %7494 = vrot.lane.b32.xlu0 %v10405_v21, %s8445_s6 }
0x155d   :  { %v3990_v47 = vpop.permute.xlu2 %3989 }
0x1565   :  { %v4010_v46 = vpop.permute.xlu1 %4009  ;;  %v3994_v48 = vpop.permute.xlu2 %3993 }
0x156d   :  { %v4000_v57 = vpop.permute.xlu1 %3999  ;;  %v7480_v53 = vpop.permute.xlu2 %7479 }
0x156e   :  { %v7481_v27 = vunpack.i.l.bf16 %v7480_v53  ;;  %v7482_v39 = vunpack.i.h.bf16 %v7480_v53 }
0x1570   :  { %v4012_v52 = vpop.permute.xlu0 %4011 }
0x1571   :  { %7064 = vmatpush.xpose.msk.msrb.mxu3 %vm455_vm1, %v4012_v52 }
0x1575   :  { %7065 = vmatpush.xpose.msk.msrb.mxu3 %vm455_vm1, %v4010_v46  ;;  %v3730_v37 = vpop.permute.xlu1 %3729 }
0x1576   :  { %7040 = vmatpush.xpose.msk.msrb.mxu2 %vm455_vm1, %v3730_v37 }
0x1578   :  { %v4006_v19 = vpop.permute.xlu0 %4005 }
0x1579   :  { %7066 = vmatpush.xpose.msk.msrb.mxu3 %vm455_vm1, %v4008_v63 }
0x157d   :  { %7067 = vmatpush.xpose.msk.msrb.mxu3 %vm455_vm1, %v4006_v19  ;;  %v3726_v0 = vpop.permute.xlu1 %3725  ;;  %v8134_v19 = vld [vmem:[#allocation5 + $0x18] sm:$0xff] }
0x1580   :  { %v4002_v61 = vpop.permute.xlu0 %4001 }
0x1581   :  { %7068 = vmatpush.xpose.msk.msrb.mxu3 %vm455_vm1, %v4004_v45 }
0x1585   :  { %7069 = vmatpush.xpose.msk.msrb.mxu3 %vm455_vm1, %v4002_v61  ;;  %v3722_v9 = vpop.permute.xlu1 %3721 }
0x1588   :  { %v3982_v12 = vpop.permute.xlu0 %3981 }
0x1589   :  { %7070 = vmatpush.xpose.msk.msrb.mxu3 %vm455_vm1, %v4000_v57 }
0x158d   :  { %7071 = vmatpush.xpose.msk.msrb.mxu3 %vm455_vm1, %v3998_v6  ;;  %v3718_v33 = vpop.permute.xlu1 %3717 }
0x1590   :  { %v3728_v17 = vpop.permute.xlu0 %3727  ;;  %7072 = vmatmul.msk.f32.vlgmr.msrb.gmra.mxu3 %vm455_vm1, %v3982_v12 }
0x1591   :  { %7041 = vmatpush.xpose.msk.msrb.mxu2 %vm455_vm1, %v3728_v17 }
0x1595   :  { %7042 = vmatpush.xpose.msk.msrb.mxu2 %vm455_vm1, %v3726_v0  ;;  %v3992_v54 = vpop.permute.xlu1 %3991 }
0x1598   :  { %v3724_v14 = vpop.permute.xlu0 %3723  ;;  %7073 = vmatmul.msk.f32.gmra.mxu3 %vm455_vm1, %v3984_v20  ;;  %v8135_v20 = vld [vmem:[#allocation5 + $0x20] sm:$0xff] }
0x1599   :  { %7043 = vmatpush.xpose.msk.msrb.mxu2 %vm455_vm1, %v3724_v14 }
0x159d   :  { %7044 = vmatpush.xpose.msk.msrb.mxu2 %vm455_vm1, %v3722_v9 }
0x15a0   :  { %v3720_v43 = vpop.permute.xlu0 %3719  ;;  %7074 = vmatmul.msk.f32.gmra.mxu3 %vm455_vm1, %v3986_v51 }
0x15a1   :  { %7045 = vmatpush.xpose.msk.msrb.mxu2 %vm455_vm1, %v3720_v43 }
0x15a5   :  { %7046 = vmatpush.xpose.msk.msrb.mxu2 %vm455_vm1, %v3718_v33  ;;  %v8136_v33 = vld [vmem:[#allocation5 + $0x28] sm:$0xff] }
0x15a8   :  { %v3716_v18 = vpop.permute.xlu0 %3715  ;;  %7075 = vmatmul.msk.f32.gmra.mxu3 %vm455_vm1, %v3988_v28 }
0x15a9   :  { %7047 = vmatpush.xpose.msk.msrb.mxu2 %vm455_vm1, %v3716_v18 }
0x15ac   :  { %7048 = vmatmul.msk.f32.vlgmr.msrb.gmra.mxu2 %vm455_vm1, %v10329_v3 }
0x15b0   :  { %v3996_v26 = vpop.permute.xlu0 %3995  ;;  %7076 = vmatmul.msk.f32.gmra.mxu3 %vm455_vm1, %v3990_v47 }
0x15b4   :  { %7049 = vmatmul.msk.f32.gmra.mxu2 %vm455_vm1, %v10333_v35 }
0x15b8   :  { %v7485_v29 = vpop.permute.xlu0 %7484  ;;  %7077 = vmatmul.msk.f32.gmra.mxu3 %vm455_vm1, %v3992_v54 }
0x15b9   :  { %v7486_v25 = vunpack.i.l.bf16 %v7485_v29  ;;  %v7487_v44 = vunpack.i.h.bf16 %v7485_v29 }
0x15bc   :  { %7050 = vmatmul.msk.f32.gmra.mxu2 %vm455_vm1, %v10337_v24 }
0x15c0   :  { %v7490_v58 = vpop.permute.xlu0 %7489  ;;  %7078 = vmatmul.msk.f32.gmra.mxu3 %vm455_vm1, %v3994_v48 }
0x15c1   :  { %v7491_v41 = vunpack.i.l.bf16 %v7490_v58  ;;  %v7492_v4 = vunpack.i.h.bf16 %v7490_v58 }
0x15c4   :  { %7051 = vmatmul.msk.f32.gmra.mxu2 %vm455_vm1, %v10325_v56 }
0x15c8   :  { %v7495_v31 = vpop.permute.xlu0 %7494  ;;  %7079 = vmatmul.msk.f32.gmra.mxu3 %vm455_vm1, %v3996_v26 }
0x15c9   :  { %v7496_v5 = vunpack.i.l.bf16 %v7495_v31  ;;  %v7497_v40 = vunpack.i.h.bf16 %v7495_v31  ;;  %v8137_v31 = vld [vmem:[#allocation5 + $0x30] sm:$0xff] }
0x15cb   :  { %4230 = vmatpush.msra.mxu0 %v7496_v5 }
0x15cc   :  { %7052 = vmatmul.msk.f32.gmra.mxu2 %vm455_vm1, %v10353_v11 }
0x15cd   :  { %4231 = vmatpush.msra.mxu0 %v7497_v40 }
0x15cf   :  { %4232 = vmatpush.msra.mxu0 %v7481_v27 }
0x15d1   :  { %4233 = vmatpush.msra.mxu0 %v7482_v39 }
0x15d3   :  { %4234 = vmatpush.msra.mxu0 %v7486_v25 }
0x15d4   :  { %7053 = vmatmul.msk.f32.gmra.mxu2 %vm455_vm1, %v10321_v7  ;;  %v8132_v7 = vld [vmem:[#allocation5 + $0x8] sm:$0xff] }
0x15d5   :  { %4235 = vmatpush.msra.mxu0 %v7487_v44  ;;  %v8138_v44 = vld [vmem:[#allocation5 + $0x38] sm:$0xff] }
0x15d7   :  { %4236 = vmatpush.msra.mxu0 %v7491_v41 }
0x15d9   :  { %4237 = vmatpush.msra.mxu0 %v7492_v4 }
0x15dc   :  { %7054 = vmatmul.msk.f32.gmra.mxu2 %vm455_vm1, %v10339_v13 }
0x15e4   :  { %7055 = vmatmul.msk.f32.gmra.mxu2 %vm455_vm1, %v10349_v60 }
0x1613   :  { %v4062_v62 = vpop.f32.mrf.mxu3 }
0x1614   :  { %v10449_v16 = vadd.f32 %v8131_v36, %v4062_v62 }
0x1616   :  { %v4086_v1 = vsel %vm529_vm2, %v10449_v16, -inf }
0x1617   :  { %4087 = vmax.xlane.f32.xlu1 %v4086_v1 }
0x161b   :  { %v4065_v8 = vpop.f32.mrf.mxu3 }
0x161c   :  { %v10453_v56 = vadd.f32 %v8132_v7, %v4065_v8 }
0x161e   :  { %v4089_v3 = vsel %vm529_vm2, %v10453_v56, -inf }
0x161f   :  { %4090 = vmax.xlane.f32.xlu2 %v4089_v3 }
0x1623   :  { %v4068_v13 = vpop.f32.mrf.mxu3 }
0x1624   :  { %v10461_v60 = vadd.f32 %v8133_v22, %v4068_v13 }
0x1626   :  { %v4092_v46 = vsel %vm529_vm2, %v10461_v60, -inf }
0x162b   :  { %v4071_v37 = vpop.f32.mrf.mxu3 }
0x162c   :  { %v10471_v45 = vadd.f32 %v8134_v19, %v4071_v37 }
0x162f   :  { %v3780_v35 = vpop.f32.mrf.mxu2 }
0x1630   :  { %v10457_v38 = vadd.f32 %v8131_v36, %v3780_v35 }
0x1632   :  { %v3804_v24 = vsel %vm529_vm2, %v10457_v38, -inf }
0x1633   :  { %3805 = vmax.xlane.f32.xlu0 %v3804_v24  ;;  %v4074_v12 = vpop.f32.mrf.mxu3 }
0x1634   :  { %v10493_v47 = vadd.f32 %v8135_v20, %v4074_v12 }
0x1636   :  { %v4098_v29 = vsel %vm529_vm2, %v10493_v47, -inf }
0x1637   :  { %7499 = vrot.lane.b32.xlu2 %v10405_v21, %s8446_s27  ;;  %v3783_v11 = vpop.f32.mrf.mxu2  ;;  %v4095_v21 = vsel %vm529_vm2, %v10471_v45, -inf }
0x1638   :  { %v10485_v51 = vadd.f32 %v8132_v7, %v3783_v11 }
0x163b   :  { %4093 = vmax.xlane.f32.xlu0 %v4092_v46  ;;  %v4077_v43 = vpop.f32.mrf.mxu3 }
0x163c   :  { %v10487_v28 = vadd.f32 %v8136_v33, %v4077_v43 }
0x163e   :  { %v4101_v18 = vsel %vm529_vm2, %v10487_v28, -inf }
0x163f   :  { %v3786_v57 = vpop.f32.mrf.mxu2 }
0x1640   :  { %v10467_v52 = vadd.f32 %v8133_v22, %v3786_v57 }
0x1642   :  { %v3810_v63 = vsel %vm529_vm2, %v10467_v52, -inf }
0x1643   :  { %3811 = vmax.xlane.f32.xlu1 %v3810_v63  ;;  %v4080_v58 = vpop.f32.mrf.mxu3 }
0x1644   :  { %v10501_v5 = vadd.f32 %v8137_v31, %v4080_v58 }
0x1646   :  { %v4104_v53 = vsel %vm529_vm2, %v10501_v5, -inf }
0x1647   :  { %v3789_v61 = vpop.f32.mrf.mxu2 }
0x1648   :  { %v10475_v6 = vadd.f32 %v8134_v19, %v3789_v61 }
0x164a   :  { %v3813_v0 = vsel %vm529_vm2, %v10475_v6, -inf }
0x164b   :  { %4096 = vmax.xlane.f32.xlu1 %v4095_v21  ;;  %v4083_v25 = vpop.f32.mrf.mxu3 }
0x164c   :  { %v10509_v41 = vadd.f32 %v8138_v44, %v4083_v25 }
0x164e   :  { %v4107_v4 = vsel %vm529_vm2, %v10509_v41, -inf }
0x164f   :  { %7504 = vrot.lane.b32.xlu0 %v10369_v32, %s8446_s27  ;;  %v3792_v17 = vpop.f32.mrf.mxu2  ;;  %v3807_v32 = vsel %vm529_vm2, %v10485_v51, -inf }
0x1650   :  { %v10481_v14 = vadd.f32 %v8135_v20, %v3792_v17 }
0x1652   :  { %v3816_v9 = vsel %vm529_vm2, %v10481_v14, -inf }
0x1653   :  { %3814 = vmax.xlane.f32.xlu1 %v3813_v0 }
0x1657   :  { %v3795_v26 = vpop.f32.mrf.mxu2 }
0x1658   :  { %v10495_v54 = vadd.f32 %v8136_v33, %v3795_v26 }
0x165a   :  { %v3819_v48 = vsel %vm529_vm2, %v10495_v54, -inf }
0x165b   :  { %3817 = vmax.xlane.f32.xlu1 %v3816_v9 }
0x165f   :  { %v3798_v40 = vpop.f32.mrf.mxu2 }
0x1660   :  { %3808 = vmax.xlane.f32.xlu2 %v3807_v32  ;;  %v10505_v27 = vadd.f32 %v8137_v31, %v3798_v40 }
0x1662   :  { %v3822_v39 = vsel %vm529_vm2, %v10505_v27, -inf }
0x1663   :  { %4102 = vmax.xlane.f32.xlu1 %v4101_v18 }
0x1667   :  { %v3801_v0 = vpop.f32.mrf.mxu2 }
0x1668   :  { %4099 = vmax.xlane.f32.xlu2 %v4098_v29  ;;  %v10529_v17 = vadd.f32 %v8138_v44, %v3801_v0 }
0x166a   :  { %v3825_v9 = vsel %vm529_vm2, %v10529_v17, -inf }
0x166b   :  { %3820 = vmax.xlane.f32.xlu1 %v3819_v48 }
0x1673   :  { %4105 = vmax.xlane.f32.xlu1 %v4104_v53 }
0x167b   :  { %3823 = vmax.xlane.f32.xlu1 %v3822_v39 }
0x1683   :  { %4108 = vmax.xlane.f32.xlu1 %v4107_v4 }
0x168a   :  { %v4088_v62 = vpop.xlane.xlu1 %4087 }
0x168b   :  { %v4110_v36 = vsub.f32 %v10449_v16, %v4088_v62 }
0x168d   :  { %v4118_v1 = vmul.f32 1.442695, %v4110_v36 }
0x168f   :  { %7945 = vpow2.f32 %v4118_v1 }
0x1692   :  { %v4091_v8 = vpop.xlane.xlu2 %4090 }
0x1693   :  { %v4111_v7 = vsub.f32 %v10453_v56, %v4091_v8 }
0x1695   :  { %v10515_v3 = vpop.eup %7945  ;;  %v4120_v35 = vmul.f32 1.442695, %v4111_v7 }
0x1696   :  { %v4134_v24 = vsel %vm529_vm2, %v10515_v3, 0.0 }
0x1697   :  { %7947 = vpow2.f32 %v4120_v35  ;;  %4135 = vadd.xlane.f32.xlu1 %v4134_v24 }
0x169a   :  { %v7500_v13 = vpop.permute.xlu2 %7499 }
0x169b   :  { %v7501_v22 = vunpack.i.l.bf16 %v7500_v13  ;;  %v7502_v46 = vunpack.i.h.bf16 %v7500_v13 }
0x169d   :  { %v10519_v11 = vpop.eup %7947  ;;  %3948 = vmatpush.msrb.mxu1 %v7501_v22 }
0x169e   :  { %v4137_v16 = vsel %vm529_vm2, %v10519_v11, 0.0 }
0x169f   :  { %3949 = vmatpush.msrb.mxu1 %v7502_v46  ;;  %4138 = vadd.xlane.f32.xlu2 %v4137_v16 }
0x16a6   :  { %v3806_v56 = vpop.xlane.xlu0 %3805 }
0x16a7   :  { %v3828_v57 = vsub.f32 %v10457_v38, %v3806_v56 }
0x16a9   :  { %v3836_v63 = vmul.f32 1.442695, %v3828_v57 }
0x16ab   :  { %7949 = vpow2.f32 %v3836_v63 }
0x16ae   :  { %v4094_v37 = vpop.xlane.xlu0 %4093 }
0x16af   :  { %v4112_v19 = vsub.f32 %v10461_v60, %v4094_v37 }
0x16b1   :  { %v10525_v61 = vpop.eup %7949  ;;  %v4122_v21 = vmul.f32 1.442695, %v4112_v19 }
0x16b2   :  { %v3852_v12 = vsel %vm529_vm2, %v10525_v61, 0.0 }
0x16b3   :  { %7951 = vpow2.f32 %v4122_v21  ;;  %3853 = vadd.xlane.f32.xlu1 %v3852_v12 }
0x16b6   :  { %v3812_v20 = vpop.xlane.xlu1 %3811 }
0x16b7   :  { %7509 = vrot.lane.b32.xlu2 %v10393_v10, %s8446_s27  ;;  %v3830_v35 = vsub.f32 %v10467_v52, %v3812_v20 }
0x16b9   :  { %v10533_v38 = vpop.eup %7951  ;;  %v3840_v13 = vmul.f32 1.442695, %v3830_v35 }
0x16ba   :  { %v4140_v60 = vsel %vm529_vm2, %v10533_v38, 0.0 }
0x16bb   :  { %4141 = vadd.xlane.f32.xlu0 %v4140_v60  ;;  %3826 = vmax.xlane.f32.xlu1 %v3825_v9 }
0x16be   :  { %v4097_v43 = vpop.xlane.xlu1 %4096 }
0x16bf   :  { %v4113_v33 = vsub.f32 %v10471_v45, %v4097_v43 }
0x16c1   :  { %v4124_v32 = vmul.f32 1.442695, %v4113_v33  ;;  %v7505_v18 = vpop.permute.xlu0 %7504 }
0x16c2   :  { %v7506_v26 = vunpack.i.l.bf16 %v7505_v18  ;;  %v7507_v29 = vunpack.i.h.bf16 %v7505_v18 }
0x16c3   :  { %7953 = vpow2.f32 %v4124_v32 }
0x16c4   :  { %3950 = vmatpush.msrb.mxu1 %v7506_v26 }
0x16c6   :  { %3951 = vmatpush.msrb.mxu1 %v7507_v29  ;;  %v3815_v10 = vpop.xlane.xlu1 %3814 }
0x16c7   :  { %v3831_v19 = vsub.f32 %v10475_v6, %v3815_v10 }
0x16c9   :  { %v10540_v48 = vpop.eup %7953  ;;  %v3842_v12 = vmul.f32 1.442695, %v3831_v19 }
0x16ca   :  { %v4143_v58 = vsel %vm529_vm2, %v10540_v48, 0.0 }
0x16cb   :  { %4144 = vadd.xlane.f32.xlu1 %v4143_v58 }
0x16ce   :  { %v3818_v31 = vpop.xlane.xlu1 %3817 }
0x16cf   :  { %7514 = vrot.lane.b32.xlu0 %v10399_v23, %s8446_s27  ;;  %v3832_v20 = vsub.f32 %v10481_v14, %v3818_v31 }
0x16d1   :  { %v3844_v60 = vmul.f32 1.442695, %v3832_v20 }
0x16d3   :  { %v3809_v53 = vpop.xlane.xlu2 %3808 }
0x16d4   :  { %v3829_v45 = vsub.f32 %v10485_v51, %v3809_v53 }
0x16d6   :  { %v3838_v40 = vmul.f32 1.442695, %v3829_v45  ;;  %v4103_v39 = vpop.xlane.xlu1 %4102 }
0x16d7   :  { %v4115_v62 = vsub.f32 %v10487_v28, %v4103_v39 }
0x16d8   :  { %7955 = vpow2.f32 %v3838_v40 }
0x16d9   :  { %v4128_v23 = vmul.f32 1.442695, %v4115_v62 }
0x16db   :  { %v4100_v25 = vpop.xlane.xlu2 %4099 }
0x16dc   :  { %v4114_v44 = vsub.f32 %v10493_v47, %v4100_v25 }
0x16de   :  { %v10548_v4 = vpop.eup %7955  ;;  %v4126_v36 = vmul.f32 1.442695, %v4114_v44  ;;  %v3821_v1 = vpop.xlane.xlu1 %3820 }
0x16df   :  { %v3855_v8 = vsel %vm529_vm2, %v10548_v4, 0.0  ;;  %v3833_v43 = vsub.f32 %v10495_v54, %v3821_v1 }
0x16e0   :  { %7957 = vpow2.f32 %v4126_v36  ;;  %3856 = vadd.xlane.f32.xlu2 %v3855_v8 }
0x16e1   :  { %7959 = vpow2.f32 %v4128_v23  ;;  %v3846_v32 = vmul.f32 1.442695, %v3833_v43 }
0x16e6   :  { %v10553_v7 = vpop.eup %7957  ;;  %v4106_v51 = vpop.xlane.xlu1 %4105 }
0x16e7   :  { %v4116_v47 = vsub.f32 %v10501_v5, %v4106_v51  ;;  %v4146_v24 = vsel %vm529_vm2, %v10553_v7, 0.0  ;;  %v10559_v22 = vpop.eup %7959 }
0x16e8   :  { %4147 = vadd.xlane.f32.xlu1 %v4146_v24  ;;  %v4149_v16 = vsel %vm529_vm2, %v10559_v22, 0.0 }
0x16e9   :  { %v4130_v28 = vmul.f32 1.442695, %v4116_v47 }
0x16eb   :  { %7961 = vpow2.f32 %v4130_v28 }
0x16ec   :  { %7963 = vpow2.f32 %v3840_v13 }
0x16ee   :  { %v3824_v46 = vpop.xlane.xlu1 %3823 }
0x16ef   :  { %v3834_v26 = vsub.f32 %v10505_v27, %v3824_v46 }
0x16f0   :  { %4150 = vadd.xlane.f32.xlu1 %v4149_v16 }
0x16f1   :  { %v10563_v56 = vpop.eup %7961  ;;  %v3848_v54 = vmul.f32 1.442695, %v3834_v26 }
0x16f2   :  { %v10565_v52 = vpop.eup %7963  ;;  %v4152_v63 = vsel %vm529_vm2, %v10563_v56, 0.0 }
0x16f3   :  { %v3858_v37 = vsel %vm529_vm2, %v10565_v52, 0.0 }
0x16f6   :  { %v4109_v5 = vpop.xlane.xlu1 %4108 }
0x16f7   :  { %v4117_v57 = vsub.f32 %v10509_v41, %v4109_v5 }
0x16f8   :  { %4153 = vadd.xlane.f32.xlu1 %v4152_v63 }
0x16f9   :  { %v4132_v21 = vmul.f32 1.442695, %v4117_v57  ;;  %3859 = vadd.xlane.f32.xlu0 %v3858_v37 }
0x16fb   :  { %7965 = vpow2.f32 %v4132_v21 }
0x16fc   :  { %7967 = vpow2.f32 %v3842_v12 }
0x16fd   :  { %7969 = vpow2.f32 %v3844_v60 }
0x1701   :  { %v10573_v0 = vpop.eup %7965 }
0x1702   :  { %v4155_v41 = vsel %vm529_vm2, %v10573_v0, 0.0  ;;  %v10578_v9 = vpop.eup %7967 }
0x1703   :  { %4156 = vadd.xlane.f32.xlu1 %v4155_v41  ;;  %v3861_v33 = vsel %vm529_vm2, %v10578_v9, 0.0  ;;  %v10583_v18 = vpop.eup %7969 }
0x1704   :  { %v3864_v58 = vsel %vm529_vm2, %v10583_v18, 0.0 }
0x170a   :  { %v4136_v6 = vpop.xlane.xlu1 %4135 }
0x170b   :  { %7971 = vrcp.f32 %v4136_v6  ;;  %3862 = vadd.xlane.f32.xlu1 %v3861_v33 }
0x170c   :  { %7973 = vpow2.f32 %v3846_v32 }
0x1711   :  { %v7972_v14 = vpop.eup %7971 }
0x1712   :  { %v4166_v29 = vmul.f32 %v7972_v14, %v10515_v3  ;;  %v4139_v10 = vpop.xlane.xlu2 %4138  ;;  %v10590_v31 = vpop.eup %7973 }
0x1713   :  { %7975 = vrcp.f32 %v4139_v10  ;;  %3865 = vadd.xlane.f32.xlu1 %v3864_v58  ;;  %v3867_v40 = vsel %vm529_vm2, %v10590_v31, 0.0 }
0x1714   :  { %7080 = vmatmul.msk.f32.vlgmr.msra.gmra.mxu0 %vm529_vm2, %v4166_v29  ;;  %7977 = vpow2.f32 %v3848_v54 }
0x1719   :  { %v7976_v53 = vpop.eup %7975 }
0x171a   :  { %v7510_v45 = vpop.permute.xlu2 %7509  ;;  %v4167_v27 = vmul.f32 %v7976_v53, %v10519_v11  ;;  %v10596_v25 = vpop.eup %7977 }
0x171b   :  { %v7511_v3 = vunpack.i.l.bf16 %v7510_v45  ;;  %3868 = vadd.xlane.f32.xlu1 %v3867_v40  ;;  %v7512_v39 = vunpack.i.h.bf16 %v7510_v45  ;;  %v3870_v44 = vsel %vm529_vm2, %v10596_v25, 0.0 }
0x171c   :  { %7081 = vmatmul.msk.f32.gmra.mxu0 %vm529_vm2, %v4167_v27 }
0x171d   :  { %3952 = vmatpush.msrb.mxu1 %v7511_v3 }
0x171f   :  { %3953 = vmatpush.msrb.mxu1 %v7512_v39 }
0x1723   :  { %3871 = vadd.xlane.f32.xlu1 %v3870_v44 }
0x1726   :  { %v3854_v62 = vpop.xlane.xlu1 %3853 }
0x172e   :  { %v4142_v36 = vpop.xlane.xlu0 %4141  ;;  %v3827_v1 = vpop.xlane.xlu1 %3826 }
0x172f   :  { %7979 = vrcp.f32 %v4142_v36  ;;  %v3835_v8 = vsub.f32 %v10529_v17, %v3827_v1 }
0x1731   :  { %v3850_v11 = vmul.f32 1.442695, %v3835_v8 }
0x1733   :  { %7981 = vpow2.f32 %v3850_v11 }
0x1734   :  { %7983 = vrcp.f32 %v3854_v62  ;;  %v7089_v62 = vld [vmem:[%s11491_s21 + $0x38] sm:$0xff] }
0x1735   :  { %v7980_v23 = vpop.eup %7979  ;;  %4349 = vmatpush.msra.mxu2 %v7089_v62 }
0x1736   :  { %v4168_v51 = vmul.f32 %v7980_v23, %v10533_v38 }
0x1738   :  { %7082 = vmatmul.msk.f32.gmra.mxu0 %vm529_vm2, %v4168_v51 }
0x1739   :  { %v10603_v35 = vpop.eup %7981 }
0x173a   :  { %v3873_v47 = vsel %vm529_vm2, %v10603_v35, 0.0  ;;  %v7984_v13 = vpop.eup %7983 }
0x173b   :  { %3874 = vadd.xlane.f32.xlu2 %v3873_v47  ;;  %v3884_v5 = vmul.f32 %v7984_v13, %v10525_v61 }
0x173e   :  { %v4145_v24 = vpop.xlane.xlu1 %4144 }
0x173f   :  { %7985 = vrcp.f32 %v4145_v24 }
0x1741   :  { %v7515_v28 = vpop.permute.xlu0 %7514 }
0x1742   :  { %v7516_v46 = vunpack.i.l.bf16 %v7515_v28  ;;  %v7517_v17 = vunpack.i.h.bf16 %v7515_v28 }
0x1744   :  { %3954 = vmatpush.msrb.mxu1 %v7516_v46 }
0x1745   :  { %v7986_v16 = vpop.eup %7985 }
0x1746   :  { %3955 = vmatpush.msrb.mxu1 %v7517_v17  ;;  %v4169_v38 = vmul.f32 %v7986_v16, %v10540_v48 }
0x1747   :  { %7056 = vmatmul.msk.f32.vlgmr.msrb.gmra.mxu1 %vm529_vm2, %v3884_v5 }
0x1748   :  { %7083 = vmatmul.msk.f32.gmra.mxu0 %vm529_vm2, %v4169_v38 }
0x1753   :  { %v3857_v57 = vpop.xlane.xlu2 %3856 }
0x1754   :  { %7987 = vrcp.f32 %v3857_v57 }
0x175a   :  { %v7988_v63 = vpop.eup %7987 }
0x175b   :  { %v4148_v37 = vpop.xlane.xlu1 %4147  ;;  %v3885_v19 = vmul.f32 %v7988_v63, %v10548_v4 }
0x175c   :  { %7989 = vrcp.f32 %v4148_v37 }
0x175d   :  { %7057 = vmatmul.msk.f32.gmra.mxu1 %vm529_vm2, %v3885_v19 }
0x1762   :  { %v7990_v21 = vpop.eup %7989 }
0x1763   :  { %v4151_v12 = vpop.xlane.xlu1 %4150  ;;  %v4170_v61 = vmul.f32 %v7990_v21, %v10553_v7 }
0x1764   :  { %7991 = vrcp.f32 %v4151_v12 }
0x1765   :  { %7084 = vmatmul.msk.f32.gmra.mxu0 %vm529_vm2, %v4170_v61 }
0x176a   :  { %v7992_v48 = vpop.eup %7991 }
0x176b   :  { %v4154_v20 = vpop.xlane.xlu1 %4153  ;;  %v4171_v41 = vmul.f32 %v7992_v48, %v10559_v22 }
0x176c   :  { %7993 = vrcp.f32 %v4154_v20  ;;  %v3860_v60 = vpop.xlane.xlu0 %3859 }
0x176d   :  { %7995 = vrcp.f32 %v3860_v60  ;;  %7085 = vmatmul.msk.f32.gmra.mxu0 %vm529_vm2, %v4171_v41 }
0x1772   :  { %v7994_v4 = vpop.eup %7993 }
0x1773   :  { %v7996_v43 = vpop.eup %7995  ;;  %v4172_v6 = vmul.f32 %v7994_v4, %v10563_v56 }
0x1774   :  { %v3886_v33 = vmul.f32 %v7996_v43, %v10565_v52  ;;  %v7637_v43 = vld [vmem:[#allocation7 + $0x3] ss:$0 sm:$0xff] }
0x1775   :  { %7086 = vmatmul.msk.f32.gmra.mxu0 %vm529_vm2, %v4172_v6 }
0x1776   :  { %7058 = vmatmul.msk.f32.gmra.mxu1 %vm529_vm2, %v3886_v33  ;;  %v4157_v7 = vpop.xlane.xlu1 %4156 }
0x1777   :  { %7997 = vrcp.f32 %v4157_v7 }
0x177d   :  { %v7998_v32 = vpop.eup %7997 }
0x177e   :  { %v3863_v14 = vpop.xlane.xlu1 %3862  ;;  %v4173_v22 = vmul.f32 %v7998_v32, %v10573_v0 }
0x177f   :  { %7999 = vrcp.f32 %v3863_v14 }
0x1780   :  { %7087 = vmatmul.msk.f32.gmra.mxu0 %vm529_vm2, %v4173_v22 }
0x1785   :  { %v8000_v26 = vpop.eup %7999 }
0x1786   :  { %v3866_v29 = vpop.xlane.xlu1 %3865  ;;  %v3887_v10 = vmul.f32 %v8000_v26, %v10578_v9 }
0x1787   :  { %8001 = vrcp.f32 %v3866_v29 }
0x1788   :  { %7059 = vmatmul.msk.f32.gmra.mxu1 %vm529_vm2, %v3887_v10 }
0x178d   :  { %v8002_v56 = vpop.eup %8001 }
0x178e   :  { %v3869_v52 = vpop.xlane.xlu1 %3868  ;;  %v3888_v58 = vmul.f32 %v8002_v56, %v10583_v18 }
0x178f   :  { %8003 = vrcp.f32 %v3869_v52 }
0x1790   :  { %7060 = vmatmul.msk.f32.gmra.mxu1 %vm529_vm2, %v3888_v58 }
0x1791   :  { %v4239_v54 = vpop.f32.mrf.mxu0 }
0x1792   :  { %4271 = vrot.lane.b32.xlu0 %v4239_v54, %s8430_s22 }
0x1795   :  { %v8004_v0 = vpop.eup %8003 }
0x1796   :  { %v3872_v53 = vpop.xlane.xlu1 %3871  ;;  %v3889_v45 = vmul.f32 %v8004_v0, %v10590_v31 }
0x1797   :  { %8005 = vrcp.f32 %v3872_v53 }
0x1798   :  { %7061 = vmatmul.msk.f32.gmra.mxu1 %vm529_vm2, %v3889_v45 }
0x1799   :  { %v4242_v9 = vpop.f32.mrf.mxu0 }
0x179a   :  { %4273 = vrot.lane.b32.xlu1 %v4242_v9, %s8430_s22 }
0x179d   :  { %v8006_v40 = vpop.eup %8005 }
0x179e   :  { %v3890_v18 = vmul.f32 %v8006_v40, %v10596_v25  ;;  %v7088_v25 = vld [vmem:[%s11491_s21 + $0x30] sm:$0xff] }
0x179f   :  { %4350 = vmatpush.msra.mxu2 %v7088_v25 }
0x17a0   :  { %7062 = vmatmul.msk.f32.gmra.mxu1 %vm529_vm2, %v3890_v18 }
0x17ae   :  { %v3875_v27 = vpop.xlane.xlu2 %3874 }
0x17af   :  { %8007 = vrcp.f32 %v3875_v27 }
0x17b5   :  { %v8008_v3 = vpop.eup %8007  ;;  %v4245_v39 = vpop.f32.mrf.mxu0 }
0x17b6   :  { %4275 = vrot.lane.b32.xlu2 %v4245_v39, %s8430_s22  ;;  %v3891_v31 = vmul.f32 %v8008_v3, %v10603_v35 }
0x17b8   :  { %7063 = vmatmul.msk.f32.gmra.mxu1 %vm529_vm2, %v3891_v31 }
0x17c4   :  { %v3957_v23 = vpop.f32.mrf.mxu1 }
0x17c5   :  { %v4248_v44 = vpop.f32.mrf.mxu0 }
0x17c6   :  { %4277 = vrot.lane.b32.xlu0 %v4248_v44, %s8430_s22 }
0x17da   :  { %v3960_v47 = vpop.f32.mrf.mxu1 }
0x17e2   :  { %v4251_v36 = vpop.f32.mrf.mxu0 }
0x17e3   :  { %4279 = vrot.lane.b32.xlu0 %v4251_v36, %s8430_s22 }
0x17ea   :  { %v4254_v1 = vpop.f32.mrf.mxu0 }
0x17eb   :  { %4281 = vrot.lane.b32.xlu2 %v4254_v1, %s8430_s22 }
0x17f2   :  { %v4257_v8 = vpop.f32.mrf.mxu0 }
0x17f3   :  { %4283 = vrot.lane.b32.xlu1 %v4257_v8, %s8430_s22  ;;  %v3963_v46 = vpop.f32.mrf.mxu1 }
0x17fd   :  { %v4260_v11 = vpop.f32.mrf.mxu0 }
0x17fe   :  { %4285 = vrot.lane.b32.xlu0 %v4260_v11, %s8430_s22 }
0x1804   :  { %v4272_v51 = vpop.permute.xlu0 %4271 }
0x1805   :  { %v4295_v35 = vsel %vm455_vm1, %v3957_v23, %v4272_v51  ;;  %v3966_v16 = vpop.f32.mrf.mxu1 }
0x1806   :  { %7090 = vmatmul.msk.f32.vlgmr.msra.gmra.mxu2 %vm1035_vm3, %v4295_v35 }
0x180c   :  { %v4274_v24 = vpop.permute.xlu1 %4273 }
0x180d   :  { %v4296_v28 = vsel %vm455_vm1, %v3960_v47, %v4274_v24  ;;  %v3969_v57 = vpop.f32.mrf.mxu1 }
0x180e   :  { %7091 = vmatmul.msk.f32.gmra.mxu2 %vm1035_vm3, %v4296_v28 }
0x1810   :  { %v4276_v13 = vpop.permute.xlu2 %4275 }
0x1811   :  { %v4297_v17 = vsel %vm455_vm1, %v3963_v46, %v4276_v13 }
0x1815   :  { %v3972_v19 = vpop.f32.mrf.mxu1 }
0x1816   :  { %7092 = vmatmul.msk.f32.gmra.mxu2 %vm1035_vm3, %v4297_v17 }
0x181d   :  { %v3975_v61 = vpop.f32.mrf.mxu1 }
0x1835   :  { %v3978_v41 = vpop.f32.mrf.mxu1 }
0x1838   :  { %v4278_v5 = vpop.permute.xlu0 %4277 }
0x1839   :  { %v4298_v38 = vsel %vm455_vm1, %v3966_v16, %v4278_v5 }
0x183a   :  { %7093 = vmatmul.msk.f32.gmra.mxu2 %vm1035_vm3, %v4298_v38 }
0x1845   :  { %v4282_v21 = vpop.permute.xlu2 %4281 }
0x1846   :  { %v4300_v12 = vsel %vm455_vm1, %v3972_v19, %v4282_v21 }
0x1855   :  { %v4280_v63 = vpop.permute.xlu0 %4279 }
0x1856   :  { %v4299_v37 = vsel %vm455_vm1, %v3969_v57, %v4280_v63 }
0x1857   :  { %7094 = vmatmul.msk.f32.gmra.mxu2 %vm1035_vm3, %v4299_v37 }
0x185f   :  { %7095 = vmatmul.msk.f32.gmra.mxu2 %vm1035_vm3, %v4300_v12 }
0x1865   :  { %v4284_v48 = vpop.permute.xlu1 %4283 }
0x1866   :  { %v4301_v20 = vsel %vm455_vm1, %v3975_v61, %v4284_v48 }
0x1867   :  { %7096 = vmatmul.msk.f32.gmra.mxu2 %vm1035_vm3, %v4301_v20 }
0x1870   :  { %v4286_v60 = vpop.permute.xlu0 %4285 }
0x1871   :  { %v4302_v4 = vsel %vm455_vm1, %v3978_v41, %v4286_v60 }
0x1872   :  { %7097 = vmatmul.msk.f32.gmra.mxu2 %vm1035_vm3, %v4302_v4 }
0x1889   :  { %v4352_v6 = vpop.f32.mrf.mxu2 }
0x188a   :  { %v4353_v33 = vadd.f32 %v7637_v43, %v4352_v6 }
0x188c   :  { %v4376_v7 = vadd.f32 %v4353_v33, %v10263_v2 }
0x188e   :  { %v4388_v32 = vsel %vm365_vm0, %v4376_v7, 0.0 }
0x188f   :  { %4389 = vadd.xlane.f32.xlu2 %v4388_v32 }
0x1891   :  { %v4355_v14 = vpop.f32.mrf.mxu2 }
0x1892   :  { %v4356_v22 = vadd.f32 %v7637_v43, %v4355_v14  ;;  %v7103_v14 = vld [vmem:[%s11494_s2 + $0x38] sm:$0xff] }
0x1893   :  { %4632 = vmatpush.msra.mxu1 %v7103_v14 }
0x1894   :  { %v4377_v26 = vadd.f32 %v4356_v22, %v10271_v15  ;;  %v7102_v22 = vld [vmem:[%s11494_s2 + $0x30] sm:$0xff] }
0x1895   :  { %4633 = vmatpush.msra.mxu1 %v7102_v22 }
0x1896   :  { %v4391_v29 = vsel %vm365_vm0, %v4377_v26, 0.0 }
0x1897   :  { %4392 = vadd.xlane.f32.xlu1 %v4391_v29  ;;  %v7100_v29 = vld [vmem:[%s11494_s2 + $0x20] sm:$0xff] }
0x1899   :  { %v4358_v10 = vpop.f32.mrf.mxu2 }
0x189a   :  { %v4359_v56 = vadd.f32 %v7637_v43, %v4358_v10 }
0x189c   :  { %v4378_v52 = vadd.f32 %v4359_v56, %v10278_v59 }
0x189e   :  { %v4394_v58 = vsel %vm365_vm0, %v4378_v52, 0.0 }
0x189f   :  { %4395 = vadd.xlane.f32.xlu0 %v4394_v58  ;;  %v8139_v58 = vld [vmem:[%s8459_s5 + $0x38] sm:$0xff] }
0x18bd   :  { %v4361_v54 = vpop.f32.mrf.mxu2 }
0x18be   :  { %v4362_v0 = vadd.f32 %v7637_v43, %v4361_v54 }
0x18c0   :  { %v4379_v2 = vadd.f32 %v4362_v0, %v10285_v50 }
0x18c2   :  { %v4397_v53 = vsel %vm365_vm0, %v4379_v2, 0.0 }
0x18c3   :  { %4398 = vadd.xlane.f32.xlu2 %v4397_v53 }
0x18da   :  { %v4364_v45 = vpop.f32.mrf.mxu2 }
0x18db   :  { %v4365_v9 = vadd.f32 %v7637_v43, %v4364_v45 }
0x18dd   :  { %v4380_v15 = vadd.f32 %v4365_v9, %v10292_v34 }
0x18df   :  { %v4400_v40 = vsel %vm365_vm0, %v4380_v15, 0.0 }
0x18e0   :  { %4401 = vadd.xlane.f32.xlu1 %v4400_v40 }
0x18e2   :  { %v4367_v18 = vpop.f32.mrf.mxu2 }
0x18e3   :  { %v4368_v27 = vadd.f32 %v7637_v43, %v4367_v18 }
0x18e5   :  { %v4381_v59 = vadd.f32 %v4368_v27, %v10300_v30 }
0x18e7   :  { %v4403_v3 = vsel %vm365_vm0, %v4381_v59, 0.0 }
0x18e8   :  { %4404 = vadd.xlane.f32.xlu2 %v4403_v3 }
0x18ea   :  { %v4370_v39 = vpop.f32.mrf.mxu2 }
0x18eb   :  { %v4371_v31 = vadd.f32 %v7637_v43, %v4370_v39 }
0x18ed   :  { %v4382_v50 = vadd.f32 %v4371_v31, %v10309_v42 }
0x18ef   :  { %v4406_v44 = vsel %vm365_vm0, %v4382_v50, 0.0 }
0x18f0   :  { %4407 = vadd.xlane.f32.xlu1 %v4406_v44 }
0x18f5   :  { %v4373_v25 = vpop.f32.mrf.mxu2 }
0x18f6   :  { %v4374_v30 = vadd.f32 %v7637_v43, %v4373_v25 }
0x18f8   :  { %v4383_v42 = vadd.f32 %v4374_v30, %v10316_v49 }
0x18fa   :  { %v4409_v47 = vsel %vm365_vm0, %v4383_v42, 0.0 }
0x1902   :  { %v4390_v62 = vpop.xlane.xlu2 %4389 }
0x1903   :  { %v4412_v34 = vmul.f32 %v4390_v62, %v9064_v55 }
0x1905   :  { %v10674_v36 = vsub.f32 %v4376_v7, %v4412_v34 }
0x1907   :  { %v4428_v1 = vmul.f32 %v10674_v36, %v10674_v36 }
0x1909   :  { %v4436_v8 = vsel %vm365_vm0, %v4428_v1, 0.0  ;;  %v10732_v1 = vld [vmem:[%s11492_s16 + $0x4] ss:$0 sm:$0xff] }
0x190a   :  { %4437 = vadd.xlane.f32.xlu0 %v4436_v8  ;;  %v4393_v11 = vpop.xlane.xlu1 %4392 }
0x190b   :  { %v4413_v23 = vmul.f32 %v4393_v11, %v9064_v55  ;;  %v10735_v11 = vld [vmem:[%s11493_s18 + $0x4] ss:$0 sm:$0xff] }
0x190d   :  { %v10681_v51 = vsub.f32 %v4377_v26, %v4413_v23  ;;  %v7101_v26 = vld [vmem:[%s11494_s2 + $0x28] sm:$0xff] }
0x190e   :  { %4634 = vmatpush.msra.mxu1 %v7101_v26 }
0x190f   :  { %v4429_v35 = vmul.f32 %v10681_v51, %v10681_v51 }
0x1910   :  { %4635 = vmatpush.msra.mxu1 %v7100_v29 }
0x1911   :  { %v4439_v24 = vsel %vm365_vm0, %v4429_v35, 0.0 }
0x1912   :  { %v4396_v28 = vpop.xlane.xlu0 %4395  ;;  %4410 = vadd.xlane.f32.xlu0 %v4409_v47  ;;  %4440 = vadd.xlane.f32.xlu2 %v4439_v24 }
0x1913   :  { %v4414_v13 = vmul.f32 %v4396_v28, %v9064_v55 }
0x1915   :  { %v10688_v46 = vsub.f32 %v4378_v52, %v4414_v13 }
0x1917   :  { %v4430_v17 = vmul.f32 %v10688_v46, %v10688_v46 }
0x1919   :  { %v4442_v49 = vsel %vm365_vm0, %v4430_v17, 0.0 }
0x191a   :  { %4443 = vadd.xlane.f32.xlu1 %v4442_v49 }
0x1936   :  { %v4399_v16 = vpop.xlane.xlu2 %4398 }
0x1937   :  { %v4415_v5 = vmul.f32 %v4399_v16, %v9064_v55 }
0x1939   :  { %v10694_v38 = vsub.f32 %v4379_v2, %v4415_v5 }
0x193b   :  { %v4431_v57 = vmul.f32 %v10694_v38, %v10694_v38 }
0x193d   :  { %v4445_v63 = vsel %vm365_vm0, %v4431_v57, 0.0 }
0x193e   :  { %4446 = vadd.xlane.f32.xlu2 %v4445_v63 }
0x1953   :  { %v4402_v37 = vpop.xlane.xlu1 %4401 }
0x1954   :  { %v4416_v19 = vmul.f32 %v4402_v37, %v9064_v55 }
0x1956   :  { %v10700_v21 = vsub.f32 %v4380_v15, %v4416_v19 }
0x1958   :  { %v4432_v12 = vmul.f32 %v10700_v21, %v10700_v21 }
0x195a   :  { %v4448_v61 = vsel %vm365_vm0, %v4432_v12, 0.0  ;;  %v8140_v12 = vld [vmem:[%s8459_s5 + $0x30] sm:$0xff] }
0x195b   :  { %v4405_v48 = vpop.xlane.xlu2 %4404  ;;  %4449 = vadd.xlane.f32.xlu0 %v4448_v61 }
0x195c   :  { %v4417_v20 = vmul.f32 %v4405_v48, %v9064_v55 }
0x195e   :  { %v10706_v41 = vsub.f32 %v4381_v59, %v4417_v20 }
0x1960   :  { %v4433_v60 = vmul.f32 %v10706_v41, %v10706_v41 }
0x1962   :  { %v4451_v4 = vsel %vm365_vm0, %v4433_v60, 0.0 }
0x1963   :  { %4452 = vadd.xlane.f32.xlu1 %v4451_v4  ;;  %v4408_v43 = vpop.xlane.xlu1 %4407 }
0x1964   :  { %v4418_v6 = vmul.f32 %v4408_v43, %v9064_v55 }
0x1966   :  { %v10712_v33 = vsub.f32 %v4382_v50, %v4418_v6 }
0x1968   :  { %v4434_v7 = vmul.f32 %v10712_v33, %v10712_v33 }
0x196a   :  { %v4454_v32 = vsel %vm365_vm0, %v4434_v7, 0.0 }
0x196b   :  { %4455 = vadd.xlane.f32.xlu2 %v4454_v32 }
0x197d   :  { %v4438_v10 = vpop.xlane.xlu0 %4437 }
0x197e   :  { %v4460_v56 = vmul.f32 %v4438_v10, %v9064_v55 }
0x1980   :  { %v4468_v52 = vadd.f32 1e-05, %v4460_v56 }
0x1982   :  { %8009 = vrsqrt.f32 %v4468_v52  ;;  %vm4482_vm14 = vweird.f32 %v4468_v52 }
0x1983   :  { %5036 = vperm.xlu2 %7357, %v8139_v58  }
0x1985   :  { %v4411_v54 = vpop.xlane.xlu0 %4410  ;;  %v4441_v0 = vpop.xlane.xlu2 %4440 }
0x1986   :  { %v4419_v2 = vmul.f32 %v4411_v54, %v9064_v55  ;;  %v4461_v53 = vmul.f32 %v4441_v0, %v9064_v55 }
0x1988   :  { %v8010_v45 = vpop.eup %8009  ;;  %v10725_v9 = vsub.f32 %v4383_v42, %v4419_v2  ;;  %v4469_v15 = vadd.f32 1e-05, %v4461_v53 }
0x1989   :  { %v4477_v40 = vmul.f32 %v8010_v45, %v4468_v52  ;;  %vm4483_vm13 = vweird.f32 %v8010_v45 }
0x198a   :  { %8011 = vrsqrt.f32 %v4469_v15  ;;  %v4435_v18 = vmul.f32 %v10725_v9, %v10725_v9  ;;  %vm4484_vm15 = vmor %vm4482_vm14, %vm4483_vm13  ;;  %vm4492_vm5 = vweird.f32 %v4469_v15 }
0x198b   :  { %v4478_v27 = vmul.f32 %v8010_v45, %v4477_v40 }
0x198c   :  { %v4457_v59 = vsel %vm365_vm0, %v4435_v18, 0.0 }
0x198d   :  { %v4479_v3 = vmul.f32 0.5, %v4478_v27  ;;  %4458 = vadd.xlane.f32.xlu0 %v4457_v59  ;;  %v4444_v39 = vpop.xlane.xlu1 %4443 }
0x198e   :  { %v4462_v31 = vmul.f32 %v4444_v39, %v9064_v55 }
0x198f   :  { %v4480_v50 = vsub.f32 1.5, %v4479_v3 }
0x1990   :  { %v8012_v44 = vpop.eup %8011  ;;  %v4470_v62 = vadd.f32 1e-05, %v4462_v31 }
0x1991   :  { %v4481_v34 = vmul.f32 %v8010_v45, %v4480_v50  ;;  %v4487_v25 = vmul.f32 %v8012_v44, %v4469_v15  ;;  %vm4493_vm4 = vweird.f32 %v8012_v44 }
0x1992   :  { %8013 = vrsqrt.f32 %v4470_v62  ;;  %vm4494_vm6 = vmor %vm4492_vm5, %vm4493_vm4  ;;  %vm4502_vm8 = vweird.f32 %v4470_v62 }
0x1993   :  { %v4485_v30 = vsel %vm4484_vm15, %v8010_v45, %v4481_v34  ;;  %v4488_v8 = vmul.f32 %v8012_v44, %v4487_v25 }
0x1994   :  { %v4556_v23 = vmul.f32 %v4485_v30, %v10674_v36  ;;  %v10773_v30 = vld [vmem:[#allocation11] ss:$0 sm:$0xff] }
0x1995   :  { %v4489_v42 = vmul.f32 0.5, %v4488_v8 }
0x1996   :  { %v4567_v35 = vmul.f32 %v10732_v1, %v4556_v23 }
0x1997   :  { %v4490_v47 = vsub.f32 1.5, %v4489_v42 }
0x1998   :  { %v8014_v24 = vpop.eup %8013  ;;  %v10740_v28 = vadd.f32 %v10735_v11, %v4567_v35 }
0x1999   :  { %v4491_v13 = vmul.f32 %v8012_v44, %v4490_v47  ;;  %v4497_v17 = vmul.f32 %v8014_v24, %v4470_v62  ;;  %vm4503_vm7 = vweird.f32 %v8014_v24 }
0x199a   :  { %7105 = vmatmul.msk.f32.vlgmr.msra.gmra.mxu1 %vm365_vm0, %v10740_v28  ;;  %vm4504_vm9 = vmor %vm4502_vm8, %vm4503_vm7 }
0x199b   :  { %v4495_v49 = vsel %vm4494_vm6, %v8012_v44, %v4491_v13  ;;  %v4498_v16 = vmul.f32 %v8014_v24, %v4497_v17  ;;  %v10770_v44 = vld [vmem:[#allocation10] ss:$0 sm:$0xff] }
0x199c   :  { %v4557_v36 = vmul.f32 %v4495_v49, %v10681_v51 }
0x199d   :  { %v4499_v5 = vmul.f32 0.5, %v4498_v16 }
0x199e   :  { %v4568_v57 = vmul.f32 %v10732_v1, %v4557_v36 }
0x199f   :  { %v4500_v63 = vsub.f32 1.5, %v4499_v5 }
0x19a0   :  { %v10747_v37 = vadd.f32 %v10735_v11, %v4568_v57 }
0x19a1   :  { %v4501_v19 = vmul.f32 %v8014_v24, %v4500_v63  ;;  %5031 = vperm.xlu0 %7355, %v8140_v12  }
0x19a2   :  { %7106 = vmatmul.msk.f32.gmra.mxu1 %vm365_vm0, %v10747_v37 }
0x19a3   :  { %v4505_v61 = vsel %vm4504_vm9, %v8014_v24, %v4501_v19 }
0x19a4   :  { %v4558_v48 = vmul.f32 %v4505_v61, %v10688_v46 }
0x19a6   :  { %v4569_v51 = vmul.f32 %v10732_v1, %v4558_v48 }
0x19a8   :  { %v10755_v20 = vadd.f32 %v10735_v11, %v4569_v51 }
0x19aa   :  { %7107 = vmatmul.msk.f32.gmra.mxu1 %vm365_vm0, %v10755_v20 }
0x19b1   :  { %v4447_v60 = vpop.xlane.xlu2 %4446 }
0x19b2   :  { %v4463_v4 = vmul.f32 %v4447_v60, %v9064_v55 }
0x19b4   :  { %v4471_v43 = vadd.f32 1e-05, %v4463_v4 }
0x19b6   :  { %8015 = vrsqrt.f32 %v4471_v43  ;;  %vm4512_vm11 = vweird.f32 %v4471_v43 }
0x19bc   :  { %v8016_v6 = vpop.eup %8015 }
0x19bd   :  { %v4507_v7 = vmul.f32 %v8016_v6, %v4471_v43  ;;  %vm4513_vm10 = vweird.f32 %v8016_v6 }
0x19be   :  { %vm4514_vm12 = vmor %vm4512_vm11, %vm4513_vm10 }
0x19bf   :  { %v4508_v32 = vmul.f32 %v8016_v6, %v4507_v7 }
0x19c1   :  { %v4509_v14 = vmul.f32 0.5, %v4508_v32 }
0x19c3   :  { %v4510_v22 = vsub.f32 1.5, %v4509_v14  ;;  %v7128_v14 = vld [vmem:[%s11495_s29 + $0x78] sm:$0xff] }
0x19c4   :  { %4755 = vmatpush.msra.mxu3 %v7128_v14 }
0x19c5   :  { %v4511_v46 = vmul.f32 %v8016_v6, %v4510_v22  ;;  %v7127_v22 = vld [vmem:[%s11495_s29 + $0x70] sm:$0xff] }
0x19c6   :  { %4756 = vmatpush.msra.mxu3 %v7127_v22 }
0x19c7   :  { %v4515_v26 = vsel %vm4514_vm12, %v8016_v6, %v4511_v46  ;;  %v7125_v46 = vld [vmem:[%s11495_s29 + $0x60] sm:$0xff] }
0x19c8   :  { %v4559_v29 = vmul.f32 %v4515_v26, %v10694_v38 }
0x19ca   :  { %v4570_v10 = vmul.f32 %v10732_v1, %v4559_v29 }
0x19cc   :  { %v10763_v56 = vadd.f32 %v10735_v11, %v4570_v10  ;;  %v7124_v10 = vld [vmem:[%s11495_s29 + $0x58] sm:$0xff] }
0x19ce   :  { %v4450_v52 = vpop.xlane.xlu0 %4449  ;;  %7108 = vmatmul.msk.f32.gmra.mxu1 %vm365_vm0, %v10763_v56 }
0x19cf   :  { %v4464_v58 = vmul.f32 %v4450_v52, %v9064_v55 }
0x19d1   :  { %v4472_v54 = vadd.f32 1e-05, %v4464_v58  ;;  %v7123_v58 = vld [vmem:[%s11495_s29 + $0x50] sm:$0xff] }
0x19d3   :  { %8017 = vrsqrt.f32 %v4472_v54  ;;  %vm4522_vm14 = vweird.f32 %v4472_v54 }
0x19d6   :  { %v4453_v0 = vpop.xlane.xlu1 %4452 }
0x19d7   :  { %v4465_v2 = vmul.f32 %v4453_v0, %v9064_v55  ;;  %v7121_v0 = vld [vmem:[%s11495_s29 + $0x40] sm:$0xff] }
0x19d9   :  { %v8018_v53 = vpop.eup %8017  ;;  %v4473_v45 = vadd.f32 1e-05, %v4465_v2 }
0x19da   :  { %v4517_v15 = vmul.f32 %v8018_v53, %v4472_v54  ;;  %vm4523_vm13 = vweird.f32 %v8018_v53  ;;  %v7122_v54 = vld [vmem:[%s11495_s29 + $0x48] sm:$0xff] }
0x19db   :  { %8019 = vrsqrt.f32 %v4473_v45  ;;  %vm4524_vm15 = vmor %vm4522_vm14, %vm4523_vm13  ;;  %vm4532_vm5 = vweird.f32 %v4473_v45 }
0x19dc   :  { %v4518_v38 = vmul.f32 %v8018_v53, %v4517_v15 }
0x19de   :  { %v4519_v40 = vmul.f32 0.5, %v4518_v38  ;;  %v4456_v18 = vpop.xlane.xlu2 %4455 }
0x19df   :  { %v4466_v27 = vmul.f32 %v4456_v18, %v9064_v55 }
0x19e0   :  { %v4520_v59 = vsub.f32 1.5, %v4519_v40 }
0x19e1   :  { %v8020_v3 = vpop.eup %8019  ;;  %v4474_v39 = vadd.f32 1e-05, %v4466_v27 }
0x19e2   :  { %v4521_v31 = vmul.f32 %v8018_v53, %v4520_v59  ;;  %v4527_v50 = vmul.f32 %v8020_v3, %v4473_v45  ;;  %vm4533_vm4 = vweird.f32 %v8020_v3  ;;  %v10808_v59 = vld [vmem:[%s11496_s0 + $0x1] ss:$0 sm:$0xff] }
0x19e3   :  { %8021 = vrsqrt.f32 %v4474_v39  ;;  %vm4534_vm6 = vmor %vm4532_vm5, %vm4533_vm4  ;;  %vm4542_vm8 = vweird.f32 %v4474_v39 }
0x19e4   :  { %v4525_v62 = vsel %vm4524_vm15, %v8018_v53, %v4521_v31  ;;  %v4528_v34 = vmul.f32 %v8020_v3, %v4527_v50 }
0x19e5   :  { %v4560_v25 = vmul.f32 %v4525_v62, %v10700_v21 }
0x19e6   :  { %v4529_v8 = vmul.f32 0.5, %v4528_v34  ;;  %v5037_v23 = vpop.permute.xlu2 %5036 }
0x19e7   :  { %v5049_v42 = vmul.f32 %v10770_v44, %v5037_v23  ;;  %v4571_v35 = vmul.f32 %v10732_v1, %v4560_v25 }
0x19e8   :  { %v4530_v47 = vsub.f32 1.5, %v4529_v8 }
0x19e9   :  { %v8022_v24 = vpop.eup %8021  ;;  %v5061_v13 = vadd.f32 %v10773_v30, %v5049_v42  ;;  %v10779_v17 = vadd.f32 %v10735_v11, %v4571_v35 }
0x19ea   :  { %v4531_v49 = vmul.f32 %v8020_v3, %v4530_v47  ;;  %v4537_v16 = vmul.f32 %v8022_v24, %v4474_v39  ;;  %vm4543_vm7 = vweird.f32 %v8022_v24 }
0x19eb   :  { %v5077_v21 = vmin.f32 %v5061_v13, 0.0  ;;  %7109 = vmatmul.msk.f32.gmra.mxu1 %vm365_vm0, %v10779_v17  ;;  %vm4544_vm9 = vmor %vm4542_vm8, %vm4543_vm7  ;;  %vm5069_vm10 = vcmp.gt.f32.partialorder %v5061_v13, 0.0 }
0x19ec   :  { %v4535_v36 = vsel %vm4534_vm6, %v8020_v3, %v4531_v49  ;;  %v4538_v5 = vmul.f32 %v8022_v24, %v4537_v16 }
0x19ed   :  { %v4561_v57 = vmul.f32 %v4535_v36, %v10706_v41  ;;  %v5092_v63 = vmul.f32 1.442695, %v5077_v21 }
0x19ee   :  { %v4539_v19 = vmul.f32 0.5, %v4538_v5 }
0x19ef   :  { %8023 = vpow2.f32 %v5092_v63  ;;  %v4572_v12 = vmul.f32 %v10732_v1, %v4561_v57 }
0x19f0   :  { %v4540_v61 = vsub.f32 1.5, %v4539_v19 }
0x19f1   :  { %v10786_v48 = vadd.f32 %v10735_v11, %v4572_v12 }
0x19f2   :  { %v4541_v51 = vmul.f32 %v8022_v24, %v4540_v61 }
0x19f3   :  { %7110 = vmatmul.msk.f32.gmra.mxu1 %vm365_vm0, %v10786_v48 }
0x19f4   :  { %v4545_v41 = vsel %vm4544_vm9, %v8022_v24, %v4541_v51 }
0x19f5   :  { %v8024_v60 = vpop.eup %8023  ;;  %v4562_v4 = vmul.f32 %v4545_v41, %v10712_v33  ;;  %v7126_v33 = vld [vmem:[%s11495_s29 + $0x68] sm:$0xff] }
0x19f6   :  { %v7146_v43 = vadd.f32 -1.0, %v8024_v60  ;;  %4757 = vmatpush.msra.mxu3 %v7126_v33 }
0x19f7   :  { %v4573_v6 = vmul.f32 %v10732_v1, %v4562_v4 }
0x19f8   :  { %v5109_v7 = vsel %vm5069_vm10, %v5061_v13, %v7146_v43  ;;  %4758 = vmatpush.msra.mxu3 %v7125_v46 }
0x19f9   :  { %5128 = vmatpush.msrb.mxu0 %v5109_v7  ;;  %v10793_v32 = vadd.f32 %v10735_v11, %v4573_v6 }
0x19fa   :  { %4759 = vmatpush.msra.mxu3 %v7124_v10 }
0x19fb   :  { %7111 = vmatmul.msk.f32.gmra.mxu1 %vm365_vm0, %v10793_v32 }
0x19fc   :  { %4760 = vmatpush.msra.mxu3 %v7123_v58 }
0x19fe   :  { %4761 = vmatpush.msra.mxu3 %v7122_v54 }
0x1a00   :  { %v4459_v26 = vpop.xlane.xlu0 %4458  ;;  %4762 = vmatpush.msra.mxu3 %v7121_v0 }
0x1a01   :  { %v4467_v29 = vmul.f32 %v4459_v26, %v9064_v55 }
0x1a03   :  { %v4475_v52 = vadd.f32 1e-05, %v4467_v29 }
0x1a05   :  { %8025 = vrsqrt.f32 %v4475_v52  ;;  %vm4552_vm12 = vweird.f32 %v4475_v52 }
0x1a0b   :  { %v8026_v2 = vpop.eup %8025 }
0x1a0c   :  { %v4547_v53 = vmul.f32 %v8026_v2, %v4475_v52  ;;  %vm4553_vm11 = vweird.f32 %v8026_v2 }
0x1a0d   :  { %vm4554_vm13 = vmor %vm4552_vm12, %vm4553_vm11 }
0x1a0e   :  { %v4548_v45 = vmul.f32 %v8026_v2, %v4547_v53 }
0x1a10   :  { %v4549_v15 = vmul.f32 0.5, %v4548_v45 }
0x1a12   :  { %v4550_v38 = vsub.f32 1.5, %v4549_v15 }
0x1a13   :  { %v5032_v40 = vpop.permute.xlu0 %5031 }
0x1a14   :  { %v4551_v18 = vmul.f32 %v8026_v2, %v4550_v38  ;;  %v5048_v27 = vmul.f32 %v10770_v44, %v5032_v40 }
0x1a16   :  { %v4555_v3 = vsel %vm4554_vm13, %v8026_v2, %v4551_v18  ;;  %v5060_v39 = vadd.f32 %v10773_v30, %v5048_v27 }
0x1a17   :  { %v4563_v31 = vmul.f32 %v4555_v3, %v10725_v9  ;;  %v4637_v50 = vpop.f32.mrf.mxu1 }
0x1a18   :  { %v5076_v62 = vmin.f32 %v5060_v39, 0.0  ;;  %v4638_v34 = vadd.f32 %v10808_v59, %v4637_v50  ;;  %vm5068_vm14 = vcmp.gt.f32.partialorder %v5060_v39, 0.0 }
0x1a19   :  { %v4574_v25 = vmul.f32 %v10732_v1, %v4563_v31 }
0x1a1a   :  { %v5090_v8 = vmul.f32 1.442695, %v5076_v62  ;;  %v4669_v23 = vmin.f32 %v4638_v34, 0.0  ;;  %vm4661_vm15 = vcmp.gt.f32.partialorder %v4638_v34, 0.0 }
0x1a1b   :  { %v10815_v42 = vadd.f32 %v10735_v11, %v4574_v25 }
0x1a1c   :  { %v4677_v35 = vmul.f32 1.442695, %v4669_v23  ;;  %8027 = vpow2.f32 %v5090_v8 }
0x1a1d   :  { %7112 = vmatmul.msk.f32.gmra.mxu1 %vm365_vm0, %v10815_v42 }
0x1a1e   :  { %8029 = vpow2.f32 %v4677_v35 }
0x1a1f   :  { %v4640_v47 = vpop.f32.mrf.mxu1 }
0x1a20   :  { %v4641_v9 = vadd.f32 %v10808_v59, %v4640_v47 }
0x1a22   :  { %v8028_v24 = vpop.eup %8027  ;;  %v4670_v13 = vmin.f32 %v4641_v9, 0.0  ;;  %vm4662_vm4 = vcmp.gt.f32.partialorder %v4641_v9, 0.0 }
0x1a23   :  { %v7145_v49 = vadd.f32 -1.0, %v8028_v24  ;;  %v7643_v24 = vld [vmem:[#allocation8 + $0x1] ss:$0 sm:$0xff] }
0x1a24   :  { %v8030_v16 = vpop.eup %8029  ;;  %v4679_v21 = vmul.f32 1.442695, %v4670_v13 }
0x1a25   :  { %v7113_v1 = vadd.f32 -1.0, %v8030_v16  ;;  %v5108_v36 = vsel %vm5068_vm14, %v5060_v39, %v7145_v49 }
0x1a26   :  { %8031 = vpow2.f32 %v4679_v21  ;;  %5129 = vmatpush.msrb.mxu0 %v5108_v36 }
0x1a27   :  { %v4701_v11 = vsel %vm4661_vm15, %v4638_v34, %v7113_v1  ;;  %v4643_v5 = vpop.f32.mrf.mxu1 }
0x1a28   :  { %v4644_v57 = vadd.f32 %v10808_v59, %v4643_v5  ;;  %7129 = vmatmul.msk.f32.vlgmr.msra.gmra.mxu3 %vm529_vm2, %v4701_v11 }
0x1a2a   :  { %v4671_v63 = vmin.f32 %v4644_v57, 0.0  ;;  %vm4663_vm5 = vcmp.gt.f32.partialorder %v4644_v57, 0.0 }
0x1a2c   :  { %v8032_v19 = vpop.eup %8031  ;;  %v4681_v12 = vmul.f32 1.442695, %v4671_v63 }
0x1a2d   :  { %v7114_v61 = vadd.f32 -1.0, %v8032_v19 }
0x1a2e   :  { %8033 = vpow2.f32 %v4681_v12 }
0x1a2f   :  { %v4702_v51 = vsel %vm4662_vm4, %v4641_v9, %v7114_v61 }
0x1a30   :  { %7130 = vmatmul.msk.f32.gmra.mxu3 %vm529_vm2, %v4702_v51 }
0x1a34   :  { %v8034_v41 = vpop.eup %8033 }
0x1a35   :  { %v7115_v60 = vadd.f32 -1.0, %v8034_v41 }
0x1a37   :  { %v4703_v4 = vsel %vm4663_vm5, %v4644_v57, %v7115_v60 }
0x1a38   :  { %7131 = vmatmul.msk.f32.gmra.mxu3 %vm529_vm2, %v4703_v4 }
0x1a4b   :  { %v4646_v43 = vpop.f32.mrf.mxu1 }
0x1a4c   :  { %v4647_v6 = vadd.f32 %v10808_v59, %v4646_v43 }
0x1a4e   :  { %v4672_v7 = vmin.f32 %v4647_v6, 0.0  ;;  %vm4664_vm6 = vcmp.gt.f32.partialorder %v4647_v6, 0.0 }
0x1a50   :  { %v4683_v14 = vmul.f32 1.442695, %v4672_v7 }
0x1a52   :  { %8035 = vpow2.f32 %v4683_v14 }
0x1a58   :  { %v8036_v22 = vpop.eup %8035 }
0x1a59   :  { %v7116_v33 = vadd.f32 -1.0, %v8036_v22 }
0x1a5b   :  { %v4704_v46 = vsel %vm4664_vm6, %v4647_v6, %v7116_v33 }
0x1a5c   :  { %7132 = vmatmul.msk.f32.gmra.mxu3 %vm529_vm2, %v4704_v46 }
0x1a68   :  { %v4649_v26 = vpop.f32.mrf.mxu1 }
0x1a69   :  { %v4650_v29 = vadd.f32 %v10808_v59, %v4649_v26  ;;  %v8141_v26 = vld [vmem:[%s8459_s5 + $0x20] sm:$0xff] }
0x1a6b   :  { %v4673_v10 = vmin.f32 %v4650_v29, 0.0  ;;  %vm4665_vm7 = vcmp.gt.f32.partialorder %v4650_v29, 0.0 }
0x1a6d   :  { %v4685_v52 = vmul.f32 1.442695, %v4673_v10 }
0x1a6f   :  { %8037 = vpow2.f32 %v4685_v52 }
0x1a70   :  { %v4652_v58 = vpop.f32.mrf.mxu1 }
0x1a71   :  { %v4653_v54 = vadd.f32 %v10808_v59, %v4652_v58 }
0x1a73   :  { %v4674_v0 = vmin.f32 %v4653_v54, 0.0  ;;  %vm4666_vm8 = vcmp.gt.f32.partialorder %v4653_v54, 0.0 }
0x1a75   :  { %v8038_v2 = vpop.eup %8037  ;;  %v4687_v53 = vmul.f32 1.442695, %v4674_v0 }
0x1a76   :  { %v7117_v45 = vadd.f32 -1.0, %v8038_v2 }
0x1a77   :  { %8039 = vpow2.f32 %v4687_v53 }
0x1a78   :  { %v4655_v15 = vpop.f32.mrf.mxu1  ;;  %v4705_v38 = vsel %vm4665_vm7, %v4650_v29, %v7117_v45 }
0x1a79   :  { %v4656_v40 = vadd.f32 %v10808_v59, %v4655_v15  ;;  %7133 = vmatmul.msk.f32.gmra.mxu3 %vm529_vm2, %v4705_v38 }
0x1a7b   :  { %v4675_v18 = vmin.f32 %v4656_v40, 0.0  ;;  %vm4667_vm9 = vcmp.gt.f32.partialorder %v4656_v40, 0.0 }
0x1a7d   :  { %v8040_v27 = vpop.eup %8039  ;;  %v4689_v3 = vmul.f32 1.442695, %v4675_v18 }
0x1a7e   :  { %v7118_v39 = vadd.f32 -1.0, %v8040_v27 }
0x1a7f   :  { %8041 = vpow2.f32 %v4689_v3 }
0x1a80   :  { %v4706_v31 = vsel %vm4666_vm8, %v4653_v54, %v7118_v39 }
0x1a81   :  { %7134 = vmatmul.msk.f32.gmra.mxu3 %vm529_vm2, %v4706_v31 }
0x1a85   :  { %v8042_v50 = vpop.eup %8041 }
0x1a86   :  { %v7119_v62 = vadd.f32 -1.0, %v8042_v50 }
0x1a88   :  { %v4707_v34 = vsel %vm4667_vm9, %v4656_v40, %v7119_v62 }
0x1a89   :  { %7135 = vmatmul.msk.f32.gmra.mxu3 %vm529_vm2, %v4707_v34 }
0x1a9a   :  { %v4658_v25 = vpop.f32.mrf.mxu1 }
0x1a9b   :  { %v4659_v8 = vadd.f32 %v10808_v59, %v4658_v25 }
0x1a9d   :  { %v4676_v23 = vmin.f32 %v4659_v8, 0.0  ;;  %vm4668_vm10 = vcmp.gt.f32.partialorder %v4659_v8, 0.0 }
0x1a9f   :  { %v4691_v35 = vmul.f32 1.442695, %v4676_v23 }
0x1aa1   :  { %8043 = vpow2.f32 %v4691_v35 }
0x1aa7   :  { %v8044_v47 = vpop.eup %8043 }
0x1aa8   :  { %v7120_v9 = vadd.f32 -1.0, %v8044_v47 }
0x1aaa   :  { %v4708_v13 = vsel %vm4668_vm10, %v4659_v8, %v7120_v9 }
0x1aab   :  { %v4764_v49 = vpop.f32.mrf.mxu3  ;;  %7136 = vmatmul.msk.f32.gmra.mxu3 %vm529_vm2, %v4708_v13 }
0x1aac   :  { %v4765_v16 = vadd.f32 %v7643_v24, %v4764_v49 }
0x1aae   :  { %v4788_v21 = vadd.f32 %v4765_v16, %v10740_v28 }
0x1ab0   :  { %v4800_v1 = vsel %vm365_vm0, %v4788_v21, 0.0 }
0x1ab1   :  { %4801 = vadd.xlane.f32.xlu2 %v4800_v1 }
0x1ab3   :  { %v4767_v36 = vpop.f32.mrf.mxu3 }
0x1ab4   :  { %v4768_v11 = vadd.f32 %v7643_v24, %v4767_v36 }
0x1ab6   :  { %v4789_v59 = vadd.f32 %v4768_v11, %v10747_v37 }
0x1ab8   :  { %v4803_v5 = vsel %vm365_vm0, %v4789_v59, 0.0 }
0x1ab9   :  { %4804 = vadd.xlane.f32.xlu1 %v4803_v5 }
0x1abb   :  { %v4770_v57 = vpop.f32.mrf.mxu3 }
0x1abc   :  { %v4771_v63 = vadd.f32 %v7643_v24, %v4770_v57 }
0x1abe   :  { %v4790_v19 = vadd.f32 %v4771_v63, %v10755_v20  ;;  %v8144_v63 = vld [vmem:[%s8459_s5] sm:$0xff] }
0x1ac0   :  { %v4806_v12 = vsel %vm365_vm0, %v4790_v19, 0.0 }
0x1ac1   :  { %4807 = vadd.xlane.f32.xlu0 %v4806_v12 }
0x1adf   :  { %v4773_v61 = vpop.f32.mrf.mxu3 }
0x1ae0   :  { %v4774_v51 = vadd.f32 %v7643_v24, %v4773_v61 }
0x1ae2   :  { %v4791_v28 = vadd.f32 %v4774_v51, %v10763_v56 }
0x1ae4   :  { %v4809_v41 = vsel %vm365_vm0, %v4791_v28, 0.0 }
0x1ae5   :  { %4810 = vadd.xlane.f32.xlu2 %v4809_v41 }
0x1afc   :  { %v4776_v60 = vpop.f32.mrf.mxu3 }
0x1afd   :  { %v4777_v37 = vadd.f32 %v7643_v24, %v4776_v60 }
0x1aff   :  { %v4792_v4 = vadd.f32 %v4777_v37, %v10779_v17  ;;  %v8142_v17 = vld [vmem:[%s8459_s5 + $0x18] sm:$0xff] }
0x1b01   :  { %v4812_v43 = vsel %vm365_vm0, %v4792_v4, 0.0 }
0x1b02   :  { %4813 = vadd.xlane.f32.xlu1 %v4812_v43 }
0x1b04   :  { %v4779_v20 = vpop.f32.mrf.mxu3 }
0x1b05   :  { %v4780_v6 = vadd.f32 %v7643_v24, %v4779_v20 }
0x1b07   :  { %v4793_v7 = vadd.f32 %v4780_v6, %v10786_v48 }
0x1b09   :  { %v4815_v14 = vsel %vm365_vm0, %v4793_v7, 0.0 }
0x1b0a   :  { %4816 = vadd.xlane.f32.xlu0 %v4815_v14 }
0x1b0c   :  { %v4782_v56 = vpop.f32.mrf.mxu3 }
0x1b0d   :  { %v4783_v22 = vadd.f32 %v7643_v24, %v4782_v56 }
0x1b0f   :  { %v4794_v33 = vadd.f32 %v4783_v22, %v10793_v32 }
0x1b11   :  { %v4818_v46 = vsel %vm365_vm0, %v4794_v33, 0.0 }
0x1b12   :  { %4819 = vadd.xlane.f32.xlu2 %v4818_v46 }
0x1b1e   :  { %5021 = vperm.xlu0 %7355, %v8141_v26  }
0x1b24   :  { %v4802_v18 = vpop.xlane.xlu2 %4801 }
0x1b25   :  { %v4824_v27 = vmul.f32 %v4802_v18, %v9064_v55 }
0x1b27   :  { %v10866_v3 = vsub.f32 %v4788_v21, %v4824_v27 }
0x1b29   :  { %v4840_v50 = vmul.f32 %v10866_v3, %v10866_v3 }
0x1b2a   :  { %5016 = vperm.xlu2 %7357, %v8142_v17  }
0x1b2b   :  { %v4848_v8 = vsel %vm365_vm0, %v4840_v50, 0.0 }
0x1b2c   :  { %v4805_v58 = vpop.xlane.xlu1 %4804 }
0x1b2d   :  { %v4825_v54 = vmul.f32 %v4805_v58, %v9064_v55 }
0x1b2e   :  { %v4785_v29 = vpop.f32.mrf.mxu3 }
0x1b2f   :  { %v4786_v10 = vadd.f32 %v7643_v24, %v4785_v29  ;;  %v10853_v0 = vsub.f32 %v4789_v59, %v4825_v54  ;;  %v8146_v29 = vld [vmem:[%s8459_s5 + $0x8] sm:$0xff] }
0x1b31   :  { %v4795_v52 = vadd.f32 %v4786_v10, %v10815_v42  ;;  %v4841_v2 = vmul.f32 %v10853_v0, %v10853_v0  ;;  %v8143_v42 = vld [vmem:[%s8459_s5 + $0x28] sm:$0xff] }
0x1b33   :  { %v4821_v48 = vsel %vm365_vm0, %v4795_v52, 0.0  ;;  %v4851_v45 = vsel %vm365_vm0, %v4841_v2, 0.0 }
0x1b34   :  { %4822 = vadd.xlane.f32.xlu1 %v4821_v48  ;;  %v4808_v32 = vpop.xlane.xlu0 %4807  ;;  %v5141_v48 = vld [vmem:[%s11498_s20] sm:$0xff] }
0x1b35   :  { %v4826_v53 = vmul.f32 %v4808_v32, %v9064_v55 }
0x1b37   :  { %v10859_v15 = vsub.f32 %v4790_v19, %v4826_v53  ;;  %v8145_v19 = vld [vmem:[%s8459_s5 + $0x10] sm:$0xff]  ;;  %s11511_s5 = sld [smem:[#allocation32_spill]] }
0x1b39   :  { %v4842_v38 = vmul.f32 %v10859_v15, %v10859_v15 }
0x1b3b   :  { %v4854_v40 = vsel %vm365_vm0, %v4842_v38, 0.0 }
0x1b48   :  { %4852 = vadd.xlane.f32.xlu0 %v4851_v45 }
0x1b4d   :  { %5026 = vperm.xlu1 %7356, %v8143_v42  }
0x1b53   :  { %4855 = vadd.xlane.f32.xlu2 %v4854_v40 }
0x1b58   :  { %v4811_v39 = vpop.xlane.xlu2 %4810 }
0x1b59   :  { %v4827_v31 = vmul.f32 %v4811_v39, %v9064_v55 }
0x1b5b   :  { %v10871_v34 = vsub.f32 %v4791_v28, %v4827_v31  ;;  %v5111_v28 = vld [vmem:[%s11497_s24] sm:$0xff] }
0x1b5d   :  { %v4843_v47 = vmul.f32 %v10871_v34, %v10871_v34 }
0x1b5f   :  { %v4857_v49 = vsel %vm365_vm0, %v4843_v47, 0.0 }
0x1b75   :  { %v4814_v62 = vpop.xlane.xlu1 %4813 }
0x1b76   :  { %v4828_v25 = vmul.f32 %v4814_v62, %v9064_v55 }
0x1b77   :  { %4849 = vadd.xlane.f32.xlu1 %v4848_v8 }
0x1b78   :  { %v10875_v23 = vsub.f32 %v4792_v4, %v4828_v25 }
0x1b7a   :  { %v4844_v35 = vmul.f32 %v10875_v23, %v10875_v23 }
0x1b7c   :  { %v4860_v9 = vsel %vm365_vm0, %v4844_v35, 0.0 }
0x1b7d   :  { %v4817_v24 = vpop.xlane.xlu0 %4816  ;;  %4861 = vadd.xlane.f32.xlu0 %v4860_v9 }
0x1b7e   :  { %v4829_v13 = vmul.f32 %v4817_v24, %v9064_v55 }
0x1b7f   :  { %4858 = vadd.xlane.f32.xlu1 %v4857_v49 }
0x1b80   :  { %v10884_v16 = vsub.f32 %v4793_v7, %v4829_v13 }
0x1b82   :  { %v4845_v21 = vmul.f32 %v10884_v16, %v10884_v16 }
0x1b84   :  { %v4863_v1 = vsel %vm365_vm0, %v4845_v21, 0.0 }
0x1b85   :  { %v4820_v36 = vpop.xlane.xlu2 %4819  ;;  %4864 = vadd.xlane.f32.xlu2 %v4863_v1 }
0x1b86   :  { %v4830_v11 = vmul.f32 %v4820_v36, %v9064_v55 }
0x1b88   :  { %v10890_v59 = vsub.f32 %v4794_v33, %v4830_v11 }
0x1b8a   :  { %v4846_v5 = vmul.f32 %v10890_v59, %v10890_v59 }
0x1b8c   :  { %v4866_v57 = vsel %vm365_vm0, %v4846_v5, 0.0 }
0x1b8d   :  { %4867 = vadd.xlane.f32.xlu1 %v4866_v57  ;;  %v5017_v4 = vpop.permute.xlu2 %5016 }
0x1b8e   :  { %v5045_v20 = vmul.f32 %v10770_v44, %v5017_v4 }
0x1b90   :  { %v5022_v37 = vpop.permute.xlu0 %5021  ;;  %v5057_v7 = vadd.f32 %v10773_v30, %v5045_v20 }
0x1b91   :  { %v5046_v43 = vmul.f32 %v10770_v44, %v5022_v37 }
0x1b92   :  { %v5073_v56 = vmin.f32 %v5057_v7, 0.0  ;;  %vm5065_vm13 = vcmp.gt.f32.partialorder %v5057_v7, 0.0 }
0x1b93   :  { %v5058_v6 = vadd.f32 %v10773_v30, %v5046_v43 }
0x1b94   :  { %v5084_v17 = vmul.f32 1.442695, %v5073_v56 }
0x1b95   :  { %v5074_v14 = vmin.f32 %v5058_v6, 0.0  ;;  %vm5066_vm12 = vcmp.gt.f32.partialorder %v5058_v6, 0.0 }
0x1b97   :  { %v5086_v46 = vmul.f32 1.442695, %v5074_v14 }
0x1b99   :  { %8045 = vpow2.f32 %v5086_v46 }
0x1b9a   :  { %8047 = vpow2.f32 %v5084_v17 }
0x1b9d   :  { %5001 = vperm.xlu2 %7357, %v8144_v63  }
0x1b9f   :  { %v8046_v58 = vpop.eup %8045 }
0x1ba0   :  { %v8048_v54 = vpop.eup %8047  ;;  %v7143_v53 = vadd.f32 -1.0, %v8046_v58 }
0x1ba1   :  { %v7142_v42 = vadd.f32 -1.0, %v8048_v54 }
0x1ba2   :  { %v5106_v38 = vsel %vm5066_vm12, %v5058_v6, %v7143_v53 }
0x1ba3   :  { %v5105_v40 = vsel %vm5065_vm13, %v5057_v7, %v7142_v42 }
0x1ba6   :  { %5011 = vperm.xlu1 %7356, %v8145_v19  }
0x1ba7   :  { %v4823_v12 = vpop.xlane.xlu1 %4822 }
0x1ba8   :  { %v4831_v61 = vmul.f32 %v4823_v12, %v9064_v55 }
0x1baa   :  { %v10898_v51 = vsub.f32 %v4795_v52, %v4831_v61 }
0x1bac   :  { %v4847_v41 = vmul.f32 %v10898_v51, %v10898_v51 }
0x1bae   :  { %5114 = vperm.xlu1 %7356, %v5111_v28   ;;  %v4869_v60 = vsel %vm365_vm0, %v4847_v41, 0.0 }
0x1baf   :  { %4870 = vadd.xlane.f32.xlu0 %v4869_v60 }
0x1bbb   :  { %v4853_v31 = vpop.xlane.xlu0 %4852 }
0x1bbc   :  { %v4873_v35 = vmul.f32 %v4853_v31, %v9064_v55 }
0x1bbe   :  { %v10919_v49 = vadd.f32 1e-05, %v4873_v35 }
0x1bbf   :  { %v5027_v22 = vpop.permute.xlu1 %5026 }
0x1bc0   :  { %v5047_v33 = vmul.f32 %v10770_v44, %v5027_v22 }
0x1bc2   :  { %v5059_v26 = vadd.f32 %v10773_v30, %v5047_v33 }
0x1bc3   :  { %5006 = vperm.xlu0 %7355, %v8146_v29  }
0x1bc4   :  { %v5075_v10 = vmin.f32 %v5059_v26, 0.0  ;;  %vm5067_vm11 = vcmp.gt.f32.partialorder %v5059_v26, 0.0 }
0x1bc6   :  { %v5088_v52 = vmul.f32 1.442695, %v5075_v10  ;;  %v4856_v39 = vpop.xlane.xlu2 %4855 }
0x1bc7   :  { %v4874_v24 = vmul.f32 %v4856_v39, %v9064_v55 }
0x1bc8   :  { %8049 = vpow2.f32 %v5088_v52 }
0x1bc9   :  { %v10926_v11 = vadd.f32 1e-05, %v4874_v24 }
0x1bcb   :  { %5144 = vperm.xlu0 %7355, %v5141_v48  }
0x1bce   :  { %v8050_v32 = vpop.eup %8049 }
0x1bcf   :  { %v7144_v2 = vadd.f32 -1.0, %v8050_v32 }
0x1bd1   :  { %v5107_v45 = vsel %vm5067_vm11, %v5059_v26, %v7144_v2 }
0x1bd2   :  { %5130 = vmatpush.msrb.mxu0 %v5107_v45 }
0x1bd4   :  { %5131 = vmatpush.msrb.mxu0 %v5106_v38 }
0x1bd6   :  { %5132 = vmatpush.msrb.mxu0 %v5105_v40 }
0x1bea   :  { %v4850_v18 = vpop.xlane.xlu1 %4849 }
0x1beb   :  { %v4872_v19 = vmul.f32 %v4850_v18, %v9064_v55 }
0x1bed   :  { %v10943_v60 = vadd.f32 1e-05, %v4872_v19 }
0x1bf0   :  { %v4862_v25 = vpop.xlane.xlu0 %4861 }
0x1bf1   :  { %v4876_v9 = vmul.f32 %v4862_v25, %v9064_v55 }
0x1bf2   :  { %v4859_v27 = vpop.xlane.xlu1 %4858 }
0x1bf3   :  { %v4875_v21 = vmul.f32 %v4859_v27, %v9064_v55  ;;  %v10924_v36 = vadd.f32 1e-05, %v4876_v9 }
0x1bf5   :  { %v10930_v5 = vadd.f32 1e-05, %v4875_v21  ;;  %vm4934_vm11 = vweird.f32 %v10924_v36 }
0x1bf8   :  { %v4865_v62 = vpop.xlane.xlu2 %4864 }
0x1bf9   :  { %v4877_v47 = vmul.f32 %v4865_v62, %v9064_v55 }
0x1bfb   :  { %v10922_v1 = vadd.f32 1e-05, %v4877_v47 }
0x1bfd   :  { %vm4944_vm7 = vweird.f32 %v10922_v1 }
0x1c00   :  { %v4868_v50 = vpop.xlane.xlu1 %4867  ;;  %v5002_v38 = vpop.permute.xlu2 %5001 }
0x1c01   :  { %v4878_v8 = vmul.f32 %v4868_v50, %v9064_v55  ;;  %v5042_v31 = vmul.f32 %v10770_v44, %v5002_v38 }
0x1c03   :  { %v10917_v13 = vadd.f32 1e-05, %v4878_v8 }
0x1c05   :  { %8051 = vrsqrt.f32 %v10917_v13  ;;  %vm4954_vm5 = vweird.f32 %v10917_v13 }
0x1c06   :  { %8053 = vrsqrt.f32 %v10919_v49 }
0x1c07   :  { %8055 = vrsqrt.f32 %v10922_v1 }
0x1c08   :  { %8057 = vrsqrt.f32 %v10924_v36 }
0x1c09   :  { %8059 = vrsqrt.f32 %v10926_v11 }
0x1c0a   :  { %8061 = vrsqrt.f32 %v10930_v5 }
0x1c0b   :  { %v10939_v61 = vpop.eup %8051 }
0x1c0c   :  { %v10941_v41 = vpop.eup %8053  ;;  %v4949_v20 = vmul.f32 %v10939_v61, %v10917_v13  ;;  %vm4955_vm15 = vweird.f32 %v10939_v61 }
0x1c0d   :  { %v10945_v37 = vpop.eup %8055  ;;  %v4899_v26 = vmul.f32 %v10941_v41, %v10919_v49  ;;  %vm10990_vm8 = vmor %vm4954_vm5, %vm4955_vm15 }
0x1c0e   :  { %v10947_v43 = vpop.eup %8057  ;;  %v4939_v14 = vmul.f32 %v10945_v37, %v10922_v1  ;;  %v4950_v46 = vmul.f32 %v10939_v61, %v4949_v20  ;;  %vm4945_vm4 = vweird.f32 %v10945_v37 }
0x1c0f   :  { %v10951_v6 = vpop.eup %8059  ;;  %v4929_v22 = vmul.f32 %v10947_v43, %v10924_v36  ;;  %v4900_v53 = vmul.f32 %v10941_v41, %v4899_v26  ;;  %vm4935_vm6 = vweird.f32 %v10947_v43  ;;  %vm11004_vm13 = vmor %vm4944_vm7, %vm4945_vm4  ;;  %vm4924_vm4 = vweird.f32 %v10930_v5 }
0x1c10   :  { %v10953_v7 = vpop.eup %8061  ;;  %v4909_v17 = vmul.f32 %v10951_v6, %v10926_v11  ;;  %v4940_v52 = vmul.f32 %v10945_v37, %v4939_v14  ;;  %v4951_v32 = vmul.f32 0.5, %v4950_v46  ;;  %vm4915_vm10 = vweird.f32 %v10951_v6 }
0x1c11   :  { %v4919_v29 = vmul.f32 %v10953_v7, %v10930_v5  ;;  %v4930_v58 = vmul.f32 %v10947_v43, %v4929_v22  ;;  %v4901_v25 = vmul.f32 0.5, %v4900_v53  ;;  %vm4925_vm12 = vweird.f32 %v10953_v7  ;;  %v7644_v5 = vld [vmem:[%s11492_s16 + $0x5] ss:$0 sm:$0xff] }
0x1c12   :  { %v4910_v45 = vmul.f32 %v10951_v6, %v4909_v17  ;;  %v4941_v40 = vmul.f32 0.5, %v4940_v52  ;;  %v4952_v50 = vsub.f32 1.5, %v4951_v32  ;;  %vm4914_vm7 = vweird.f32 %v10926_v11 }
0x1c13   :  { %v4920_v42 = vmul.f32 %v10953_v7, %v4919_v29  ;;  %v4931_v39 = vmul.f32 0.5, %v4930_v58 }
0x1c14   :  { %v4911_v8 = vmul.f32 0.5, %v4910_v45  ;;  %v4942_v47 = vsub.f32 1.5, %v4941_v40  ;;  %v7645_v40 = vld [vmem:[%s11493_s18 + $0x5] ss:$0 sm:$0xff] }
0x1c15   :  { %v4921_v35 = vmul.f32 0.5, %v4920_v42  ;;  %v4932_v21 = vsub.f32 1.5, %v4931_v39 }
0x1c16   :  { %v4943_v20 = vmul.f32 %v10945_v37, %v4942_v47 }
0x1c17   :  { %v4933_v22 = vmul.f32 %v10947_v43, %v4932_v21 }
0x1c18   :  { %v5012_v57 = vpop.permute.xlu1 %5011 }
0x1c19   :  { %v5044_v63 = vmul.f32 %v10770_v44, %v5012_v57  ;;  %v10980_v57 = vadd.f32 %v10773_v30, %v5042_v31 }
0x1c1b   :  { %v5056_v12 = vadd.f32 %v10773_v30, %v5044_v63  ;;  %v4953_v63 = vmul.f32 %v10939_v61, %v4952_v50  ;;  %v5070_v46 = vmin.f32 %v10980_v57, 0.0 }
0x1c1d   :  { %v5072_v28 = vmin.f32 %v5056_v12, 0.0  ;;  %vm5064_vm14 = vcmp.gt.f32.partialorder %v5056_v12, 0.0  ;;  %v4957_v26 = vsel %vm10990_vm8, %v10939_v61, %v4953_v63  ;;  %v4947_v61 = vsel %vm11004_vm13, %v10945_v37, %v4943_v20  ;;  %vm11028_vm8 = vmor %vm4924_vm4, %vm4925_vm12 }
0x1c1e   :  { %v5078_v45 = vmul.f32 1.442695, %v5070_v46  ;;  %vm4894_vm13 = vweird.f32 %v10943_v60  ;;  %vm5062_vm4 = vcmp.gt.f32.partialorder %v10980_v57, 0.0  ;;  %v7151_v46 = vld [vmem:[%s8499_s8 + $0x90] sm:$0xff] }
0x1c1f   :  { %v5082_v4 = vmul.f32 1.442695, %v5072_v28  ;;  %v4912_v28 = vsub.f32 1.5, %v4911_v8 }
0x1c21   :  { %8063 = vpow2.f32 %v5082_v4  ;;  %v4922_v4 = vsub.f32 1.5, %v4921_v35  ;;  %v4913_v58 = vmul.f32 %v10951_v6, %v4912_v28 }
0x1c22   :  { %8065 = vrsqrt.f32 %v10943_v60  ;;  %v4871_v56 = vpop.xlane.xlu0 %4870 }
0x1c23   :  { %v4879_v33 = vmul.f32 %v4871_v56, %v9064_v55  ;;  %v4923_v13 = vmul.f32 %v10953_v7, %v4922_v4 }
0x1c25   :  { %v4887_v10 = vadd.f32 1e-05, %v4879_v33  ;;  %v4927_v11 = vsel %vm11028_vm8, %v10953_v7, %v4923_v13  ;;  %v7152_v33 = vld [vmem:[%s8499_s8 + $0x98] sm:$0xff]  ;;  %v5115_v13 = vpop.permute.xlu1 %5114 }
0x1c27   :  { %v8064_v48 = vpop.eup %8063  ;;  %8067 = vrsqrt.f32 %v4887_v10  ;;  %vm4964_vm15 = vweird.f32 %v4887_v10 }
0x1c28   :  { %v10970_v54 = vpop.eup %8065  ;;  %v7141_v2 = vadd.f32 -1.0, %v8064_v48  ;;  %8069 = vpow2.f32 %v5078_v45 }
0x1c29   :  { %v4889_v27 = vmul.f32 %v10970_v54, %v10943_v60 }
0x1c2a   :  { %v5104_v18 = vsel %vm5064_vm14, %v5056_v12, %v7141_v2  ;;  %v4902_v12 = vsub.f32 1.5, %v4901_v25  ;;  %vm11008_vm14 = vmor %vm4934_vm11, %vm4935_vm6  ;;  %v4974_v2 = vmul.f32 %v4957_v26, %v10890_v59  ;;  %vm4904_vm6 = vweird.f32 %v10919_v49  ;;  %v7149_v26 = vld [vmem:[%s8499_s8 + $0x80] sm:$0xff] }
0x1c2b   :  { %5133 = vmatpush.msrb.mxu0 %v5104_v18  ;;  %v4890_v24 = vmul.f32 %v10970_v54, %v4889_v27  ;;  %v4937_v53 = vsel %vm11008_vm14, %v10947_v43, %v4933_v22  ;;  %v4973_v43 = vmul.f32 %v4947_v61, %v10884_v16  ;;  %vm11039_vm11 = vmor %vm4914_vm7, %vm4915_vm10  ;;  %vm4895_vm10 = vweird.f32 %v10970_v54  ;;  %v5140_v22 = vld [vmem:[%s11512_s15] sm:$0xff] }
0x1c2c   :  { %v4903_v42 = vmul.f32 %v10941_v41, %v4902_v12  ;;  %v4985_v18 = vmul.f32 %v7644_v5, %v4974_v2  ;;  %v4972_v27 = vmul.f32 %v4937_v53, %v10875_v23  ;;  %vm4896_vm14 = vmor %vm4894_vm13, %vm4895_vm10 }
0x1c2d   :  { %v8068_v62 = vpop.eup %8067  ;;  %v4891_v56 = vmul.f32 0.5, %v4890_v24 }
0x1c2e   :  { %v4959_v9 = vmul.f32 %v8068_v62, %v4887_v10  ;;  %vm4965_vm9 = vweird.f32 %v8068_v62  ;;  %v11067_v49 = vadd.f32 %v7645_v40, %v4985_v18  ;;  %v4983_v25 = vmul.f32 %v7644_v5, %v4972_v27 }
0x1c2f   :  { %v4892_v32 = vsub.f32 1.5, %v4891_v56  ;;  %vm4966_vm5 = vmor %vm4964_vm15, %vm4965_vm9  ;;  %vm4905_vm9 = vweird.f32 %v10941_v41 }
0x1c30   :  { %v4960_v19 = vmul.f32 %v8068_v62, %v4959_v9  ;;  %vm11055_vm12 = vmor %vm4904_vm6, %vm4905_vm9  ;;  %v8070_v9 = vpop.eup %8069  ;;  %v11076_v60 = vadd.f32 %v7645_v40, %v4983_v25 }
0x1c31   :  { %v4893_v39 = vmul.f32 %v10970_v54, %v4892_v32  ;;  %v4907_v23 = vsel %vm11055_vm12, %v10941_v41, %v4903_v42  ;;  %v7646_v32 = vld [vmem:[%s8504_s14 + $0x4] ss:$0 sm:$0xff] }
0x1c32   :  { %v4961_v14 = vmul.f32 0.5, %v4960_v19  ;;  %v4969_v41 = vmul.f32 %v4907_v23, %v10853_v0  ;;  %v7139_v19 = vadd.f32 -1.0, %v8070_v9 }
0x1c33   :  { %v4897_v35 = vsel %vm4896_vm14, %v10970_v54, %v4893_v39 }
0x1c34   :  { %v4962_v17 = vsub.f32 1.5, %v4961_v14  ;;  %v4968_v21 = vmul.f32 %v4897_v35, %v10866_v3  ;;  %v4980_v12 = vmul.f32 %v7644_v5, %v4969_v41  ;;  %v5110_v3 = vld [vmem:[%s11511_s5] sm:$0xff]  ;;  %v5102_v20 = vsel %vm5062_vm4, %v10980_v57, %v7139_v19  ;;  %v7150_v57 = vld [vmem:[%s8499_s8 + $0x88] sm:$0xff] }
0x1c35   :  { %v5007_v29 = vpop.permute.xlu0 %5006  ;;  %v7162_v19 = vld [vmem:[%s11491_s21 + $0x48] sm:$0xff] }
0x1c36   :  { %v4963_v36 = vmul.f32 %v8068_v62, %v4962_v17  ;;  %v5043_v48 = vmul.f32 %v10770_v44, %v5007_v29  ;;  %v4979_v4 = vmul.f32 %v7644_v5, %v4968_v21  ;;  %v11089_v14 = vadd.f32 %v7645_v40, %v4980_v12  ;;  %v11115_v44 = vld [vmem:[%s11513_s7] sm:$0xff]  ;;  %v7168_v21 = vld [vmem:[%s8499_s8 + $0xb0] sm:$0xff] }
0x1c38   :  { %v4967_v37 = vsel %vm4966_vm5, %v8068_v62, %v4963_v36  ;;  %v5055_v10 = vadd.f32 %v10773_v30, %v5043_v48  ;;  %v4971_v62 = vmul.f32 %v4927_v11, %v10871_v34  ;;  %v11093_v56 = vadd.f32 %v7645_v40, %v4979_v4  ;;  %v5171_v36 = vld [vmem:[#allocation13] sm:$0xff] }
0x1c39   :  { %v4975_v59 = vmul.f32 %v4967_v37, %v10898_v51  ;;  %v4917_v51 = vsel %vm11039_vm11, %v10951_v6, %v4913_v58  ;;  %v4984_v6 = vmul.f32 %v7644_v5, %v4973_v43 }
0x1c3a   :  { %v5071_v38 = vmin.f32 %v5055_v10, 0.0  ;;  %v4970_v8 = vmul.f32 %v4917_v51, %v10859_v15  ;;  %v4982_v47 = vmul.f32 %v7644_v5, %v4971_v62  ;;  %vm5063_vm15 = vcmp.gt.f32.partialorder %v5055_v10, 0.0 }
0x1c3b   :  { %v4986_v16 = vmul.f32 %v7644_v5, %v4975_v59  ;;  %v11072_v34 = vadd.f32 %v7645_v40, %v4984_v6 }
0x1c3c   :  { %v5080_v31 = vmul.f32 1.442695, %v5071_v38  ;;  %v4981_v24 = vmul.f32 %v7644_v5, %v4970_v8  ;;  %v11080_v15 = vadd.f32 %v7645_v40, %v4982_v47 }
0x1c3d   :  { %v11059_v50 = vadd.f32 %v7645_v40, %v4986_v16  ;;  %v5145_v1 = vpop.permute.xlu0 %5144 }
0x1c3e   :  { %8071 = vpow2.f32 %v5080_v31  ;;  %v11083_v28 = vadd.f32 %v7645_v40, %v4981_v24  ;;  %v7169_v24 = vld [vmem:[%s8499_s8 + $0xb8] sm:$0xff] }
0x1c3f   :  { %5158 = vmatpush.msrb.mxu2 %v11059_v50 }
0x1c41   :  { %5159 = vmatpush.msrb.mxu2 %v11067_v49 }
0x1c43   :  { %5160 = vmatpush.msrb.mxu2 %v11072_v34 }
0x1c44   :  { %v8072_v63 = vpop.eup %8071 }
0x1c45   :  { %5161 = vmatpush.msrb.mxu2 %v11076_v60  ;;  %v7140_v54 = vadd.f32 -1.0, %v8072_v63  ;;  %v7167_v63 = vld [vmem:[%s8499_s8 + $0xa8] sm:$0xff] }
0x1c47   :  { %5162 = vmatpush.msrb.mxu2 %v11080_v15  ;;  %v5103_v0 = vsel %vm5063_vm15, %v5055_v10, %v7140_v54  ;;  %v7166_v54 = vld [vmem:[%s8499_s8 + $0xa0] sm:$0xff] }
0x1c48   :  { %5134 = vmatpush.msrb.mxu0 %v5103_v0  ;;  %v7518_v0 = vpack.i.bf16 %v7168_v21, %v7169_v24  ;;  %v7523_v4 = vpack.i.bf16 %v7166_v54, %v7167_v63 }
0x1c49   :  { %5163 = vmatpush.msrb.mxu2 %v11083_v28 }
0x1c4a   :  { %5135 = vmatpush.msrb.mxu0 %v5102_v20  ;;  %v11137_v20 = vld [vmem:[%s8504_s14 + $0x5] ss:$0 sm:$0xff] }
0x1c4b   :  { %7147 = vmatmul.msk.f32.vlgmr.msrb.gmra.mxu0 %vm529_vm2, %v5110_v3  ;;  %5164 = vmatpush.msrb.mxu2 %v11089_v14  ;;  %v7161_v3 = vld [vmem:[%s11491_s21 + $0x40] sm:$0xff] }
0x1c4c   :  { %5200 = vmatpush.msra.mxu0 %v7152_v33 }
0x1c4d   :  { %5165 = vmatpush.msrb.mxu2 %v11093_v56 }
0x1c4e   :  { %7148 = vmatmul.msk.f32.vlgmr.msrb.gmra.mxu2 %vm529_vm2, %v5140_v22  ;;  %5201 = vmatpush.msra.mxu0 %v7151_v46 }
0x1c50   :  { %5202 = vmatpush.msra.mxu0 %v7150_v57 }
0x1c52   :  { %5203 = vmatpush.msra.mxu0 %v7149_v26 }
0x1cc8   :  { %v5137_v17 = vpop.f32.mrf.mxu0 }
0x1cc9   :  { %v5138_v52 = vadd.f32 %v5137_v17, %v5115_v13 }
0x1cd1   :  { %v5167_v29 = vpop.f32.mrf.mxu2 }
0x1cd2   :  { %v5168_v61 = vadd.f32 %v5167_v29, %v5145_v1 }
0x1cd4   :  { %v5170_v48 = vadd.f32 %v5168_v61, %v5138_v52  ;;  %v7648_v52 = vld [vmem:[#allocation7 + $0x4] ss:$0 sm:$0xff] }
0x1cd6   :  { %v11102_v58 = vadd.f32 %v5171_v36, %v5170_v48 }
0x1cd8   :  { %7154 = vmatmul.msk.f32.vlgmr.msra.gmra.mxu0 %vm365_vm0, %v11102_v58 }
0x1d55   :  { %v5205_v2 = vpop.f32.mrf.mxu0 }
0x1d56   :  { %v5206_v53 = vadd.f32 %v7646_v32, %v5205_v2 }
0x1d58   :  { %5272 = vrot.lane.b32.xlu0 %v5206_v53, %s8443_s13  ;;  %5274 = vrot.lane.b32.xlu1 %v5206_v53, %s8442_s9 }
0x1d59   :  { %5209 = vrot.lane.b32.xlu2 %v5206_v53, %s8444_s17 }
0x1db3   :  { %v5210_v45 = vpop.permute.xlu2 %5209 }
0x1db4   :  { %7155 = vmatpush.xpose.msk.msrb.mxu0 %vm455_vm1, %v5210_v45 }
0x1db7   :  { %7156 = vmatmul.msk.f32.vlgmr.msrb.gmra.mxu0 %vm455_vm1, %v5206_v53 }
0x1dca   :  { %v5275_v37 = vpop.permute.xlu1 %5274  ;;  %v5273_v10 = vpop.permute.xlu0 %5272 }
0x1dcb   :  { %7158 = vmatpush.xpose.msk.msra.mxu0 %vm455_vm1, %v5275_v37 }
0x1dce   :  { %7159 = vmatmul.msk.f32.vlgmr.msra.gmra.mxu0 %vm455_vm1, %v5273_v10 }
0x1dcf   :  { %5433 = vmatpush.msrb.mxu0 %v7169_v24  ;;  %v7650_v24 = vld [vmem:[%s11493_s18 + $0x6] ss:$0 sm:$0xff] }
0x1dd1   :  { %5434 = vmatpush.msrb.mxu0 %v7168_v21 }
0x1dd3   :  { %5435 = vmatpush.msrb.mxu0 %v7167_v63 }
0x1dd5   :  { %5436 = vmatpush.msrb.mxu0 %v7166_v54 }
0x1e34   :  { %v5232_v59 = vpop.f32.mrf.mxu0 }
0x1e35   :  { %v5233_v5 = vadd.f32 %v5232_v59, %v11115_v44 }
0x1e37   :  { %v5235_v43 = vsel %vm455_vm1, %v5233_v5, -inf }
0x1e38   :  { %5236 = vmax.xlane.f32.xlu1 %v5235_v43 }
0x1e4b   :  { %v5297_v42 = vpop.f32.mrf.mxu0 }
0x1e4c   :  { %v5298_v30 = vadd.f32 %v5297_v42, %v11115_v44 }
0x1e4e   :  { %v5300_v11 = vsel %vm455_vm1, %v5298_v30, -inf }
0x1e4f   :  { %5301 = vmax.xlane.f32.xlu2 %v5300_v11 }
0x1e67   :  { %5311 = vrot.lane.b32.xlu2 %v5206_v53, %s8445_s6 }
0x1eab   :  { %v5237_v38 = vpop.xlane.xlu1 %5236 }
0x1eac   :  { %v5238_v51 = vsub.f32 %v5233_v5, %v5237_v38 }
0x1eae   :  { %v5239_v16 = vmul.f32 1.442695, %v5238_v51 }
0x1eb0   :  { %8073 = vpow2.f32 %v5239_v16 }
0x1eb6   :  { %v8074_v40 = vpop.eup %8073 }
0x1eb7   :  { %v5241_v18 = vsel %vm455_vm1, %v8074_v40, 0.0 }
0x1eb8   :  { %5242 = vadd.xlane.f32.xlu1 %v5241_v18 }
0x1ec2   :  { %v5302_v27 = vpop.xlane.xlu2 %5301 }
0x1ec3   :  { %v5303_v39 = vsub.f32 %v5298_v30, %v5302_v27 }
0x1ec5   :  { %v5304_v31 = vmul.f32 1.442695, %v5303_v39 }
0x1ec7   :  { %8075 = vpow2.f32 %v5304_v31 }
0x1eca   :  { %v5312_v7 = vpop.permute.xlu2 %5311 }
0x1ecb   :  { %5332 = vmatpush.msrb.mxu1 %v5312_v7 }
0x1ecd   :  { %v8076_v6 = vpop.eup %8075 }
0x1ece   :  { %v5306_v62 = vsel %vm455_vm1, %v8076_v6, 0.0 }
0x1ecf   :  { %5307 = vadd.xlane.f32.xlu0 %v5306_v62 }
0x1ee3   :  { %5246 = vrot.lane.b32.xlu0 %v5206_v53, %s8446_s27 }
0x1f2b   :  { %v5243_v8 = vpop.xlane.xlu1 %5242 }
0x1f42   :  { %v5308_v23 = vpop.xlane.xlu0 %5307 }
0x1f43   :  { %8077 = vrcp.f32 %v5308_v23 }
0x1f44   :  { %8079 = vrcp.f32 %v5243_v8 }
0x1f49   :  { %v8078_v25 = vpop.eup %8077 }
0x1f4a   :  { %v5310_v35 = vmul.f32 %v8078_v25, %v8076_v6  ;;  %v8080_v47 = vpop.eup %8079 }
0x1f4b   :  { %v5245_v41 = vmul.f32 %v8080_v47, %v8074_v40  ;;  %v7649_v47 = vld [vmem:[%s11492_s16 + $0x6] ss:$0 sm:$0xff] }
0x1f4c   :  { %7160 = vmatmul.msk.f32.vlgmr.msrb.gmra.mxu1 %vm455_vm1, %v5310_v35 }
0x1f55   :  { %v5247_v9 = vpop.permute.xlu0 %5246 }
0x1f56   :  { %5267 = vmatpush.msra.mxu2 %v5247_v9 }
0x1f57   :  { %7157 = vmatmul.msk.f32.vlgmr.msra.gmra.mxu2 %vm455_vm1, %v5245_v41 }
0x1f58   :  { %5367 = vmatpush.msrb.mxu2 %v7162_v19 }
0x1f5a   :  { %5368 = vmatpush.msrb.mxu2 %v7161_v3 }
0x1fc9   :  { %v5334_v12 = vpop.f32.mrf.mxu1 }
0x1fca   :  { %5338 = vrot.lane.b32.xlu1 %v5334_v12, %s8430_s22 }
0x1fd2   :  { %7519 = vrot.lane.b32.xlu1 %v7518_v0, %s8444_s17 }
0x1fda   :  { %7524 = vrot.lane.b32.xlu1 %v7523_v4, %s8444_s17  ;;  %v5269_v22 = vpop.f32.mrf.mxu2 }
0x1fe2   :  { %5457 = vrot.lane.b32.xlu1 %v11137_v20, %s8444_s17 }
0x203c   :  { %v5339_v33 = vpop.permute.xlu1 %5338 }
0x203d   :  { %v5341_v46 = vsel %vm455_vm1, %v5269_v22, %v5339_v33 }
0x203e   :  { %7163 = vmatmul.msk.f32.vlgmr.msrb.gmra.mxu2 %vm1035_vm3, %v5341_v46 }
0x2044   :  { %v7520_v57 = vpop.permute.xlu1 %7519 }
0x2045   :  { %v7522_v26 = vunpack.i.h.bf16 %v7520_v57  ;;  %v7521_v17 = vunpack.i.l.bf16 %v7520_v57 }
0x2047   :  { %7299 = vmatpush.msra.mxu1 %v7521_v17  ;;  %5496 = vmatpush.msra.mxu0 %v7521_v17 }
0x2049   :  { %7300 = vmatpush.msra.mxu1 %v7522_v26  ;;  %5497 = vmatpush.msra.mxu0 %v7522_v26 }
0x204c   :  { %v7525_v13 = vpop.permute.xlu1 %7524 }
0x204d   :  { %v7527_v1 = vunpack.i.h.bf16 %v7525_v13  ;;  %v7526_v29 = vunpack.i.l.bf16 %v7525_v13 }
0x204f   :  { %7301 = vmatpush.msra.mxu1 %v7526_v29  ;;  %5498 = vmatpush.msra.mxu0 %v7526_v29 }
0x2051   :  { %7302 = vmatpush.msra.mxu1 %v7527_v1  ;;  %5499 = vmatpush.msra.mxu0 %v7527_v1 }
0x2052   :  { %7176 = vmatmul.msk.f32.vlgmr.msra.gmra.mxu1 %vm365_vm0, %v11076_v60 }
0x2054   :  { %v11153_v45 = vpop.permute.xlu1 %5457 }
0x205a   :  { %7177 = vmatmul.msk.f32.gmra.mxu1 %vm365_vm0, %v11072_v34 }
0x2062   :  { %7178 = vmatmul.msk.f32.gmra.mxu1 %vm365_vm0, %v11067_v49 }
0x206a   :  { %7179 = vmatmul.msk.f32.gmra.mxu1 %vm365_vm0, %v11059_v50 }
0x20c1   :  { %v5370_v61 = vpop.f32.mrf.mxu2 }
0x20c2   :  { %v5371_v36 = vadd.f32 %v7648_v52, %v5370_v61 }
0x20c4   :  { %v5373_v48 = vadd.f32 %v5371_v36, %v11102_v58 }
0x20c6   :  { %v5378_v32 = vsel %vm365_vm0, %v5373_v48, 0.0 }
0x20c7   :  { %5379 = vadd.xlane.f32.xlu2 %v5378_v32  ;;  %v11224_v32 = vld [vmem:[%s11514_s1] sm:$0xff] }
0x20cf   :  { %v5513_v2 = vpop.f32.mrf.mxu1 }
0x20d0   :  { %v11164_v43 = vadd.f32 %v5513_v2, %v11153_v45 }
0x20d7   :  { %v5516_v53 = vpop.f32.mrf.mxu1 }
0x20d8   :  { %v11167_v42 = vadd.f32 %v5516_v53, %v11153_v45 }
0x20da   :  { %v7533_v1 = vpack.i.bf16 %v11164_v43, %v11167_v42 }
0x20df   :  { %v5519_v37 = vpop.f32.mrf.mxu1 }
0x20e0   :  { %v5520_v10 = vadd.f32 %v5519_v37, %v11153_v45 }
0x20e2   :  { %5644 = vrot.lane.b32.xlu2 %v5520_v10, %s8443_s13 }
0x20e7   :  { %v5522_v59 = vpop.f32.mrf.mxu1 }
0x20e8   :  { %v5523_v5 = vadd.f32 %v5522_v59, %v11153_v45 }
0x20ea   :  { %5646 = vrot.lane.b32.xlu1 %v5523_v5, %s8443_s13  ;;  %7180 = vmatpush.xpose.msk.msrb.mxu1 %vm455_vm1, %v5523_v5  ;;  %v11160_v58 = vpack.i.bf16 %v5520_v10, %v5523_v5 }
0x20ee   :  { %7181 = vmatpush.xpose.msk.msrb.mxu1 %vm455_vm1, %v5520_v10 }
0x20f2   :  { %7182 = vmatpush.xpose.msk.msrb.mxu1 %vm455_vm1, %v11167_v42  ;;  %5640 = vrot.lane.b32.xlu1 %v11164_v43, %s8443_s13 }
0x20f6   :  { %7183 = vmatpush.xpose.msk.msrb.mxu1 %vm455_vm1, %v11164_v43 }
0x213a   :  { %v5380_v30 = vpop.xlane.xlu2 %5379 }
0x213b   :  { %v5381_v11 = vmul.f32 %v5380_v30, %v9064_v55 }
0x213d   :  { %v5382_v38 = vsub.f32 %v5373_v48, %v5381_v11 }
0x213f   :  { %v5383_v51 = vmul.f32 %v5382_v38, %v5382_v38 }
0x2141   :  { %v5384_v16 = vsel %vm365_vm0, %v5383_v51, 0.0 }
0x2142   :  { %5385 = vadd.xlane.f32.xlu0 %v5384_v16  ;;  %v5645_v18 = vpop.permute.xlu2 %5644 }
0x2156   :  { %5642 = vrot.lane.b32.xlu0 %v11167_v42, %s8443_s13 }
0x215c   :  { %v5647_v40 = vpop.permute.xlu1 %5646 }
0x215d   :  { %7190 = vmatpush.xpose.msk.msrb.mxu3 %vm455_vm1, %v5647_v40 }
0x2161   :  { %7191 = vmatpush.xpose.msk.msrb.mxu3 %vm455_vm1, %v5645_v18 }
0x2164   :  { %v5641_v9 = vpop.permute.xlu1 %5640 }
0x21b5   :  { %v5386_v27 = vpop.xlane.xlu0 %5385 }
0x21b6   :  { %v5387_v39 = vmul.f32 %v5386_v27, %v9064_v55 }
0x21b8   :  { %v5388_v31 = vadd.f32 1e-05, %v5387_v39 }
0x21ba   :  { %8081 = vrsqrt.f32 %v5388_v31  ;;  %vm5395_vm6 = vweird.f32 %v5388_v31 }
0x21c0   :  { %v8082_v7 = vpop.eup %8081 }
0x21c1   :  { %v5390_v6 = vmul.f32 %v8082_v7, %v5388_v31  ;;  %vm5396_vm5 = vweird.f32 %v8082_v7 }
0x21c2   :  { %vm5397_vm7 = vmor %vm5395_vm6, %vm5396_vm5 }
0x21c3   :  { %v5391_v62 = vmul.f32 %v8082_v7, %v5390_v6 }
0x21c5   :  { %v5392_v23 = vmul.f32 0.5, %v5391_v62 }
0x21c7   :  { %v5393_v25 = vsub.f32 1.5, %v5392_v23 }
0x21c8   :  { %v5643_v8 = vpop.permute.xlu0 %5642 }
0x21c9   :  { %v5394_v35 = vmul.f32 %v8082_v7, %v5393_v25  ;;  %7192 = vmatpush.xpose.msk.msrb.mxu3 %vm455_vm1, %v5643_v8 }
0x21cb   :  { %v5398_v41 = vsel %vm5397_vm7, %v8082_v7, %v5394_v35 }
0x21cc   :  { %v5399_v21 = vmul.f32 %v5398_v41, %v5382_v38 }
0x21cd   :  { %7193 = vmatpush.xpose.msk.msrb.mxu3 %vm455_vm1, %v5641_v9 }
0x21ce   :  { %v5403_v63 = vmul.f32 %v7649_v47, %v5399_v21 }
0x21d0   :  { %v11186_v54 = vadd.f32 %v7650_v24, %v5403_v63 }
0x21d2   :  { %7171 = vmatmul.msk.f32.vlgmr.msrb.gmra.mxu0 %vm365_vm0, %v11186_v54 }
0x21da   :  { %7172 = vmatmul.msk.f32.vlgmr.msra.gmra.mxu0 %vm365_vm0, %v11093_v56 }
0x21e2   :  { %7173 = vmatmul.msk.f32.gmra.mxu0 %vm365_vm0, %v11089_v14 }
0x21ea   :  { %7174 = vmatmul.msk.f32.gmra.mxu0 %vm365_vm0, %v11083_v28 }
0x21f2   :  { %7175 = vmatmul.msk.f32.gmra.mxu0 %vm365_vm0, %v11080_v15 }
0x224f   :  { %v5438_v19 = vpop.f32.mrf.mxu0 }
0x2250   :  { %v5439_v13 = vadd.f32 %v11137_v20, %v5438_v19 }
0x2257   :  { %v5501_v12 = vpop.f32.mrf.mxu0 }
0x2258   :  { %v5502_v0 = vadd.f32 %v5501_v12, %v11153_v45 }
0x225a   :  { %5632 = vrot.lane.b32.xlu2 %v5502_v0, %s8443_s13 }
0x225f   :  { %v5504_v4 = vpop.f32.mrf.mxu0 }
0x2260   :  { %v5505_v3 = vadd.f32 %v5504_v4, %v11153_v45 }
0x2262   :  { %5634 = vrot.lane.b32.xlu0 %v5505_v3, %s8443_s13  ;;  %v7548_v22 = vpack.i.bf16 %v5502_v0, %v5505_v3 }
0x2267   :  { %v5507_v33 = vpop.f32.mrf.mxu0 }
0x2268   :  { %v5508_v57 = vadd.f32 %v5507_v33, %v11153_v45 }
0x226f   :  { %v5510_v46 = vpop.f32.mrf.mxu0 }
0x2270   :  { %v5511_v26 = vadd.f32 %v5510_v46, %v11153_v45 }
0x2272   :  { %5638 = vrot.lane.b32.xlu1 %v5511_v26, %s8443_s13  ;;  %7184 = vmatpush.xpose.msk.msrb.mxu1 %vm455_vm1, %v5511_v26  ;;  %v7538_v17 = vpack.i.bf16 %v5508_v57, %v5511_v26 }
0x2276   :  { %7185 = vmatpush.xpose.msk.msrb.mxu1 %vm455_vm1, %v5508_v57 }
0x227a   :  { %5636 = vrot.lane.b32.xlu1 %v5508_v57, %s8443_s13  ;;  %7186 = vmatpush.xpose.msk.msrb.mxu1 %vm455_vm1, %v5505_v3 }
0x227e   :  { %7187 = vmatpush.xpose.msk.msrb.mxu1 %vm455_vm1, %v5502_v0 }
0x2281   :  { %7188 = vmatmul.msk.f32.vlgmr.msrb.gmra.mxu1 %vm455_vm1, %v5439_v13 }
0x2282   :  { %5630 = vrot.lane.b32.xlu1 %v5439_v13, %s8443_s13 }
0x228a   :  { %7529 = vrot.lane.b32.xlu1 %v11160_v58, %s8444_s17 }
0x2292   :  { %7534 = vrot.lane.b32.xlu1 %v7533_v1, %s8444_s17 }
0x22b4   :  { %v5633_v61 = vpop.permute.xlu2 %5632 }
0x22d4   :  { %v5635_v20 = vpop.permute.xlu0 %5634 }
0x22e4   :  { %v5639_v29 = vpop.permute.xlu1 %5638 }
0x22e5   :  { %7194 = vmatpush.xpose.msk.msrb.mxu3 %vm455_vm1, %v5639_v29 }
0x22ec   :  { %v5637_v52 = vpop.permute.xlu1 %5636 }
0x22ed   :  { %7195 = vmatpush.xpose.msk.msrb.mxu3 %vm455_vm1, %v5637_v52 }
0x22f1   :  { %7196 = vmatpush.xpose.msk.msrb.mxu3 %vm455_vm1, %v5635_v20  ;;  %v7200_v20 = vld [vmem:[%s11491_s21 + $0x50] sm:$0xff] }
0x22f4   :  { %v5631_v36 = vpop.permute.xlu1 %5630 }
0x22f5   :  { %7197 = vmatpush.xpose.msk.msrb.mxu3 %vm455_vm1, %v5633_v61 }
0x22f8   :  { %7198 = vmatmul.msk.f32.vlgmr.msrb.gmra.mxu3 %vm455_vm1, %v5631_v36 }
0x22fc   :  { %v7530_v48 = vpop.permute.xlu1 %7529 }
0x22fd   :  { %v7531_v2 = vunpack.i.l.bf16 %v7530_v48  ;;  %v7532_v45 = vunpack.i.h.bf16 %v7530_v48  ;;  %v7651_v48 = vld [vmem:[#allocation7 + $0x5] ss:$0 sm:$0xff] }
0x22fe   :  { %v5569_v53 = vpop.f32.mrf.mxu1 }
0x22ff   :  { %v5570_v37 = vadd.f32 %v5569_v53, %v11224_v32  ;;  %5618 = vmatpush.msra.mxu2 %v7531_v2 }
0x2301   :  { %5619 = vmatpush.msra.mxu2 %v7532_v45  ;;  %v5572_v10 = vsel %vm529_vm2, %v5570_v37, -inf }
0x2302   :  { %5573 = vmax.xlane.f32.xlu0 %v5572_v10 }
0x2304   :  { %v7535_v59 = vpop.permute.xlu1 %7534 }
0x2305   :  { %v7536_v5 = vunpack.i.l.bf16 %v7535_v59  ;;  %v7537_v43 = vunpack.i.h.bf16 %v7535_v59 }
0x2307   :  { %5620 = vmatpush.msra.mxu2 %v7536_v5 }
0x2309   :  { %5621 = vmatpush.msra.mxu2 %v7537_v43 }
0x2316   :  { %7539 = vrot.lane.b32.xlu0 %v7538_v17, %s8444_s17 }
0x231e   :  { %7549 = vrot.lane.b32.xlu0 %v7548_v22, %s8444_s17 }
0x2326   :  { %7559 = vrot.lane.b32.xlu0 %v7538_v17, %s8442_s9 }
0x232e   :  { %7564 = vrot.lane.b32.xlu0 %v7548_v22, %s8442_s9 }
0x2375   :  { %v5574_v42 = vpop.xlane.xlu0 %5573 }
0x2376   :  { %v5575_v30 = vsub.f32 %v5570_v37, %v5574_v42 }
0x2378   :  { %v5576_v11 = vmul.f32 1.442695, %v5575_v30  ;;  %v7208_v30 = vld [vmem:[%s11494_s2 + $0x58] sm:$0xff] }
0x237a   :  { %8083 = vpow2.f32 %v5576_v11  ;;  %v7207_v11 = vld [vmem:[%s11494_s2 + $0x50] sm:$0xff] }
0x237b   :  { %v5683_v38 = vpop.f32.mrf.mxu3 }
0x237c   :  { %v5684_v51 = vadd.f32 %v5683_v38, %v11224_v32  ;;  %v7206_v38 = vld [vmem:[%s11494_s2 + $0x48] sm:$0xff] }
0x237e   :  { %v5686_v16 = vsel %vm529_vm2, %v5684_v51, -inf }
0x237f   :  { %5687 = vmax.xlane.f32.xlu2 %v5686_v16 }
0x2380   :  { %v8084_v40 = vpop.eup %8083 }
0x2381   :  { %v5578_v18 = vsel %vm529_vm2, %v8084_v40, 0.0 }
0x2382   :  { %5579 = vadd.xlane.f32.xlu1 %v5578_v18 }
0x2388   :  { %v7540_v27 = vpop.permute.xlu0 %7539 }
0x2389   :  { %v7541_v39 = vunpack.i.l.bf16 %v7540_v27  ;;  %v7542_v31 = vunpack.i.h.bf16 %v7540_v27 }
0x238b   :  { %5622 = vmatpush.msra.mxu2 %v7541_v39 }
0x238d   :  { %5623 = vmatpush.msra.mxu2 %v7542_v31 }
0x2390   :  { %v7550_v7 = vpop.permute.xlu0 %7549 }
0x2391   :  { %v7551_v6 = vunpack.i.l.bf16 %v7550_v7  ;;  %v7552_v62 = vunpack.i.h.bf16 %v7550_v7 }
0x2393   :  { %5624 = vmatpush.msra.mxu2 %v7551_v6 }
0x2395   :  { %5625 = vmatpush.msra.mxu2 %v7552_v62  ;;  %v7652_v62 = vld [vmem:[%s11492_s16 + $0x7] ss:$0 sm:$0xff] }
0x2397   :  { %7544 = vrot.lane.b32.xlu2 %v11160_v58, %s8442_s9 }
0x2398   :  { %v7560_v58 = vpop.permute.xlu0 %7559 }
0x2399   :  { %v7561_v3 = vunpack.i.l.bf16 %v7560_v58  ;;  %v7562_v33 = vunpack.i.h.bf16 %v7560_v58  ;;  %v7213_v58 = vld [vmem:[%s11495_s29 + $0x88] sm:$0xff] }
0x239b   :  { %7554 = vrot.lane.b32.xlu1 %v7533_v1, %s8442_s9  ;;  %v7201_v1 = vld [vmem:[%s11491_s21 + $0x58] sm:$0xff] }
0x239c   :  { %5774 = vmatpush.msra.mxu1 %v7201_v1 }
0x239e   :  { %5775 = vmatpush.msra.mxu1 %v7200_v20 }
0x23a0   :  { %v7565_v22 = vpop.permute.xlu0 %7564 }
0x23a1   :  { %v7566_v46 = vunpack.i.l.bf16 %v7565_v22  ;;  %v7567_v57 = vunpack.i.h.bf16 %v7565_v22 }
0x23f2   :  { %v5688_v23 = vpop.xlane.xlu2 %5687 }
0x23f3   :  { %v5689_v25 = vsub.f32 %v5684_v51, %v5688_v23  ;;  %v7205_v51 = vld [vmem:[%s11494_s2 + $0x40] sm:$0xff] }
0x23f5   :  { %v5690_v8 = vmul.f32 1.442695, %v5689_v25  ;;  %v5580_v35 = vpop.xlane.xlu1 %5579  ;;  %v7653_v25 = vld [vmem:[%s11493_s18 + $0x7] ss:$0 sm:$0xff] }
0x23f6   :  { %8085 = vrcp.f32 %v5580_v35 }
0x23f7   :  { %8087 = vpow2.f32 %v5690_v8 }
0x23fa   :  { %v7545_v47 = vpop.permute.xlu2 %7544 }
0x23fb   :  { %v7546_v41 = vunpack.i.l.bf16 %v7545_v47  ;;  %v7547_v63 = vunpack.i.h.bf16 %v7545_v47 }
0x23fc   :  { %v8086_v9 = vpop.eup %8085 }
0x23fd   :  { %v8088_v24 = vpop.eup %8087  ;;  %v5582_v21 = vmul.f32 %v8086_v9, %v8084_v40  ;;  %5732 = vmatpush.msrb.mxu2 %v7546_v41  ;;  %v7219_v41 = vld [vmem:[%s11495_s29 + $0xb8] sm:$0xff]  ;;  %v7218_v9 = vld [vmem:[%s11495_s29 + $0xb0] sm:$0xff] }
0x23fe   :  { %v5692_v19 = vsel %vm529_vm2, %v8088_v24, 0.0  ;;  %5879 = vmatpush.msra.mxu3 %v7219_v41 }
0x23ff   :  { %5693 = vadd.xlane.f32.xlu2 %v5692_v19  ;;  %7189 = vmatmul.msk.f32.vlgmr.msra.gmra.mxu2 %vm529_vm2, %v5582_v21  ;;  %v7216_v21 = vld [vmem:[%s11495_s29 + $0xa0] sm:$0xff]  ;;  %v7214_v19 = vld [vmem:[%s11495_s29 + $0x90] sm:$0xff] }
0x2400   :  { %5733 = vmatpush.msrb.mxu2 %v7547_v63  ;;  %5880 = vmatpush.msra.mxu3 %v7218_v9  ;;  %v7215_v63 = vld [vmem:[%s11495_s29 + $0x98] sm:$0xff] }
0x240d   :  { %v7555_v12 = vpop.permute.xlu1 %7554 }
0x240e   :  { %v7556_v0 = vunpack.i.l.bf16 %v7555_v12  ;;  %v7557_v4 = vunpack.i.h.bf16 %v7555_v12  ;;  %v7212_v12 = vld [vmem:[%s11495_s29 + $0x80] sm:$0xff] }
0x2410   :  { %5734 = vmatpush.msrb.mxu2 %v7556_v0  ;;  %v7654_v0 = vld [vmem:[%s11496_s0 + $0x2] ss:$0 sm:$0xff] }
0x2412   :  { %5735 = vmatpush.msrb.mxu2 %v7557_v4 }
0x2414   :  { %5736 = vmatpush.msrb.mxu2 %v7561_v3 }
0x2416   :  { %5737 = vmatpush.msrb.mxu2 %v7562_v33 }
0x2418   :  { %5738 = vmatpush.msrb.mxu2 %v7566_v46 }
0x241a   :  { %5739 = vmatpush.msrb.mxu2 %v7567_v57 }
0x241c   :  { %5840 = vmatpush.msra.mxu2 %v7208_v30 }
0x241e   :  { %5841 = vmatpush.msra.mxu2 %v7207_v11 }
0x2420   :  { %5842 = vmatpush.msra.mxu2 %v7206_v38 }
0x2422   :  { %5843 = vmatpush.msra.mxu2 %v7205_v51 }
0x2472   :  { %v5694_v26 = vpop.xlane.xlu2 %5693 }
0x2473   :  { %8089 = vrcp.f32 %v5694_v26 }
0x2479   :  { %v8090_v17 = vpop.eup %8089 }
0x247a   :  { %v5696_v13 = vmul.f32 %v8090_v17, %v8088_v24  ;;  %v7217_v24 = vld [vmem:[%s11495_s29 + $0xa8] sm:$0xff] }
0x247b   :  { %5881 = vmatpush.msra.mxu3 %v7217_v24  ;;  %v7655_v17 = vld [vmem:[#allocation8 + $0x2] ss:$0 sm:$0xff] }
0x247c   :  { %7199 = vmatmul.msk.f32.vlgmr.msrb.gmra.mxu2 %vm529_vm2, %v5696_v13 }
0x247d   :  { %5882 = vmatpush.msra.mxu3 %v7216_v21 }
0x247f   :  { %5883 = vmatpush.msra.mxu3 %v7215_v63 }
0x2481   :  { %5884 = vmatpush.msra.mxu3 %v7214_v19 }
0x2482   :  { %v5627_v29 = vpop.f32.mrf.mxu2 }
0x2483   :  { %5885 = vmatpush.msra.mxu3 %v7213_v58 }
0x2485   :  { %5886 = vmatpush.msra.mxu3 %v7212_v12 }
0x24ff   :  { %v5741_v52 = vpop.f32.mrf.mxu2 }
0x2500   :  { %5745 = vrot.lane.b32.xlu0 %v5741_v52, %s8430_s22 }
0x2572   :  { %v5746_v61 = vpop.permute.xlu0 %5745 }
0x2573   :  { %v5748_v36 = vsel %vm455_vm1, %v5627_v29, %v5746_v61 }
0x2574   :  { %7202 = vmatmul.msk.f32.vlgmr.msra.gmra.mxu1 %vm1035_vm3, %v5748_v36 }
0x25f1   :  { %v5777_v2 = vpop.f32.mrf.mxu1 }
0x25f2   :  { %v5778_v53 = vadd.f32 %v7651_v48, %v5777_v2 }
0x25f4   :  { %v5780_v45 = vadd.f32 %v5778_v53, %v11186_v54  ;;  %v7226_v53 = vld [vmem:[%s8499_s8 + $0xd8] sm:$0xff] }
0x25f5   :  { %5951 = vmatpush.msrb.mxu1 %v7226_v53 }
0x25f6   :  { %v5785_v37 = vsel %vm365_vm0, %v5780_v45, 0.0 }
0x25f7   :  { %5786 = vadd.xlane.f32.xlu1 %v5785_v37  ;;  %v7224_v37 = vld [vmem:[%s8499_s8 + $0xc8] sm:$0xff] }
0x266a   :  { %v5787_v10 = vpop.xlane.xlu1 %5786 }
0x266b   :  { %v5788_v59 = vmul.f32 %v5787_v10, %v9064_v55  ;;  %v7223_v10 = vld [vmem:[%s8499_s8 + $0xc0] sm:$0xff] }
0x266d   :  { %v5789_v5 = vsub.f32 %v5780_v45, %v5788_v59  ;;  %v7225_v45 = vld [vmem:[%s8499_s8 + $0xd0] sm:$0xff] }
0x266e   :  { %5952 = vmatpush.msrb.mxu1 %v7225_v45 }
0x266f   :  { %v5790_v43 = vmul.f32 %v5789_v5, %v5789_v5 }
0x2670   :  { %5953 = vmatpush.msrb.mxu1 %v7224_v37 }
0x2671   :  { %v5791_v42 = vsel %vm365_vm0, %v5790_v43, 0.0 }
0x2672   :  { %5792 = vadd.xlane.f32.xlu0 %v5791_v42  ;;  %5954 = vmatpush.msrb.mxu1 %v7223_v10 }
0x26e5   :  { %v5793_v54 = vpop.xlane.xlu0 %5792 }
0x26e6   :  { %v5794_v16 = vmul.f32 %v5793_v54, %v9064_v55 }
0x26e8   :  { %v5795_v40 = vadd.f32 1e-05, %v5794_v16  ;;  %v7656_v16 = vld [vmem:[%s11492_s16 + $0x8] ss:$0 sm:$0xff] }
0x26ea   :  { %8091 = vrsqrt.f32 %v5795_v40  ;;  %vm5802_vm9 = vweird.f32 %v5795_v40 }
0x26f0   :  { %v8092_v18 = vpop.eup %8091 }
0x26f1   :  { %v5797_v27 = vmul.f32 %v8092_v18, %v5795_v40  ;;  %vm5803_vm8 = vweird.f32 %v8092_v18 }
0x26f2   :  { %vm5804_vm11 = vmor %vm5802_vm9, %vm5803_vm8 }
0x26f3   :  { %v5798_v39 = vmul.f32 %v8092_v18, %v5797_v27 }
0x26f5   :  { %v5799_v31 = vmul.f32 0.5, %v5798_v39 }
0x26f7   :  { %v5800_v7 = vsub.f32 1.5, %v5799_v31 }
0x26f9   :  { %v5801_v6 = vmul.f32 %v8092_v18, %v5800_v7  ;;  %v7658_v7 = vld [vmem:[%s8504_s14 + $0x6] ss:$0 sm:$0xff] }
0x26fb   :  { %v5805_v23 = vsel %vm5804_vm11, %v8092_v18, %v5801_v6  ;;  %v7657_v18 = vld [vmem:[%s11493_s18 + $0x8] ss:$0 sm:$0xff] }
0x26fc   :  { %v5806_v8 = vmul.f32 %v5805_v23, %v5789_v5 }
0x26fe   :  { %v5810_v35 = vmul.f32 %v7652_v62, %v5806_v8 }
0x2700   :  { %v5814_v47 = vadd.f32 %v7653_v25, %v5810_v35 }
0x2702   :  { %7210 = vmatmul.msk.f32.vlgmr.msra.gmra.mxu2 %vm365_vm0, %v5814_v47 }
0x2785   :  { %v5845_v4 = vpop.f32.mrf.mxu2 }
0x2786   :  { %v5846_v3 = vadd.f32 %v7654_v0, %v5845_v4 }
0x2788   :  { %v5849_v22 = vmin.f32 %v5846_v3, 0.0  ;;  %vm5848_vm10 = vcmp.gt.f32.partialorder %v5846_v3, 0.0 }
0x278a   :  { %v5850_v33 = vmul.f32 1.442695, %v5849_v22 }
0x278c   :  { %8093 = vpow2.f32 %v5850_v33  ;;  %v7242_v33 = vld [vmem:[%s8499_s8 + $0xf0] sm:$0xff] }
0x2792   :  { %v8094_v46 = vpop.eup %8093 }
0x2793   :  { %v7211_v57 = vadd.f32 -1.0, %v8094_v46  ;;  %v7243_v46 = vld [vmem:[%s8499_s8 + $0xf8] sm:$0xff] }
0x2795   :  { %v5853_v26 = vsel %vm5848_vm10, %v5846_v3, %v7211_v57  ;;  %v7568_v57 = vpack.i.bf16 %v7242_v33, %v7243_v46 }
0x2796   :  { %7220 = vmatmul.msk.f32.vlgmr.msra.gmra.mxu3 %vm529_vm2, %v5853_v26 }
0x2819   :  { %v5888_v13 = vpop.f32.mrf.mxu3 }
0x281a   :  { %v5889_v1 = vadd.f32 %v7655_v17, %v5888_v13  ;;  %v7241_v13 = vld [vmem:[%s8499_s8 + $0xe8] sm:$0xff] }
0x281c   :  { %v5891_v29 = vadd.f32 %v5889_v1, %v5814_v47  ;;  %v7240_v1 = vld [vmem:[%s8499_s8 + $0xe0] sm:$0xff]  ;;  %s8448_s8 = smov 64  }
0x281e   :  { %v5896_v52 = vsel %vm365_vm0, %v5891_v29, 0.0 }
0x281f   :  { %5897 = vadd.xlane.f32.xlu2 %v5896_v52 }
0x2892   :  { %v5898_v20 = vpop.xlane.xlu2 %5897 }
0x2893   :  { %v5899_v61 = vmul.f32 %v5898_v20, %v9064_v55 }
0x2895   :  { %v5900_v36 = vsub.f32 %v5891_v29, %v5899_v61  ;;  %v7573_v29 = vpack.i.bf16 %v7240_v1, %v7241_v13 }
0x2897   :  { %v5901_v48 = vmul.f32 %v5900_v36, %v5900_v36 }
0x2899   :  { %v5902_v2 = vsel %vm365_vm0, %v5901_v48, 0.0 }
0x289a   :  { %5903 = vadd.xlane.f32.xlu2 %v5902_v2 }
0x290d   :  { %v5904_v59 = vpop.xlane.xlu2 %5903 }
0x290e   :  { %v5905_v5 = vmul.f32 %v5904_v59, %v9064_v55 }
0x2910   :  { %v5906_v43 = vadd.f32 1e-05, %v5905_v5 }
0x2912   :  { %8095 = vrsqrt.f32 %v5906_v43  ;;  %vm5913_vm13 = vweird.f32 %v5906_v43 }
0x2918   :  { %v8096_v42 = vpop.eup %8095 }
0x2919   :  { %v5908_v30 = vmul.f32 %v8096_v42, %v5906_v43  ;;  %vm5914_vm12 = vweird.f32 %v8096_v42 }
0x291a   :  { %vm5915_vm14 = vmor %vm5913_vm13, %vm5914_vm12  ;;  %vm6665_vm12 = vcmask 785408  }
0x291b   :  { %v5909_v11 = vmul.f32 %v8096_v42, %v5908_v30  ;;  %v7235_v30 = vld [vmem:[%s11491_s21 + $0x60] sm:$0xff] }
0x291d   :  { %v5910_v38 = vmul.f32 0.5, %v5909_v11 }
0x291f   :  { %v5911_v51 = vsub.f32 1.5, %v5910_v38 }
0x2921   :  { %v5912_v54 = vmul.f32 %v8096_v42, %v5911_v51 }
0x2923   :  { %v5916_v40 = vsel %vm5915_vm14, %v8096_v42, %v5912_v54 }
0x2924   :  { %v5917_v27 = vmul.f32 %v5916_v40, %v5900_v36 }
0x2926   :  { %v5921_v39 = vmul.f32 %v7656_v16, %v5917_v27 }
0x2928   :  { %v11278_v31 = vadd.f32 %v7657_v18, %v5921_v39 }
0x292a   :  { %7228 = vmatmul.msk.f32.vlgmr.msrb.gmra.mxu1 %vm365_vm0, %v11278_v31 }
0x29a7   :  { %v5956_v6 = vpop.f32.mrf.mxu1 }
0x29a8   :  { %v5957_v62 = vadd.f32 %v7658_v7, %v5956_v6 }
0x29aa   :  { %6023 = vrot.lane.b32.xlu0 %v5957_v62, %s8443_s13  ;;  %6025 = vrot.lane.b32.xlu1 %v5957_v62, %s8442_s9 }
0x29ab   :  { %5960 = vrot.lane.b32.xlu2 %v5957_v62, %s8444_s17 }
0x2a05   :  { %v5961_v23 = vpop.permute.xlu2 %5960 }
0x2a06   :  { %7229 = vmatpush.xpose.msk.msrb.mxu2 %vm455_vm1, %v5961_v23 }
0x2a09   :  { %7230 = vmatmul.msk.f32.vlgmr.msrb.gmra.mxu2 %vm455_vm1, %v5957_v62 }
0x2a1c   :  { %v6026_v25 = vpop.permute.xlu1 %6025  ;;  %v6024_v8 = vpop.permute.xlu0 %6023 }
0x2a1d   :  { %7232 = vmatpush.xpose.msk.msra.mxu2 %vm455_vm1, %v6026_v25 }
0x2a20   :  { %7233 = vmatmul.msk.f32.vlgmr.msra.gmra.mxu2 %vm455_vm1, %v6024_v8 }
0x2a21   :  { %6184 = vmatpush.msrb.mxu2 %v7243_v46 }
0x2a23   :  { %6185 = vmatpush.msrb.mxu2 %v7242_v33 }
0x2a25   :  { %6186 = vmatpush.msrb.mxu2 %v7241_v13 }
0x2a27   :  { %6187 = vmatpush.msrb.mxu2 %v7240_v1 }
0x2a8c   :  { %v5983_v35 = vpop.f32.mrf.mxu2 }
0x2a8d   :  { %v5984_v47 = vadd.f32 %v5983_v35, %v11115_v44 }
0x2a8f   :  { %v5986_v41 = vsel %vm455_vm1, %v5984_v47, -inf }
0x2a90   :  { %5987 = vmax.xlane.f32.xlu1 %v5986_v41 }
0x2aa3   :  { %v6048_v9 = vpop.f32.mrf.mxu2 }
0x2aa4   :  { %v6049_v24 = vadd.f32 %v6048_v9, %v11115_v44 }
0x2aa6   :  { %v6051_v21 = vsel %vm455_vm1, %v6049_v24, -inf }
0x2aa7   :  { %6052 = vmax.xlane.f32.xlu2 %v6051_v21 }
0x2abf   :  { %6062 = vrot.lane.b32.xlu2 %v5957_v62, %s8445_s6 }
0x2ac7   :  { %7569 = vrot.lane.b32.xlu2 %v7568_v57, %s8444_s17 }
0x2b03   :  { %v5988_v63 = vpop.xlane.xlu1 %5987 }
0x2b04   :  { %v5989_v19 = vsub.f32 %v5984_v47, %v5988_v63  ;;  %v7660_v47 = vld [vmem:[#allocation7 + $0x6] ss:$0 sm:$0xff] }
0x2b06   :  { %v5990_v58 = vmul.f32 1.442695, %v5989_v19 }
0x2b08   :  { %8097 = vpow2.f32 %v5990_v58 }
0x2b0e   :  { %v8098_v12 = vpop.eup %8097 }
0x2b0f   :  { %v5992_v0 = vsel %vm455_vm1, %v8098_v12, 0.0 }
0x2b10   :  { %5993 = vadd.xlane.f32.xlu1 %v5992_v0 }
0x2b1a   :  { %v6053_v4 = vpop.xlane.xlu2 %6052 }
0x2b1b   :  { %v6054_v3 = vsub.f32 %v6049_v24, %v6053_v4 }
0x2b1d   :  { %v6055_v44 = vmul.f32 1.442695, %v6054_v3 }
0x2b1f   :  { %8099 = vpow2.f32 %v6055_v44 }
0x2b22   :  { %v6063_v22 = vpop.permute.xlu2 %6062 }
0x2b23   :  { %6083 = vmatpush.msrb.mxu3 %v6063_v22 }
0x2b25   :  { %v8100_v26 = vpop.eup %8099 }
0x2b26   :  { %v6057_v17 = vsel %vm455_vm1, %v8100_v26, 0.0 }
0x2b27   :  { %6058 = vadd.xlane.f32.xlu0 %v6057_v17 }
0x2b2a   :  { %v7570_v52 = vpop.permute.xlu2 %7569 }
0x2b2b   :  { %v7572_v20 = vunpack.i.h.bf16 %v7570_v52  ;;  %v7571_v61 = vunpack.i.l.bf16 %v7570_v52 }
0x2b2d   :  { %6223 = vmatpush.msra.mxu3 %v7571_v61 }
0x2b2f   :  { %6224 = vmatpush.msra.mxu3 %v7572_v20 }
0x2b3b   :  { %5997 = vrot.lane.b32.xlu0 %v5957_v62, %s8446_s27 }
0x2b43   :  { %7574 = vrot.lane.b32.xlu0 %v7573_v29, %s8444_s17 }
0x2b83   :  { %v5994_v2 = vpop.xlane.xlu1 %5993 }
0x2b9a   :  { %v6059_v36 = vpop.xlane.xlu0 %6058 }
0x2b9b   :  { %8101 = vrcp.f32 %v6059_v36  ;;  %v7661_v36 = vld [vmem:[%s11492_s16 + $0x9] ss:$0 sm:$0xff] }
0x2b9c   :  { %8103 = vrcp.f32 %v5994_v2  ;;  %v7662_v2 = vld [vmem:[%s11493_s18 + $0x9] ss:$0 sm:$0xff] }
0x2ba1   :  { %v8102_v48 = vpop.eup %8101 }
0x2ba2   :  { %v6061_v53 = vmul.f32 %v8102_v48, %v8100_v26  ;;  %v8104_v45 = vpop.eup %8103 }
0x2ba3   :  { %v5996_v37 = vmul.f32 %v8104_v45, %v8098_v12 }
0x2ba4   :  { %7234 = vmatmul.msk.f32.vlgmr.msrb.gmra.mxu3 %vm455_vm1, %v6061_v53 }
0x2bad   :  { %v5998_v10 = vpop.permute.xlu0 %5997 }
0x2bae   :  { %6018 = vmatpush.msra.mxu1 %v5998_v10 }
0x2baf   :  { %7231 = vmatmul.msk.f32.vlgmr.msra.gmra.mxu1 %vm455_vm1, %v5996_v37 }
0x2bb5   :  { %v7575_v59 = vpop.permute.xlu0 %7574 }
0x2bb6   :  { %v7577_v5 = vunpack.i.h.bf16 %v7575_v59  ;;  %v7576_v43 = vunpack.i.l.bf16 %v7575_v59 }
0x2bb8   :  { %6225 = vmatpush.msra.mxu3 %v7576_v43 }
0x2bba   :  { %6226 = vmatpush.msra.mxu3 %v7577_v5 }
0x2bbb   :  { %7246 = vmatmul.msk.f32.vlgmr.msra.gmra.mxu3 %vm365_vm0, %v11093_v56 }
0x2bc3   :  { %7247 = vmatmul.msk.f32.gmra.mxu3 %vm365_vm0, %v11089_v14 }
0x2bcb   :  { %7248 = vmatmul.msk.f32.gmra.mxu3 %vm365_vm0, %v11083_v28  ;;  %v11324_v28 = vld [vmem:[%s8504_s14 + $0x7] ss:$0 sm:$0xff]  ;;  %s8449_s14 = smov 32  }
0x2bd3   :  { %7249 = vmatmul.msk.f32.gmra.mxu3 %vm365_vm0, %v11080_v15  ;;  %v7236_v15 = vld [vmem:[%s11491_s21 + $0x68] sm:$0xff] }
0x2bd4   :  { %6118 = vmatpush.msrb.mxu1 %v7236_v15 }
0x2bd6   :  { %6119 = vmatpush.msrb.mxu1 %v7235_v30 }
0x2bdb   :  { %7250 = vmatmul.msk.f32.gmra.mxu3 %vm365_vm0, %v11076_v60 }
0x2be3   :  { %7251 = vmatmul.msk.f32.gmra.mxu3 %vm365_vm0, %v11072_v34 }
0x2beb   :  { %7252 = vmatmul.msk.f32.gmra.mxu3 %vm365_vm0, %v11067_v49 }
0x2bf3   :  { %7253 = vmatmul.msk.f32.gmra.mxu3 %vm365_vm0, %v11059_v50 }
0x2c27   :  { %v6085_v14 = vpop.f32.mrf.mxu3 }
0x2c28   :  { %6089 = vrot.lane.b32.xlu1 %v6085_v14, %s8430_s22 }
0x2c2c   :  { %v6020_v50 = vpop.f32.mrf.mxu1 }
0x2c30   :  { %6208 = vrot.lane.b32.xlu1 %v11324_v28, %s8444_s17 }
0x2c3e   :  { %v6228_v60 = vpop.f32.mrf.mxu3 }
0x2c46   :  { %v6231_v56 = vpop.f32.mrf.mxu3 }
0x2c4e   :  { %v6234_v42 = vpop.f32.mrf.mxu3 }
0x2c56   :  { %v6237_v34 = vpop.f32.mrf.mxu3 }
0x2c5e   :  { %v6240_v49 = vpop.f32.mrf.mxu3 }
0x2c66   :  { %v6243_v11 = vpop.f32.mrf.mxu3 }
0x2c6e   :  { %v6246_v38 = vpop.f32.mrf.mxu3 }
0x2c76   :  { %v6249_v16 = vpop.f32.mrf.mxu3 }
0x2c9a   :  { %v6090_v51 = vpop.permute.xlu1 %6089 }
0x2c9b   :  { %v6092_v54 = vsel %vm455_vm1, %v6020_v50, %v6090_v51 }
0x2c9c   :  { %7237 = vmatmul.msk.f32.vlgmr.msrb.gmra.mxu1 %vm1035_vm3, %v6092_v54 }
0x2ca2   :  { %v6209_v40 = vpop.permute.xlu1 %6208 }
0x2ca3   :  { %v6250_v18 = vadd.f32 %v6249_v16, %v6209_v40  ;;  %v6247_v27 = vadd.f32 %v6246_v38, %v6209_v40  ;;  %v6232_v39 = vadd.f32 %v6231_v56, %v6209_v40  ;;  %v6229_v7 = vadd.f32 %v6228_v60, %v6209_v40 }
0x2ca4   :  { %v11339_v23 = vadd.f32 %v6243_v11, %v6209_v40  ;;  %v11344_v25 = vadd.f32 %v6240_v49, %v6209_v40  ;;  %v11348_v8 = vadd.f32 %v6237_v34, %v6209_v40  ;;  %v11354_v35 = vadd.f32 %v6234_v42, %v6209_v40 }
0x2ca5   :  { %6373 = vrot.lane.b32.xlu1 %v6250_v18, %s8443_s13  ;;  %7254 = vmatpush.xpose.msk.msrb.mxu0 %vm455_vm1, %v6250_v18  ;;  %v11334_v6 = vpack.i.bf16 %v6247_v27, %v6250_v18  ;;  %v11336_v62 = vpack.i.bf16 %v6229_v7, %v6232_v39 }
0x2ca6   :  { %v7583_v43 = vpack.i.bf16 %v11344_v25, %v11339_v23  ;;  %v7608_v38 = vpack.i.bf16 %v11354_v35, %v11348_v8 }
0x2ca9   :  { %7255 = vmatpush.xpose.msk.msrb.mxu0 %vm455_vm1, %v6247_v27 }
0x2cad   :  { %6371 = vrot.lane.b32.xlu1 %v6247_v27, %s8443_s13  ;;  %7256 = vmatpush.xpose.msk.msrb.mxu0 %vm455_vm1, %v11339_v23 }
0x2cb1   :  { %7257 = vmatpush.xpose.msk.msrb.mxu0 %vm455_vm1, %v11344_v25 }
0x2cb5   :  { %6369 = vrot.lane.b32.xlu1 %v11339_v23, %s8443_s13  ;;  %7258 = vmatpush.xpose.msk.msrb.mxu0 %vm455_vm1, %v11348_v8 }
0x2cb9   :  { %7259 = vmatpush.xpose.msk.msrb.mxu0 %vm455_vm1, %v11354_v35 }
0x2cbd   :  { %6365 = vrot.lane.b32.xlu1 %v11348_v8, %s8443_s13  ;;  %7260 = vmatpush.xpose.msk.msrb.mxu0 %vm455_vm1, %v6232_v39 }
0x2cc1   :  { %7261 = vmatpush.xpose.msk.msrb.mxu0 %vm455_vm1, %v6229_v7 }
0x2cc5   :  { %6361 = vrot.lane.b32.xlu1 %v6232_v39, %s8443_s13 }
0x2ccd   :  { %6359 = vrot.lane.b32.xlu1 %v6229_v7, %s8443_s13 }
0x2d17   :  { %v6374_v41 = vpop.permute.xlu1 %6373 }
0x2d18   :  { %7264 = vmatpush.xpose.msk.msra.mxu2 %vm455_vm1, %v6374_v41 }
0x2d19   :  { %v6121_v9 = vpop.f32.mrf.mxu1 }
0x2d1a   :  { %v6122_v24 = vadd.f32 %v7660_v47, %v6121_v9 }
0x2d1c   :  { %v6124_v21 = vadd.f32 %v6122_v24, %v11278_v31 }
0x2d1e   :  { %v6129_v63 = vsel %vm365_vm0, %v6124_v21, 0.0 }
0x2d1f   :  { %6130 = vadd.xlane.f32.xlu2 %v6129_v63  ;;  %v6372_v19 = vpop.permute.xlu1 %6371 }
0x2d20   :  { %7265 = vmatpush.xpose.msk.msra.mxu2 %vm455_vm1, %v6372_v19 }
0x2d27   :  { %v6370_v58 = vpop.permute.xlu1 %6369 }
0x2d28   :  { %7266 = vmatpush.xpose.msk.msra.mxu2 %vm455_vm1, %v6370_v58 }
0x2d2f   :  { %v6366_v22 = vpop.permute.xlu1 %6365 }
0x2d37   :  { %6367 = vrot.lane.b32.xlu2 %v11344_v25, %s8443_s13  ;;  %v6362_v29 = vpop.permute.xlu1 %6361 }
0x2d3f   :  { %v6360_v37 = vpop.permute.xlu1 %6359 }
0x2d92   :  { %v6131_v12 = vpop.xlane.xlu2 %6130 }
0x2d93   :  { %v6132_v0 = vmul.f32 %v6131_v12, %v9064_v55 }
0x2d95   :  { %v6133_v4 = vsub.f32 %v6124_v21, %v6132_v0 }
0x2d97   :  { %v6134_v3 = vmul.f32 %v6133_v4, %v6133_v4 }
0x2d99   :  { %v6135_v44 = vsel %vm365_vm0, %v6134_v3, 0.0 }
0x2d9a   :  { %6136 = vadd.xlane.f32.xlu0 %v6135_v44  ;;  %v6368_v31 = vpop.permute.xlu2 %6367 }
0x2d9b   :  { %7267 = vmatpush.xpose.msk.msra.mxu2 %vm455_vm1, %v6368_v31 }
0x2d9f   :  { %7268 = vmatpush.xpose.msk.msra.mxu2 %vm455_vm1, %v6366_v22 }
0x2dae   :  { %6363 = vrot.lane.b32.xlu0 %v11354_v35, %s8443_s13 }
0x2e0d   :  { %v6137_v33 = vpop.xlane.xlu0 %6136 }
0x2e0e   :  { %v6138_v46 = vmul.f32 %v6137_v33, %v9064_v55 }
0x2e10   :  { %v6139_v57 = vadd.f32 1e-05, %v6138_v46 }
0x2e12   :  { %8105 = vrsqrt.f32 %v6139_v57  ;;  %vm6146_vm4 = vweird.f32 %v6139_v57 }
0x2e18   :  { %v8106_v26 = vpop.eup %8105 }
0x2e19   :  { %v6141_v17 = vmul.f32 %v8106_v26, %v6139_v57  ;;  %vm6147_vm15 = vweird.f32 %v8106_v26 }
0x2e1a   :  { %vm6148_vm5 = vmor %vm6146_vm4, %vm6147_vm15 }
0x2e1b   :  { %v6142_v13 = vmul.f32 %v8106_v26, %v6141_v17 }
0x2e1d   :  { %v6143_v1 = vmul.f32 0.5, %v6142_v13 }
0x2e1f   :  { %v6144_v52 = vsub.f32 1.5, %v6143_v1  ;;  %v7275_v1 = vld [vmem:[%s11491_s21 + $0x78] sm:$0xff] }
0x2e20   :  { %v6364_v20 = vpop.permute.xlu0 %6363  ;;  %6501 = vmatpush.msra.mxu1 %v7275_v1 }
0x2e21   :  { %v6145_v61 = vmul.f32 %v8106_v26, %v6144_v52  ;;  %7269 = vmatpush.xpose.msk.msra.mxu2 %vm455_vm1, %v6364_v20  ;;  %v7274_v52 = vld [vmem:[%s11491_s21 + $0x70] sm:$0xff] }
0x2e22   :  { %6502 = vmatpush.msra.mxu1 %v7274_v52 }
0x2e23   :  { %v6149_v48 = vsel %vm6148_vm5, %v8106_v26, %v6145_v61 }
0x2e24   :  { %v6150_v53 = vmul.f32 %v6149_v48, %v6133_v4  ;;  %v7663_v48 = vld [vmem:[#allocation7 + $0x7] ss:$0 sm:$0xff] }
0x2e25   :  { %7270 = vmatpush.xpose.msk.msra.mxu2 %vm455_vm1, %v6362_v29 }
0x2e26   :  { %v6154_v45 = vmul.f32 %v7661_v36, %v6150_v53 }
0x2e28   :  { %v11382_v10 = vadd.f32 %v7662_v2, %v6154_v45 }
0x2e29   :  { %7271 = vmatpush.xpose.msk.msra.mxu2 %vm455_vm1, %v6360_v37 }
0x2e2a   :  { %7245 = vmatmul.msk.f32.vlgmr.msrb.gmra.mxu2 %vm365_vm0, %v11382_v10 }
0x2ead   :  { %v6189_v59 = vpop.f32.mrf.mxu2 }
0x2eae   :  { %v6190_v5 = vadd.f32 %v11324_v28, %v6189_v59 }
0x2eb0   :  { %6357 = vrot.lane.b32.xlu2 %v6190_v5, %s8443_s13  ;;  %7262 = vmatmul.msk.f32.vlgmr.msrb.gmra.mxu0 %vm455_vm1, %v6190_v5 }
0x2eb8   :  { %7579 = vrot.lane.b32.xlu2 %v11334_v6, %s8442_s9 }
0x2ec0   :  { %7584 = vrot.lane.b32.xlu2 %v7583_v43, %s8442_s9 }
0x2f0a   :  { %v6358_v14 = vpop.permute.xlu2 %6357 }
0x2f0b   :  { %7272 = vmatmul.msk.f32.vlgmr.msra.gmra.mxu2 %vm455_vm1, %v6358_v14 }
0x2f12   :  { %v7580_v15 = vpop.permute.xlu2 %7579 }
0x2f13   :  { %v7581_v60 = vunpack.i.l.bf16 %v7580_v15  ;;  %v7582_v56 = vunpack.i.h.bf16 %v7580_v15 }
0x2f15   :  { %6459 = vmatpush.msra.mxu0 %v7581_v60  ;;  %v7282_v60 = vld [vmem:[%s11494_s2 + $0x78] sm:$0xff] }
0x2f17   :  { %6460 = vmatpush.msra.mxu0 %v7582_v56  ;;  %v7281_v56 = vld [vmem:[%s11494_s2 + $0x70] sm:$0xff] }
0x2f1a   :  { %v7585_v28 = vpop.permute.xlu2 %7584 }
0x2f1b   :  { %v7586_v42 = vunpack.i.l.bf16 %v7585_v28  ;;  %v7587_v34 = vunpack.i.h.bf16 %v7585_v28  ;;  %v7280_v28 = vld [vmem:[%s11494_s2 + $0x68] sm:$0xff] }
0x2f1d   :  { %6461 = vmatpush.msra.mxu0 %v7586_v42  ;;  %v7279_v42 = vld [vmem:[%s11494_s2 + $0x60] sm:$0xff] }
0x2f1f   :  { %6462 = vmatpush.msra.mxu0 %v7587_v34 }
0x2f2d   :  { %v6296_v30 = vpop.f32.mrf.mxu0 }
0x2f2e   :  { %v6297_v49 = vadd.f32 %v6296_v30, %v11224_v32 }
0x2f30   :  { %v6299_v11 = vsel %vm529_vm2, %v6297_v49, -inf }
0x2f31   :  { %6300 = vmax.xlane.f32.xlu0 %v6299_v11 }
0x2f45   :  { %7594 = vrot.lane.b32.xlu0 %v11336_v62, %s8442_s9 }
0x2f4d   :  { %7599 = vrot.lane.b32.xlu0 %v11334_v6, %s8444_s17 }
0x2f55   :  { %7609 = vrot.lane.b32.xlu0 %v7608_v38, %s8444_s17 }
0x2f5d   :  { %7614 = vrot.lane.b32.xlu0 %v11336_v62, %s8444_s17 }
0x2f8e   :  { %v6410_v50 = vpop.f32.mrf.mxu2 }
0x2f8f   :  { %v6411_v51 = vadd.f32 %v6410_v50, %v11224_v32 }
0x2f91   :  { %v6413_v54 = vsel %vm529_vm2, %v6411_v51, -inf }
0x2f92   :  { %6414 = vmax.xlane.f32.xlu1 %v6413_v54 }
0x2fa4   :  { %v6301_v16 = vpop.xlane.xlu0 %6300 }
0x2fa5   :  { %v6302_v7 = vsub.f32 %v6297_v49, %v6301_v16  ;;  %v7664_v16 = vld [vmem:[%s11492_s16 + $0xa] ss:$0 sm:$0xff] }
0x2fa7   :  { %v6303_v6 = vmul.f32 1.442695, %v6302_v7 }
0x2fa9   :  { %8107 = vpow2.f32 %v6303_v6  ;;  %v7293_v6 = vld [vmem:[%s11495_s29 + $0xf8] sm:$0xff] }
0x2faa   :  { %6606 = vmatpush.msrb.mxu1 %v7293_v6 }
0x2fab   :  { %7589 = vrot.lane.b32.xlu1 %v7608_v38, %s8442_s9 }
0x2faf   :  { %v8108_v23 = vpop.eup %8107 }
0x2fb0   :  { %v6305_v62 = vsel %vm529_vm2, %v8108_v23, 0.0 }
0x2fb7   :  { %v7595_v40 = vpop.permute.xlu0 %7594 }
0x2fb8   :  { %v7596_v21 = vunpack.i.l.bf16 %v7595_v40  ;;  %v7597_v63 = vunpack.i.h.bf16 %v7595_v40 }
0x2fbf   :  { %v7600_v18 = vpop.permute.xlu0 %7599 }
0x2fc0   :  { %v7601_v27 = vunpack.i.l.bf16 %v7600_v18  ;;  %v7602_v39 = vunpack.i.h.bf16 %v7600_v18  ;;  %v7665_v18 = vld [vmem:[%s11493_s18 + $0xa] ss:$0 sm:$0xff] }
0x2fc2   :  { %6345 = vmatpush.msrb.mxu3 %v7601_v27 }
0x2fc4   :  { %6346 = vmatpush.msrb.mxu3 %v7602_v39 }
0x2fc7   :  { %v7610_v58 = vpop.permute.xlu0 %7609 }
0x2fc8   :  { %v7611_v22 = vunpack.i.l.bf16 %v7610_v58  ;;  %v7612_v46 = vunpack.i.h.bf16 %v7610_v58 }
0x2fcf   :  { %v7615_v33 = vpop.permute.xlu0 %7614 }
0x2fd0   :  { %v7616_v26 = vunpack.i.l.bf16 %v7615_v33  ;;  %v7617_v17 = vunpack.i.h.bf16 %v7615_v33 }
0x2fd5   :  { %6306 = vadd.xlane.f32.xlu1 %v6305_v62  ;;  %v7291_v62 = vld [vmem:[%s11495_s29 + $0xe8] sm:$0xff] }
0x3005   :  { %v6415_v32 = vpop.xlane.xlu1 %6414 }
0x3006   :  { %v6416_v25 = vsub.f32 %v6411_v51, %v6415_v32  ;;  %v7290_v32 = vld [vmem:[%s11495_s29 + $0xe0] sm:$0xff] }
0x3008   :  { %v6417_v8 = vmul.f32 1.442695, %v6416_v25  ;;  %v7289_v25 = vld [vmem:[%s11495_s29 + $0xd8] sm:$0xff] }
0x300a   :  { %8109 = vpow2.f32 %v6417_v8  ;;  %v7288_v8 = vld [vmem:[%s11495_s29 + $0xd0] sm:$0xff] }
0x3010   :  { %v8110_v35 = vpop.eup %8109 }
0x3011   :  { %v6419_v47 = vsel %vm529_vm2, %v8110_v35, 0.0 }
0x3012   :  { %6420 = vadd.xlane.f32.xlu2 %v6419_v47  ;;  %v7286_v47 = vld [vmem:[%s11495_s29 + $0xc0] sm:$0xff] }
0x301d   :  { %v7590_v41 = vpop.permute.xlu1 %7589 }
0x301e   :  { %v7591_v9 = vunpack.i.l.bf16 %v7590_v41  ;;  %v7592_v24 = vunpack.i.h.bf16 %v7590_v41  ;;  %v7666_v41 = vld [vmem:[%s11496_s0 + $0x3] ss:$0 sm:$0xff] }
0x3020   :  { %6463 = vmatpush.msra.mxu0 %v7591_v9 }
0x3022   :  { %6464 = vmatpush.msra.mxu0 %v7592_v24 }
0x3024   :  { %6465 = vmatpush.msra.mxu0 %v7596_v21 }
0x3026   :  { %6466 = vmatpush.msra.mxu0 %v7597_v63 }
0x3028   :  { %6567 = vmatpush.msrb.mxu0 %v7282_v60  ;;  %v6680_v60 = vld [vmem:[%s8594_s4 + $0x58] sm:$0xff] }
0x302a   :  { %7604 = vrot.lane.b32.xlu2 %v7583_v43, %s8444_s17  ;;  %6568 = vmatpush.msrb.mxu0 %v7281_v56  ;;  %v6679_v56 = vld [vmem:[%s8594_s4 + $0x50] sm:$0xff] }
0x302c   :  { %6569 = vmatpush.msrb.mxu0 %v7280_v28  ;;  %v6678_v28 = vld [vmem:[%s8594_s4 + $0x48] sm:$0xff] }
0x302e   :  { %6570 = vmatpush.msrb.mxu0 %v7279_v42  ;;  %v6677_v42 = vld [vmem:[%s8594_s4 + $0x40] sm:$0xff] }
0x3048   :  { %v6307_v0 = vpop.xlane.xlu1 %6306 }
0x3085   :  { %v6421_v19 = vpop.xlane.xlu2 %6420 }
0x3086   :  { %8111 = vrcp.f32 %v6421_v19 }
0x3087   :  { %8113 = vrcp.f32 %v6307_v0  ;;  %v7667_v0 = vld [vmem:[#allocation8 + $0x3] ss:$0 sm:$0xff] }
0x308c   :  { %v8112_v12 = vpop.eup %8111 }
0x308d   :  { %v6423_v4 = vmul.f32 %v8112_v12, %v8110_v35  ;;  %v7605_v3 = vpop.permute.xlu2 %7604  ;;  %v8114_v57 = vpop.eup %8113  ;;  %v7287_v35 = vld [vmem:[%s11495_s29 + $0xc8] sm:$0xff] }
0x308e   :  { %v7606_v44 = vunpack.i.l.bf16 %v7605_v3  ;;  %v7607_v31 = vunpack.i.h.bf16 %v7605_v3  ;;  %v6309_v13 = vmul.f32 %v8114_v57, %v8108_v23  ;;  %v7292_v23 = vld [vmem:[%s11495_s29 + $0xf0] sm:$0xff] }
0x308f   :  { %7273 = vmatmul.msk.f32.vlgmr.msra.gmra.mxu0 %vm529_vm2, %v6423_v4  ;;  %6607 = vmatpush.msrb.mxu1 %v7292_v23  ;;  %v6705_v23 = vld [vmem:[%s8589_s30] sm:$0x3]  ;;  %s8375_s30 = sshra.s32 %s6749_s26, 4  ;;  %s8376_s30 = int_to_ptr.hbm [resolvable:$true] %s8375_s30 }
0x3090   :  { %6347 = vmatpush.msrb.mxu3 %v7606_v44  ;;  %s8377_s25 = scalar_lea.hbm %s8376_s30, 2  ;;  %p8380_p4 = scmp.lt.s32.totalorder %s8376_s30, %s8604_s19 }
0x3091   :  { %6608 = vmatpush.msrb.mxu1 %v7291_v62  ;;  %p8378_p3 = scmp.ne.s32.totalorder %s8376_s30, %s8377_s25  ;;  %p8381_p5 = scmp.lt.s32.totalorder %s8379_s12, %s8377_s25 }
0x3092   :  { %6348 = vmatpush.msrb.mxu3 %v7607_v31 }
0x3093   :  { %6609 = vmatpush.msrb.mxu1 %v7290_v32  ;;  %v7670_v32 = vld [vmem:[#allocation16] ss:$0 sm:$0xff]  ;;  %p8382_p6 = por %p8381_p5, %p8380_p4 }
0x3094   :  { %6349 = vmatpush.msrb.mxu3 %v7611_v22 }
0x3095   :  { %6610 = vmatpush.msrb.mxu1 %v7289_v25  ;;  %p8383_p7 = pnand %p8382_p6, %p8378_p3 }
0x3096   :  { %6350 = vmatpush.msrb.mxu3 %v7612_v46 }
0x3097   :  { %6611 = vmatpush.msrb.mxu1 %v7288_v8 }
0x3098   :  { %6351 = vmatpush.msrb.mxu3 %v7616_v26 }
0x3099   :  { %6612 = vmatpush.msrb.mxu1 %v7287_v35 }
0x309a   :  { %6352 = vmatpush.msrb.mxu3 %v7617_v17  ;;  %v6684_v17 = vld [vmem:[%s8594_s4 + $0x78] sm:$0xff] }
0x309b   :  { %7263 = vmatmul.msk.f32.vlgmr.msrb.gmra.mxu3 %vm529_vm2, %v6309_v13  ;;  %6613 = vmatpush.msrb.mxu1 %v7286_v47 }
0x309c   :  { %6685 = vmatpush.msra.mxu0 %v6684_v17 }
0x310c   :  { %v6468_v29 = vpop.f32.mrf.mxu0 }
0x310d   :  { %6472 = vrot.lane.b32.xlu0 %v6468_v29, %s8430_s22 }
0x311e   :  { %v6354_v20 = vpop.f32.mrf.mxu3 }
0x317f   :  { %v6473_v61 = vpop.permute.xlu0 %6472 }
0x3180   :  { %v6475_v36 = vsel %vm455_vm1, %v6354_v20, %v6473_v61 }
0x3181   :  { %7276 = vmatmul.msk.f32.vlgmr.msra.gmra.mxu1 %vm1035_vm3, %v6475_v36 }
0x31fe   :  { %v6504_v2 = vpop.f32.mrf.mxu1 }
0x31ff   :  { %v6505_v53 = vadd.f32 %v7663_v48, %v6504_v2 }
0x3201   :  { %v6507_v45 = vadd.f32 %v6505_v53, %v11382_v10  ;;  %v7668_v53 = vld [vmem:[%s11492_s16 + $0xb] ss:$0 sm:$0xff] }
0x3203   :  { %v6512_v37 = vsel %vm365_vm0, %v6507_v45, 0.0 }
0x3204   :  { %6513 = vadd.xlane.f32.xlu2 %v6512_v37 }
0x3277   :  { %v6514_v59 = vpop.xlane.xlu2 %6513 }
0x3278   :  { %v6515_v5 = vmul.f32 %v6514_v59, %v9064_v55 }
0x327a   :  { %v6516_v43 = vsub.f32 %v6507_v45, %v6515_v5 }
0x327c   :  { %v6517_v14 = vmul.f32 %v6516_v43, %v6516_v43 }
0x327e   :  { %v6518_v15 = vsel %vm365_vm0, %v6517_v14, 0.0  ;;  %v6682_v14 = vld [vmem:[%s8594_s4 + $0x68] sm:$0xff] }
0x327f   :  { %6519 = vadd.xlane.f32.xlu0 %v6518_v15  ;;  %v6681_v15 = vld [vmem:[%s8594_s4 + $0x60] sm:$0xff] }
0x32f2   :  { %v6520_v10 = vpop.xlane.xlu0 %6519 }
0x32f3   :  { %v6521_v34 = vmul.f32 %v6520_v10, %v9064_v55  ;;  %v6676_v10 = vld [vmem:[%s8594_s4 + $0x38] sm:$0xff] }
0x32f5   :  { %v6522_v30 = vadd.f32 1e-05, %v6521_v34  ;;  %v6675_v34 = vld [vmem:[%s8594_s4 + $0x30] sm:$0xff] }
0x32f7   :  { %8115 = vrsqrt.f32 %v6522_v30  ;;  %vm6529_vm6 = vweird.f32 %v6522_v30 }
0x32fd   :  { %v8116_v49 = vpop.eup %8115 }
0x32fe   :  { %v6524_v11 = vmul.f32 %v8116_v49, %v6522_v30  ;;  %vm6530_vm3 = vweird.f32 %v8116_v49  ;;  %v6674_v30 = vld [vmem:[%s8594_s4 + $0x28] sm:$0xff] }
0x32ff   :  { %vm6531_vm7 = vmor %vm6529_vm6, %vm6530_vm3 }
0x3300   :  { %v6525_v38 = vmul.f32 %v8116_v49, %v6524_v11  ;;  %v6672_v11 = vld [vmem:[%s8594_s4 + $0x18] sm:$0xff] }
0x3302   :  { %v6526_v50 = vmul.f32 0.5, %v6525_v38  ;;  %v6671_v38 = vld [vmem:[%s8594_s4 + $0x10] sm:$0xff] }
0x3304   :  { %v6527_v51 = vsub.f32 1.5, %v6526_v50  ;;  %v6670_v50 = vld [vmem:[%s8594_s4 + $0x8] sm:$0xff] }
0x3306   :  { %v6528_v54 = vmul.f32 %v8116_v49, %v6527_v51  ;;  %v6669_v51 = vld [vmem:[%s8594_s4] sm:$0xff] }
0x3308   :  { %v6532_v40 = vsel %vm6531_vm7, %v8116_v49, %v6528_v54  ;;  %v6673_v49 = vld [vmem:[%s8594_s4 + $0x20] sm:$0xff] }
0x3309   :  { %v6533_v27 = vmul.f32 %v6532_v40, %v6516_v43  ;;  %v6683_v43 = vld [vmem:[%s8594_s4 + $0x70] sm:$0xff]  ;;  %v6667_v40 = vld [vmem:[#allocation14] sm:$0xff]  ;;  %s8450_s4 = smov [#allocation17]  }
0x330a   :  { %6686 = vmatpush.msra.mxu0 %v6683_v43  ;;  %s6746_s22 = sshll.u32 %s8450_s4, 4  ;;  %s6747_s22 = int_to_ptr.vmem [resolvable:$true] %s6746_s22 }
0x330b   :  { %v6537_v39 = vmul.f32 %v7664_v16, %v6533_v27 }
0x330c   :  { %6687 = vmatpush.msra.mxu0 %v6682_v14 }
0x330d   :  { %v6541_v7 = vadd.f32 %v7665_v18, %v6537_v39 }
0x330e   :  { %6688 = vmatpush.msra.mxu0 %v6681_v15 }
0x330f   :  { %7284 = vmatmul.msk.f32.vlgmr.msrb.gmra.mxu0 %vm365_vm0, %v6541_v7 }
0x3310   :  { %6689 = vmatpush.msra.mxu0 %v6680_v60 }
0x3312   :  { %6690 = vmatpush.msra.mxu0 %v6679_v56 }
0x3314   :  { %6691 = vmatpush.msra.mxu0 %v6678_v28 }
0x3316   :  { %6692 = vmatpush.msra.mxu0 %v6677_v42 }
0x3318   :  { %6693 = vmatpush.msra.mxu0 %v6676_v10 }
0x331a   :  { %6694 = vmatpush.msra.mxu0 %v6675_v34 }
0x331c   :  { %6695 = vmatpush.msra.mxu0 %v6674_v30 }
0x331e   :  { %6696 = vmatpush.msra.mxu0 %v6673_v49 }
0x3320   :  { %6697 = vmatpush.msra.mxu0 %v6672_v11 }
0x3322   :  { %6698 = vmatpush.msra.mxu0 %v6671_v38 }
0x3324   :  { %6699 = vmatpush.msra.mxu0 %v6670_v50 }
0x3326   :  { %6700 = vmatpush.msra.mxu0 %v6669_v51 }
0x338c   :  { %v6572_v9 = vpop.f32.mrf.mxu0 }
0x338d   :  { %v6573_v24 = vadd.f32 %v7666_v41, %v6572_v9 }
0x338f   :  { %v6576_v21 = vmin.f32 %v6573_v24, 0.0  ;;  %vm6575_vm8 = vcmp.gt.f32.partialorder %v6573_v24, 0.0 }
0x3391   :  { %v6577_v63 = vmul.f32 1.442695, %v6576_v21 }
0x3393   :  { %8117 = vpow2.f32 %v6577_v63 }
0x3399   :  { %v8118_v19 = vpop.eup %8117 }
0x339a   :  { %v7285_v58 = vadd.f32 -1.0, %v8118_v19 }
0x339c   :  { %v6580_v12 = vsel %vm6575_vm8, %v6573_v24, %v7285_v58 }
0x339d   :  { %7294 = vmatmul.msk.f32.vlgmr.msrb.gmra.mxu1 %vm529_vm2, %v6580_v12 }
0x341a   :  { %v6615_v4 = vpop.f32.mrf.mxu1 }
0x341b   :  { %v6616_v3 = vadd.f32 %v7667_v0, %v6615_v4 }
0x341d   :  { %v6618_v44 = vadd.f32 %v6616_v3, %v6541_v7 }
0x341f   :  { %v6623_v31 = vsel %vm365_vm0, %v6618_v44, 0.0 }
0x3420   :  { %6624 = vadd.xlane.f32.xlu1 %v6623_v31 }
0x3493   :  { %v6625_v22 = vpop.xlane.xlu1 %6624 }
0x3494   :  { %v6626_v33 = vmul.f32 %v6625_v22, %v9064_v55 }
0x3496   :  { %v6627_v46 = vsub.f32 %v6618_v44, %v6626_v33 }
0x3498   :  { %v6628_v57 = vmul.f32 %v6627_v46, %v6627_v46 }
0x349a   :  { %v6629_v26 = vsel %vm365_vm0, %v6628_v57, 0.0 }
0x349b   :  { %6630 = vadd.xlane.f32.xlu1 %v6629_v26 }
0x350e   :  { %v6631_v13 = vpop.xlane.xlu1 %6630 }
0x350f   :  { %v6632_v1 = vmul.f32 %v6631_v13, %v9064_v55  ;;  %v7669_v55 = vld [vmem:[%s11493_s18 + $0xb] ss:$0 sm:$0xff] }
0x3511   :  { %v6633_v29 = vadd.f32 1e-05, %v6632_v1 }
0x3513   :  { %8119 = vrsqrt.f32 %v6633_v29  ;;  %vm6640_vm11 = vweird.f32 %v6633_v29 }
0x3519   :  { %v8120_v52 = vpop.eup %8119 }
0x351a   :  { %v6635_v20 = vmul.f32 %v8120_v52, %v6633_v29  ;;  %vm6641_vm9 = vweird.f32 %v8120_v52 }
0x351b   :  { %vm6642_vm10 = vmor %vm6640_vm11, %vm6641_vm9 }
0x351c   :  { %v6636_v61 = vmul.f32 %v8120_v52, %v6635_v20 }
0x351e   :  { %v6637_v36 = vmul.f32 0.5, %v6636_v61 }
0x3520   :  { %v6638_v48 = vsub.f32 1.5, %v6637_v36 }
0x3522   :  { %v6639_v2 = vmul.f32 %v8120_v52, %v6638_v48 }
0x3524   :  { %v6643_v45 = vsel %vm6642_vm10, %v8120_v52, %v6639_v2 }
0x3525   :  { %v6644_v37 = vmul.f32 %v6643_v45, %v6627_v46 }
0x3527   :  { %v6648_v59 = vmul.f32 %v7668_v53, %v6644_v37 }
0x3529   :  { %v6652_v5 = vadd.f32 %v7669_v55, %v6648_v59 }
0x352b   :  { %6660 = vrot.lane.b32.xlu0 %v6652_v5, %s8446_s27  ;;  %6657 = vrot.lane.b32.xlu2 %v6652_v5, %s8448_s8 }
0x352c   :  { %6654 = vrot.lane.b32.xlu1 %v6652_v5, %s8449_s14 }
0x3585   :  { %v6658_v16 = vpop.permute.xlu2 %6657 }
0x359d   :  { %v6661_v27 = vpop.permute.xlu0 %6660 }
0x359e   :  { %v6655_v54 = vpop.permute.xlu1 %6654 }
0x359f   :  { %v6663_v18 = vsel %vm365_vm0, %v6652_v5, %v6655_v54  ;;  %vm6739_vm0 = vcmask 25600  }
0x35a0   :  { %v6664_v39 = vsel %vm529_vm2, %v6663_v18, %v6658_v16 }
0x35a1   :  { %v6666_v7 = vsel %vm6665_vm12, %v6664_v39, %v6661_v27 }
0x35a2   :  { %v6668_v6 = vmul.f32 %v6667_v40, %v6666_v7 }
0x35a4   :  { %6701 = vmatmul.f32.vlgmr.msra.gmra.mxu0 %v6668_v6 }
0x3621   :  { %v6702_v62 = vpop.f32.mrf.mxu0 }
0x3622   :  { %6728 = vmatpush.msrb.mxu2 %v6702_v62 }
0x3623   :  { %7297 = vmatmul.msk.f32.vlgmr.msrb.gmra.mxu2 %vm455_vm1, %v6705_v23 }
0x36a6   :  { %v6730_v25 = vpop.f32.mrf.mxu2 }
0x36a7   :  { %v6731_v8 = vadd.f32 %v7670_v32, %v6730_v25 }
0x36a9   :  { %v6734_v35 = vmin.f32 %v6731_v8, 0.0  ;;  %vm6733_vm2 = vcmp.gt.f32.partialorder %v6731_v8, 0.0 }
0x36ab   :  { %v6735_v47 = vmul.f32 1.442695, %v6734_v35 }
0x36ad   :  { %8121 = vpow2.f32 %v6735_v47 }
0x36b3   :  { %v8122_v41 = vpop.eup %8121 }
0x36b4   :  { %v7298_v9 = vadd.f32 -1.0, %v8122_v41 }
0x36b6   :  { %v6738_v24 = vsel %vm6733_vm2, %v6731_v8, %v7298_v9 }
0x36b7   :  { %6740 = vst.msk [vmem:[#allocation17] sm:$0x3] %vm6739_vm0, %v6738_v24 }
0x36b8   :  { %8386 = shalt.err (!%p8383_p7)
}
0x36b9   :  { %6751 = dma.vmem_to_hbm [thread:$0]  %s6747_s22, 32, %s6749_s26, [#allocation4]  }
0x36ba   :  { %8397 = dma.done.wait [#allocation4], 32  }
0x36bb   :  { %8398 = vsyncadd [#allocation4], 4294967264 }
0x36bc   :  { %6756 = vsyncpa [#allocation3], 1 }
0x36bd   :  { %6757 = vsyncpa [#allocation6], 1 }
0x36be   :  { %6758 = vsyncpa [#allocation9], 1 }
0x36bf   :  { %6759 = vsyncpa [#allocation12], 1 }
0x36c0   :  { %6760 = vsyncpa [#allocation15], 1 }
0x36c1   :  { %6761 = vsyncpa [#allocation4], 1 }

</bundles_post_ra>
